<compile_context>
chip_gen: v7x
topology: tpu7x:2x2x1
jax: 0.10.0
libtpu: 0.0.40
codegen_flags: <defaults>
</compile_context>

<pallas_src>
import jax
import jax.numpy as jnp
from jax import lax
from jax.experimental import pallas as pl
from jax.experimental.pallas import tpu as pltpu


_PH = 32                  # padded conv grid height
_PW = 32                  # padded conv grid width
_PN = _PH * _PW           # 1024 flat grid positions (image lives at rows/cols 1..28)
_NROW = 28 * _PW          # 896 conv2 output rows (r2 in [0,28), c2 in [0,32))
_C1_CHUNK = 256           # conv1 row chunk (bounds live f32 registers)


def _pick_block(n):
    for b in (8, 4, 2, 1):
        if n % b == 0:
            return b
    return 1


# ---------------- fused conv1 -> ReLU -> conv2 -> ReLU -> 2x2 maxpool ----------------

def _conv_pool_kernel(p3_ref, w1_ref, b1_ref, m3_ref, w2_ref, b2_ref, o_ref,
                      y3_ref, pool_ref):
    nb = p3_ref.shape[0]                       # images per grid step
    for b in range(nb):
        # conv1 + ReLU + ring mask: one block-diagonal matmul per 256-row chunk
        # produces the three column-shifted copies Y3[k, tx*32+c] = y1[k+tx, c].
        for c in range(_PN // _C1_CHUNK):
            rows = pl.ds(c * _C1_CHUNK, _C1_CHUNK)
            pre = jnp.dot(p3_ref[b, rows, :], w1_ref[...],
                          preferred_element_type=jnp.float32)          # (256, 96)
            act = jnp.maximum(pre + b1_ref[...], 0.0) * m3_ref[rows, :]
            y3_ref[rows, :] = act.astype(jnp.bfloat16)

        # conv2 as three tile-aligned K=96 matmuls (row offsets 0 / 32 / 64).
        acc = jnp.dot(y3_ref[pl.ds(0, _NROW), :], w2_ref[0],
                      preferred_element_type=jnp.float32)
        acc = acc + jnp.dot(y3_ref[pl.ds(32, _NROW), :], w2_ref[1],
                            preferred_element_type=jnp.float32)
        acc = acc + jnp.dot(y3_ref[pl.ds(64, _NROW), :], w2_ref[2],
                            preferred_element_type=jnp.float32)         # (896, 64)

        # bias + ReLU + 2x2 maxpool: one pass, one row-pair max, one strided
        # column-pair max.  pool_ref[pr, jr*32 + c2, co].
        pool_ref[...] = jnp.maximum(acc + b2_ref[...], 0.0).reshape(14, 64, 64)
        m1 = jnp.maximum(pool_ref[:, pl.ds(0, 32), :],
                         pool_ref[:, pl.ds(32, 32), :])                 # (14, 32, 64)
        pool_ref[:, pl.ds(0, 32), :] = m1
        pooled = jnp.maximum(pool_ref[:, pl.ds(0, 14, stride=2), :],
                             pool_ref[:, pl.ds(1, 14, stride=2), :])    # (14, 14, 64)
        o_ref[b] = pooled.astype(o_ref.dtype)


def conv_pool(p3, w1big, b1t, mask3, w2r, b2):
    """p3: (n, 1024, 27) bf16 patches -> pooled (n, 14, 14, 64) bf16."""
    n = p3.shape[0]
    blk = _pick_block(n)
    return pl.pallas_call(
        _conv_pool_kernel,
        out_shape=jax.ShapeDtypeStruct((n, 14, 14, 64), jnp.bfloat16),
        grid=(n // blk,),
        in_specs=[
            pl.BlockSpec((blk, _PN, 27), lambda i: (i, 0, 0)),   # patches (per block)
            pl.BlockSpec((27, 96), lambda i: (0, 0)),            # block-diag conv1 w
            pl.BlockSpec((1, 96), lambda i: (0, 0)),             # tiled conv1 bias
            pl.BlockSpec((_PN, 96), lambda i: (0, 0)),           # static interior mask
            pl.BlockSpec((3, 96, 64), lambda i: (0, 0, 0)),      # conv2 w (per kh row)
            pl.BlockSpec((1, 64), lambda i: (0, 0)),             # conv2 bias
        ],
        out_specs=pl.BlockSpec((blk, 14, 14, 64), lambda i: (i, 0, 0, 0)),
        scratch_shapes=[
            pltpu.VMEM((_PN, 96), jnp.bfloat16),   # Y3: shifted conv1 activation
            pltpu.VMEM((14, 64, 64), jnp.float32),  # pool staging
        ],
        compiler_params=pltpu.CompilerParams(
            dimension_semantics=("parallel",)),
    )(p3, w1big, b1t, mask3, w2r, b2)


# --------------------------- fused fc1 -> ReLU -> fc2 head ---------------------------

def _mlp_head_kernel(x_ref, w1_ref, b1_ref, w2_ref, b2_ref, o_ref):
    h = jnp.dot(x_ref[...], w1_ref[...], preferred_element_type=jnp.float32)
    h = jnp.maximum(h + b1_ref[...], 0.0).astype(jnp.bfloat16)
    o_ref[...] = (jnp.dot(h, w2_ref[...], preferred_element_type=jnp.float32)
                  + b2_ref[...])


def mlp_head(x, w1, b1, w2, b2, *, tm_cap=128):
    """relu(x @ w1 + b1) @ w2 + b2.  Single grid step for small batch (fc1
    weight resident in VMEM); M-tiled "parallel" grid for large batch."""
    m, k = x.shape
    hid = w1.shape[1]
    c = w2.shape[1]
    if m <= tm_cap:
        tm, mp, xp = m, m, x
    else:
        tm = tm_cap
        mp = ((m + tm - 1) // tm) * tm
        xp = jnp.pad(x, ((0, mp - m), (0, 0))) if mp != m else x
    out = pl.pallas_call(
        _mlp_head_kernel,
        out_shape=jax.ShapeDtypeStruct((mp, c), jnp.float32),
        grid=(mp // tm,),
        in_specs=[
            pl.BlockSpec((tm, k), lambda i: (i, 0)),     # activations (M-tiled)
            pl.BlockSpec((k, hid), lambda i: (0, 0)),    # fc1 weight (resident)
            pl.BlockSpec((1, hid), lambda i: (0, 0)),
            pl.BlockSpec((hid, c), lambda i: (0, 0)),
            pl.BlockSpec((1, c), lambda i: (0, 0)),
        ],
        out_specs=pl.BlockSpec((tm, c), lambda i: (i, 0)),
        compiler_params=pltpu.CompilerParams(
            dimension_semantics=("parallel",)),
    )(xp, w1, b1, w2, b2)
    return out[:m] if mp != m else out


# ------------------------------------ JAX glue ---------------------------------------

def prepare_params(params):
    """One-time weight massaging (kept out of the per-forward graph)."""
    f32, bf16 = jnp.float32, jnp.bfloat16

    # conv1 tap-major (kh*3+kw, cout), replicated block-diagonally so one matmul
    # emits the three column-shifted copies of the conv1 activation.
    w1 = jnp.transpose(params["conv1_w"], (2, 3, 1, 0)).reshape(9, 32)
    w1big = jnp.zeros((27, 96), f32)
    for t in range(3):
        w1big = w1big.at[t * 9:(t + 1) * 9, t * 32:(t + 1) * 32].set(w1)

    # conv2 grouped per kernel row: (kh, kw*32+cin, cout) matches Y3's lane order.
    w2r = jnp.transpose(params["conv2_w"], (2, 3, 1, 0)).reshape(3, 96, 64)

    # static interior mask for the three shifted copies: mask3[k, tx*32+c] = interior(k+tx)
    pos = (jnp.arange(_PN, dtype=jnp.int32)[:, None]
           + jnp.arange(3, dtype=jnp.int32)[None, :])
    hh, ww = pos // _PW, pos % _PW
    inter = ((hh >= 1) & (hh <= 28) & (ww >= 1) & (ww <= 28)).astype(f32)
    mask3 = jnp.repeat(inter, 32, axis=1)                       # (1024, 96)

    # fc1 columns: PyTorch flattens NCHW (c*196 + r*14 + col); pooled feature is
    # NHWC-flat ((r*14 + col)*64 + c).  Permute columns once.
    fc1 = params["fc1_w"].reshape(128, 64, 14, 14).transpose(0, 2, 3, 1)
    fc1 = fc1.reshape(128, 64 * 14 * 14)

    return {
        "w1big": w1big.astype(bf16),
        "b1": jnp.tile(params["conv1_b"], 3).reshape(1, 96).astype(f32),
        "mask3": mask3.astype(bf16),
        "w2r": w2r.astype(bf16),
        "b2": params["conv2_b"].reshape(1, 64).astype(f32),
        "fc1_w": fc1.T.astype(bf16),                  # (12544, 128)
        "fc1_b": params["fc1_b"].reshape(1, 128).astype(f32),
        "fc2_w": params["fc2_w"].T.astype(bf16),      # (128, 10)
        "fc2_b": params["fc2_b"].reshape(1, 10).astype(f32),
    }


def convnet_forward(prep, x_nchw):
    n = x_nchw.shape[0]
    x = x_nchw.reshape(n, 28, 28).astype(jnp.float32)
    # 27-tap patches: the 9 conv1 taps for flat positions k, k+1 and k+2 of the
    # padded 32x32 grid (image at rows/cols 1..28), built from a single-channel
    # image -> ~54 KB/image bf16.  Tap order: tx*9 + sy*3 + sx.
    xp = jnp.pad(x, ((0, 0), (2, 4), (2, 6)))                    # (n, 34, 36)
    taps = [xp[:, sy:sy + 32, tx + sx:tx + sx + 32]
            for tx in range(3) for sy in range(3) for sx in range(3)]
    p3 = jnp.stack(taps, axis=-1).reshape(n, _PN, 27).astype(jnp.bfloat16)

    pooled = conv_pool(p3, prep["w1big"], prep["b1"], prep["mask3"],
                       prep["w2r"], prep["b2"])
    feat = pooled.reshape(n, 64 * 14 * 14)            # NHWC flatten (bitcast)
    return mlp_head(feat, prep["fc1_w"], prep["fc1_b"],
                    prep["fc2_w"], prep["fc2_b"])


# -------------------------- pure-JAX reference (for check) ---------------------------

def reference_forward(params, x_nchw):
    dn = ("NCHW", "OIHW", "NCHW")
    hp = lax.Precision.HIGHEST
    y = lax.conv_general_dilated(x_nchw, params["conv1_w"], (1, 1),
                                 ((1, 1), (1, 1)), dimension_numbers=dn,
                                 precision=hp)
    y = jnp.maximum(y + params["conv1_b"].reshape(1, -1, 1, 1), 0.0)
    y = lax.conv_general_dilated(y, params["conv2_w"], (1, 1),
                                 ((1, 1), (1, 1)), dimension_numbers=dn,
                                 precision=hp)
    y = jnp.maximum(y + params["conv2_b"].reshape(1, -1, 1, 1), 0.0)
    y = lax.reduce_window(y, -jnp.inf, lax.max, (1, 1, 2, 2), (1, 1, 2, 2), "VALID")
    y = y.reshape(y.shape[0], -1)
    y = jnp.maximum(jnp.dot(y, params["fc1_w"].T, precision=hp) + params["fc1_b"], 0.0)
    return jnp.dot(y, params["fc2_w"].T, precision=hp) + params["fc2_b"]


# ----------------------------------- parameters --------------------------------------

def init_params(key):
    ks = jax.random.split(key, 8)

    def u(k, shape, fan_in):
        bound = 1.0 / jnp.sqrt(float(fan_in))
        return jax.random.uniform(k, shape, jnp.float32, -bound, bound)

    return {
        "conv1_w": u(ks[0], (32, 1, 3, 3), 1 * 9),
        "conv1_b": u(ks[1], (32,), 1 * 9),
        "conv2_w": u(ks[2], (64, 32, 3, 3), 32 * 9),
        "conv2_b": u(ks[3], (64,), 32 * 9),
        "fc1_w":   u(ks[4], (128, 64 * 14 * 14), 64 * 14 * 14),
        "fc1_b":   u(ks[5], (128,), 64 * 14 * 14),
        "fc2_w":   u(ks[6], (10, 128), 128),
        "fc2_b":   u(ks[7], (10,), 128),
    }


if __name__ == "__main__":
    key = jax.random.PRNGKey(0)
    pkey, xkey = jax.random.split(key)
    params = init_params(pkey)
    # fc1 = Linear(64*14*14, ...) implies 28x28 single-channel input (MNIST).
    x = jax.random.normal(xkey, (2, 1, 28, 28), dtype=jnp.float32)

    prep = prepare_params(params)            # one-time, outside the forward graph
    out = jax.jit(convnet_forward)(prep, x)
    out = jax.block_until_ready(out)
    assert out.shape == (2, 10), out.shape

    ref = reference_forward(params, x)
    max_err = float(jnp.max(jnp.abs(out - ref)))
    assert max_err < 5e-2, f"mismatch vs f32 reference (bf16 matmuls): {max_err}"

    print("KERNEL_OK")
</pallas_src>

<mosaic_0001>
module attributes {stable_mosaic.version = 11 : i64} {
  func.func @_conv_pool_kernel(%arg0: i32, %arg1: memref<2x1024x27xbf16, #tpu.memory_space<vmem>>, %arg2: memref<27x96xbf16, #tpu.memory_space<vmem>>, %arg3: memref<1x96xf32, #tpu.memory_space<vmem>>, %arg4: memref<1024x96xbf16, #tpu.memory_space<vmem>>, %arg5: memref<3x96x64xbf16, #tpu.memory_space<vmem>>, %arg6: memref<1x64xf32, #tpu.memory_space<vmem>>, %arg7: memref<2x14x14x64xbf16, #tpu.memory_space<vmem>>, %arg8: memref<1024x96xbf16, #tpu.memory_space<vmem>>, %arg9: memref<14x64x64xf32, #tpu.memory_space<vmem>>) attributes {dimension_semantics = [#tpu.dimension_semantics<parallel>], iteration_bounds = array<i64: 1>, scalar_prefetch = 0 : i64, scratch_operands = 2 : i64, tpu.core_type = #tpu.core_type<tc>, window_params = [{transform_indices = @transform_0, window_bounds = array<i64: 2, 1024, 27>}, {pipeline_mode = #tpu.pipeline_mode<synchronous>, transform_indices = @transform_1, window_bounds = array<i64: 27, 96>}, {pipeline_mode = #tpu.pipeline_mode<synchronous>, transform_indices = @transform_2, window_bounds = array<i64: 1, 96>}, {pipeline_mode = #tpu.pipeline_mode<synchronous>, transform_indices = @transform_3, window_bounds = array<i64: 1024, 96>}, {pipeline_mode = #tpu.pipeline_mode<synchronous>, transform_indices = @transform_4, window_bounds = array<i64: 3, 96, 64>}, {pipeline_mode = #tpu.pipeline_mode<synchronous>, transform_indices = @transform_5, window_bounds = array<i64: 1, 64>}, {transform_indices = @transform_6, window_bounds = array<i64: 2, 14, 14, 64>}]} {
    %c0 = arith.constant 0 : index
    %c0_0 = arith.constant 0 : index
    %c0_1 = arith.constant 0 : index
    %0 = vector.load %arg1[%c0, %c0_0, %c0_1] : memref<2x1024x27xbf16, #tpu.memory_space<vmem>>, vector<1x256x27xbf16>
    %1 = vector.shape_cast %0 : vector<1x256x27xbf16> to vector<256x27xbf16>
    %c0_2 = arith.constant 0 : index
    %c0_3 = arith.constant 0 : index
    %2 = vector.load %arg2[%c0_2, %c0_3] : memref<27x96xbf16, #tpu.memory_space<vmem>>, vector<27x96xbf16>
    %cst = arith.constant dense<0.000000e+00> : vector<256x96xf32>
    %3 = tpu.matmul %1, %2, %cst {dimension_numbers = #tpu.dot_dimension_numbers<[1], [0], [0], [1], [0, 0, 1, 1], [], []>} : vector<256x27xbf16>, vector<27x96xbf16>, vector<256x96xf32> -> vector<256x96xf32>
    %c0_4 = arith.constant 0 : index
    %c0_5 = arith.constant 0 : index
    %4 = vector.load %arg3[%c0_4, %c0_5] : memref<1x96xf32, #tpu.memory_space<vmem>>, vector<1x96xf32>
    %5 = vector.broadcast %4 : vector<1x96xf32> to vector<256x96xf32>
    %6 = arith.addf %3, %5 : vector<256x96xf32>
    %cst_6 = arith.constant 0.000000e+00 : f32
    %7 = vector.broadcast %cst_6 : f32 to vector<256x96xf32>
    %8 = arith.maximumf %6, %7 : vector<256x96xf32>
    %c0_7 = arith.constant 0 : index
    %c0_8 = arith.constant 0 : index
    %9 = vector.load %arg4[%c0_7, %c0_8] : memref<1024x96xbf16, #tpu.memory_space<vmem>>, vector<256x96xbf16>
    %10 = arith.extf %9 : vector<256x96xbf16> to vector<256x96xf32>
    %11 = arith.mulf %8, %10 : vector<256x96xf32>
    %12 = arith.truncf %11 : vector<256x96xf32> to vector<256x96xbf16>
    %c0_9 = arith.constant 0 : index
    %c0_10 = arith.constant 0 : index
    %13 = vector.load %arg8[%c0_9, %c0_10] : memref<1024x96xbf16, #tpu.memory_space<vmem>>, vector<256x96xbf16>
    tpu.vector_store %arg8[%c0_9, %c0_10], %12 {strides = array<i32>} : memref<1024x96xbf16, #tpu.memory_space<vmem>>, vector<256x96xbf16>,
    %c0_11 = arith.constant 0 : index
    %c256 = arith.constant 256 : index
    %c0_12 = arith.constant 0 : index
    %14 = vector.load %arg1[%c0_11, %c256, %c0_12] : memref<2x1024x27xbf16, #tpu.memory_space<vmem>>, vector<1x256x27xbf16>
    %15 = vector.shape_cast %14 : vector<1x256x27xbf16> to vector<256x27xbf16>
    %c0_13 = arith.constant 0 : index
    %c0_14 = arith.constant 0 : index
    %16 = vector.load %arg2[%c0_13, %c0_14] : memref<27x96xbf16, #tpu.memory_space<vmem>>, vector<27x96xbf16>
    %cst_15 = arith.constant dense<0.000000e+00> : vector<256x96xf32>
    %17 = tpu.matmul %15, %16, %cst_15 {dimension_numbers = #tpu.dot_dimension_numbers<[1], [0], [0], [1], [0, 0, 1, 1], [], []>} : vector<256x27xbf16>, vector<27x96xbf16>, vector<256x96xf32> -> vector<256x96xf32>
    %c0_16 = arith.constant 0 : index
    %c0_17 = arith.constant 0 : index
    %18 = vector.load %arg3[%c0_16, %c0_17] : memref<1x96xf32, #tpu.memory_space<vmem>>, vector<1x96xf32>
    %19 = vector.broadcast %18 : vector<1x96xf32> to vector<256x96xf32>
    %20 = arith.addf %17, %19 : vector<256x96xf32>
    %cst_18 = arith.constant 0.000000e+00 : f32
    %21 = vector.broadcast %cst_18 : f32 to vector<256x96xf32>
    %22 = arith.maximumf %20, %21 : vector<256x96xf32>
    %c256_19 = arith.constant 256 : index
    %c0_20 = arith.constant 0 : index
    %23 = vector.load %arg4[%c256_19, %c0_20] : memref<1024x96xbf16, #tpu.memory_space<vmem>>, vector<256x96xbf16>
    %24 = arith.extf %23 : vector<256x96xbf16> to vector<256x96xf32>
    %25 = arith.mulf %22, %24 : vector<256x96xf32>
    %26 = arith.truncf %25 : vector<256x96xf32> to vector<256x96xbf16>
    %c256_21 = arith.constant 256 : index
    %c0_22 = arith.constant 0 : index
    %27 = vector.load %arg8[%c256_21, %c0_22] : memref<1024x96xbf16, #tpu.memory_space<vmem>>, vector<256x96xbf16>
    tpu.vector_store %arg8[%c256_21, %c0_22], %26 {strides = array<i32>} : memref<1024x96xbf16, #tpu.memory_space<vmem>>, vector<256x96xbf16>,
    %c0_23 = arith.constant 0 : index
    %c512 = arith.constant 512 : index
    %c0_24 = arith.constant 0 : index
    %28 = vector.load %arg1[%c0_23, %c512, %c0_24] : memref<2x1024x27xbf16, #tpu.memory_space<vmem>>, vector<1x256x27xbf16>
    %29 = vector.shape_cast %28 : vector<1x256x27xbf16> to vector<256x27xbf16>
    %c0_25 = arith.constant 0 : index
    %c0_26 = arith.constant 0 : index
    %30 = vector.load %arg2[%c0_25, %c0_26] : memref<27x96xbf16, #tpu.memory_space<vmem>>, vector<27x96xbf16>
    %cst_27 = arith.constant dense<0.000000e+00> : vector<256x96xf32>
    %31 = tpu.matmul %29, %30, %cst_27 {dimension_numbers = #tpu.dot_dimension_numbers<[1], [0], [0], [1], [0, 0, 1, 1], [], []>} : vector<256x27xbf16>, vector<27x96xbf16>, vector<256x96xf32> -> vector<256x96xf32>
    %c0_28 = arith.constant 0 : index
    %c0_29 = arith.constant 0 : index
    %32 = vector.load %arg3[%c0_28, %c0_29] : memref<1x96xf32, #tpu.memory_space<vmem>>, vector<1x96xf32>
    %33 = vector.broadcast %32 : vector<1x96xf32> to vector<256x96xf32>
    %34 = arith.addf %31, %33 : vector<256x96xf32>
    %cst_30 = arith.constant 0.000000e+00 : f32
    %35 = vector.broadcast %cst_30 : f32 to vector<256x96xf32>
    %36 = arith.maximumf %34, %35 : vector<256x96xf32>
    %c512_31 = arith.constant 512 : index
    %c0_32 = arith.constant 0 : index
    %37 = vector.load %arg4[%c512_31, %c0_32] : memref<1024x96xbf16, #tpu.memory_space<vmem>>, vector<256x96xbf16>
    %38 = arith.extf %37 : vector<256x96xbf16> to vector<256x96xf32>
    %39 = arith.mulf %36, %38 : vector<256x96xf32>
    %40 = arith.truncf %39 : vector<256x96xf32> to vector<256x96xbf16>
    %c512_33 = arith.constant 512 : index
    %c0_34 = arith.constant 0 : index
    %41 = vector.load %arg8[%c512_33, %c0_34] : memref<1024x96xbf16, #tpu.memory_space<vmem>>, vector<256x96xbf16>
    tpu.vector_store %arg8[%c512_33, %c0_34], %40 {strides = array<i32>} : memref<1024x96xbf16, #tpu.memory_space<vmem>>, vector<256x96xbf16>,
    %c0_35 = arith.constant 0 : index
    %c768 = arith.constant 768 : index
    %c0_36 = arith.constant 0 : index
    %42 = vector.load %arg1[%c0_35, %c768, %c0_36] : memref<2x1024x27xbf16, #tpu.memory_space<vmem>>, vector<1x256x27xbf16>
    %43 = vector.shape_cast %42 : vector<1x256x27xbf16> to vector<256x27xbf16>
    %c0_37 = arith.constant 0 : index
    %c0_38 = arith.constant 0 : index
    %44 = vector.load %arg2[%c0_37, %c0_38] : memref<27x96xbf16, #tpu.memory_space<vmem>>, vector<27x96xbf16>
    %cst_39 = arith.constant dense<0.000000e+00> : vector<256x96xf32>
    %45 = tpu.matmul %43, %44, %cst_39 {dimension_numbers = #tpu.dot_dimension_numbers<[1], [0], [0], [1], [0, 0, 1, 1], [], []>} : vector<256x27xbf16>, vector<27x96xbf16>, vector<256x96xf32> -> vector<256x96xf32>
    %c0_40 = arith.constant 0 : index
    %c0_41 = arith.constant 0 : index
    %46 = vector.load %arg3[%c0_40, %c0_41] : memref<1x96xf32, #tpu.memory_space<vmem>>, vector<1x96xf32>
    %47 = vector.broadcast %46 : vector<1x96xf32> to vector<256x96xf32>
    %48 = arith.addf %45, %47 : vector<256x96xf32>
    %cst_42 = arith.constant 0.000000e+00 : f32
    %49 = vector.broadcast %cst_42 : f32 to vector<256x96xf32>
    %50 = arith.maximumf %48, %49 : vector<256x96xf32>
    %c768_43 = arith.constant 768 : index
    %c0_44 = arith.constant 0 : index
    %51 = vector.load %arg4[%c768_43, %c0_44] : memref<1024x96xbf16, #tpu.memory_space<vmem>>, vector<256x96xbf16>
    %52 = arith.extf %51 : vector<256x96xbf16> to vector<256x96xf32>
    %53 = arith.mulf %50, %52 : vector<256x96xf32>
    %54 = arith.truncf %53 : vector<256x96xf32> to vector<256x96xbf16>
    %c768_45 = arith.constant 768 : index
    %c0_46 = arith.constant 0 : index
    %55 = vector.load %arg8[%c768_45, %c0_46] : memref<1024x96xbf16, #tpu.memory_space<vmem>>, vector<256x96xbf16>
    tpu.vector_store %arg8[%c768_45, %c0_46], %54 {strides = array<i32>} : memref<1024x96xbf16, #tpu.memory_space<vmem>>, vector<256x96xbf16>,
    %c0_47 = arith.constant 0 : index
    %c0_48 = arith.constant 0 : index
    %56 = vector.load %arg8[%c0_47, %c0_48] : memref<1024x96xbf16, #tpu.memory_space<vmem>>, vector<896x96xbf16>
    %c0_49 = arith.constant 0 : index
    %c0_50 = arith.constant 0 : index
    %c0_51 = arith.constant 0 : index
    %57 = vector.load %arg5[%c0_49, %c0_50, %c0_51] : memref<3x96x64xbf16, #tpu.memory_space<vmem>>, vector<1x96x64xbf16>
    %58 = vector.shape_cast %57 : vector<1x96x64xbf16> to vector<96x64xbf16>
    %cst_52 = arith.constant dense<0.000000e+00> : vector<896x64xf32>
    %59 = tpu.matmul %56, %58, %cst_52 {dimension_numbers = #tpu.dot_dimension_numbers<[1], [0], [0], [1], [0, 0, 1, 1], [], []>} : vector<896x96xbf16>, vector<96x64xbf16>, vector<896x64xf32> -> vector<896x64xf32>
    %c32 = arith.constant 32 : index
    %c0_53 = arith.constant 0 : index
    %60 = vector.load %arg8[%c32, %c0_53] : memref<1024x96xbf16, #tpu.memory_space<vmem>>, vector<896x96xbf16>
    %c1 = arith.constant 1 : index
    %c0_54 = arith.constant 0 : index
    %c0_55 = arith.constant 0 : index
    %61 = vector.load %arg5[%c1, %c0_54, %c0_55] : memref<3x96x64xbf16, #tpu.memory_space<vmem>>, vector<1x96x64xbf16>
    %62 = vector.shape_cast %61 : vector<1x96x64xbf16> to vector<96x64xbf16>
    %cst_56 = arith.constant dense<0.000000e+00> : vector<896x64xf32>
    %63 = tpu.matmul %60, %62, %cst_56 {dimension_numbers = #tpu.dot_dimension_numbers<[1], [0], [0], [1], [0, 0, 1, 1], [], []>} : vector<896x96xbf16>, vector<96x64xbf16>, vector<896x64xf32> -> vector<896x64xf32>
    %64 = arith.addf %59, %63 : vector<896x64xf32>
    %c64 = arith.constant 64 : index
    %c0_57 = arith.constant 0 : index
    %65 = vector.load %arg8[%c64, %c0_57] : memref<1024x96xbf16, #tpu.memory_space<vmem>>, vector<896x96xbf16>
    %c2 = arith.constant 2 : index
    %c0_58 = arith.constant 0 : index
    %c0_59 = arith.constant 0 : index
    %66 = vector.load %arg5[%c2, %c0_58, %c0_59] : memref<3x96x64xbf16, #tpu.memory_space<vmem>>, vector<1x96x64xbf16>
    %67 = vector.shape_cast %66 : vector<1x96x64xbf16> to vector<96x64xbf16>
    %cst_60 = arith.constant dense<0.000000e+00> : vector<896x64xf32>
    %68 = tpu.matmul %65, %67, %cst_60 {dimension_numbers = #tpu.dot_dimension_numbers<[1], [0], [0], [1], [0, 0, 1, 1], [], []>} : vector<896x96xbf16>, vector<96x64xbf16>, vector<896x64xf32> -> vector<896x64xf32>
    %69 = arith.addf %64, %68 : vector<896x64xf32>
    %c0_61 = arith.constant 0 : index
    %c0_62 = arith.constant 0 : index
    %70 = vector.load %arg6[%c0_61, %c0_62] : memref<1x64xf32, #tpu.memory_space<vmem>>, vector<1x64xf32>
    %71 = vector.broadcast %70 : vector<1x64xf32> to vector<896x64xf32>
    %72 = arith.addf %69, %71 : vector<896x64xf32>
    %cst_63 = arith.constant 0.000000e+00 : f32
    %73 = vector.broadcast %cst_63 : f32 to vector<896x64xf32>
    %74 = arith.maximumf %72, %73 : vector<896x64xf32>
    %75 = vector.shape_cast %74 : vector<896x64xf32> to vector<14x64x64xf32>
    %c0_64 = arith.constant 0 : index
    %c0_65 = arith.constant 0 : index
    %c0_66 = arith.constant 0 : index
    %76 = vector.load %arg9[%c0_64, %c0_65, %c0_66] : memref<14x64x64xf32, #tpu.memory_space<vmem>>, vector<14x64x64xf32>
    tpu.vector_store %arg9[%c0_64, %c0_65, %c0_66], %75 {strides = array<i32>} : memref<14x64x64xf32, #tpu.memory_space<vmem>>, vector<14x64x64xf32>,
    %c0_67 = arith.constant 0 : index
    %c0_68 = arith.constant 0 : index
    %c0_69 = arith.constant 0 : index
    %77 = vector.load %arg9[%c0_67, %c0_68, %c0_69] : memref<14x64x64xf32, #tpu.memory_space<vmem>>, vector<14x32x64xf32>
    %c0_70 = arith.constant 0 : index
    %c32_71 = arith.constant 32 : index
    %c0_72 = arith.constant 0 : index
    %78 = vector.load %arg9[%c0_70, %c32_71, %c0_72] : memref<14x64x64xf32, #tpu.memory_space<vmem>>, vector<14x32x64xf32>
    %79 = arith.maximumf %77, %78 : vector<14x32x64xf32>
    %c0_73 = arith.constant 0 : index
    %c0_74 = arith.constant 0 : index
    %c0_75 = arith.constant 0 : index
    %80 = vector.load %arg9[%c0_73, %c0_74, %c0_75] : memref<14x64x64xf32, #tpu.memory_space<vmem>>, vector<14x32x64xf32>
    tpu.vector_store %arg9[%c0_73, %c0_74, %c0_75], %79 {strides = array<i32>} : memref<14x64x64xf32, #tpu.memory_space<vmem>>, vector<14x32x64xf32>,
    %c0_76 = arith.constant 0 : index
    %c0_77 = arith.constant 0 : index
    %c0_78 = arith.constant 0 : index
    %81 = tpu.strided_load %arg9[%c0_76, %c0_77, %c0_78] {strides = array<i32: 1, 2, 1>} : memref<14x64x64xf32, #tpu.memory_space<vmem>>, vector<14x14x64xf32>
    %c0_79 = arith.constant 0 : index
    %c1_80 = arith.constant 1 : index
    %c0_81 = arith.constant 0 : index
    %82 = tpu.strided_load %arg9[%c0_79, %c1_80, %c0_81] {strides = array<i32: 1, 2, 1>} : memref<14x64x64xf32, #tpu.memory_space<vmem>>, vector<14x14x64xf32>
    %83 = arith.maximumf %81, %82 : vector<14x14x64xf32>
    %84 = arith.truncf %83 : vector<14x14x64xf32> to vector<14x14x64xbf16>
    %c0_82 = arith.constant 0 : index
    %c0_83 = arith.constant 0 : index
    %c0_84 = arith.constant 0 : index
    %c0_85 = arith.constant 0 : index
    %85 = vector.load %arg7[%c0_82, %c0_83, %c0_84, %c0_85] : memref<2x14x14x64xbf16, #tpu.memory_space<vmem>>, vector<1x14x14x64xbf16>
    %86 = vector.shape_cast %85 : vector<1x14x14x64xbf16> to vector<14x14x64xbf16>
    %87 = vector.shape_cast %84 : vector<14x14x64xbf16> to vector<1x14x14x64xbf16>
    tpu.vector_store %arg7[%c0_82, %c0_83, %c0_84, %c0_85], %87 {strides = array<i32>} : memref<2x14x14x64xbf16, #tpu.memory_space<vmem>>, vector<1x14x14x64xbf16>,
    %c1_86 = arith.constant 1 : index
    %c0_87 = arith.constant 0 : index
    %c0_88 = arith.constant 0 : index
    %88 = vector.load %arg1[%c1_86, %c0_87, %c0_88] : memref<2x1024x27xbf16, #tpu.memory_space<vmem>>, vector<1x256x27xbf16>
    %89 = vector.shape_cast %88 : vector<1x256x27xbf16> to vector<256x27xbf16>
    %c0_89 = arith.constant 0 : index
    %c0_90 = arith.constant 0 : index
    %90 = vector.load %arg2[%c0_89, %c0_90] : memref<27x96xbf16, #tpu.memory_space<vmem>>, vector<27x96xbf16>
    %cst_91 = arith.constant dense<0.000000e+00> : vector<256x96xf32>
    %91 = tpu.matmul %89, %90, %cst_91 {dimension_numbers = #tpu.dot_dimension_numbers<[1], [0], [0], [1], [0, 0, 1, 1], [], []>} : vector<256x27xbf16>, vector<27x96xbf16>, vector<256x96xf32> -> vector<256x96xf32>
    %c0_92 = arith.constant 0 : index
    %c0_93 = arith.constant 0 : index
    %92 = vector.load %arg3[%c0_92, %c0_93] : memref<1x96xf32, #tpu.memory_space<vmem>>, vector<1x96xf32>
    %93 = vector.broadcast %92 : vector<1x96xf32> to vector<256x96xf32>
    %94 = arith.addf %91, %93 : vector<256x96xf32>
    %cst_94 = arith.constant 0.000000e+00 : f32
    %95 = vector.broadcast %cst_94 : f32 to vector<256x96xf32>
    %96 = arith.maximumf %94, %95 : vector<256x96xf32>
    %c0_95 = arith.constant 0 : index
    %c0_96 = arith.constant 0 : index
    %97 = vector.load %arg4[%c0_95, %c0_96] : memref<1024x96xbf16, #tpu.memory_space<vmem>>, vector<256x96xbf16>
    %98 = arith.extf %97 : vector<256x96xbf16> to vector<256x96xf32>
    %99 = arith.mulf %96, %98 : vector<256x96xf32>
    %100 = arith.truncf %99 : vector<256x96xf32> to vector<256x96xbf16>
    %c0_97 = arith.constant 0 : index
    %c0_98 = arith.constant 0 : index
    %101 = vector.load %arg8[%c0_97, %c0_98] : memref<1024x96xbf16, #tpu.memory_space<vmem>>, vector<256x96xbf16>
    tpu.vector_store %arg8[%c0_97, %c0_98], %100 {strides = array<i32>} : memref<1024x96xbf16, #tpu.memory_space<vmem>>, vector<256x96xbf16>,
    %c1_99 = arith.constant 1 : index
    %c256_100 = arith.constant 256 : index
    %c0_101 = arith.constant 0 : index
    %102 = vector.load %arg1[%c1_99, %c256_100, %c0_101] : memref<2x1024x27xbf16, #tpu.memory_space<vmem>>, vector<1x256x27xbf16>
    %103 = vector.shape_cast %102 : vector<1x256x27xbf16> to vector<256x27xbf16>
    %c0_102 = arith.constant 0 : index
    %c0_103 = arith.constant 0 : index
    %104 = vector.load %arg2[%c0_102, %c0_103] : memref<27x96xbf16, #tpu.memory_space<vmem>>, vector<27x96xbf16>
    %cst_104 = arith.constant dense<0.000000e+00> : vector<256x96xf32>
    %105 = tpu.matmul %103, %104, %cst_104 {dimension_numbers = #tpu.dot_dimension_numbers<[1], [0], [0], [1], [0, 0, 1, 1], [], []>} : vector<256x27xbf16>, vector<27x96xbf16>, vector<256x96xf32> -> vector<256x96xf32>
    %c0_105 = arith.constant 0 : index
    %c0_106 = arith.constant 0 : index
    %106 = vector.load %arg3[%c0_105, %c0_106] : memref<1x96xf32, #tpu.memory_space<vmem>>, vector<1x96xf32>
    %107 = vector.broadcast %106 : vector<1x96xf32> to vector<256x96xf32>
    %108 = arith.addf %105, %107 : vector<256x96xf32>
    %cst_107 = arith.constant 0.000000e+00 : f32
    %109 = vector.broadcast %cst_107 : f32 to vector<256x96xf32>
    %110 = arith.maximumf %108, %109 : vector<256x96xf32>
    %c256_108 = arith.constant 256 : index
    %c0_109 = arith.constant 0 : index
    %111 = vector.load %arg4[%c256_108, %c0_109] : memref<1024x96xbf16, #tpu.memory_space<vmem>>, vector<256x96xbf16>
    %112 = arith.extf %111 : vector<256x96xbf16> to vector<256x96xf32>
    %113 = arith.mulf %110, %112 : vector<256x96xf32>
    %114 = arith.truncf %113 : vector<256x96xf32> to vector<256x96xbf16>
    %c256_110 = arith.constant 256 : index
    %c0_111 = arith.constant 0 : index
    %115 = vector.load %arg8[%c256_110, %c0_111] : memref<1024x96xbf16, #tpu.memory_space<vmem>>, vector<256x96xbf16>
    tpu.vector_store %arg8[%c256_110, %c0_111], %114 {strides = array<i32>} : memref<1024x96xbf16, #tpu.memory_space<vmem>>, vector<256x96xbf16>,
    %c1_112 = arith.constant 1 : index
    %c512_113 = arith.constant 512 : index
    %c0_114 = arith.constant 0 : index
    %116 = vector.load %arg1[%c1_112, %c512_113, %c0_114] : memref<2x1024x27xbf16, #tpu.memory_space<vmem>>, vector<1x256x27xbf16>
    %117 = vector.shape_cast %116 : vector<1x256x27xbf16> to vector<256x27xbf16>
    %c0_115 = arith.constant 0 : index
    %c0_116 = arith.constant 0 : index
    %118 = vector.load %arg2[%c0_115, %c0_116] : memref<27x96xbf16, #tpu.memory_space<vmem>>, vector<27x96xbf16>
    %cst_117 = arith.constant dense<0.000000e+00> : vector<256x96xf32>
    %119 = tpu.matmul %117, %118, %cst_117 {dimension_numbers = #tpu.dot_dimension_numbers<[1], [0], [0], [1], [0, 0, 1, 1], [], []>} : vector<256x27xbf16>, vector<27x96xbf16>, vector<256x96xf32> -> vector<256x96xf32>
    %c0_118 = arith.constant 0 : index
    %c0_119 = arith.constant 0 : index
    %120 = vector.load %arg3[%c0_118, %c0_119] : memref<1x96xf32, #tpu.memory_space<vmem>>, vector<1x96xf32>
    %121 = vector.broadcast %120 : vector<1x96xf32> to vector<256x96xf32>
    %122 = arith.addf %119, %121 : vector<256x96xf32>
    %cst_120 = arith.constant 0.000000e+00 : f32
    %123 = vector.broadcast %cst_120 : f32 to vector<256x96xf32>
    %124 = arith.maximumf %122, %123 : vector<256x96xf32>
    %c512_121 = arith.constant 512 : index
    %c0_122 = arith.constant 0 : index
    %125 = vector.load %arg4[%c512_121, %c0_122] : memref<1024x96xbf16, #tpu.memory_space<vmem>>, vector<256x96xbf16>
    %126 = arith.extf %125 : vector<256x96xbf16> to vector<256x96xf32>
    %127 = arith.mulf %124, %126 : vector<256x96xf32>
    %128 = arith.truncf %127 : vector<256x96xf32> to vector<256x96xbf16>
    %c512_123 = arith.constant 512 : index
    %c0_124 = arith.constant 0 : index
    %129 = vector.load %arg8[%c512_123, %c0_124] : memref<1024x96xbf16, #tpu.memory_space<vmem>>, vector<256x96xbf16>
    tpu.vector_store %arg8[%c512_123, %c0_124], %128 {strides = array<i32>} : memref<1024x96xbf16, #tpu.memory_space<vmem>>, vector<256x96xbf16>,
    %c1_125 = arith.constant 1 : index
    %c768_126 = arith.constant 768 : index
    %c0_127 = arith.constant 0 : index
    %130 = vector.load %arg1[%c1_125, %c768_126, %c0_127] : memref<2x1024x27xbf16, #tpu.memory_space<vmem>>, vector<1x256x27xbf16>
    %131 = vector.shape_cast %130 : vector<1x256x27xbf16> to vector<256x27xbf16>
    %c0_128 = arith.constant 0 : index
    %c0_129 = arith.constant 0 : index
    %132 = vector.load %arg2[%c0_128, %c0_129] : memref<27x96xbf16, #tpu.memory_space<vmem>>, vector<27x96xbf16>
    %cst_130 = arith.constant dense<0.000000e+00> : vector<256x96xf32>
    %133 = tpu.matmul %131, %132, %cst_130 {dimension_numbers = #tpu.dot_dimension_numbers<[1], [0], [0], [1], [0, 0, 1, 1], [], []>} : vector<256x27xbf16>, vector<27x96xbf16>, vector<256x96xf32> -> vector<256x96xf32>
    %c0_131 = arith.constant 0 : index
    %c0_132 = arith.constant 0 : index
    %134 = vector.load %arg3[%c0_131, %c0_132] : memref<1x96xf32, #tpu.memory_space<vmem>>, vector<1x96xf32>
    %135 = vector.broadcast %134 : vector<1x96xf32> to vector<256x96xf32>
    %136 = arith.addf %133, %135 : vector<256x96xf32>
    %cst_133 = arith.constant 0.000000e+00 : f32
    %137 = vector.broadcast %cst_133 : f32 to vector<256x96xf32>
    %138 = arith.maximumf %136, %137 : vector<256x96xf32>
    %c768_134 = arith.constant 768 : index
    %c0_135 = arith.constant 0 : index
    %139 = vector.load %arg4[%c768_134, %c0_135] : memref<1024x96xbf16, #tpu.memory_space<vmem>>, vector<256x96xbf16>
    %140 = arith.extf %139 : vector<256x96xbf16> to vector<256x96xf32>
    %141 = arith.mulf %138, %140 : vector<256x96xf32>
    %142 = arith.truncf %141 : vector<256x96xf32> to vector<256x96xbf16>
    %c768_136 = arith.constant 768 : index
    %c0_137 = arith.constant 0 : index
    %143 = vector.load %arg8[%c768_136, %c0_137] : memref<1024x96xbf16, #tpu.memory_space<vmem>>, vector<256x96xbf16>
    tpu.vector_store %arg8[%c768_136, %c0_137], %142 {strides = array<i32>} : memref<1024x96xbf16, #tpu.memory_space<vmem>>, vector<256x96xbf16>,
    %c0_138 = arith.constant 0 : index
    %c0_139 = arith.constant 0 : index
    %144 = vector.load %arg8[%c0_138, %c0_139] : memref<1024x96xbf16, #tpu.memory_space<vmem>>, vector<896x96xbf16>
    %c0_140 = arith.constant 0 : index
    %c0_141 = arith.constant 0 : index
    %c0_142 = arith.constant 0 : index
    %145 = vector.load %arg5[%c0_140, %c0_141, %c0_142] : memref<3x96x64xbf16, #tpu.memory_space<vmem>>, vector<1x96x64xbf16>
    %146 = vector.shape_cast %145 : vector<1x96x64xbf16> to vector<96x64xbf16>
    %cst_143 = arith.constant dense<0.000000e+00> : vector<896x64xf32>
    %147 = tpu.matmul %144, %146, %cst_143 {dimension_numbers = #tpu.dot_dimension_numbers<[1], [0], [0], [1], [0, 0, 1, 1], [], []>} : vector<896x96xbf16>, vector<96x64xbf16>, vector<896x64xf32> -> vector<896x64xf32>
    %c32_144 = arith.constant 32 : index
    %c0_145 = arith.constant 0 : index
    %148 = vector.load %arg8[%c32_144, %c0_145] : memref<1024x96xbf16, #tpu.memory_space<vmem>>, vector<896x96xbf16>
    %c1_146 = arith.constant 1 : index
    %c0_147 = arith.constant 0 : index
    %c0_148 = arith.constant 0 : index
    %149 = vector.load %arg5[%c1_146, %c0_147, %c0_148] : memref<3x96x64xbf16, #tpu.memory_space<vmem>>, vector<1x96x64xbf16>
    %150 = vector.shape_cast %149 : vector<1x96x64xbf16> to vector<96x64xbf16>
    %cst_149 = arith.constant dense<0.000000e+00> : vector<896x64xf32>
    %151 = tpu.matmul %148, %150, %cst_149 {dimension_numbers = #tpu.dot_dimension_numbers<[1], [0], [0], [1], [0, 0, 1, 1], [], []>} : vector<896x96xbf16>, vector<96x64xbf16>, vector<896x64xf32> -> vector<896x64xf32>
    %152 = arith.addf %147, %151 : vector<896x64xf32>
    %c64_150 = arith.constant 64 : index
    %c0_151 = arith.constant 0 : index
    %153 = vector.load %arg8[%c64_150, %c0_151] : memref<1024x96xbf16, #tpu.memory_space<vmem>>, vector<896x96xbf16>
    %c2_152 = arith.constant 2 : index
    %c0_153 = arith.constant 0 : index
    %c0_154 = arith.constant 0 : index
    %154 = vector.load %arg5[%c2_152, %c0_153, %c0_154] : memref<3x96x64xbf16, #tpu.memory_space<vmem>>, vector<1x96x64xbf16>
    %155 = vector.shape_cast %154 : vector<1x96x64xbf16> to vector<96x64xbf16>
    %cst_155 = arith.constant dense<0.000000e+00> : vector<896x64xf32>
    %156 = tpu.matmul %153, %155, %cst_155 {dimension_numbers = #tpu.dot_dimension_numbers<[1], [0], [0], [1], [0, 0, 1, 1], [], []>} : vector<896x96xbf16>, vector<96x64xbf16>, vector<896x64xf32> -> vector<896x64xf32>
    %157 = arith.addf %152, %156 : vector<896x64xf32>
    %c0_156 = arith.constant 0 : index
    %c0_157 = arith.constant 0 : index
    %158 = vector.load %arg6[%c0_156, %c0_157] : memref<1x64xf32, #tpu.memory_space<vmem>>, vector<1x64xf32>
    %159 = vector.broadcast %158 : vector<1x64xf32> to vector<896x64xf32>
    %160 = arith.addf %157, %159 : vector<896x64xf32>
    %cst_158 = arith.constant 0.000000e+00 : f32
    %161 = vector.broadcast %cst_158 : f32 to vector<896x64xf32>
    %162 = arith.maximumf %160, %161 : vector<896x64xf32>
    %163 = vector.shape_cast %162 : vector<896x64xf32> to vector<14x64x64xf32>
    %c0_159 = arith.constant 0 : index
    %c0_160 = arith.constant 0 : index
    %c0_161 = arith.constant 0 : index
    %164 = vector.load %arg9[%c0_159, %c0_160, %c0_161] : memref<14x64x64xf32, #tpu.memory_space<vmem>>, vector<14x64x64xf32>
    tpu.vector_store %arg9[%c0_159, %c0_160, %c0_161], %163 {strides = array<i32>} : memref<14x64x64xf32, #tpu.memory_space<vmem>>, vector<14x64x64xf32>,
    %c0_162 = arith.constant 0 : index
    %c0_163 = arith.constant 0 : index
    %c0_164 = arith.constant 0 : index
    %165 = vector.load %arg9[%c0_162, %c0_163, %c0_164] : memref<14x64x64xf32, #tpu.memory_space<vmem>>, vector<14x32x64xf32>
    %c0_165 = arith.constant 0 : index
    %c32_166 = arith.constant 32 : index
    %c0_167 = arith.constant 0 : index
    %166 = vector.load %arg9[%c0_165, %c32_166, %c0_167] : memref<14x64x64xf32, #tpu.memory_space<vmem>>, vector<14x32x64xf32>
    %167 = arith.maximumf %165, %166 : vector<14x32x64xf32>
    %c0_168 = arith.constant 0 : index
    %c0_169 = arith.constant 0 : index
    %c0_170 = arith.constant 0 : index
    %168 = vector.load %arg9[%c0_168, %c0_169, %c0_170] : memref<14x64x64xf32, #tpu.memory_space<vmem>>, vector<14x32x64xf32>
    tpu.vector_store %arg9[%c0_168, %c0_169, %c0_170], %167 {strides = array<i32>} : memref<14x64x64xf32, #tpu.memory_space<vmem>>, vector<14x32x64xf32>,
    %c0_171 = arith.constant 0 : index
    %c0_172 = arith.constant 0 : index
    %c0_173 = arith.constant 0 : index
    %169 = tpu.strided_load %arg9[%c0_171, %c0_172, %c0_173] {strides = array<i32: 1, 2, 1>} : memref<14x64x64xf32, #tpu.memory_space<vmem>>, vector<14x14x64xf32>
    %c0_174 = arith.constant 0 : index
    %c1_175 = arith.constant 1 : index
    %c0_176 = arith.constant 0 : index
    %170 = tpu.strided_load %arg9[%c0_174, %c1_175, %c0_176] {strides = array<i32: 1, 2, 1>} : memref<14x64x64xf32, #tpu.memory_space<vmem>>, vector<14x14x64xf32>
    %171 = arith.maximumf %169, %170 : vector<14x14x64xf32>
    %172 = arith.truncf %171 : vector<14x14x64xf32> to vector<14x14x64xbf16>
    %c1_177 = arith.constant 1 : index
    %c0_178 = arith.constant 0 : index
    %c0_179 = arith.constant 0 : index
    %c0_180 = arith.constant 0 : index
    %173 = vector.load %arg7[%c1_177, %c0_178, %c0_179, %c0_180] : memref<2x14x14x64xbf16, #tpu.memory_space<vmem>>, vector<1x14x14x64xbf16>
    %174 = vector.shape_cast %173 : vector<1x14x14x64xbf16> to vector<14x14x64xbf16>
    %175 = vector.shape_cast %172 : vector<14x14x64xbf16> to vector<1x14x14x64xbf16>
    tpu.vector_store %arg7[%c1_177, %c0_178, %c0_179, %c0_180], %175 {strides = array<i32>} : memref<2x14x14x64xbf16, #tpu.memory_space<vmem>>, vector<1x14x14x64xbf16>,
    return
  }
  func.func @transform_0(%arg0: i32) -> (i32, i32, i32) {
    %c0_i32 = arith.constant 0 : i32
    %c0_i32_0 = arith.constant 0 : i32
    %c0_i32_1 = arith.constant 0 : i32
    return %arg0, %c0_i32, %c0_i32_0 : i32, i32, i32
  }
  func.func @transform_1(%arg0: i32) -> (i32, i32) {
    %c0_i32 = arith.constant 0 : i32
    %c0_i32_0 = arith.constant 0 : i32
    %c0_i32_1 = arith.constant 0 : i32
    return %c0_i32, %c0_i32_0 : i32, i32
  }
  func.func @transform_2(%arg0: i32) -> (i32, i32) {
    %c0_i32 = arith.constant 0 : i32
    %c0_i32_0 = arith.constant 0 : i32
    %c0_i32_1 = arith.constant 0 : i32
    return %c0_i32, %c0_i32_0 : i32, i32
  }
  func.func @transform_3(%arg0: i32) -> (i32, i32) {
    %c0_i32 = arith.constant 0 : i32
    %c0_i32_0 = arith.constant 0 : i32
    %c0_i32_1 = arith.constant 0 : i32
    return %c0_i32, %c0_i32_0 : i32, i32
  }
  func.func @transform_4(%arg0: i32) -> (i32, i32, i32) {
    %c0_i32 = arith.constant 0 : i32
    %c0_i32_0 = arith.constant 0 : i32
    %c0_i32_1 = arith.constant 0 : i32
    %c0_i32_2 = arith.constant 0 : i32
    return %c0_i32, %c0_i32_0, %c0_i32_1 : i32, i32, i32
  }
  func.func @transform_5(%arg0: i32) -> (i32, i32) {
    %c0_i32 = arith.constant 0 : i32
    %c0_i32_0 = arith.constant 0 : i32
    %c0_i32_1 = arith.constant 0 : i32
    return %c0_i32, %c0_i32_0 : i32, i32
  }
  func.func @transform_6(%arg0: i32) -> (i32, i32, i32, i32) {
    %c0_i32 = arith.constant 0 : i32
    %c0_i32_0 = arith.constant 0 : i32
    %c0_i32_1 = arith.constant 0 : i32
    %c0_i32_2 = arith.constant 0 : i32
    return %arg0, %c0_i32, %c0_i32_0, %c0_i32_1 : i32, i32, i32, i32
  }
}

module attributes {stable_mosaic.version = 11 : i64} {
  func.func @_mlp_head_kernel(%arg0: i32, %arg1: memref<2x12544xbf16, #tpu.memory_space<vmem>>, %arg2: memref<12544x128xbf16, #tpu.memory_space<vmem>>, %arg3: memref<1x128xf32, #tpu.memory_space<vmem>>, %arg4: memref<128x10xbf16, #tpu.memory_space<vmem>>, %arg5: memref<1x10xf32, #tpu.memory_space<vmem>>, %arg6: memref<2x10xf32, #tpu.memory_space<vmem>>) attributes {dimension_semantics = [#tpu.dimension_semantics<parallel>], iteration_bounds = array<i64: 1>, scalar_prefetch = 0 : i64, scratch_operands = 0 : i64, tpu.core_type = #tpu.core_type<tc>, window_params = [{transform_indices = @transform_0, window_bounds = array<i64: 2, 12544>}, {pipeline_mode = #tpu.pipeline_mode<synchronous>, transform_indices = @transform_1, window_bounds = array<i64: 12544, 128>}, {pipeline_mode = #tpu.pipeline_mode<synchronous>, transform_indices = @transform_2, window_bounds = array<i64: 1, 128>}, {pipeline_mode = #tpu.pipeline_mode<synchronous>, transform_indices = @transform_3, window_bounds = array<i64: 128, 10>}, {pipeline_mode = #tpu.pipeline_mode<synchronous>, transform_indices = @transform_4, window_bounds = array<i64: 1, 10>}, {transform_indices = @transform_5, window_bounds = array<i64: 2, 10>}]} {
    %c0 = arith.constant 0 : index
    %c0_0 = arith.constant 0 : index
    %0 = vector.load %arg1[%c0, %c0_0] : memref<2x12544xbf16, #tpu.memory_space<vmem>>, vector<2x12544xbf16>
    %c0_1 = arith.constant 0 : index
    %c0_2 = arith.constant 0 : index
    %1 = vector.load %arg2[%c0_1, %c0_2] : memref<12544x128xbf16, #tpu.memory_space<vmem>>, vector<12544x128xbf16>
    %cst = arith.constant dense<0.000000e+00> : vector<2x128xf32>
    %2 = tpu.matmul %0, %1, %cst {dimension_numbers = #tpu.dot_dimension_numbers<[1], [0], [0], [1], [0, 0, 1, 1], [], []>} : vector<2x12544xbf16>, vector<12544x128xbf16>, vector<2x128xf32> -> vector<2x128xf32>
    %c0_3 = arith.constant 0 : index
    %c0_4 = arith.constant 0 : index
    %3 = vector.load %arg3[%c0_3, %c0_4] : memref<1x128xf32, #tpu.memory_space<vmem>>, vector<1x128xf32>
    %4 = vector.broadcast %3 : vector<1x128xf32> to vector<2x128xf32>
    %5 = arith.addf %2, %4 : vector<2x128xf32>
    %cst_5 = arith.constant 0.000000e+00 : f32
    %6 = vector.broadcast %cst_5 : f32 to vector<2x128xf32>
    %7 = arith.maximumf %5, %6 : vector<2x128xf32>
    %8 = arith.truncf %7 : vector<2x128xf32> to vector<2x128xbf16>
    %c0_6 = arith.constant 0 : index
    %c0_7 = arith.constant 0 : index
    %9 = vector.load %arg4[%c0_6, %c0_7] : memref<128x10xbf16, #tpu.memory_space<vmem>>, vector<128x10xbf16>
    %cst_8 = arith.constant dense<0.000000e+00> : vector<2x10xf32>
    %10 = tpu.matmul %8, %9, %cst_8 {dimension_numbers = #tpu.dot_dimension_numbers<[1], [0], [0], [1], [0, 0, 1, 1], [], []>} : vector<2x128xbf16>, vector<128x10xbf16>, vector<2x10xf32> -> vector<2x10xf32>
    %c0_9 = arith.constant 0 : index
    %c0_10 = arith.constant 0 : index
    %11 = vector.load %arg5[%c0_9, %c0_10] : memref<1x10xf32, #tpu.memory_space<vmem>>, vector<1x10xf32>
    %12 = vector.broadcast %11 : vector<1x10xf32> to vector<2x10xf32>
    %13 = arith.addf %10, %12 : vector<2x10xf32>
    %c0_11 = arith.constant 0 : index
    %c0_12 = arith.constant 0 : index
    %14 = vector.load %arg6[%c0_11, %c0_12] : memref<2x10xf32, #tpu.memory_space<vmem>>, vector<2x10xf32>
    tpu.vector_store %arg6[%c0_11, %c0_12], %13 {strides = array<i32>} : memref<2x10xf32, #tpu.memory_space<vmem>>, vector<2x10xf32>,
    return
  }
  func.func @transform_0(%arg0: i32) -> (i32, i32) {
    %c0_i32 = arith.constant 0 : i32
    %c0_i32_0 = arith.constant 0 : i32
    return %arg0, %c0_i32 : i32, i32
  }
  func.func @transform_1(%arg0: i32) -> (i32, i32) {
    %c0_i32 = arith.constant 0 : i32
    %c0_i32_0 = arith.constant 0 : i32
    %c0_i32_1 = arith.constant 0 : i32
    return %c0_i32, %c0_i32_0 : i32, i32
  }
  func.func @transform_2(%arg0: i32) -> (i32, i32) {
    %c0_i32 = arith.constant 0 : i32
    %c0_i32_0 = arith.constant 0 : i32
    %c0_i32_1 = arith.constant 0 : i32
    return %c0_i32, %c0_i32_0 : i32, i32
  }
  func.func @transform_3(%arg0: i32) -> (i32, i32) {
    %c0_i32 = arith.constant 0 : i32
    %c0_i32_0 = arith.constant 0 : i32
    %c0_i32_1 = arith.constant 0 : i32
    return %c0_i32, %c0_i32_0 : i32, i32
  }
  func.func @transform_4(%arg0: i32) -> (i32, i32) {
    %c0_i32 = arith.constant 0 : i32
    %c0_i32_0 = arith.constant 0 : i32
    %c0_i32_1 = arith.constant 0 : i32
    return %c0_i32, %c0_i32_0 : i32, i32
  }
  func.func @transform_5(%arg0: i32) -> (i32, i32) {
    %c0_i32 = arith.constant 0 : i32
    %c0_i32_0 = arith.constant 0 : i32
    return %arg0, %c0_i32 : i32, i32
  }
}

</mosaic_0001>

<bundles_post_ra>
// kernel: convnet_forward.3
= control target key start
LH: loop header
LB: loop body
LE: loop exit
PB: predicated region body
PF: predicated region fallthrough
CT: control target
= control target key end

     0   :  { %v1627_v27 = vlaneseq  ;;  %v11858_v35 = vmov 1966171168   ;;  %s14509_s0 = inlined_call_operand.vmem [shape: bf16[2,12544], index: 0, kind: input, shape index: {}]   ;;  %s14510_s1 = inlined_call_operand.vmem [shape: bf16[12544,128], index: 1, kind: input, shape index: {}]   ;;  %s14511_s2 = inlined_call_operand.vmem [shape: f32[1,128], index: 2, kind: input, shape index: {}]   ;;  %s14512_s3 = inlined_call_operand.vmem [shape: bf16[128,10], index: 3, kind: input, shape index: {}]   ;;  %s14513_s4 = inlined_call_operand.vmem [shape: f32[1,10], index: 4, kind: input, shape index: {}]   ;;  %s14514_s5 = inlined_call_operand.hbm [shape: f32[2,10], index: 5, kind: output, shape index: {}]  }
   0x1   :  { %v11030_v0 = vld [vmem:[%s14510_s1 + $0x40] sm:$0xff]   ;;  %v11034_v4 = vld [vmem:[%s14510_s1 + $0x48] sm:$0xff]   ;;  %v11038_v8 = vld [vmem:[%s14510_s1 + $0x50] sm:$0xff]   ;;  %v1625_v36 = vunpack.c.l.s4 %v11858_v35 }
   0x2   :  { %v11031_v1 = vld [vmem:[%s14510_s1] sm:$0xff]   ;;  %9919 = vmatprep.subr.bf16.mxu0 %v11030_v0  ;;  %v11035_v5 = vld [vmem:[%s14510_s1 + $0x8] sm:$0xff]   ;;  %v11039_v9 = vld [vmem:[%s14510_s1 + $0x10] sm:$0xff]   ;;  %v1628_v32 = vshrl.u32 %v1627_v27, 7 }
   0x3   :  { %v11032_v2 = vld [vmem:[%s14510_s1 + $0xc0] sm:$0xff]   ;;  %9920 = vmatpush3.bf16.msra.mxu0 %v11031_v1  ;;  %v11036_v6 = vld [vmem:[%s14510_s1 + $0xc8] sm:$0xff]   ;;  %v11040_v10 = vld [vmem:[%s14510_s1 + $0xd0] sm:$0xff]   ;;  %v1626_v39 = vunpack.c.0.s8 %v1625_v36 }
   0x4   :  { %v11033_v3 = vld [vmem:[%s14510_s1 + $0x80] sm:$0xff]   ;;  %9941 = vmatprep.subr.bf16.mxu1 %v11032_v2  ;;  %9921 = vmatprep.subr.bf16.mxu0 %v11034_v4  ;;  %v11037_v7 = vld [vmem:[%s14510_s1 + $0x88] sm:$0xff]   ;;  %v11041_v11 = vld [vmem:[%s14510_s1 + $0x90] sm:$0xff]  }
   0x5   :  { %9942 = vmatpush3.bf16.msra.mxu1 %v11033_v3  ;;  %v11042_v12 = vld [vmem:[%s14510_s1 + $0x58] sm:$0xff]   ;;  %v11046_v16 = vld [vmem:[%s14510_s1 + $0x60] sm:$0xff]   ;;  %v11050_v20 = vld [vmem:[%s14510_s1 + $0x68] sm:$0xff]   ;;  %v11997_v41 = vsub.s32 %v1626_v39, %v1628_v32 }
   0x6   :  { %9943 = vmatprep.subr.bf16.mxu1 %v11036_v6  ;;  %v11043_v13 = vld [vmem:[%s14510_s1 + $0x18] sm:$0xff]   ;;  %v11047_v17 = vld [vmem:[%s14510_s1 + $0x20] sm:$0xff]   ;;  %v11051_v21 = vld [vmem:[%s14510_s1 + $0x28] sm:$0xff]  }
   0x7   :  { %9922 = vmatpush3.bf16.msra.mxu0 %v11035_v5  ;;  %v11044_v14 = vld [vmem:[%s14510_s1 + $0xd8] sm:$0xff]   ;;  %v11048_v18 = vld [vmem:[%s14510_s1 + $0xe0] sm:$0xff]   ;;  %v11052_v22 = vld [vmem:[%s14510_s1 + $0xe8] sm:$0xff]  }
   0x8   :  { %9923 = vmatprep.subr.bf16.mxu0 %v11038_v8  ;;  %v11045_v15 = vld [vmem:[%s14510_s1 + $0x98] sm:$0xff]   ;;  %v11049_v19 = vld [vmem:[%s14510_s1 + $0xa0] sm:$0xff]   ;;  %v11053_v23 = vld [vmem:[%s14510_s1 + $0xa8] sm:$0xff]  }
   0x9   :  { %9944 = vmatpush3.bf16.msra.mxu1 %v11037_v7  ;;  %v11054_v24 = vld [vmem:[%s14510_s1 + $0x70] sm:$0xff]   ;;  %v11058_v29 = vld [vmem:[%s14510_s1 + $0x78] sm:$0xff]   ;;  %v22_v33 = vld [vmem:[%s14509_s0] sm:$0xff] }
   0xa   :  { %9945 = vmatprep.subr.bf16.mxu1 %v11040_v10  ;;  %v11055_v25 = vld [vmem:[%s14510_s1 + $0x30] sm:$0xff]   ;;  %v11059_v30 = vld [vmem:[%s14510_s1 + $0x38] sm:$0xff]   ;;  %v11063_v37 = vld [vmem:[%s14510_s1 + $0x140] sm:$0xff]   ;;  %v1623_v38 = vcombine.high %v22_v33, %v22_v33  ;;  %v1630_v42 = vrot.slane %v22_v33, %v11997_v41 }
   0xb   :  { %9924 = vmatpush3.bf16.msra.mxu0 %v11039_v9  ;;  %v11056_v26 = vld [vmem:[%s14510_s1 + $0xf0] sm:$0xff]   ;;  %v11060_v31 = vld [vmem:[%s14510_s1 + $0xf8] sm:$0xff]   ;;  %v11065_v40 = vld [vmem:[%s14510_s1 + $0x1c0] sm:$0xff]  }
   0xc   :  { %9925 = vmatprep.subr.bf16.mxu0 %v11042_v12  ;;  %v11057_v28 = vld [vmem:[%s14510_s1 + $0xb0] sm:$0xff]   ;;  %v11062_v34 = vld [vmem:[%s14510_s1 + $0xb8] sm:$0xff]   ;;  %v12001_v43 = vrot.slane %v1623_v38, %v11997_v41  ;;  %v1638_v44 = vcombine.high %v1630_v42, %v1630_v42  ;;  %v1646_v45 = vrot.slane %v1630_v42, %v11997_v41  ;;  %v11064_v47 = vld [vmem:[%s14510_s1 + $0x100] sm:$0xff]  }
   0xd   :  { %9946 = vmatpush3.bf16.msra.mxu1 %v11041_v11  ;;  %v11066_v49 = vld [vmem:[%s14510_s1 + $0x180] sm:$0xff]   ;;  %v11067_v52 = vld [vmem:[%s14510_s1 + $0x148] sm:$0xff]   ;;  %v11071_v58 = vld [vmem:[%s14510_s1 + $0x150] sm:$0xff]  }
   0xe   :  { %9947 = vmatprep.subr.bf16.mxu1 %v11044_v14  ;;  %v1639_v46 = vcombine.high %v12001_v43, %v12001_v43  ;;  %v1660_v48 = vrot.slane %v1638_v44, %v11997_v41  ;;  %v1668_v51 = vcombine.high %v1646_v45, %v1646_v45  ;;  %v11068_v54 = vld [vmem:[%s14510_s1 + $0x108] sm:$0xff]   ;;  %v11072_v59 = vld [vmem:[%s14510_s1 + $0x110] sm:$0xff]   ;;  %v11075_v62 = vld [vmem:[%s14510_s1 + $0x158] sm:$0xff]  }
   0xf   :  { %9926 = vmatpush3.bf16.msra.mxu0 %v11043_v13  ;;  %v11069_v55 = vld [vmem:[%s14510_s1 + $0x1c8] sm:$0xff]   ;;  %v11073_v60 = vld [vmem:[%s14510_s1 + $0x1d0] sm:$0xff]   ;;  %v11076_v63 = vld [vmem:[%s14510_s1 + $0x118] sm:$0xff]  }
  0x10   :  { %9927 = vmatprep.subr.bf16.mxu0 %v11046_v16  ;;  %v1667_v50 = vrot.slane %v1639_v46, %v11997_v41  ;;  %7067 = vmatprep.mubr.bf16.mxu0 %v1660_v48  ;;  %v1670_v53 = vcombine.high %v1660_v48, %v1660_v48  ;;  %v11070_v57 = vld [vmem:[%s14510_s1 + $0x188] sm:$0xff]   ;;  %v11074_v61 = vld [vmem:[%s14510_s1 + $0x190] sm:$0xff]   ;;  %v11077_v0 = vld [vmem:[%s14510_s1 + $0x1d8] sm:$0xff]  }
  0x11   :  { %9948 = vmatpush3.bf16.msra.mxu1 %v11045_v15  ;;  %v11078_v1 = vld [vmem:[%s14510_s1 + $0x198] sm:$0xff]   ;;  %v11079_v2 = vld [vmem:[%s14510_s1 + $0x160] sm:$0xff]   ;;  %v11083_v6 = vld [vmem:[%s14510_s1 + $0x168] sm:$0xff]  }
  0x12   :  { %9949 = vmatprep.subr.bf16.mxu1 %v11048_v18  ;;  %v1671_v56 = vcombine.high %v1667_v50, %v1667_v50  ;;  %7107 = vmatprep.mubr.bf16.mxu1 %v1670_v53  ;;  %v11080_v3 = vld [vmem:[%s14510_s1 + $0x120] sm:$0xff]   ;;  %v11084_v7 = vld [vmem:[%s14510_s1 + $0x128] sm:$0xff]   ;;  %v11087_v10 = vld [vmem:[%s14510_s1 + $0x170] sm:$0xff]   ;;  %v1653_v18 = vrot.slane %v12001_v43, %v11997_v41 }
  0x13   :  { %9928 = vmatpush3.bf16.msra.mxu0 %v11047_v17  ;;  %v11081_v4 = vld [vmem:[%s14510_s1 + $0x1e0] sm:$0xff]   ;;  %v11085_v8 = vld [vmem:[%s14510_s1 + $0x1e8] sm:$0xff]   ;;  %v11088_v11 = vld [vmem:[%s14510_s1 + $0x130] sm:$0xff]  }
  0x14   :  { %9929 = vmatprep.subr.bf16.mxu0 %v11050_v20  ;;  %v11082_v5 = vld [vmem:[%s14510_s1 + $0x1a0] sm:$0xff]   ;;  %v11086_v9 = vld [vmem:[%s14510_s1 + $0x1a8] sm:$0xff]   ;;  %v11089_v12 = vld [vmem:[%s14510_s1 + $0x1f0] sm:$0xff]  }
  0x15   :  { %9950 = vmatpush3.bf16.msra.mxu1 %v11049_v19  ;;  %v11090_v13 = vld [vmem:[%s14510_s1 + $0x1b0] sm:$0xff]   ;;  %v11091_v14 = vld [vmem:[%s14510_s1 + $0x178] sm:$0xff]   ;;  %v11095_v19 = vld [vmem:[%s14510_s1 + $0x240] sm:$0xff]  }
  0x16   :  { %9951 = vmatprep.subr.bf16.mxu1 %v11052_v22  ;;  %v11092_v15 = vld [vmem:[%s14510_s1 + $0x138] sm:$0xff]   ;;  %v11096_v20 = vld [vmem:[%s14510_s1 + $0x200] sm:$0xff]   ;;  %v11102_v27 = vld [vmem:[%s14510_s1 + $0x288] sm:$0xff]  }
  0x17   :  { %9930 = vmatpush3.bf16.msra.mxu0 %v11051_v21  ;;  %v11093_v16 = vld [vmem:[%s14510_s1 + $0x1f8] sm:$0xff]   ;;  %v11097_v21 = vld [vmem:[%s14510_s1 + $0x2c0] sm:$0xff]   ;;  %v11116_v42 = vld [vmem:[%s14510_s1 + $0x228] sm:$0xff]  }
  0x18   :  { %9931 = vmatprep.subr.bf16.mxu0 %v11054_v24  ;;  %v11094_v17 = vld [vmem:[%s14510_s1 + $0x1b8] sm:$0xff]   ;;  %v11098_v22 = vld [vmem:[%s14510_s1 + $0x280] sm:$0xff]   ;;  %v11099_v24 = vld [vmem:[%s14510_s1 + $0x248] sm:$0xff]  }
  0x19   :  { %9952 = vmatpush3.bf16.msra.mxu1 %v11053_v23  ;;  %v1669_v23 = vcombine.high %v1653_v18, %v1653_v18  ;;  %v11107_v32 = vld [vmem:[%s14510_s1 + $0x258] sm:$0xff]   ;;  %v11111_v36 = vld [vmem:[%s14510_s1 + $0x260] sm:$0xff]   ;;  %v11117_v43 = vld [vmem:[%s14510_s1 + $0x2e8] sm:$0xff]  }
  0x1a   :  { %9953 = vmatprep.subr.bf16.mxu1 %v11056_v26  ;;  %v11101_v26 = vld [vmem:[%s14510_s1 + $0x2c8] sm:$0xff]   ;;  %v11108_v33 = vld [vmem:[%s14510_s1 + $0x218] sm:$0xff]   ;;  %v11113_v38 = vld [vmem:[%s14510_s1 + $0x2e0] sm:$0xff]  }
  0x1b   :  { %9932 = vmatpush3.bf16.msra.mxu0 %v11055_v25  ;;  %v11100_v25 = vld [vmem:[%s14510_s1 + $0x208] sm:$0xff]   ;;  %v11110_v35 = vld [vmem:[%s14510_s1 + $0x298] sm:$0xff]   ;;  %v11114_v39 = vld [vmem:[%s14510_s1 + $0x2a0] sm:$0xff]  }
  0x1c   :  { %9933 = vmatprep.subr.bf16.mxu0 %v11058_v29  ;;  %v11104_v29 = vld [vmem:[%s14510_s1 + $0x210] sm:$0xff]   ;;  %v11118_v44 = vld [vmem:[%s14510_s1 + $0x2a8] sm:$0xff]  }
  0x1d   :  { %9954 = vmatpush3.bf16.msra.mxu1 %v11057_v28  ;;  %v11103_v28 = vld [vmem:[%s14510_s1 + $0x250] sm:$0xff]   ;;  %v23_v46 = vld [vmem:[%s14509_s0 + $0x8] sm:$0xff] }
  0x1e   :  { %9955 = vmatprep.subr.bf16.mxu1 %v11060_v31  ;;  %v11106_v31 = vld [vmem:[%s14510_s1 + $0x290] sm:$0xff]   ;;  %v1679_v48 = vrot.slane %v23_v46, %v11997_v41 }
  0x1f   :  { %9934 = vmatpush3.bf16.msra.mxu0 %v11059_v30  ;;  %v11105_v30 = vld [vmem:[%s14510_s1 + $0x2d0] sm:$0xff]  }
  0x20   :  { %9963 = vmatprep.subr.bf16.mxu0 %v11063_v37  ;;  %v11112_v37 = vld [vmem:[%s14510_s1 + $0x220] sm:$0xff]  }
  0x21   :  { %9956 = vmatpush3.bf16.msra.mxu1 %v11062_v34  ;;  %v11109_v34 = vld [vmem:[%s14510_s1 + $0x2d8] sm:$0xff]  }
  0x22   :  { %9985 = vmatprep.subr.bf16.mxu1 %v11065_v40  ;;  %7068 = vmatmul.mubr.bf16.vlgmr.msra.gmra.mrb[0].mxu0 %v1646_v45  ;;  %v11115_v40 = vld [vmem:[%s14510_s1 + $0x268] sm:$0xff]   ;;  %v11119_v45 = vld [vmem:[%s14510_s1 + $0x270] sm:$0xff]  }
  0x23   :  { %9964 = vmatpush3.bf16.msra.mxu0 %v11064_v47  ;;  %7147 = vmatprep.mubr.bf16.mxu0 %v1667_v50  ;;  %v11120_v47 = vld [vmem:[%s14510_s1 + $0x230] sm:$0xff]  }
  0x24   :  { %7108 = vmatmul.mubr.bf16.vlgmr.msra.gmra.mrb[0].mxu1 %v1668_v51  ;;  %9965 = vmatprep.subr.bf16.mxu0 %v11067_v52  ;;  %v11121_v50 = vld [vmem:[%s14510_s1 + $0x2f0] sm:$0xff]   ;;  %v1687_v52 = vcombine.high %v1679_v48, %v1679_v48 }
  0x25   :  { %9986 = vmatpush3.bf16.msra.mxu1 %v11066_v49  ;;  %7187 = vmatprep.mubr.bf16.mxu1 %v1671_v56  ;;  %v1672_v49 = vcombine.high %v23_v46, %v23_v46  ;;  %v11122_v51 = vld [vmem:[%s14510_s1 + $0x2b0] sm:$0xff]  }
  0x26   :  { %9987 = vmatprep.subr.bf16.mxu1 %v11069_v55  ;;  %v11124_v55 = vld [vmem:[%s14510_s1 + $0x238] sm:$0xff]   ;;  %v1709_v56 = vrot.slane %v1687_v52, %v11997_v41  ;;  %v11170_v46 = vld [vmem:[%s14510_s1 + $0x4d0] sm:$0xff]   ;;  %v11176_v52 = vld [vmem:[%s14510_s1 + $0x460] sm:$0xff]  }
  0x27   :  { %9966 = vmatpush3.bf16.msra.mxu0 %v11068_v54  ;;  %v12189_v53 = vrot.slane %v1672_v49, %v11997_v41  ;;  %v11123_v54 = vld [vmem:[%s14510_s1 + $0x278] sm:$0xff]  }
  0x28   :  { %9967 = vmatprep.subr.bf16.mxu0 %v11071_v58  ;;  %v11125_v58 = vld [vmem:[%s14510_s1 + $0x2f8] sm:$0xff]  }
  0x29   :  { %9988 = vmatpush3.bf16.msra.mxu1 %v11070_v57  ;;  %v1688_v57 = vcombine.high %v12189_v53, %v12189_v53  ;;  %v11173_v49 = vld [vmem:[%s14510_s1 + $0x418] sm:$0xff]  }
  0x2a   :  { %9989 = vmatprep.subr.bf16.mxu1 %v11073_v60  ;;  %v1719_v60 = vcombine.high %v1709_v56, %v1709_v56 }
  0x2b   :  { %9968 = vmatpush3.bf16.msra.mxu0 %v11072_v59  ;;  %v11126_v59 = vld [vmem:[%s14510_s1 + $0x2b8] sm:$0xff]  }
  0x2c   :  { %9969 = vmatprep.subr.bf16.mxu0 %v11075_v62  ;;  %v11127_v62 = vld [vmem:[%s14510_s1 + $0x340] sm:$0xff]  }
  0x2d   :  { %9990 = vmatpush3.bf16.msra.mxu1 %v11074_v61  ;;  %v1695_v61 = vrot.slane %v1679_v48, %v11997_v41  ;;  %v11172_v48 = vld [vmem:[%s14510_s1 + $0x458] sm:$0xff]  }
  0x2e   :  { %9991 = vmatprep.subr.bf16.mxu1 %v11077_v0  ;;  %v1716_v0 = vrot.slane %v1688_v57, %v11997_v41  ;;  %v11181_v57 = vld [vmem:[%s14510_s1 + $0x428] sm:$0xff]  }
  0x2f   :  { %9970 = vmatpush3.bf16.msra.mxu0 %v11076_v63  ;;  %v11128_v63 = vld [vmem:[%s14510_s1 + $0x300] sm:$0xff]  }
  0x30   :  { %9971 = vmatprep.subr.bf16.mxu0 %v11079_v2  ;;  %v11130_v2 = vld [vmem:[%s14510_s1 + $0x380] sm:$0xff]  }
  0x31   :  { %9992 = vmatpush3.bf16.msra.mxu1 %v11078_v1  ;;  %v11129_v1 = vld [vmem:[%s14510_s1 + $0x3c0] sm:$0xff]  }
  0x32   :  { %9993 = vmatprep.subr.bf16.mxu1 %v11081_v4  ;;  %v11131_v4 = vld [vmem:[%s14510_s1 + $0x348] sm:$0xff]  }
  0x33   :  { %9972 = vmatpush3.bf16.msra.mxu0 %v11080_v3  ;;  %v1717_v3 = vcombine.high %v1695_v61, %v1695_v61 }
  0x34   :  { %9973 = vmatprep.subr.bf16.mxu0 %v11083_v6  ;;  %v1720_v6 = vcombine.high %v1716_v0, %v1716_v0 }
  0x35   :  { %9994 = vmatpush3.bf16.msra.mxu1 %v11082_v5  ;;  %v11132_v5 = vld [vmem:[%s14510_s1 + $0x308] sm:$0xff]  }
  0x36   :  { %9995 = vmatprep.subr.bf16.mxu1 %v11085_v8  ;;  %v11134_v8 = vld [vmem:[%s14510_s1 + $0x388] sm:$0xff]  }
  0x37   :  { %9974 = vmatpush3.bf16.msra.mxu0 %v11084_v7  ;;  %v11133_v7 = vld [vmem:[%s14510_s1 + $0x3c8] sm:$0xff]  }
  0x38   :  { %9975 = vmatprep.subr.bf16.mxu0 %v11087_v10  ;;  %v11136_v10 = vld [vmem:[%s14510_s1 + $0x310] sm:$0xff]  }
  0x39   :  { %9996 = vmatpush3.bf16.msra.mxu1 %v11086_v9  ;;  %v11135_v9 = vld [vmem:[%s14510_s1 + $0x350] sm:$0xff]  }
  0x3a   :  { %9997 = vmatprep.subr.bf16.mxu1 %v11089_v12  ;;  %v11138_v12 = vld [vmem:[%s14510_s1 + $0x390] sm:$0xff]  }
  0x3b   :  { %9976 = vmatpush3.bf16.msra.mxu0 %v11088_v11  ;;  %v11137_v11 = vld [vmem:[%s14510_s1 + $0x3d0] sm:$0xff]  }
  0x3c   :  { %9977 = vmatprep.subr.bf16.mxu0 %v11091_v14  ;;  %v11140_v14 = vld [vmem:[%s14510_s1 + $0x318] sm:$0xff]  }
  0x3d   :  { %9998 = vmatpush3.bf16.msra.mxu1 %v11090_v13  ;;  %v11139_v13 = vld [vmem:[%s14510_s1 + $0x358] sm:$0xff]  }
  0x3e   :  { %9999 = vmatprep.subr.bf16.mxu1 %v11093_v16  ;;  %v11142_v16 = vld [vmem:[%s14510_s1 + $0x398] sm:$0xff]  }
  0x3f   :  { %9978 = vmatpush3.bf16.msra.mxu0 %v11092_v15  ;;  %v11141_v15 = vld [vmem:[%s14510_s1 + $0x3d8] sm:$0xff]  }
  0x40   :  { %10007 = vmatprep.subr.bf16.mxu0 %v11095_v19  ;;  %v11145_v19 = vld [vmem:[%s14510_s1 + $0x3e0] sm:$0xff]  }
  0x41   :  { %10000 = vmatpush3.bf16.msra.mxu1 %v11094_v17  ;;  %v11143_v17 = vld [vmem:[%s14510_s1 + $0x360] sm:$0xff]  }
  0x42   :  { %7148 = vmatmul.mubr.bf16.vlgmr.msra.gmra.mrb[4].mxu0 %v1653_v18  ;;  %10029 = vmatprep.subr.bf16.mxu1 %v11097_v21  ;;  %v11144_v18 = vld [vmem:[%s14510_s1 + $0x320] sm:$0xff]   ;;  %v11147_v21 = vld [vmem:[%s14510_s1 + $0x368] sm:$0xff]  }
  0x43   :  { %10008 = vmatpush3.bf16.msra.mxu0 %v11096_v20  ;;  %7227 = vmatprep.mubr.bf16.mxu0 %v1709_v56  ;;  %v11146_v20 = vld [vmem:[%s14510_s1 + $0x3a0] sm:$0xff]   ;;  %v11180_v56 = vld [vmem:[%s14510_s1 + $0x468] sm:$0xff]  }
  0x44   :  { %7188 = vmatmul.mubr.bf16.vlgmr.msra.gmra.mrb[4].mxu1 %v1669_v23  ;;  %10009 = vmatprep.subr.bf16.mxu0 %v11099_v24  ;;  %v11149_v23 = vld [vmem:[%s14510_s1 + $0x3e8] sm:$0xff]  }
  0x45   :  { %10030 = vmatpush3.bf16.msra.mxu1 %v11098_v22  ;;  %7267 = vmatprep.mubr.bf16.mxu1 %v1719_v60  ;;  %v11148_v22 = vld [vmem:[%s14510_s1 + $0x328] sm:$0xff]   ;;  %v11184_v60 = vld [vmem:[%s14510_s1 + $0x470] sm:$0xff]  }
  0x46   :  { %10031 = vmatprep.subr.bf16.mxu1 %v11101_v26  ;;  %v11150_v24 = vld [vmem:[%s14510_s1 + $0x3a8] sm:$0xff]   ;;  %v11152_v26 = vld [vmem:[%s14510_s1 + $0x330] sm:$0xff]  }
  0x47   :  { %10010 = vmatpush3.bf16.msra.mxu0 %v11100_v25  ;;  %v11151_v25 = vld [vmem:[%s14510_s1 + $0x370] sm:$0xff]  }
  0x48   :  { %10011 = vmatprep.subr.bf16.mxu0 %v11103_v28  ;;  %v11154_v28 = vld [vmem:[%s14510_s1 + $0x3b0] sm:$0xff]  }
  0x49   :  { %10032 = vmatpush3.bf16.msra.mxu1 %v11102_v27  ;;  %v11153_v27 = vld [vmem:[%s14510_s1 + $0x3f0] sm:$0xff]  }
  0x4a   :  { %10033 = vmatprep.subr.bf16.mxu1 %v11105_v30  ;;  %v11156_v30 = vld [vmem:[%s14510_s1 + $0x338] sm:$0xff]  }
  0x4b   :  { %10012 = vmatpush3.bf16.msra.mxu0 %v11104_v29  ;;  %v11155_v29 = vld [vmem:[%s14510_s1 + $0x378] sm:$0xff]  }
  0x4c   :  { %10013 = vmatprep.subr.bf16.mxu0 %v11107_v32  ;;  %v11159_v32 = vld [vmem:[%s14510_s1 + $0x3b8] sm:$0xff]  }
  0x4d   :  { %10034 = vmatpush3.bf16.msra.mxu1 %v11106_v31  ;;  %v11157_v31 = vld [vmem:[%s14510_s1 + $0x3f8] sm:$0xff]  }
  0x4e   :  { %10035 = vmatprep.subr.bf16.mxu1 %v11109_v34  ;;  %v11160_v34 = vld [vmem:[%s14510_s1 + $0x440] sm:$0xff]  }
  0x4f   :  { %10014 = vmatpush3.bf16.msra.mxu0 %v11108_v33  ;;  %v1702_v33 = vrot.slane %v12189_v53, %v11997_v41  ;;  %v11177_v53 = vld [vmem:[%s14510_s1 + $0x420] sm:$0xff]  }
  0x50   :  { %10015 = vmatprep.subr.bf16.mxu0 %v11111_v36  ;;  %v11162_v36 = vld [vmem:[%s14510_s1 + $0x4c0] sm:$0xff]  }
  0x51   :  { %10036 = vmatpush3.bf16.msra.mxu1 %v11110_v35  ;;  %v11161_v35 = vld [vmem:[%s14510_s1 + $0x400] sm:$0xff]  }
  0x52   :  { %10037 = vmatprep.subr.bf16.mxu1 %v11113_v38  ;;  %v1718_v38 = vcombine.high %v1702_v33, %v1702_v33 }
  0x53   :  { %10016 = vmatpush3.bf16.msra.mxu0 %v11112_v37  ;;  %v11163_v37 = vld [vmem:[%s14510_s1 + $0x480] sm:$0xff]  }
  0x54   :  { %10017 = vmatprep.subr.bf16.mxu0 %v11115_v40  ;;  %v11165_v40 = vld [vmem:[%s14510_s1 + $0x408] sm:$0xff]  }
  0x55   :  { %10038 = vmatpush3.bf16.msra.mxu1 %v11114_v39  ;;  %v11164_v39 = vld [vmem:[%s14510_s1 + $0x448] sm:$0xff]  }
  0x56   :  { %10039 = vmatprep.subr.bf16.mxu1 %v11117_v43  ;;  %v11167_v43 = vld [vmem:[%s14510_s1 + $0x488] sm:$0xff]  }
  0x57   :  { %10018 = vmatpush3.bf16.msra.mxu0 %v11116_v42  ;;  %v11166_v42 = vld [vmem:[%s14510_s1 + $0x4c8] sm:$0xff]  }
  0x58   :  { %10019 = vmatprep.subr.bf16.mxu0 %v11119_v45  ;;  %v11169_v45 = vld [vmem:[%s14510_s1 + $0x410] sm:$0xff]  }
  0x59   :  { %10040 = vmatpush3.bf16.msra.mxu1 %v11118_v44  ;;  %v11168_v44 = vld [vmem:[%s14510_s1 + $0x450] sm:$0xff]  }
  0x5a   :  { %10041 = vmatprep.subr.bf16.mxu1 %v11121_v50  ;;  %v11174_v50 = vld [vmem:[%s14510_s1 + $0x4d8] sm:$0xff]  }
  0x5b   :  { %10020 = vmatpush3.bf16.msra.mxu0 %v11120_v47  ;;  %v11171_v47 = vld [vmem:[%s14510_s1 + $0x490] sm:$0xff]  }
  0x5c   :  { %10021 = vmatprep.subr.bf16.mxu0 %v11123_v54  ;;  %v11178_v54 = vld [vmem:[%s14510_s1 + $0x4e0] sm:$0xff]  }
  0x5d   :  { %10042 = vmatpush3.bf16.msra.mxu1 %v11122_v51  ;;  %v11175_v51 = vld [vmem:[%s14510_s1 + $0x498] sm:$0xff]  }
  0x5e   :  { %10043 = vmatprep.subr.bf16.mxu1 %v11125_v58  ;;  %v11182_v58 = vld [vmem:[%s14510_s1 + $0x4e8] sm:$0xff]  }
  0x5f   :  { %10022 = vmatpush3.bf16.msra.mxu0 %v11124_v55  ;;  %v11179_v55 = vld [vmem:[%s14510_s1 + $0x4a0] sm:$0xff]  }
  0x60   :  { %10051 = vmatprep.subr.bf16.mxu0 %v11127_v62  ;;  %v11185_v62 = vld [vmem:[%s14510_s1 + $0x430] sm:$0xff]  }
  0x61   :  { %10044 = vmatpush3.bf16.msra.mxu1 %v11126_v59  ;;  %v11183_v59 = vld [vmem:[%s14510_s1 + $0x4a8] sm:$0xff]  }
  0x62   :  { %7228 = vmatmul.mubr.bf16.vlgmr.msra.gmra.mrb[8].mxu0 %v1695_v61  ;;  %10073 = vmatprep.subr.bf16.mxu1 %v11129_v1  ;;  %v24_v61 = vld [vmem:[%s14509_s0 + $0x10] sm:$0xff] }
  0x63   :  { %10052 = vmatpush3.bf16.msra.mxu0 %v11128_v63  ;;  %7307 = vmatprep.mubr.bf16.mxu0 %v1716_v0  ;;  %v1728_v63 = vrot.slane %v24_v61, %v11997_v41  ;;  %v1721_v0 = vcombine.high %v24_v61, %v24_v61  ;;  %v11186_v1 = vld [vmem:[%s14510_s1 + $0x4f0] sm:$0xff]  }
  0x64   :  { %7268 = vmatmul.mubr.bf16.vlgmr.msra.gmra.mrb[8].mxu1 %v1717_v3  ;;  %10053 = vmatprep.subr.bf16.mxu0 %v11131_v4  ;;  %v11235_v61 = vld [vmem:[%s14510_s1 + $0x6d0] sm:$0xff]  }
  0x65   :  { %10074 = vmatpush3.bf16.msra.mxu1 %v11130_v2  ;;  %7347 = vmatprep.mubr.bf16.mxu1 %v1720_v6  ;;  %v11187_v2 = vld [vmem:[%s14510_s1 + $0x4b0] sm:$0xff]   ;;  %v1736_v3 = vcombine.high %v1728_v63, %v1728_v63  ;;  %v12395_v4 = vrot.slane %v1721_v0, %v11997_v41  ;;  %v11189_v6 = vld [vmem:[%s14510_s1 + $0x438] sm:$0xff]  }
  0x66   :  { %10075 = vmatprep.subr.bf16.mxu1 %v11133_v7  ;;  %v11238_v0 = vld [vmem:[%s14510_s1 + $0x618] sm:$0xff]  }
  0x67   :  { %10054 = vmatpush3.bf16.msra.mxu0 %v11132_v5  ;;  %v11188_v5 = vld [vmem:[%s14510_s1 + $0x478] sm:$0xff]   ;;  %v1758_v7 = vrot.slane %v1736_v3, %v11997_v41  ;;  %v11241_v3 = vld [vmem:[%s14510_s1 + $0x660] sm:$0xff]  }
  0x68   :  { %10055 = vmatprep.subr.bf16.mxu0 %v11135_v9  ;;  %v11190_v9 = vld [vmem:[%s14510_s1 + $0x4f8] sm:$0xff]  }
  0x69   :  { %10076 = vmatpush3.bf16.msra.mxu1 %v11134_v8  ;;  %v1737_v8 = vcombine.high %v12395_v4, %v12395_v4 }
  0x6a   :  { %10077 = vmatprep.subr.bf16.mxu1 %v11137_v11  ;;  %v1768_v11 = vcombine.high %v1758_v7, %v1758_v7 }
  0x6b   :  { %10056 = vmatpush3.bf16.msra.mxu0 %v11136_v10  ;;  %v11191_v10 = vld [vmem:[%s14510_s1 + $0x4b8] sm:$0xff]  }
  0x6c   :  { %10057 = vmatprep.subr.bf16.mxu0 %v11139_v13  ;;  %v11192_v13 = vld [vmem:[%s14510_s1 + $0x540] sm:$0xff]  }
  0x6d   :  { %10078 = vmatpush3.bf16.msra.mxu1 %v11138_v12  ;;  %v1744_v12 = vrot.slane %v1728_v63, %v11997_v41  ;;  %v11237_v63 = vld [vmem:[%s14510_s1 + $0x658] sm:$0xff]  }
  0x6e   :  { %10079 = vmatprep.subr.bf16.mxu1 %v11141_v15  ;;  %v1765_v15 = vrot.slane %v1737_v8, %v11997_v41  ;;  %v11246_v8 = vld [vmem:[%s14510_s1 + $0x628] sm:$0xff]  }
  0x6f   :  { %10058 = vmatpush3.bf16.msra.mxu0 %v11140_v14  ;;  %v11193_v14 = vld [vmem:[%s14510_s1 + $0x500] sm:$0xff]  }
  0x70   :  { %10059 = vmatprep.subr.bf16.mxu0 %v11143_v17  ;;  %v11195_v17 = vld [vmem:[%s14510_s1 + $0x580] sm:$0xff]  }
  0x71   :  { %10080 = vmatpush3.bf16.msra.mxu1 %v11142_v16  ;;  %v11194_v16 = vld [vmem:[%s14510_s1 + $0x5c0] sm:$0xff]  }
  0x72   :  { %10081 = vmatprep.subr.bf16.mxu1 %v11145_v19  ;;  %v11196_v19 = vld [vmem:[%s14510_s1 + $0x548] sm:$0xff]  }
  0x73   :  { %10060 = vmatpush3.bf16.msra.mxu0 %v11144_v18  ;;  %v1766_v18 = vcombine.high %v1744_v12, %v1744_v12 }
  0x74   :  { %10061 = vmatprep.subr.bf16.mxu0 %v11147_v21  ;;  %v1769_v21 = vcombine.high %v1765_v15, %v1765_v15 }
  0x75   :  { %10082 = vmatpush3.bf16.msra.mxu1 %v11146_v20  ;;  %v11197_v20 = vld [vmem:[%s14510_s1 + $0x508] sm:$0xff]  }
  0x76   :  { %10083 = vmatprep.subr.bf16.mxu1 %v11149_v23  ;;  %v11199_v23 = vld [vmem:[%s14510_s1 + $0x588] sm:$0xff]  }
  0x77   :  { %10062 = vmatpush3.bf16.msra.mxu0 %v11148_v22  ;;  %v11198_v22 = vld [vmem:[%s14510_s1 + $0x5c8] sm:$0xff]  }
  0x78   :  { %10063 = vmatprep.subr.bf16.mxu0 %v11151_v25  ;;  %v11201_v25 = vld [vmem:[%s14510_s1 + $0x510] sm:$0xff]  }
  0x79   :  { %10084 = vmatpush3.bf16.msra.mxu1 %v11150_v24  ;;  %v11200_v24 = vld [vmem:[%s14510_s1 + $0x550] sm:$0xff]  }
  0x7a   :  { %10085 = vmatprep.subr.bf16.mxu1 %v11153_v27  ;;  %v11203_v27 = vld [vmem:[%s14510_s1 + $0x590] sm:$0xff]  }
  0x7b   :  { %10064 = vmatpush3.bf16.msra.mxu0 %v11152_v26  ;;  %v11202_v26 = vld [vmem:[%s14510_s1 + $0x5d0] sm:$0xff]  }
  0x7c   :  { %10065 = vmatprep.subr.bf16.mxu0 %v11155_v29  ;;  %v11205_v29 = vld [vmem:[%s14510_s1 + $0x518] sm:$0xff]  }
  0x7d   :  { %10086 = vmatpush3.bf16.msra.mxu1 %v11154_v28  ;;  %v11204_v28 = vld [vmem:[%s14510_s1 + $0x558] sm:$0xff]  }
  0x7e   :  { %10087 = vmatprep.subr.bf16.mxu1 %v11157_v31  ;;  %v11207_v31 = vld [vmem:[%s14510_s1 + $0x598] sm:$0xff]  }
  0x7f   :  { %10066 = vmatpush3.bf16.msra.mxu0 %v11156_v30  ;;  %v11206_v30 = vld [vmem:[%s14510_s1 + $0x5d8] sm:$0xff]  }
  0x80   :  { %10095 = vmatprep.subr.bf16.mxu0 %v11160_v34  ;;  %v11210_v34 = vld [vmem:[%s14510_s1 + $0x5e0] sm:$0xff]  }
  0x81   :  { %10088 = vmatpush3.bf16.msra.mxu1 %v11159_v32  ;;  %v11208_v32 = vld [vmem:[%s14510_s1 + $0x560] sm:$0xff]  }
  0x82   :  { %7308 = vmatmul.mubr.bf16.vlgmr.msra.gmra.mrb[12].mxu0 %v1702_v33  ;;  %10117 = vmatprep.subr.bf16.mxu1 %v11162_v36  ;;  %v11209_v33 = vld [vmem:[%s14510_s1 + $0x520] sm:$0xff]   ;;  %v11212_v36 = vld [vmem:[%s14510_s1 + $0x568] sm:$0xff]  }
  0x83   :  { %10096 = vmatpush3.bf16.msra.mxu0 %v11161_v35  ;;  %7387 = vmatprep.mubr.bf16.mxu0 %v1758_v7  ;;  %v11211_v35 = vld [vmem:[%s14510_s1 + $0x5a0] sm:$0xff]   ;;  %v11245_v7 = vld [vmem:[%s14510_s1 + $0x668] sm:$0xff]  }
  0x84   :  { %7348 = vmatmul.mubr.bf16.vlgmr.msra.gmra.mrb[12].mxu1 %v1718_v38  ;;  %10097 = vmatprep.subr.bf16.mxu0 %v11164_v39  ;;  %v11214_v38 = vld [vmem:[%s14510_s1 + $0x5e8] sm:$0xff]  }
  0x85   :  { %10118 = vmatpush3.bf16.msra.mxu1 %v11163_v37  ;;  %7427 = vmatprep.mubr.bf16.mxu1 %v1768_v11  ;;  %v11213_v37 = vld [vmem:[%s14510_s1 + $0x528] sm:$0xff]   ;;  %v11249_v11 = vld [vmem:[%s14510_s1 + $0x670] sm:$0xff]  }
  0x86   :  { %10119 = vmatprep.subr.bf16.mxu1 %v11166_v42  ;;  %v11215_v39 = vld [vmem:[%s14510_s1 + $0x5a8] sm:$0xff]   ;;  %v11217_v42 = vld [vmem:[%s14510_s1 + $0x530] sm:$0xff]  }
  0x87   :  { %10098 = vmatpush3.bf16.msra.mxu0 %v11165_v40  ;;  %v11216_v40 = vld [vmem:[%s14510_s1 + $0x570] sm:$0xff]  }
  0x88   :  { %10099 = vmatprep.subr.bf16.mxu0 %v11168_v44  ;;  %v11219_v44 = vld [vmem:[%s14510_s1 + $0x5b0] sm:$0xff]  }
  0x89   :  { %10120 = vmatpush3.bf16.msra.mxu1 %v11167_v43  ;;  %v11218_v43 = vld [vmem:[%s14510_s1 + $0x5f0] sm:$0xff]  }
  0x8a   :  { %10121 = vmatprep.subr.bf16.mxu1 %v11170_v46  ;;  %v11221_v46 = vld [vmem:[%s14510_s1 + $0x538] sm:$0xff]  }
  0x8b   :  { %10100 = vmatpush3.bf16.msra.mxu0 %v11169_v45  ;;  %v11220_v45 = vld [vmem:[%s14510_s1 + $0x578] sm:$0xff]  }
  0x8c   :  { %10101 = vmatprep.subr.bf16.mxu0 %v11172_v48  ;;  %v11224_v48 = vld [vmem:[%s14510_s1 + $0x5b8] sm:$0xff]  }
  0x8d   :  { %10122 = vmatpush3.bf16.msra.mxu1 %v11171_v47  ;;  %v11222_v47 = vld [vmem:[%s14510_s1 + $0x5f8] sm:$0xff]  }
  0x8e   :  { %10123 = vmatprep.subr.bf16.mxu1 %v11174_v50  ;;  %v11225_v50 = vld [vmem:[%s14510_s1 + $0x640] sm:$0xff]  }
  0x8f   :  { %10102 = vmatpush3.bf16.msra.mxu0 %v11173_v49  ;;  %v1751_v49 = vrot.slane %v12395_v4, %v11997_v41  ;;  %v11242_v4 = vld [vmem:[%s14510_s1 + $0x620] sm:$0xff]  }
  0x90   :  { %10103 = vmatprep.subr.bf16.mxu0 %v11176_v52  ;;  %v11227_v52 = vld [vmem:[%s14510_s1 + $0x6c0] sm:$0xff]  }
  0x91   :  { %10124 = vmatpush3.bf16.msra.mxu1 %v11175_v51  ;;  %v11226_v51 = vld [vmem:[%s14510_s1 + $0x600] sm:$0xff]  }
  0x92   :  { %10125 = vmatprep.subr.bf16.mxu1 %v11178_v54  ;;  %v1767_v54 = vcombine.high %v1751_v49, %v1751_v49 }
  0x93   :  { %10104 = vmatpush3.bf16.msra.mxu0 %v11177_v53  ;;  %v11228_v53 = vld [vmem:[%s14510_s1 + $0x680] sm:$0xff]  }
  0x94   :  { %10105 = vmatprep.subr.bf16.mxu0 %v11180_v56  ;;  %v11230_v56 = vld [vmem:[%s14510_s1 + $0x608] sm:$0xff]  }
  0x95   :  { %10126 = vmatpush3.bf16.msra.mxu1 %v11179_v55  ;;  %v11229_v55 = vld [vmem:[%s14510_s1 + $0x648] sm:$0xff]  }
  0x96   :  { %10127 = vmatprep.subr.bf16.mxu1 %v11182_v58  ;;  %v11232_v58 = vld [vmem:[%s14510_s1 + $0x688] sm:$0xff]  }
  0x97   :  { %10106 = vmatpush3.bf16.msra.mxu0 %v11181_v57  ;;  %v11231_v57 = vld [vmem:[%s14510_s1 + $0x6c8] sm:$0xff]  }
  0x98   :  { %10107 = vmatprep.subr.bf16.mxu0 %v11184_v60  ;;  %v11234_v60 = vld [vmem:[%s14510_s1 + $0x610] sm:$0xff]  }
  0x99   :  { %10128 = vmatpush3.bf16.msra.mxu1 %v11183_v59  ;;  %v11233_v59 = vld [vmem:[%s14510_s1 + $0x650] sm:$0xff]  }
  0x9a   :  { %10129 = vmatprep.subr.bf16.mxu1 %v11186_v1  ;;  %v11239_v1 = vld [vmem:[%s14510_s1 + $0x6d8] sm:$0xff]  }
  0x9b   :  { %10108 = vmatpush3.bf16.msra.mxu0 %v11185_v62  ;;  %v11236_v62 = vld [vmem:[%s14510_s1 + $0x690] sm:$0xff]  }
  0x9c   :  { %10109 = vmatprep.subr.bf16.mxu0 %v11188_v5  ;;  %v11243_v5 = vld [vmem:[%s14510_s1 + $0x6e0] sm:$0xff]  }
  0x9d   :  { %10130 = vmatpush3.bf16.msra.mxu1 %v11187_v2  ;;  %v11240_v2 = vld [vmem:[%s14510_s1 + $0x698] sm:$0xff]  }
  0x9e   :  { %10131 = vmatprep.subr.bf16.mxu1 %v11190_v9  ;;  %v11247_v9 = vld [vmem:[%s14510_s1 + $0x6e8] sm:$0xff]  }
  0x9f   :  { %10110 = vmatpush3.bf16.msra.mxu0 %v11189_v6  ;;  %v11244_v6 = vld [vmem:[%s14510_s1 + $0x6a0] sm:$0xff]  }
  0xa0   :  { %10139 = vmatprep.subr.bf16.mxu0 %v11192_v13  ;;  %v11251_v13 = vld [vmem:[%s14510_s1 + $0x6f0] sm:$0xff]  }
  0xa1   :  { %10132 = vmatpush3.bf16.msra.mxu1 %v11191_v10  ;;  %v11248_v10 = vld [vmem:[%s14510_s1 + $0x6a8] sm:$0xff]  }
  0xa2   :  { %7388 = vmatmul.mubr.bf16.vlgmr.msra.gmra.mrb[16].mxu0 %v1744_v12  ;;  %10161 = vmatprep.subr.bf16.mxu1 %v11194_v16  ;;  %v25_v12 = vld [vmem:[%s14509_s0 + $0x18] sm:$0xff]  ;;  %v11250_v16 = vld [vmem:[%s14510_s1 + $0x630] sm:$0xff]  }
  0xa3   :  { %10140 = vmatpush3.bf16.msra.mxu0 %v11193_v14  ;;  %7467 = vmatprep.mubr.bf16.mxu0 %v1765_v15  ;;  %v1777_v14 = vrot.slane %v25_v12, %v11997_v41  ;;  %v1770_v15 = vcombine.high %v25_v12, %v25_v12  ;;  %v11289_v12 = vld [vmem:[%s14510_s1 + $0x7b8] sm:$0xff]  }
  0xa4   :  { %7428 = vmatmul.mubr.bf16.vlgmr.msra.gmra.mrb[16].mxu1 %v1766_v18  ;;  %10141 = vmatprep.subr.bf16.mxu0 %v11196_v19 }
  0xa5   :  { %10162 = vmatpush3.bf16.msra.mxu1 %v11195_v17  ;;  %7507 = vmatprep.mubr.bf16.mxu1 %v1769_v21  ;;  %v11253_v17 = vld [vmem:[%s14510_s1 + $0x678] sm:$0xff]   ;;  %v1785_v18 = vcombine.high %v1777_v14, %v1777_v14  ;;  %v12601_v19 = vrot.slane %v1770_v15, %v11997_v41  ;;  %v11291_v15 = vld [vmem:[%s14510_s1 + $0x800] sm:$0xff]  }
  0xa6   :  { %10163 = vmatprep.subr.bf16.mxu1 %v11198_v22  ;;  %v11255_v21 = vld [vmem:[%s14510_s1 + $0x6f8] sm:$0xff]  }
  0xa7   :  { %10142 = vmatpush3.bf16.msra.mxu0 %v11197_v20  ;;  %v11252_v20 = vld [vmem:[%s14510_s1 + $0x6b0] sm:$0xff]   ;;  %v1807_v22 = vrot.slane %v1785_v18, %v11997_v41 }
  0xa8   :  { %10143 = vmatprep.subr.bf16.mxu0 %v11200_v24  ;;  %v11254_v24 = vld [vmem:[%s14510_s1 + $0x638] sm:$0xff]  }
  0xa9   :  { %10164 = vmatpush3.bf16.msra.mxu1 %v11199_v23  ;;  %v1786_v23 = vcombine.high %v12601_v19, %v12601_v19 }
  0xaa   :  { %10165 = vmatprep.subr.bf16.mxu1 %v11202_v26  ;;  %v11257_v26 = vld [vmem:[%s14510_s1 + $0x740] sm:$0xff]  }
  0xab   :  { %10144 = vmatpush3.bf16.msra.mxu0 %v11201_v25  ;;  %v1793_v25 = vrot.slane %v1777_v14, %v11997_v41  ;;  %v11290_v14 = vld [vmem:[%s14510_s1 + $0x840] sm:$0xff]  }
  0xac   :  { %10145 = vmatprep.subr.bf16.mxu0 %v11204_v28  ;;  %v11256_v28 = vld [vmem:[%s14510_s1 + $0x6b8] sm:$0xff]  }
  0xad   :  { %10166 = vmatpush3.bf16.msra.mxu1 %v11203_v27  ;;  %v1817_v27 = vcombine.high %v1807_v22, %v1807_v22 }
  0xae   :  { %10167 = vmatprep.subr.bf16.mxu1 %v11206_v30  ;;  %v11259_v30 = vld [vmem:[%s14510_s1 + $0x7c0] sm:$0xff]  }
  0xaf   :  { %10146 = vmatpush3.bf16.msra.mxu0 %v11205_v29  ;;  %v1814_v29 = vrot.slane %v1786_v23, %v11997_v41  ;;  %v11298_v23 = vld [vmem:[%s14510_s1 + $0x850] sm:$0xff]  }
  0xb0   :  { %10147 = vmatprep.subr.bf16.mxu0 %v11208_v32  ;;  %v1815_v32 = vcombine.high %v1793_v25, %v1793_v25 }
  0xb1   :  { %10168 = vmatpush3.bf16.msra.mxu1 %v11207_v31  ;;  %v11258_v31 = vld [vmem:[%s14510_s1 + $0x700] sm:$0xff]  }
  0xb2   :  { %10169 = vmatprep.subr.bf16.mxu1 %v11210_v34  ;;  %v11260_v34 = vld [vmem:[%s14510_s1 + $0x780] sm:$0xff]  }
  0xb3   :  { %10148 = vmatpush3.bf16.msra.mxu0 %v11209_v33  ;;  %v11261_v33 = vld [vmem:[%s14510_s1 + $0x748] sm:$0xff]  }
  0xb4   :  { %10149 = vmatprep.subr.bf16.mxu0 %v11212_v36  ;;  %v11263_v36 = vld [vmem:[%s14510_s1 + $0x7c8] sm:$0xff]  }
  0xb5   :  { %10170 = vmatpush3.bf16.msra.mxu1 %v11211_v35  ;;  %v1818_v35 = vcombine.high %v1814_v29, %v1814_v29 }
  0xb6   :  { %10171 = vmatprep.subr.bf16.mxu1 %v11214_v38  ;;  %v11265_v38 = vld [vmem:[%s14510_s1 + $0x750] sm:$0xff]  }
  0xb7   :  { %10150 = vmatpush3.bf16.msra.mxu0 %v11213_v37  ;;  %v11262_v37 = vld [vmem:[%s14510_s1 + $0x708] sm:$0xff]  }
  0xb8   :  { %10151 = vmatprep.subr.bf16.mxu0 %v11216_v40  ;;  %v11267_v40 = vld [vmem:[%s14510_s1 + $0x7d0] sm:$0xff]  }
  0xb9   :  { %10172 = vmatpush3.bf16.msra.mxu1 %v11215_v39  ;;  %v11264_v39 = vld [vmem:[%s14510_s1 + $0x788] sm:$0xff]  }
  0xba   :  { %10173 = vmatprep.subr.bf16.mxu1 %v11218_v43  ;;  %v11269_v43 = vld [vmem:[%s14510_s1 + $0x758] sm:$0xff]  }
  0xbb   :  { %10152 = vmatpush3.bf16.msra.mxu0 %v11217_v42  ;;  %v11266_v42 = vld [vmem:[%s14510_s1 + $0x710] sm:$0xff]  }
  0xbc   :  { %10153 = vmatprep.subr.bf16.mxu0 %v11220_v45  ;;  %v11270_v45 = vld [vmem:[%s14510_s1 + $0x718] sm:$0xff]  }
  0xbd   :  { %10174 = vmatpush3.bf16.msra.mxu1 %v11219_v44  ;;  %v11268_v44 = vld [vmem:[%s14510_s1 + $0x790] sm:$0xff]  }
  0xbe   :  { %10175 = vmatprep.subr.bf16.mxu1 %v11222_v47  ;;  %v11272_v47 = vld [vmem:[%s14510_s1 + $0x798] sm:$0xff]  }
  0xbf   :  { %10154 = vmatpush3.bf16.msra.mxu0 %v11221_v46  ;;  %v11271_v46 = vld [vmem:[%s14510_s1 + $0x7d8] sm:$0xff]  }
  0xc0   :  { %10183 = vmatprep.subr.bf16.mxu0 %v11225_v50  ;;  %v11275_v50 = vld [vmem:[%s14510_s1 + $0x7e0] sm:$0xff]  }
  0xc1   :  { %10176 = vmatpush3.bf16.msra.mxu1 %v11224_v48  ;;  %v11273_v48 = vld [vmem:[%s14510_s1 + $0x760] sm:$0xff]  }
  0xc2   :  { %7468 = vmatmul.mubr.bf16.vlgmr.msra.gmra.mrb[20].mxu0 %v1751_v49  ;;  %10205 = vmatprep.subr.bf16.mxu1 %v11227_v52  ;;  %v11274_v49 = vld [vmem:[%s14510_s1 + $0x720] sm:$0xff]   ;;  %v11277_v52 = vld [vmem:[%s14510_s1 + $0x768] sm:$0xff]  }
  0xc3   :  { %10184 = vmatpush3.bf16.msra.mxu0 %v11226_v51  ;;  %7547 = vmatprep.mubr.bf16.mxu0 %v1807_v22  ;;  %v11276_v51 = vld [vmem:[%s14510_s1 + $0x7a0] sm:$0xff]   ;;  %v11297_v22 = vld [vmem:[%s14510_s1 + $0x888] sm:$0xff]  }
  0xc4   :  { %7508 = vmatmul.mubr.bf16.vlgmr.msra.gmra.mrb[20].mxu1 %v1767_v54  ;;  %10185 = vmatprep.subr.bf16.mxu0 %v11229_v55  ;;  %v11279_v54 = vld [vmem:[%s14510_s1 + $0x7e8] sm:$0xff]  }
  0xc5   :  { %10206 = vmatpush3.bf16.msra.mxu1 %v11228_v53  ;;  %7587 = vmatprep.mubr.bf16.mxu1 %v1817_v27  ;;  %v11278_v53 = vld [vmem:[%s14510_s1 + $0x728] sm:$0xff]   ;;  %v11302_v27 = vld [vmem:[%s14510_s1 + $0x858] sm:$0xff]  }
  0xc6   :  { %10207 = vmatprep.subr.bf16.mxu1 %v11231_v57  ;;  %v11280_v55 = vld [vmem:[%s14510_s1 + $0x7a8] sm:$0xff]   ;;  %v11281_v57 = vld [vmem:[%s14510_s1 + $0x770] sm:$0xff]  }
  0xc7   :  { %10186 = vmatpush3.bf16.msra.mxu0 %v11230_v56  ;;  %v9124_v56 = vld [vmem:[%s14511_s2] ss:$0 sm:$0xff] }
  0xc8   :  { %10187 = vmatprep.subr.bf16.mxu0 %v11233_v59  ;;  %v11282_v59 = vld [vmem:[%s14510_s1 + $0x730] sm:$0xff]  }
  0xc9   :  { %10208 = vmatpush3.bf16.msra.mxu1 %v11232_v58 }
  0xca   :  { %10209 = vmatprep.subr.bf16.mxu1 %v11235_v61  ;;  %v11283_v61 = vld [vmem:[%s14510_s1 + $0x7f0] sm:$0xff]  }
  0xcb   :  { %10188 = vmatpush3.bf16.msra.mxu0 %v11234_v60 }
  0xcc   :  { %10189 = vmatprep.subr.bf16.mxu0 %v11237_v63 }
  0xcd   :  { %10210 = vmatpush3.bf16.msra.mxu1 %v11236_v62 }
  0xce   :  { %10211 = vmatprep.subr.bf16.mxu1 %v11239_v1  ;;  %v11284_v1 = vld [vmem:[%s14510_s1 + $0x7b0] sm:$0xff]  }
  0xcf   :  { %10190 = vmatpush3.bf16.msra.mxu0 %v11238_v0 }
  0xd0   :  { %10191 = vmatprep.subr.bf16.mxu0 %v11241_v3 }
  0xd1   :  { %10212 = vmatpush3.bf16.msra.mxu1 %v11240_v2  ;;  %v11285_v2 = vld [vmem:[%s14510_s1 + $0x778] sm:$0xff]  }
  0xd2   :  { %10213 = vmatprep.subr.bf16.mxu1 %v11243_v5 }
  0xd3   :  { %10192 = vmatpush3.bf16.msra.mxu0 %v11242_v4 }
  0xd4   :  { %10193 = vmatprep.subr.bf16.mxu0 %v11245_v7  ;;  %v11286_v7 = vld [vmem:[%s14510_s1 + $0x738] sm:$0xff]  }
  0xd5   :  { %10214 = vmatpush3.bf16.msra.mxu1 %v11244_v6 }
  0xd6   :  { %10215 = vmatprep.subr.bf16.mxu1 %v11247_v9  ;;  %v11287_v9 = vld [vmem:[%s14510_s1 + $0x7f8] sm:$0xff]  }
  0xd7   :  { %10194 = vmatpush3.bf16.msra.mxu0 %v11246_v8 }
  0xd8   :  { %10195 = vmatprep.subr.bf16.mxu0 %v11249_v11 }
  0xd9   :  { %10216 = vmatpush3.bf16.msra.mxu1 %v11248_v10 }
  0xda   :  { %10217 = vmatprep.subr.bf16.mxu1 %v11251_v13  ;;  %v1800_v13 = vrot.slane %v12601_v19, %v11997_v41  ;;  %v11294_v19 = vld [vmem:[%s14510_s1 + $0x848] sm:$0xff]  }
  0xdb   :  { %10196 = vmatpush3.bf16.msra.mxu0 %v11250_v16  ;;  %v11292_v16 = vld [vmem:[%s14510_s1 + $0x8c0] sm:$0xff]  }
  0xdc   :  { %10197 = vmatprep.subr.bf16.mxu0 %v11253_v17  ;;  %v11293_v17 = vld [vmem:[%s14510_s1 + $0x880] sm:$0xff]   ;;  %v1816_v18 = vcombine.high %v1800_v13, %v1800_v13 }
  0xdd   :  { %10218 = vmatpush3.bf16.msra.mxu1 %v11252_v20  ;;  %v11295_v20 = vld [vmem:[%s14510_s1 + $0x808] sm:$0xff]  }
  0xde   :  { %10219 = vmatprep.subr.bf16.mxu1 %v11255_v21  ;;  %v11296_v21 = vld [vmem:[%s14510_s1 + $0x8c8] sm:$0xff]  }
  0xdf   :  { %10198 = vmatpush3.bf16.msra.mxu0 %v11254_v24  ;;  %v11299_v24 = vld [vmem:[%s14510_s1 + $0x810] sm:$0xff]  }
  0xe0   :  { %10227 = vmatprep.subr.bf16.mxu0 %v11257_v26  ;;  %v11301_v26 = vld [vmem:[%s14510_s1 + $0x890] sm:$0xff]  }
  0xe1   :  { %10220 = vmatpush3.bf16.msra.mxu1 %v11256_v28  ;;  %v11303_v28 = vld [vmem:[%s14510_s1 + $0x818] sm:$0xff]  }
  0xe2   :  { %7548 = vmatmul.mubr.bf16.vlgmr.msra.gmra.mrb[24].mxu0 %v1793_v25  ;;  %10249 = vmatprep.subr.bf16.mxu1 %v11259_v30  ;;  %v11300_v25 = vld [vmem:[%s14510_s1 + $0x8d0] sm:$0xff]   ;;  %v11305_v30 = vld [vmem:[%s14510_s1 + $0x898] sm:$0xff]  }
  0xe3   :  { %10228 = vmatpush3.bf16.msra.mxu0 %v11258_v31  ;;  %7627 = vmatprep.mubr.bf16.mxu0 %v1814_v29  ;;  %v11304_v29 = vld [vmem:[%s14510_s1 + $0x8d8] sm:$0xff]   ;;  %v11306_v31 = vld [vmem:[%s14510_s1 + $0x860] sm:$0xff]  }
  0xe4   :  { %7588 = vmatmul.mubr.bf16.vlgmr.msra.gmra.mrb[24].mxu1 %v1815_v32  ;;  %10229 = vmatprep.subr.bf16.mxu0 %v11261_v33  ;;  %v11307_v32 = vld [vmem:[%s14510_s1 + $0x820] sm:$0xff]  }
  0xe5   :  { %10250 = vmatpush3.bf16.msra.mxu1 %v11260_v34  ;;  %7667 = vmatprep.mubr.bf16.mxu1 %v1818_v35  ;;  %v11308_v33 = vld [vmem:[%s14510_s1 + $0x8e0] sm:$0xff]   ;;  %v11310_v35 = vld [vmem:[%s14510_s1 + $0x868] sm:$0xff]  }
  0xe6   :  { %10251 = vmatprep.subr.bf16.mxu1 %v11263_v36  ;;  %v11309_v34 = vld [vmem:[%s14510_s1 + $0x8a0] sm:$0xff]   ;;  %v11311_v36 = vld [vmem:[%s14510_s1 + $0x828] sm:$0xff]  }
  0xe7   :  { %10230 = vmatpush3.bf16.msra.mxu0 %v11262_v37  ;;  %v11312_v37 = vld [vmem:[%s14510_s1 + $0x8e8] sm:$0xff]  }
  0xe8   :  { %10231 = vmatprep.subr.bf16.mxu0 %v11265_v38  ;;  %v11313_v38 = vld [vmem:[%s14510_s1 + $0x8a8] sm:$0xff]  }
  0xe9   :  { %10252 = vmatpush3.bf16.msra.mxu1 %v11264_v39  ;;  %v11314_v39 = vld [vmem:[%s14510_s1 + $0x870] sm:$0xff]  }
  0xea   :  { %10253 = vmatprep.subr.bf16.mxu1 %v11267_v40 }
  0xeb   :  { %10232 = vmatpush3.bf16.msra.mxu0 %v11266_v42  ;;  %v11315_v42 = vld [vmem:[%s14510_s1 + $0x830] sm:$0xff]  }
  0xec   :  { %10233 = vmatprep.subr.bf16.mxu0 %v11269_v43  ;;  %v11316_v43 = vld [vmem:[%s14510_s1 + $0x8f0] sm:$0xff]  }
  0xed   :  { %10254 = vmatpush3.bf16.msra.mxu1 %v11268_v44 }
  0xee   :  { %10255 = vmatprep.subr.bf16.mxu1 %v11271_v46 }
  0xef   :  { %10234 = vmatpush3.bf16.msra.mxu0 %v11270_v45  ;;  %v26_v45 = vld [vmem:[%s14509_s0 + $0x20] sm:$0xff] }
  0xf0   :  { %10235 = vmatprep.subr.bf16.mxu0 %v11273_v48 }
  0xf1   :  { %10256 = vmatpush3.bf16.msra.mxu1 %v11272_v47 }
  0xf2   :  { %10257 = vmatprep.subr.bf16.mxu1 %v11275_v50  ;;  %v11318_v50 = vld [vmem:[%s14510_s1 + $0x878] sm:$0xff]  }
  0xf3   :  { %10236 = vmatpush3.bf16.msra.mxu0 %v11274_v49  ;;  %v11317_v49 = vld [vmem:[%s14510_s1 + $0x8b0] sm:$0xff]  }
  0xf4   :  { %10237 = vmatprep.subr.bf16.mxu0 %v11277_v52  ;;  %v1819_v52 = vcombine.high %v26_v45, %v26_v45 }
  0xf5   :  { %v9935_v58 = vpop.f32.mrb[0].mxu0  ;;  %10258 = vmatpush3.bf16.msra.mxu1 %v11276_v51  ;;  %v1826_v51 = vrot.slane %v26_v45, %v11997_v41 }
  0xf6   :  { %v9936_v60 = vpop.f32.mrb[1].mxu0  ;;  %10259 = vmatprep.subr.bf16.mxu1 %v11279_v54 }
  0xf7   :  { %v9937_v62 = vadd.f32 %v9936_v60, %v9935_v58  ;;  %v9938_v63 = vpop.f32.mrb[2].mxu0  ;;  %v9957_v0 = vpop.f32.mrb[0].mxu1  ;;  %10238 = vmatpush3.bf16.msra.mxu0 %v11278_v53  ;;  %v1834_v58 = vcombine.high %v1826_v51, %v1826_v51  ;;  %v11320_v60 = vld [vmem:[%s14510_s1 + $0x8f8] sm:$0xff]  }
  0xf8   :  { %v9939_v3 = vpop.f32.mrb[3].mxu0  ;;  %v9958_v4 = vpop.f32.mrb[1].mxu1  ;;  %10239 = vmatprep.subr.bf16.mxu0 %v11281_v57  ;;  %v11319_v57 = vld [vmem:[%s14510_s1 + $0x838] sm:$0xff]  }
  0xf9   :  { %v7070_v5 = vadd.f32 %v9937_v62, %v9124_v56  ;;  %v9959_v6 = vadd.f32 %v9958_v4, %v9957_v0  ;;  %10260 = vmatpush3.bf16.msra.mxu1 %v11280_v55  ;;  %v9960_v8 = vpop.f32.mrb[2].mxu1  ;;  %v12822_v62 = vrot.slane %v1819_v52, %v11997_v41  ;;  %v1856_v0 = vrot.slane %v1834_v58, %v11997_v41  ;;  %v11322_v3 = vld [vmem:[%s14510_s1 + $0x940] sm:$0xff]   ;;  %v11354_v52 = vld [vmem:[%s14510_s1 + $0x9b8] sm:$0xff]  }
  0xfa   :  { %10261 = vmatprep.subr.bf16.mxu1 %v11283_v61  ;;  %v9961_v10 = vpop.f32.mrb[3].mxu1 }
  0xfb   :  { %v12716_v11 = vadd.f32 %v9959_v6, %v7070_v5  ;;  %10240 = vmatpush3.bf16.msra.mxu0 %v11282_v59  ;;  %v1835_v4 = vcombine.high %v12822_v62, %v12822_v62  ;;  %v1866_v5 = vcombine.high %v1856_v0, %v1856_v0  ;;  %v11323_v6 = vld [vmem:[%s14510_s1 + $0x900] sm:$0xff]  }
  0xfc   :  { %10241 = vmatprep.subr.bf16.mxu0 %v11285_v2  ;;  %v1842_v2 = vrot.slane %v1826_v51, %v11997_v41 }
  0xfd   :  { %10262 = vmatpush3.bf16.msra.mxu1 %v11284_v1  ;;  %v11321_v1 = vld [vmem:[%s14510_s1 + $0x8b8] sm:$0xff]   ;;  %v1863_v8 = vrot.slane %v1835_v4, %v11997_v41 }
  0xfe   :  { %10263 = vmatprep.subr.bf16.mxu1 %v11287_v9  ;;  %v11325_v9 = vld [vmem:[%s14510_s1 + $0x980] sm:$0xff]   ;;  %v1864_v10 = vcombine.high %v1842_v2, %v1842_v2  ;;  %v11368_v4 = vld [vmem:[%s14510_s1 + $0xa18] sm:$0xff]  }
  0xff   :  { %10242 = vmatpush3.bf16.msra.mxu0 %v11286_v7  ;;  %v11324_v7 = vld [vmem:[%s14510_s1 + $0x9c0] sm:$0xff]  }
 0x100   :  { %10271 = vmatprep.subr.bf16.mxu0 %v11290_v14  ;;  %v11328_v14 = vld [vmem:[%s14510_s1 + $0x9c8] sm:$0xff]  }
 0x101   :  { %10264 = vmatpush3.bf16.msra.mxu1 %v11289_v12  ;;  %v11327_v12 = vld [vmem:[%s14510_s1 + $0x908] sm:$0xff]  }
 0x102   :  { %7628 = vmatmul.mubr.bf16.vlgmr.msra.gmra.mrb[28].mxu0 %v1800_v13  ;;  %10293 = vmatprep.subr.bf16.mxu1 %v11292_v16  ;;  %v1867_v13 = vcombine.high %v1863_v8, %v1863_v8  ;;  %v11330_v16 = vld [vmem:[%s14510_s1 + $0x950] sm:$0xff]  }
 0x103   :  { %10272 = vmatpush3.bf16.msra.mxu0 %v11291_v15  ;;  %7707 = vmatprep.mubr.bf16.mxu0 %v1856_v0  ;;  %v11329_v15 = vld [vmem:[%s14510_s1 + $0x988] sm:$0xff]   ;;  %v11364_v0 = vld [vmem:[%s14510_s1 + $0xa10] sm:$0xff]  }
 0x104   :  { %7668 = vmatmul.mubr.bf16.vlgmr.msra.gmra.mrb[28].mxu1 %v1816_v18  ;;  %10273 = vmatprep.subr.bf16.mxu0 %v11294_v19  ;;  %v11332_v18 = vld [vmem:[%s14510_s1 + $0x9d0] sm:$0xff]  }
 0x105   :  { %10294 = vmatpush3.bf16.msra.mxu1 %v11293_v17  ;;  %7747 = vmatprep.mubr.bf16.mxu1 %v1866_v5  ;;  %v11331_v17 = vld [vmem:[%s14510_s1 + $0x910] sm:$0xff]   ;;  %v11369_v5 = vld [vmem:[%s14510_s1 + $0xad8] sm:$0xff]  }
 0x106   :  { %10295 = vmatprep.subr.bf16.mxu1 %v11296_v21  ;;  %v11333_v19 = vld [vmem:[%s14510_s1 + $0x990] sm:$0xff]   ;;  %v11335_v21 = vld [vmem:[%s14510_s1 + $0x918] sm:$0xff]  }
 0x107   :  { %10274 = vmatpush3.bf16.msra.mxu0 %v11295_v20  ;;  %v11334_v20 = vld [vmem:[%s14510_s1 + $0x958] sm:$0xff]  }
 0x108   :  { %10275 = vmatprep.subr.bf16.mxu0 %v11298_v23  ;;  %v11337_v23 = vld [vmem:[%s14510_s1 + $0x998] sm:$0xff]  }
 0x109   :  { %10296 = vmatpush3.bf16.msra.mxu1 %v11297_v22  ;;  %v11336_v22 = vld [vmem:[%s14510_s1 + $0x9d8] sm:$0xff]  }
 0x10a   :  { %10297 = vmatprep.subr.bf16.mxu1 %v11300_v25  ;;  %v11339_v25 = vld [vmem:[%s14510_s1 + $0x920] sm:$0xff]  }
 0x10b   :  { %10276 = vmatpush3.bf16.msra.mxu0 %v11299_v24  ;;  %v11338_v24 = vld [vmem:[%s14510_s1 + $0x960] sm:$0xff]  }
 0x10c   :  { %10277 = vmatprep.subr.bf16.mxu0 %v11302_v27  ;;  %v11341_v27 = vld [vmem:[%s14510_s1 + $0x9a0] sm:$0xff]  }
 0x10d   :  { %10298 = vmatpush3.bf16.msra.mxu1 %v11301_v26  ;;  %v11340_v26 = vld [vmem:[%s14510_s1 + $0x9e0] sm:$0xff]  }
 0x10e   :  { %10299 = vmatprep.subr.bf16.mxu1 %v11304_v29  ;;  %v11343_v29 = vld [vmem:[%s14510_s1 + $0x928] sm:$0xff]  }
 0x10f   :  { %10278 = vmatpush3.bf16.msra.mxu0 %v11303_v28  ;;  %v11342_v28 = vld [vmem:[%s14510_s1 + $0x968] sm:$0xff]  }
 0x110   :  { %10279 = vmatprep.subr.bf16.mxu0 %v11306_v31  ;;  %v11345_v31 = vld [vmem:[%s14510_s1 + $0x9a8] sm:$0xff]  }
 0x111   :  { %10300 = vmatpush3.bf16.msra.mxu1 %v11305_v30  ;;  %v11344_v30 = vld [vmem:[%s14510_s1 + $0x9e8] sm:$0xff]  }
 0x112   :  { %10301 = vmatprep.subr.bf16.mxu1 %v11308_v33 }
 0x113   :  { %10280 = vmatpush3.bf16.msra.mxu0 %v11307_v32  ;;  %v11346_v32 = vld [vmem:[%s14510_s1 + $0x970] sm:$0xff]  }
 0x114   :  { %10281 = vmatprep.subr.bf16.mxu0 %v11310_v35 }
 0x115   :  { %v9979_v40 = vpop.f32.mrb[4].mxu0  ;;  %10302 = vmatpush3.bf16.msra.mxu1 %v11309_v34  ;;  %v11347_v34 = vld [vmem:[%s14510_s1 + $0x930] sm:$0xff]  }
 0x116   :  { %v9980_v44 = vpop.f32.mrb[5].mxu0  ;;  %10303 = vmatprep.subr.bf16.mxu1 %v11312_v37 }
 0x117   :  { %v9981_v46 = vadd.f32 %v9980_v44, %v9979_v40  ;;  %v9982_v47 = vpop.f32.mrb[6].mxu0  ;;  %v10001_v48 = vpop.f32.mrb[4].mxu1  ;;  %10282 = vmatpush3.bf16.msra.mxu0 %v11311_v36  ;;  %v11348_v36 = vld [vmem:[%s14510_s1 + $0x9f0] sm:$0xff]  }
 0x118   :  { %v9983_v53 = vpop.f32.mrb[7].mxu0  ;;  %v10002_v54 = vpop.f32.mrb[5].mxu1  ;;  %10283 = vmatprep.subr.bf16.mxu0 %v11314_v39  ;;  %v11349_v40 = vld [vmem:[%s14510_s1 + $0x9b0] sm:$0xff]   ;;  %v11351_v47 = vld [vmem:[%s14510_s1 + $0x938] sm:$0xff]  }
 0x119   :  { %v7150_v55 = vadd.f32 %v9981_v46, %v12716_v11  ;;  %v10003_v56 = vadd.f32 %v10002_v54, %v10001_v48  ;;  %10304 = vmatpush3.bf16.msra.mxu1 %v11313_v38  ;;  %v10004_v59 = vpop.f32.mrb[6].mxu1  ;;  %v11326_v11 = vld [vmem:[%s14510_s1 + $0x948] sm:$0xff]   ;;  %v1849_v53 = vrot.slane %v12822_v62, %v11997_v41  ;;  %v11355_v54 = vld [vmem:[%s14510_s1 + $0xa40] sm:$0xff]  }
 0x11a   :  { %10305 = vmatprep.subr.bf16.mxu1 %v11316_v43  ;;  %v10005_v61 = vpop.f32.mrb[7].mxu1  ;;  %v11359_v59 = vld [vmem:[%s14510_s1 + $0xa48] sm:$0xff]  }
 0x11b   :  { %v12824_v63 = vadd.f32 %v10003_v56, %v7150_v55  ;;  %10284 = vmatpush3.bf16.msra.mxu0 %v11315_v42  ;;  %v11350_v42 = vld [vmem:[%s14510_s1 + $0x978] sm:$0xff]   ;;  %v11356_v55 = vld [vmem:[%s14510_s1 + $0xa00] sm:$0xff]   ;;  %v1865_v58 = vcombine.high %v1849_v53, %v1849_v53  ;;  %v11361_v61 = vld [vmem:[%s14510_s1 + $0xac8] sm:$0xff]  }
 0x11c   :  { %10285 = vmatprep.subr.bf16.mxu0 %v11318_v50  ;;  %v11357_v56 = vld [vmem:[%s14510_s1 + $0xac0] sm:$0xff]   ;;  %v11362_v62 = vld [vmem:[%s14510_s1 + $0xa88] sm:$0xff]  }
 0x11d   :  { %10306 = vmatpush3.bf16.msra.mxu1 %v11317_v49  ;;  %v11352_v49 = vld [vmem:[%s14510_s1 + $0x9f8] sm:$0xff]  }
 0x11e   :  { %10307 = vmatprep.subr.bf16.mxu1 %v11320_v60  ;;  %v11360_v60 = vld [vmem:[%s14510_s1 + $0xa08] sm:$0xff]  }
 0x11f   :  { %10286 = vmatpush3.bf16.msra.mxu0 %v11319_v57  ;;  %v11358_v57 = vld [vmem:[%s14510_s1 + $0xa80] sm:$0xff]  }
 0x120   :  { %10315 = vmatprep.subr.bf16.mxu0 %v11322_v3  ;;  %v11367_v3 = vld [vmem:[%s14510_s1 + $0xa58] sm:$0xff]  }
 0x121   :  { %10308 = vmatpush3.bf16.msra.mxu1 %v11321_v1  ;;  %v11365_v1 = vld [vmem:[%s14510_s1 + $0xad0] sm:$0xff]  }
 0x122   :  { %7708 = vmatmul.mubr.bf16.vlgmr.msra.gmra.mrb[32].mxu0 %v1842_v2  ;;  %10337 = vmatprep.subr.bf16.mxu1 %v11324_v7  ;;  %v11366_v2 = vld [vmem:[%s14510_s1 + $0xa90] sm:$0xff]   ;;  %v11371_v7 = vld [vmem:[%s14510_s1 + $0xa60] sm:$0xff]  }
 0x123   :  { %10316 = vmatpush3.bf16.msra.mxu0 %v11323_v6  ;;  %7787 = vmatprep.mubr.bf16.mxu0 %v1863_v8  ;;  %v11370_v6 = vld [vmem:[%s14510_s1 + $0xa98] sm:$0xff]   ;;  %v11372_v8 = vld [vmem:[%s14510_s1 + $0xa20] sm:$0xff]  }
 0x124   :  { %7748 = vmatmul.mubr.bf16.vlgmr.msra.gmra.mrb[32].mxu1 %v1864_v10  ;;  %10317 = vmatprep.subr.bf16.mxu0 %v11326_v11  ;;  %v11374_v10 = vld [vmem:[%s14510_s1 + $0xaa0] sm:$0xff]   ;;  %v11375_v11 = vld [vmem:[%s14510_s1 + $0xa68] sm:$0xff]  }
 0x125   :  { %10338 = vmatpush3.bf16.msra.mxu1 %v11325_v9  ;;  %7827 = vmatprep.mubr.bf16.mxu1 %v1867_v13  ;;  %v11373_v9 = vld [vmem:[%s14510_s1 + $0xae0] sm:$0xff]   ;;  %v11377_v13 = vld [vmem:[%s14510_s1 + $0xae8] sm:$0xff]  }
 0x126   :  { %10339 = vmatprep.subr.bf16.mxu1 %v11328_v14  ;;  %v11378_v14 = vld [vmem:[%s14510_s1 + $0xaa8] sm:$0xff]  }
 0x127   :  { %10318 = vmatpush3.bf16.msra.mxu0 %v11327_v12  ;;  %v11376_v12 = vld [vmem:[%s14510_s1 + $0xa28] sm:$0xff]  }
 0x128   :  { %10319 = vmatprep.subr.bf16.mxu0 %v11330_v16 }
 0x129   :  { %10340 = vmatpush3.bf16.msra.mxu1 %v11329_v15  ;;  %v11379_v15 = vld [vmem:[%s14510_s1 + $0xa70] sm:$0xff]  }
 0x12a   :  { %10341 = vmatprep.subr.bf16.mxu1 %v11332_v18 }
 0x12b   :  { %10320 = vmatpush3.bf16.msra.mxu0 %v11331_v17  ;;  %v11380_v17 = vld [vmem:[%s14510_s1 + $0xa30] sm:$0xff]  }
 0x12c   :  { %10321 = vmatprep.subr.bf16.mxu0 %v11334_v20 }
 0x12d   :  { %10342 = vmatpush3.bf16.msra.mxu1 %v11333_v19  ;;  %v11381_v19 = vld [vmem:[%s14510_s1 + $0xaf0] sm:$0xff]  }
 0x12e   :  { %10343 = vmatprep.subr.bf16.mxu1 %v11336_v22 }
 0x12f   :  { %10322 = vmatpush3.bf16.msra.mxu0 %v11335_v21 }
 0x130   :  { %10323 = vmatprep.subr.bf16.mxu0 %v11338_v24  ;;  %v11383_v24 = vld [vmem:[%s14510_s1 + $0xa78] sm:$0xff]  }
 0x131   :  { %10344 = vmatpush3.bf16.msra.mxu1 %v11337_v23  ;;  %v11382_v23 = vld [vmem:[%s14510_s1 + $0xab0] sm:$0xff]  }
 0x132   :  { %10345 = vmatprep.subr.bf16.mxu1 %v11340_v26 }
 0x133   :  { %10324 = vmatpush3.bf16.msra.mxu0 %v11339_v25  ;;  %v27_v25 = vld [vmem:[%s14509_s0 + $0x28] sm:$0xff] }
 0x134   :  { %10325 = vmatprep.subr.bf16.mxu0 %v11342_v28  ;;  %v1875_v28 = vrot.slane %v27_v25, %v11997_v41 }
 0x135   :  { %v10023_v33 = vpop.f32.mrb[8].mxu0  ;;  %10346 = vmatpush3.bf16.msra.mxu1 %v11341_v27 }
 0x136   :  { %v10024_v35 = vpop.f32.mrb[9].mxu0  ;;  %10347 = vmatprep.subr.bf16.mxu1 %v11344_v30 }
 0x137   :  { %v10025_v37 = vadd.f32 %v10024_v35, %v10023_v33  ;;  %v10026_v38 = vpop.f32.mrb[10].mxu0  ;;  %v10045_v39 = vpop.f32.mrb[8].mxu1  ;;  %10326 = vmatpush3.bf16.msra.mxu0 %v11343_v29  ;;  %v1868_v29 = vcombine.high %v27_v25, %v27_v25  ;;  %v1883_v35 = vcombine.high %v1875_v28, %v1875_v28 }
 0x138   :  { %v10027_v43 = vpop.f32.mrb[11].mxu0  ;;  %v10046_v44 = vpop.f32.mrb[9].mxu1  ;;  %10327 = vmatprep.subr.bf16.mxu0 %v11346_v32  ;;  %v11384_v32 = vld [vmem:[%s14510_s1 + $0xa38] sm:$0xff]  }
 0x139   :  { %v7230_v45 = vadd.f32 %v10025_v37, %v12824_v63  ;;  %v10047_v46 = vadd.f32 %v10046_v44, %v10045_v39  ;;  %10348 = vmatpush3.bf16.msra.mxu1 %v11345_v31  ;;  %v10048_v48 = vpop.f32.mrb[10].mxu1  ;;  %v11363_v63 = vld [vmem:[%s14510_s1 + $0xa50] sm:$0xff]   ;;  %v13034_v37 = vrot.slane %v1868_v29, %v11997_v41  ;;  %v11386_v39 = vld [vmem:[%s14510_s1 + $0xab8] sm:$0xff]   ;;  %v11387_v43 = vld [vmem:[%s14510_s1 + $0xb40] sm:$0xff]  }
 0x13a   :  { %10349 = vmatprep.subr.bf16.mxu1 %v11348_v36  ;;  %v10049_v50 = vpop.f32.mrb[11].mxu1  ;;  %v11420_v29 = vld [vmem:[%s14510_s1 + $0xc40] sm:$0xff]  }
 0x13b   :  { %v12928_v51 = vadd.f32 %v10047_v46, %v7230_v45  ;;  %10328 = vmatpush3.bf16.msra.mxu0 %v11347_v34  ;;  %v11385_v34 = vld [vmem:[%s14510_s1 + $0xaf8] sm:$0xff]   ;;  %v1884_v44 = vcombine.high %v13034_v37, %v13034_v37  ;;  %v11388_v45 = vld [vmem:[%s14510_s1 + $0xb00] sm:$0xff]  }
 0x13c   :  { %10329 = vmatprep.subr.bf16.mxu0 %v11350_v42  ;;  %v1891_v42 = vrot.slane %v1875_v28, %v11997_v41  ;;  %v1898_v28 = vrot.slane %v13034_v37, %v11997_v41  ;;  %v11427_v37 = vld [vmem:[%s14510_s1 + $0xc88] sm:$0xff]  }
 0x13d   :  { %10350 = vmatpush3.bf16.msra.mxu1 %v11349_v40  ;;  %v1905_v40 = vrot.slane %v1883_v35, %v11997_v41  ;;  %v1912_v48 = vrot.slane %v1884_v44, %v11997_v41  ;;  %v11425_v35 = vld [vmem:[%s14510_s1 + $0xc08] sm:$0xff]   ;;  %v11433_v44 = vld [vmem:[%s14510_s1 + $0xc18] sm:$0xff]  }
 0x13e   :  { %10351 = vmatprep.subr.bf16.mxu1 %v11352_v49  ;;  %v11390_v49 = vld [vmem:[%s14510_s1 + $0xb80] sm:$0xff]   ;;  %v1913_v50 = vcombine.high %v1891_v42, %v1891_v42 }
 0x13f   :  { %10330 = vmatpush3.bf16.msra.mxu0 %v11351_v47  ;;  %v1915_v46 = vcombine.high %v1905_v40, %v1905_v40  ;;  %v11389_v47 = vld [vmem:[%s14510_s1 + $0xbc0] sm:$0xff]  }
 0x140   :  { %10359 = vmatprep.subr.bf16.mxu0 %v11355_v54  ;;  %v11393_v54 = vld [vmem:[%s14510_s1 + $0xbc8] sm:$0xff]  }
 0x141   :  { %10352 = vmatpush3.bf16.msra.mxu1 %v11354_v52  ;;  %v11392_v52 = vld [vmem:[%s14510_s1 + $0xb08] sm:$0xff]  }
 0x142   :  { %7788 = vmatmul.mubr.bf16.vlgmr.msra.gmra.mrb[36].mxu0 %v1849_v53  ;;  %10381 = vmatprep.subr.bf16.mxu1 %v11357_v56  ;;  %v1916_v53 = vcombine.high %v1912_v48, %v1912_v48  ;;  %v11395_v56 = vld [vmem:[%s14510_s1 + $0xb50] sm:$0xff]  }
 0x143   :  { %10360 = vmatpush3.bf16.msra.mxu0 %v11356_v55  ;;  %7867 = vmatprep.mubr.bf16.mxu0 %v1905_v40  ;;  %v11394_v55 = vld [vmem:[%s14510_s1 + $0xb88] sm:$0xff]   ;;  %v11430_v40 = vld [vmem:[%s14510_s1 + $0xcd0] sm:$0xff]  }
 0x144   :  { %7828 = vmatmul.mubr.bf16.vlgmr.msra.gmra.mrb[36].mxu1 %v1865_v58  ;;  %10361 = vmatprep.subr.bf16.mxu0 %v11359_v59  ;;  %v11397_v58 = vld [vmem:[%s14510_s1 + $0xbd0] sm:$0xff]  }
 0x145   :  { %10382 = vmatpush3.bf16.msra.mxu1 %v11358_v57  ;;  %7907 = vmatprep.mubr.bf16.mxu1 %v1915_v46  ;;  %v11396_v57 = vld [vmem:[%s14510_s1 + $0xb10] sm:$0xff]   ;;  %v11435_v46 = vld [vmem:[%s14510_s1 + $0xc98] sm:$0xff]  }
 0x146   :  { %10383 = vmatprep.subr.bf16.mxu1 %v11361_v61  ;;  %v11398_v59 = vld [vmem:[%s14510_s1 + $0xb90] sm:$0xff]   ;;  %v11400_v61 = vld [vmem:[%s14510_s1 + $0xb18] sm:$0xff]  }
 0x147   :  { %10362 = vmatpush3.bf16.msra.mxu0 %v11360_v60  ;;  %v11399_v60 = vld [vmem:[%s14510_s1 + $0xb58] sm:$0xff]  }
 0x148   :  { %10363 = vmatprep.subr.bf16.mxu0 %v11363_v63  ;;  %v11402_v63 = vld [vmem:[%s14510_s1 + $0xb98] sm:$0xff]  }
 0x149   :  { %10384 = vmatpush3.bf16.msra.mxu1 %v11362_v62  ;;  %v11401_v62 = vld [vmem:[%s14510_s1 + $0xbd8] sm:$0xff]  }
 0x14a   :  { %10385 = vmatprep.subr.bf16.mxu1 %v11365_v1  ;;  %v11404_v1 = vld [vmem:[%s14510_s1 + $0xb20] sm:$0xff]  }
 0x14b   :  { %10364 = vmatpush3.bf16.msra.mxu0 %v11364_v0  ;;  %v11403_v0 = vld [vmem:[%s14510_s1 + $0xb60] sm:$0xff]  }
 0x14c   :  { %10365 = vmatprep.subr.bf16.mxu0 %v11367_v3  ;;  %v11406_v3 = vld [vmem:[%s14510_s1 + $0xba0] sm:$0xff]  }
 0x14d   :  { %10386 = vmatpush3.bf16.msra.mxu1 %v11366_v2  ;;  %v11405_v2 = vld [vmem:[%s14510_s1 + $0xbe0] sm:$0xff]  }
 0x14e   :  { %10387 = vmatprep.subr.bf16.mxu1 %v11369_v5  ;;  %v11408_v5 = vld [vmem:[%s14510_s1 + $0xb28] sm:$0xff]  }
 0x14f   :  { %10366 = vmatpush3.bf16.msra.mxu0 %v11368_v4  ;;  %v11407_v4 = vld [vmem:[%s14510_s1 + $0xb68] sm:$0xff]  }
 0x150   :  { %10367 = vmatprep.subr.bf16.mxu0 %v11371_v7  ;;  %v11410_v7 = vld [vmem:[%s14510_s1 + $0xba8] sm:$0xff]  }
 0x151   :  { %10388 = vmatpush3.bf16.msra.mxu1 %v11370_v6  ;;  %v11409_v6 = vld [vmem:[%s14510_s1 + $0xbe8] sm:$0xff]  }
 0x152   :  { %10389 = vmatprep.subr.bf16.mxu1 %v11373_v9 }
 0x153   :  { %10368 = vmatpush3.bf16.msra.mxu0 %v11372_v8  ;;  %v11411_v8 = vld [vmem:[%s14510_s1 + $0xb70] sm:$0xff]  }
 0x154   :  { %10369 = vmatprep.subr.bf16.mxu0 %v11375_v11 }
 0x155   :  { %v10067_v16 = vpop.f32.mrb[12].mxu0  ;;  %10390 = vmatpush3.bf16.msra.mxu1 %v11374_v10  ;;  %v11412_v10 = vld [vmem:[%s14510_s1 + $0xb30] sm:$0xff]  }
 0x156   :  { %v10068_v18 = vpop.f32.mrb[13].mxu0  ;;  %10391 = vmatprep.subr.bf16.mxu1 %v11377_v13 }
 0x157   :  { %v10069_v20 = vadd.f32 %v10068_v18, %v10067_v16  ;;  %v10070_v21 = vpop.f32.mrb[14].mxu0  ;;  %v10089_v22 = vpop.f32.mrb[12].mxu1  ;;  %10370 = vmatpush3.bf16.msra.mxu0 %v11376_v12  ;;  %v11413_v12 = vld [vmem:[%s14510_s1 + $0xbf0] sm:$0xff]  }
 0x158   :  { %v10071_v26 = vpop.f32.mrb[15].mxu0  ;;  %v10090_v27 = vpop.f32.mrb[13].mxu1  ;;  %10371 = vmatprep.subr.bf16.mxu0 %v11379_v15  ;;  %v11414_v16 = vld [vmem:[%s14510_s1 + $0xbb0] sm:$0xff]  }
 0x159   :  { %v7310_v30 = vadd.f32 %v10069_v20, %v12928_v51  ;;  %v10091_v31 = vadd.f32 %v10090_v27, %v10089_v22  ;;  %10392 = vmatpush3.bf16.msra.mxu1 %v11378_v14  ;;  %v10092_v33 = vpop.f32.mrb[14].mxu1  ;;  %v11391_v51 = vld [vmem:[%s14510_s1 + $0xb48] sm:$0xff]   ;;  %v11416_v22 = vld [vmem:[%s14510_s1 + $0xb38] sm:$0xff]  }
 0x15a   :  { %10393 = vmatprep.subr.bf16.mxu1 %v11381_v19  ;;  %v10093_v36 = vpop.f32.mrb[15].mxu1  ;;  %v11419_v27 = vld [vmem:[%s14510_s1 + $0xbb8] sm:$0xff]   ;;  %v1914_v33 = vcombine.high %v1898_v28, %v1898_v28 }
 0x15b   :  { %v13036_v38 = vadd.f32 %v10091_v31, %v7310_v30  ;;  %10372 = vmatpush3.bf16.msra.mxu0 %v11380_v17  ;;  %v11415_v17 = vld [vmem:[%s14510_s1 + $0xb78] sm:$0xff]   ;;  %v11421_v30 = vld [vmem:[%s14510_s1 + $0xc00] sm:$0xff]   ;;  %v11426_v36 = vld [vmem:[%s14510_s1 + $0xcc8] sm:$0xff]  }
 0x15c   :  { %10373 = vmatprep.subr.bf16.mxu0 %v11383_v24  ;;  %v11417_v24 = vld [vmem:[%s14510_s1 + $0xbf8] sm:$0xff]   ;;  %v11422_v31 = vld [vmem:[%s14510_s1 + $0xcc0] sm:$0xff]  }
 0x15d   :  { %10394 = vmatpush3.bf16.msra.mxu1 %v11382_v23 }
 0x15e   :  { %10395 = vmatprep.subr.bf16.mxu1 %v11385_v34  ;;  %v11424_v34 = vld [vmem:[%s14510_s1 + $0xc48] sm:$0xff]  }
 0x15f   :  { %10374 = vmatpush3.bf16.msra.mxu0 %v11384_v32  ;;  %v11423_v32 = vld [vmem:[%s14510_s1 + $0xc80] sm:$0xff]  }
 0x160   :  { %10403 = vmatprep.subr.bf16.mxu0 %v11387_v43  ;;  %v11432_v43 = vld [vmem:[%s14510_s1 + $0xc58] sm:$0xff]  }
 0x161   :  { %10396 = vmatpush3.bf16.msra.mxu1 %v11386_v39  ;;  %v11429_v39 = vld [vmem:[%s14510_s1 + $0xc10] sm:$0xff]  }
 0x162   :  { %7868 = vmatmul.mubr.bf16.vlgmr.msra.gmra.mrb[40].mxu0 %v1891_v42  ;;  %10425 = vmatprep.subr.bf16.mxu1 %v11389_v47  ;;  %v11431_v42 = vld [vmem:[%s14510_s1 + $0xc90] sm:$0xff]   ;;  %v11436_v47 = vld [vmem:[%s14510_s1 + $0xc60] sm:$0xff]  }
 0x163   :  { %10404 = vmatpush3.bf16.msra.mxu0 %v11388_v45  ;;  %7947 = vmatprep.mubr.bf16.mxu0 %v1912_v48  ;;  %v11434_v45 = vld [vmem:[%s14510_s1 + $0xcd8] sm:$0xff]   ;;  %v11437_v48 = vld [vmem:[%s14510_s1 + $0xc20] sm:$0xff]  }
 0x164   :  { %7908 = vmatmul.mubr.bf16.vlgmr.msra.gmra.mrb[40].mxu1 %v1913_v50  ;;  %10405 = vmatprep.subr.bf16.mxu0 %v11391_v51  ;;  %v11439_v50 = vld [vmem:[%s14510_s1 + $0xca0] sm:$0xff]   ;;  %v11440_v51 = vld [vmem:[%s14510_s1 + $0xc68] sm:$0xff]  }
 0x165   :  { %10426 = vmatpush3.bf16.msra.mxu1 %v11390_v49  ;;  %7987 = vmatprep.mubr.bf16.mxu1 %v1916_v53  ;;  %v11438_v49 = vld [vmem:[%s14510_s1 + $0xce0] sm:$0xff]   ;;  %v11442_v53 = vld [vmem:[%s14510_s1 + $0xce8] sm:$0xff]  }
 0x166   :  { %10427 = vmatprep.subr.bf16.mxu1 %v11393_v54  ;;  %v11443_v54 = vld [vmem:[%s14510_s1 + $0xca8] sm:$0xff]  }
 0x167   :  { %10406 = vmatpush3.bf16.msra.mxu0 %v11392_v52  ;;  %v11441_v52 = vld [vmem:[%s14510_s1 + $0xc28] sm:$0xff]  }
 0x168   :  { %10407 = vmatprep.subr.bf16.mxu0 %v11395_v56 }
 0x169   :  { %10428 = vmatpush3.bf16.msra.mxu1 %v11394_v55  ;;  %v11444_v55 = vld [vmem:[%s14510_s1 + $0xc70] sm:$0xff]  }
 0x16a   :  { %10429 = vmatprep.subr.bf16.mxu1 %v11397_v58 }
 0x16b   :  { %10408 = vmatpush3.bf16.msra.mxu0 %v11396_v57  ;;  %v11445_v57 = vld [vmem:[%s14510_s1 + $0xc30] sm:$0xff]  }
 0x16c   :  { %10409 = vmatprep.subr.bf16.mxu0 %v11399_v60 }
 0x16d   :  { %10430 = vmatpush3.bf16.msra.mxu1 %v11398_v59  ;;  %v11446_v59 = vld [vmem:[%s14510_s1 + $0xcf0] sm:$0xff]  }
 0x16e   :  { %10431 = vmatprep.subr.bf16.mxu1 %v11401_v62 }
 0x16f   :  { %10410 = vmatpush3.bf16.msra.mxu0 %v11400_v61 }
 0x170   :  { %10411 = vmatprep.subr.bf16.mxu0 %v11403_v0 }
 0x171   :  { %10432 = vmatpush3.bf16.msra.mxu1 %v11402_v63  ;;  %v11447_v63 = vld [vmem:[%s14510_s1 + $0xcb0] sm:$0xff]  }
 0x172   :  { %10433 = vmatprep.subr.bf16.mxu1 %v11405_v2  ;;  %v11448_v2 = vld [vmem:[%s14510_s1 + $0xc78] sm:$0xff]  }
 0x173   :  { %10412 = vmatpush3.bf16.msra.mxu0 %v11404_v1 }
 0x174   :  { %10413 = vmatprep.subr.bf16.mxu0 %v11407_v4 }
 0x175   :  { %v10111_v9 = vpop.f32.mrb[16].mxu0  ;;  %10434 = vmatpush3.bf16.msra.mxu1 %v11406_v3  ;;  %v28_v3 = vld [vmem:[%s14509_s0 + $0x30] sm:$0xff] }
 0x176   :  { %v10112_v11 = vpop.f32.mrb[17].mxu0  ;;  %10435 = vmatprep.subr.bf16.mxu1 %v11409_v6  ;;  %v11449_v6 = vld [vmem:[%s14510_s1 + $0xc38] sm:$0xff]  }
 0x177   :  { %v10113_v13 = vadd.f32 %v10112_v11, %v10111_v9  ;;  %v10114_v14 = vpop.f32.mrb[18].mxu0  ;;  %v10133_v15 = vpop.f32.mrb[16].mxu1  ;;  %10414 = vmatpush3.bf16.msra.mxu0 %v11408_v5  ;;  %v1917_v9 = vcombine.high %v28_v3, %v28_v3 }
 0x178   :  { %v10115_v18 = vpop.f32.mrb[19].mxu0  ;;  %v10134_v19 = vpop.f32.mrb[17].mxu1  ;;  %10415 = vmatprep.subr.bf16.mxu0 %v11411_v8  ;;  %v11451_v14 = vld [vmem:[%s14510_s1 + $0xcb8] sm:$0xff]  }
 0x179   :  { %v7390_v20 = vadd.f32 %v10113_v13, %v13036_v38  ;;  %v10135_v21 = vadd.f32 %v10134_v19, %v10133_v15  ;;  %10436 = vmatpush3.bf16.msra.mxu1 %v11410_v7  ;;  %v10136_v23 = vpop.f32.mrb[18].mxu1  ;;  %v11428_v38 = vld [vmem:[%s14510_s1 + $0xc50] sm:$0xff]   ;;  %v1924_v7 = vrot.slane %v28_v3, %v11997_v41  ;;  %v13251_v15 = vrot.slane %v1917_v9, %v11997_v41  ;;  %v11453_v19 = vld [vmem:[%s14510_s1 + $0xd00] sm:$0xff]   ;;  %v11484_v3 = vld [vmem:[%s14510_s1 + $0xdb8] sm:$0xff]  }
 0x17a   :  { %10437 = vmatprep.subr.bf16.mxu1 %v11413_v12  ;;  %v10137_v25 = vpop.f32.mrb[19].mxu1  ;;  %v11455_v23 = vld [vmem:[%s14510_s1 + $0xd80] sm:$0xff]  }
 0x17b   :  { %v13140_v26 = vadd.f32 %v10135_v21, %v7390_v20  ;;  %10416 = vmatpush3.bf16.msra.mxu0 %v11412_v10  ;;  %v11450_v10 = vld [vmem:[%s14510_s1 + $0xcf8] sm:$0xff]   ;;  %v1932_v13 = vcombine.high %v1924_v7, %v1924_v7  ;;  %v1933_v20 = vcombine.high %v13251_v15, %v13251_v15  ;;  %v11454_v21 = vld [vmem:[%s14510_s1 + $0xdc0] sm:$0xff]  }
 0x17c   :  { %10417 = vmatprep.subr.bf16.mxu0 %v11415_v17  ;;  %v11452_v17 = vld [vmem:[%s14510_s1 + $0xd40] sm:$0xff]  }
 0x17d   :  { %10438 = vmatpush3.bf16.msra.mxu1 %v11414_v16  ;;  %v1940_v16 = vrot.slane %v1924_v7, %v11997_v41  ;;  %v1954_v18 = vrot.slane %v1932_v13, %v11997_v41  ;;  %v11487_v7 = vld [vmem:[%s14510_s1 + $0xec0] sm:$0xff]   ;;  %v11492_v13 = vld [vmem:[%s14510_s1 + $0xe88] sm:$0xff]  }
 0x17e   :  { %10439 = vmatprep.subr.bf16.mxu1 %v11417_v24  ;;  %v1961_v24 = vrot.slane %v1933_v20, %v11997_v41  ;;  %v11499_v20 = vld [vmem:[%s14510_s1 + $0xed8] sm:$0xff]  }
 0x17f   :  { %10418 = vmatpush3.bf16.msra.mxu0 %v11416_v22  ;;  %v1964_v22 = vcombine.high %v1954_v18, %v1954_v18  ;;  %v1962_v25 = vcombine.high %v1940_v16, %v1940_v16 }
 0x180   :  { %10447 = vmatprep.subr.bf16.mxu0 %v11420_v29  ;;  %v11458_v29 = vld [vmem:[%s14510_s1 + $0xdc8] sm:$0xff]  }
 0x181   :  { %10440 = vmatpush3.bf16.msra.mxu1 %v11419_v27  ;;  %v11457_v27 = vld [vmem:[%s14510_s1 + $0xd08] sm:$0xff]  }
 0x182   :  { %7948 = vmatmul.mubr.bf16.vlgmr.msra.gmra.mrb[44].mxu0 %v1898_v28  ;;  %10469 = vmatprep.subr.bf16.mxu1 %v11422_v31  ;;  %v1965_v28 = vcombine.high %v1961_v24, %v1961_v24  ;;  %v11460_v31 = vld [vmem:[%s14510_s1 + $0xd50] sm:$0xff]  }
 0x183   :  { %10448 = vmatpush3.bf16.msra.mxu0 %v11421_v30  ;;  %8027 = vmatprep.mubr.bf16.mxu0 %v1954_v18  ;;  %v11459_v30 = vld [vmem:[%s14510_s1 + $0xd88] sm:$0xff]   ;;  %v11497_v18 = vld [vmem:[%s14510_s1 + $0xe58] sm:$0xff]  }
 0x184   :  { %7988 = vmatmul.mubr.bf16.vlgmr.msra.gmra.mrb[44].mxu1 %v1914_v33  ;;  %10449 = vmatprep.subr.bf16.mxu0 %v11424_v34  ;;  %v11462_v33 = vld [vmem:[%s14510_s1 + $0xdd0] sm:$0xff]  }
 0x185   :  { %10470 = vmatpush3.bf16.msra.mxu1 %v11423_v32  ;;  %8067 = vmatprep.mubr.bf16.mxu1 %v1964_v22  ;;  %v11461_v32 = vld [vmem:[%s14510_s1 + $0xd10] sm:$0xff]   ;;  %v11501_v22 = vld [vmem:[%s14510_s1 + $0xe60] sm:$0xff]  }
 0x186   :  { %10471 = vmatprep.subr.bf16.mxu1 %v11426_v36  ;;  %v11463_v34 = vld [vmem:[%s14510_s1 + $0xd90] sm:$0xff]   ;;  %v11465_v36 = vld [vmem:[%s14510_s1 + $0xd18] sm:$0xff]  }
 0x187   :  { %10450 = vmatpush3.bf16.msra.mxu0 %v11425_v35  ;;  %v11464_v35 = vld [vmem:[%s14510_s1 + $0xd58] sm:$0xff]  }
 0x188   :  { %10451 = vmatprep.subr.bf16.mxu0 %v11428_v38  ;;  %v11467_v38 = vld [vmem:[%s14510_s1 + $0xd98] sm:$0xff]  }
 0x189   :  { %10472 = vmatpush3.bf16.msra.mxu1 %v11427_v37  ;;  %v11466_v37 = vld [vmem:[%s14510_s1 + $0xdd8] sm:$0xff]  }
 0x18a   :  { %10473 = vmatprep.subr.bf16.mxu1 %v11430_v40  ;;  %v11469_v40 = vld [vmem:[%s14510_s1 + $0xd20] sm:$0xff]  }
 0x18b   :  { %10452 = vmatpush3.bf16.msra.mxu0 %v11429_v39  ;;  %v11468_v39 = vld [vmem:[%s14510_s1 + $0xd60] sm:$0xff]  }
 0x18c   :  { %10453 = vmatprep.subr.bf16.mxu0 %v11432_v43  ;;  %v11471_v43 = vld [vmem:[%s14510_s1 + $0xda0] sm:$0xff]  }
 0x18d   :  { %10474 = vmatpush3.bf16.msra.mxu1 %v11431_v42  ;;  %v11470_v42 = vld [vmem:[%s14510_s1 + $0xde0] sm:$0xff]  }
 0x18e   :  { %10475 = vmatprep.subr.bf16.mxu1 %v11434_v45  ;;  %v11473_v45 = vld [vmem:[%s14510_s1 + $0xd28] sm:$0xff]  }
 0x18f   :  { %10454 = vmatpush3.bf16.msra.mxu0 %v11433_v44  ;;  %v11472_v44 = vld [vmem:[%s14510_s1 + $0xd68] sm:$0xff]  }
 0x190   :  { %10455 = vmatprep.subr.bf16.mxu0 %v11436_v47  ;;  %v11475_v47 = vld [vmem:[%s14510_s1 + $0xda8] sm:$0xff]  }
 0x191   :  { %10476 = vmatpush3.bf16.msra.mxu1 %v11435_v46  ;;  %v11474_v46 = vld [vmem:[%s14510_s1 + $0xde8] sm:$0xff]  }
 0x192   :  { %10477 = vmatprep.subr.bf16.mxu1 %v11438_v49 }
 0x193   :  { %10456 = vmatpush3.bf16.msra.mxu0 %v11437_v48  ;;  %v11476_v48 = vld [vmem:[%s14510_s1 + $0xd70] sm:$0xff]  }
 0x194   :  { %10457 = vmatprep.subr.bf16.mxu0 %v11440_v51 }
 0x195   :  { %v10155_v56 = vpop.f32.mrb[20].mxu0  ;;  %10478 = vmatpush3.bf16.msra.mxu1 %v11439_v50  ;;  %v11477_v50 = vld [vmem:[%s14510_s1 + $0xd30] sm:$0xff]  }
 0x196   :  { %v10156_v58 = vpop.f32.mrb[21].mxu0  ;;  %10479 = vmatprep.subr.bf16.mxu1 %v11442_v53 }
 0x197   :  { %v10157_v60 = vadd.f32 %v10156_v58, %v10155_v56  ;;  %v10158_v61 = vpop.f32.mrb[22].mxu0  ;;  %v10177_v62 = vpop.f32.mrb[20].mxu1  ;;  %10458 = vmatpush3.bf16.msra.mxu0 %v11441_v52  ;;  %v11478_v52 = vld [vmem:[%s14510_s1 + $0xdf0] sm:$0xff]  }
 0x198   :  { %v10159_v0 = vpop.f32.mrb[23].mxu0  ;;  %v10178_v1 = vpop.f32.mrb[21].mxu1  ;;  %10459 = vmatprep.subr.bf16.mxu0 %v11444_v55  ;;  %v11479_v56 = vld [vmem:[%s14510_s1 + $0xdb0] sm:$0xff]  }
 0x199   :  { %v7470_v4 = vadd.f32 %v10157_v60, %v13140_v26  ;;  %v10179_v5 = vadd.f32 %v10178_v1, %v10177_v62  ;;  %10480 = vmatpush3.bf16.msra.mxu1 %v11443_v54  ;;  %v10180_v8 = vpop.f32.mrb[22].mxu1  ;;  %v11456_v26 = vld [vmem:[%s14510_s1 + $0xd48] sm:$0xff]   ;;  %v11481_v62 = vld [vmem:[%s14510_s1 + $0xd38] sm:$0xff]  }
 0x19a   :  { %10481 = vmatprep.subr.bf16.mxu1 %v11446_v59  ;;  %v10181_v11 = vpop.f32.mrb[23].mxu1  ;;  %v11482_v0 = vld [vmem:[%s14510_s1 + $0xdf8] sm:$0xff]   ;;  %v11488_v8 = vld [vmem:[%s14510_s1 + $0xe80] sm:$0xff]  }
 0x19b   :  { %v13245_v12 = vadd.f32 %v10179_v5, %v7470_v4  ;;  %10460 = vmatpush3.bf16.msra.mxu0 %v11445_v57  ;;  %v11480_v57 = vld [vmem:[%s14510_s1 + $0xd78] sm:$0xff]   ;;  %v1947_v4 = vrot.slane %v13251_v15, %v11997_v41  ;;  %v11485_v5 = vld [vmem:[%s14510_s1 + $0xe40] sm:$0xff]   ;;  %v11490_v11 = vld [vmem:[%s14510_s1 + $0xe08] sm:$0xff]  }
 0x19c   :  { %10461 = vmatprep.subr.bf16.mxu0 %v11448_v2  ;;  %v11494_v15 = vld [vmem:[%s14510_s1 + $0xe10] sm:$0xff]  }
 0x19d   :  { %10482 = vmatpush3.bf16.msra.mxu1 %v11447_v63  ;;  %v1963_v9 = vcombine.high %v1947_v4, %v1947_v4 }
 0x19e   :  { %10483 = vmatprep.subr.bf16.mxu1 %v11450_v10  ;;  %v11489_v10 = vld [vmem:[%s14510_s1 + $0xe48] sm:$0xff]  }
 0x19f   :  { %10462 = vmatpush3.bf16.msra.mxu0 %v11449_v6  ;;  %v11486_v6 = vld [vmem:[%s14510_s1 + $0xe00] sm:$0xff]  }
 0x1a0   :  { %10491 = vmatprep.subr.bf16.mxu0 %v11452_v17  ;;  %v11496_v17 = vld [vmem:[%s14510_s1 + $0xe90] sm:$0xff]  }
 0x1a1   :  { %10484 = vmatpush3.bf16.msra.mxu1 %v11451_v14  ;;  %v11493_v14 = vld [vmem:[%s14510_s1 + $0xe50] sm:$0xff]  }
 0x1a2   :  { %8028 = vmatmul.mubr.bf16.vlgmr.msra.gmra.mrb[48].mxu0 %v1940_v16  ;;  %10513 = vmatprep.subr.bf16.mxu1 %v11454_v21  ;;  %v11495_v16 = vld [vmem:[%s14510_s1 + $0xed0] sm:$0xff]   ;;  %v11500_v21 = vld [vmem:[%s14510_s1 + $0xe98] sm:$0xff]  }
 0x1a3   :  { %10492 = vmatpush3.bf16.msra.mxu0 %v11453_v19  ;;  %8107 = vmatprep.mubr.bf16.mxu0 %v1961_v24  ;;  %v11498_v19 = vld [vmem:[%s14510_s1 + $0xe18] sm:$0xff]   ;;  %v11503_v24 = vld [vmem:[%s14510_s1 + $0xee0] sm:$0xff]  }
 0x1a4   :  { %8068 = vmatmul.mubr.bf16.vlgmr.msra.gmra.mrb[48].mxu1 %v1962_v25  ;;  %10493 = vmatprep.subr.bf16.mxu0 %v11456_v26  ;;  %v11504_v25 = vld [vmem:[%s14510_s1 + $0xea0] sm:$0xff]   ;;  %v11505_v26 = vld [vmem:[%s14510_s1 + $0xe68] sm:$0xff]  }
 0x1a5   :  { %10514 = vmatpush3.bf16.msra.mxu1 %v11455_v23  ;;  %8147 = vmatprep.mubr.bf16.mxu1 %v1965_v28  ;;  %v11502_v23 = vld [vmem:[%s14510_s1 + $0xe20] sm:$0xff]   ;;  %v11507_v28 = vld [vmem:[%s14510_s1 + $0xee8] sm:$0xff]  }
 0x1a6   :  { %10515 = vmatprep.subr.bf16.mxu1 %v11458_v29  ;;  %v11508_v29 = vld [vmem:[%s14510_s1 + $0xea8] sm:$0xff]  }
 0x1a7   :  { %10494 = vmatpush3.bf16.msra.mxu0 %v11457_v27  ;;  %v11506_v27 = vld [vmem:[%s14510_s1 + $0xe28] sm:$0xff]  }
 0x1a8   :  { %10495 = vmatprep.subr.bf16.mxu0 %v11460_v31 }
 0x1a9   :  { %10516 = vmatpush3.bf16.msra.mxu1 %v11459_v30  ;;  %v11509_v30 = vld [vmem:[%s14510_s1 + $0xe70] sm:$0xff]  }
 0x1aa   :  { %10517 = vmatprep.subr.bf16.mxu1 %v11462_v33 }
 0x1ab   :  { %10496 = vmatpush3.bf16.msra.mxu0 %v11461_v32  ;;  %v11510_v32 = vld [vmem:[%s14510_s1 + $0xe30] sm:$0xff]  }
 0x1ac   :  { %10497 = vmatprep.subr.bf16.mxu0 %v11464_v35 }
 0x1ad   :  { %10518 = vmatpush3.bf16.msra.mxu1 %v11463_v34  ;;  %v11511_v34 = vld [vmem:[%s14510_s1 + $0xef0] sm:$0xff]  }
 0x1ae   :  { %10519 = vmatprep.subr.bf16.mxu1 %v11466_v37 }
 0x1af   :  { %10498 = vmatpush3.bf16.msra.mxu0 %v11465_v36 }
 0x1b0   :  { %10499 = vmatprep.subr.bf16.mxu0 %v11468_v39 }
 0x1b1   :  { %10520 = vmatpush3.bf16.msra.mxu1 %v11467_v38 }
 0x1b2   :  { %10521 = vmatprep.subr.bf16.mxu1 %v11470_v42  ;;  %v11513_v42 = vld [vmem:[%s14510_s1 + $0xe78] sm:$0xff]  }
 0x1b3   :  { %10500 = vmatpush3.bf16.msra.mxu0 %v11469_v40  ;;  %v11512_v40 = vld [vmem:[%s14510_s1 + $0xeb0] sm:$0xff]  }
 0x1b4   :  { %10501 = vmatprep.subr.bf16.mxu0 %v11472_v44 }
 0x1b5   :  { %v10199_v49 = vpop.f32.mrb[24].mxu0  ;;  %10522 = vmatpush3.bf16.msra.mxu1 %v11471_v43 }
 0x1b6   :  { %v10200_v51 = vpop.f32.mrb[25].mxu0  ;;  %10523 = vmatprep.subr.bf16.mxu1 %v11474_v46  ;;  %v29_v46 = vld [vmem:[%s14509_s0 + $0x38] sm:$0xff] }
 0x1b7   :  { %v10201_v53 = vadd.f32 %v10200_v51, %v10199_v49  ;;  %v10202_v54 = vpop.f32.mrb[26].mxu0  ;;  %v10221_v55 = vpop.f32.mrb[24].mxu1  ;;  %10502 = vmatpush3.bf16.msra.mxu0 %v11473_v45  ;;  %v11514_v45 = vld [vmem:[%s14510_s1 + $0xe38] sm:$0xff]   ;;  %v1973_v49 = vrot.slane %v29_v46, %v11997_v41  ;;  %v1966_v51 = vcombine.high %v29_v46, %v29_v46  ;;  %v11551_v46 = vld [vmem:[%s14510_s1 + $0x1000] sm:$0xff]  }
 0x1b8   :  { %v10203_v58 = vpop.f32.mrb[27].mxu0  ;;  %v10222_v59 = vpop.f32.mrb[25].mxu1  ;;  %10503 = vmatprep.subr.bf16.mxu0 %v11476_v48  ;;  %v11515_v48 = vld [vmem:[%s14510_s1 + $0xef8] sm:$0xff]  }
 0x1b9   :  { %v7550_v60 = vadd.f32 %v10201_v53, %v13245_v12  ;;  %v10223_v61 = vadd.f32 %v10222_v59, %v10221_v55  ;;  %10524 = vmatpush3.bf16.msra.mxu1 %v11475_v47  ;;  %v10224_v63 = vpop.f32.mrb[26].mxu1  ;;  %v11491_v12 = vld [vmem:[%s14510_s1 + $0xec8] sm:$0xff]   ;;  %v11516_v53 = vld [vmem:[%s14510_s1 + $0xeb8] sm:$0xff]   ;;  %v1981_v54 = vcombine.high %v1973_v49, %v1973_v49  ;;  %v1989_v55 = vrot.slane %v1973_v49, %v11997_v41  ;;  %v11518_v58 = vld [vmem:[%s14510_s1 + $0xf00] sm:$0xff]  }
 0x1ba   :  { %10525 = vmatprep.subr.bf16.mxu1 %v11478_v52  ;;  %v10225_v1 = vpop.f32.mrb[27].mxu1 }
 0x1bb   :  { %v13352_v2 = vadd.f32 %v10223_v61, %v7550_v60  ;;  %10504 = vmatpush3.bf16.msra.mxu0 %v11477_v50  ;;  %v2003_v59 = vrot.slane %v1981_v54, %v11997_v41  ;;  %v11519_v60 = vld [vmem:[%s14510_s1 + $0xfc0] sm:$0xff]   ;;  %v11521_v1 = vld [vmem:[%s14510_s1 + $0xf48] sm:$0xff]   ;;  %v11558_v54 = vld [vmem:[%s14510_s1 + $0x1050] sm:$0xff]  }
 0x1bc   :  { %10505 = vmatprep.subr.bf16.mxu0 %v11480_v57  ;;  %v13467_v57 = vrot.slane %v1966_v51, %v11997_v41  ;;  %v11555_v51 = vld [vmem:[%s14510_s1 + $0x1008] sm:$0xff]  }
 0x1bd   :  { %10526 = vmatpush3.bf16.msra.mxu1 %v11479_v56  ;;  %v11517_v56 = vld [vmem:[%s14510_s1 + $0xf40] sm:$0xff]   ;;  %v2013_v63 = vcombine.high %v2003_v59, %v2003_v59 }
 0x1be   :  { %10527 = vmatprep.subr.bf16.mxu1 %v11482_v0  ;;  %v1982_v61 = vcombine.high %v13467_v57, %v13467_v57  ;;  %v2011_v0 = vcombine.high %v1989_v55, %v1989_v55 }
 0x1bf   :  { %10506 = vmatpush3.bf16.msra.mxu0 %v11481_v62  ;;  %v11520_v62 = vld [vmem:[%s14510_s1 + $0xf80] sm:$0xff]  }
 0x1c0   :  { %10535 = vmatprep.subr.bf16.mxu0 %v11485_v5 }
 0x1c1   :  { %10528 = vmatpush3.bf16.msra.mxu1 %v11484_v3  ;;  %v11522_v3 = vld [vmem:[%s14510_s1 + $0xf08] sm:$0xff]  }
 0x1c2   :  { %8108 = vmatmul.mubr.bf16.vlgmr.msra.gmra.mrb[52].mxu0 %v1947_v4  ;;  %10557 = vmatprep.subr.bf16.mxu1 %v11487_v7  ;;  %v11523_v4 = vld [vmem:[%s14510_s1 + $0xfc8] sm:$0xff]   ;;  %v11525_v7 = vld [vmem:[%s14510_s1 + $0xf50] sm:$0xff]  }
 0x1c3   :  { %10536 = vmatpush3.bf16.msra.mxu0 %v11486_v6  ;;  %8187 = vmatprep.mubr.bf16.mxu0 %v2003_v59  ;;  %v11524_v6 = vld [vmem:[%s14510_s1 + $0xf88] sm:$0xff]   ;;  %v11563_v59 = vld [vmem:[%s14510_s1 + $0x1018] sm:$0xff]  }
 0x1c4   :  { %8148 = vmatmul.mubr.bf16.vlgmr.msra.gmra.mrb[52].mxu1 %v1963_v9  ;;  %10537 = vmatprep.subr.bf16.mxu0 %v11489_v10  ;;  %v11527_v9 = vld [vmem:[%s14510_s1 + $0xfd0] sm:$0xff]  }
 0x1c5   :  { %10558 = vmatpush3.bf16.msra.mxu1 %v11488_v8  ;;  %8227 = vmatprep.mubr.bf16.mxu1 %v2013_v63  ;;  %v11526_v8 = vld [vmem:[%s14510_s1 + $0xf10] sm:$0xff]   ;;  %v11567_v63 = vld [vmem:[%s14510_s1 + $0x1020] sm:$0xff]  }
 0x1c6   :  { %10559 = vmatprep.subr.bf16.mxu1 %v11491_v12  ;;  %v11528_v10 = vld [vmem:[%s14510_s1 + $0xf90] sm:$0xff]   ;;  %v11530_v12 = vld [vmem:[%s14510_s1 + $0xf18] sm:$0xff]  }
 0x1c7   :  { %10538 = vmatpush3.bf16.msra.mxu0 %v11490_v11  ;;  %v11529_v11 = vld [vmem:[%s14510_s1 + $0xf58] sm:$0xff]  }
 0x1c8   :  { %10539 = vmatprep.subr.bf16.mxu0 %v11493_v14  ;;  %v11532_v14 = vld [vmem:[%s14510_s1 + $0xf98] sm:$0xff]  }
 0x1c9   :  { %10560 = vmatpush3.bf16.msra.mxu1 %v11492_v13  ;;  %v11531_v13 = vld [vmem:[%s14510_s1 + $0xfd8] sm:$0xff]  }
 0x1ca   :  { %10561 = vmatprep.subr.bf16.mxu1 %v11495_v16  ;;  %v11534_v16 = vld [vmem:[%s14510_s1 + $0xf20] sm:$0xff]  }
 0x1cb   :  { %10540 = vmatpush3.bf16.msra.mxu0 %v11494_v15  ;;  %v11533_v15 = vld [vmem:[%s14510_s1 + $0xf60] sm:$0xff]  }
 0x1cc   :  { %10541 = vmatprep.subr.bf16.mxu0 %v11497_v18  ;;  %v11536_v18 = vld [vmem:[%s14510_s1 + $0xfa0] sm:$0xff]  }
 0x1cd   :  { %10562 = vmatpush3.bf16.msra.mxu1 %v11496_v17  ;;  %v11535_v17 = vld [vmem:[%s14510_s1 + $0xfe0] sm:$0xff]  }
 0x1ce   :  { %10563 = vmatprep.subr.bf16.mxu1 %v11499_v20  ;;  %v11538_v20 = vld [vmem:[%s14510_s1 + $0xf28] sm:$0xff]  }
 0x1cf   :  { %10542 = vmatpush3.bf16.msra.mxu0 %v11498_v19  ;;  %v11537_v19 = vld [vmem:[%s14510_s1 + $0xf68] sm:$0xff]  }
 0x1d0   :  { %10543 = vmatprep.subr.bf16.mxu0 %v11501_v22  ;;  %v11540_v22 = vld [vmem:[%s14510_s1 + $0xfa8] sm:$0xff]  }
 0x1d1   :  { %10564 = vmatpush3.bf16.msra.mxu1 %v11500_v21  ;;  %v11539_v21 = vld [vmem:[%s14510_s1 + $0xfe8] sm:$0xff]  }
 0x1d2   :  { %10565 = vmatprep.subr.bf16.mxu1 %v11503_v24 }
 0x1d3   :  { %10544 = vmatpush3.bf16.msra.mxu0 %v11502_v23  ;;  %v11541_v23 = vld [vmem:[%s14510_s1 + $0xf70] sm:$0xff]  }
 0x1d4   :  { %10545 = vmatprep.subr.bf16.mxu0 %v11505_v26 }
 0x1d5   :  { %v10243_v31 = vpop.f32.mrb[28].mxu0  ;;  %10566 = vmatpush3.bf16.msra.mxu1 %v11504_v25  ;;  %v11542_v25 = vld [vmem:[%s14510_s1 + $0xf30] sm:$0xff]  }
 0x1d6   :  { %v10244_v33 = vpop.f32.mrb[29].mxu0  ;;  %10567 = vmatprep.subr.bf16.mxu1 %v11507_v28 }
 0x1d7   :  { %v10245_v35 = vadd.f32 %v10244_v33, %v10243_v31  ;;  %v10246_v36 = vpop.f32.mrb[30].mxu0  ;;  %v10265_v37 = vpop.f32.mrb[28].mxu1  ;;  %10546 = vmatpush3.bf16.msra.mxu0 %v11506_v27  ;;  %v11543_v27 = vld [vmem:[%s14510_s1 + $0xff0] sm:$0xff]  }
 0x1d8   :  { %v10247_v38 = vpop.f32.mrb[31].mxu0  ;;  %v10266_v39 = vpop.f32.mrb[29].mxu1  ;;  %10547 = vmatprep.subr.bf16.mxu0 %v11509_v30  ;;  %v11544_v31 = vld [vmem:[%s14510_s1 + $0xfb0] sm:$0xff]  }
 0x1d9   :  { %v7630_v43 = vadd.f32 %v10245_v35, %v13352_v2  ;;  %v10267_v44 = vadd.f32 %v10266_v39, %v10265_v37  ;;  %10568 = vmatpush3.bf16.msra.mxu1 %v11508_v29  ;;  %v10268_v47 = vpop.f32.mrb[30].mxu1  ;;  %v2010_v2 = vrot.slane %v1982_v61, %v11997_v41  ;;  %v11546_v37 = vld [vmem:[%s14510_s1 + $0xf38] sm:$0xff]  }
 0x1da   :  { %10569 = vmatprep.subr.bf16.mxu1 %v11511_v34  ;;  %v10269_v50 = vpop.f32.mrb[31].mxu1  ;;  %v11547_v39 = vld [vmem:[%s14510_s1 + $0xff8] sm:$0xff]   ;;  %v11552_v47 = vld [vmem:[%s14510_s1 + $0x10c0] sm:$0xff]  }
 0x1db   :  { %v13457_v52 = vadd.f32 %v10267_v44, %v7630_v43  ;;  %10548 = vmatpush3.bf16.msra.mxu0 %v11510_v32  ;;  %v2014_v5 = vcombine.high %v2010_v2, %v2010_v2  ;;  %v11545_v32 = vld [vmem:[%s14510_s1 + $0xf78] sm:$0xff]   ;;  %v1996_v44 = vrot.slane %v13467_v57, %v11997_v41  ;;  %v11554_v50 = vld [vmem:[%s14510_s1 + $0x1048] sm:$0xff]   ;;  %v11561_v57 = vld [vmem:[%s14510_s1 + $0x1090] sm:$0xff]  }
 0x1dc   :  { %10549 = vmatprep.subr.bf16.mxu0 %v11513_v42  ;;  %v11549_v43 = vld [vmem:[%s14510_s1 + $0xfb8] sm:$0xff]  }
 0x1dd   :  { %10570 = vmatpush3.bf16.msra.mxu1 %v11512_v40  ;;  %v2012_v49 = vcombine.high %v1996_v44, %v1996_v44  ;;  %v11565_v61 = vld [vmem:[%s14510_s1 + $0x1098] sm:$0xff]  }
 0x1de   :  { %10571 = vmatprep.subr.bf16.mxu1 %v11515_v48  ;;  %v11553_v48 = vld [vmem:[%s14510_s1 + $0x1080] sm:$0xff]  }
 0x1df   :  { %10550 = vmatpush3.bf16.msra.mxu0 %v11514_v45  ;;  %v11550_v45 = vld [vmem:[%s14510_s1 + $0x1040] sm:$0xff]  }
 0x1e0   :  { %10579 = vmatprep.subr.bf16.mxu0 %v11517_v56  ;;  %v11560_v56 = vld [vmem:[%s14510_s1 + $0x10d0] sm:$0xff]  }
 0x1e1   :  { %10572 = vmatpush3.bf16.msra.mxu1 %v11516_v53  ;;  %v11557_v53 = vld [vmem:[%s14510_s1 + $0x1088] sm:$0xff]  }
 0x1e2   :  { %8188 = vmatmul.mubr.bf16.vlgmr.msra.gmra.mrb[56].mxu0 %v1989_v55  ;;  %10601 = vmatprep.subr.bf16.mxu1 %v11519_v60  ;;  %v11559_v55 = vld [vmem:[%s14510_s1 + $0x1010] sm:$0xff]   ;;  %v11564_v60 = vld [vmem:[%s14510_s1 + $0x10d8] sm:$0xff]  }
 0x1e3   :  { %10580 = vmatpush3.bf16.msra.mxu0 %v11518_v58  ;;  %8267 = vmatprep.mubr.bf16.mxu0 %v2010_v2  ;;  %v11562_v58 = vld [vmem:[%s14510_s1 + $0x1058] sm:$0xff]   ;;  %v11570_v2 = vld [vmem:[%s14510_s1 + $0x1068] sm:$0xff]  }
 0x1e4   :  { %8228 = vmatmul.mubr.bf16.vlgmr.msra.gmra.mrb[56].mxu1 %v2011_v0  ;;  %10581 = vmatprep.subr.bf16.mxu0 %v11521_v1  ;;  %v11568_v0 = vld [vmem:[%s14510_s1 + $0x10e0] sm:$0xff]  }
 0x1e5   :  { %10602 = vmatpush3.bf16.msra.mxu1 %v11520_v62  ;;  %8307 = vmatprep.mubr.bf16.mxu1 %v2014_v5  ;;  %v11566_v62 = vld [vmem:[%s14510_s1 + $0x1060] sm:$0xff]   ;;  %v11573_v5 = vld [vmem:[%s14510_s1 + $0x10a8] sm:$0xff]  }
 0x1e6   :  { %10603 = vmatprep.subr.bf16.mxu1 %v11523_v4  ;;  %v11569_v1 = vld [vmem:[%s14510_s1 + $0x10a0] sm:$0xff]   ;;  %v11572_v4 = vld [vmem:[%s14510_s1 + $0x10e8] sm:$0xff]  }
 0x1e7   :  { %10582 = vmatpush3.bf16.msra.mxu0 %v11522_v3  ;;  %v11571_v3 = vld [vmem:[%s14510_s1 + $0x1028] sm:$0xff]  }
 0x1e8   :  { %10583 = vmatprep.subr.bf16.mxu0 %v11525_v7 }
 0x1e9   :  { %10604 = vmatpush3.bf16.msra.mxu1 %v11524_v6  ;;  %v11574_v6 = vld [vmem:[%s14510_s1 + $0x1070] sm:$0xff]  }
 0x1ea   :  { %10605 = vmatprep.subr.bf16.mxu1 %v11527_v9 }
 0x1eb   :  { %10584 = vmatpush3.bf16.msra.mxu0 %v11526_v8  ;;  %v11575_v8 = vld [vmem:[%s14510_s1 + $0x1030] sm:$0xff]  }
 0x1ec   :  { %10585 = vmatprep.subr.bf16.mxu0 %v11529_v11 }
 0x1ed   :  { %10606 = vmatpush3.bf16.msra.mxu1 %v11528_v10  ;;  %v11576_v10 = vld [vmem:[%s14510_s1 + $0x10f0] sm:$0xff]  }
 0x1ee   :  { %10607 = vmatprep.subr.bf16.mxu1 %v11531_v13 }
 0x1ef   :  { %10586 = vmatpush3.bf16.msra.mxu0 %v11530_v12 }
 0x1f0   :  { %10587 = vmatprep.subr.bf16.mxu0 %v11533_v15 }
 0x1f1   :  { %10608 = vmatpush3.bf16.msra.mxu1 %v11532_v14 }
 0x1f2   :  { %10609 = vmatprep.subr.bf16.mxu1 %v11535_v17  ;;  %v11578_v17 = vld [vmem:[%s14510_s1 + $0x1078] sm:$0xff]  }
 0x1f3   :  { %10588 = vmatpush3.bf16.msra.mxu0 %v11534_v16  ;;  %v11577_v16 = vld [vmem:[%s14510_s1 + $0x10b0] sm:$0xff]  }
 0x1f4   :  { %10589 = vmatprep.subr.bf16.mxu0 %v11537_v19 }
 0x1f5   :  { %v10287_v24 = vpop.f32.mrb[32].mxu0  ;;  %10610 = vmatpush3.bf16.msra.mxu1 %v11536_v18 }
 0x1f6   :  { %v10288_v26 = vpop.f32.mrb[33].mxu0  ;;  %10611 = vmatprep.subr.bf16.mxu1 %v11539_v21  ;;  %v11580_v21 = vld [vmem:[%s14510_s1 + $0x10f8] sm:$0xff]  }
 0x1f7   :  { %v10289_v28 = vadd.f32 %v10288_v26, %v10287_v24  ;;  %v10290_v29 = vpop.f32.mrb[34].mxu0  ;;  %v10309_v30 = vpop.f32.mrb[32].mxu1  ;;  %10590 = vmatpush3.bf16.msra.mxu0 %v11538_v20  ;;  %v11579_v20 = vld [vmem:[%s14510_s1 + $0x1038] sm:$0xff]  }
 0x1f8   :  { %v10291_v33 = vpop.f32.mrb[35].mxu0  ;;  %v10310_v34 = vpop.f32.mrb[33].mxu1  ;;  %10591 = vmatprep.subr.bf16.mxu0 %v11541_v23  ;;  %v11581_v26 = vld [vmem:[%s14510_s1 + $0x10b8] sm:$0xff]   ;;  %v11582_v29 = vld [vmem:[%s14510_s1 + $0x1140] sm:$0xff]  }
 0x1f9   :  { %v7710_v35 = vadd.f32 %v10289_v28, %v13457_v52  ;;  %v10311_v36 = vadd.f32 %v10310_v34, %v10309_v30  ;;  %10612 = vmatpush3.bf16.msra.mxu1 %v11540_v22  ;;  %v10312_v38 = vpop.f32.mrb[34].mxu1  ;;  %v11556_v52 = vld [vmem:[%s14510_s1 + $0x10c8] sm:$0xff]   ;;  %v30_v22 = vld [vmem:[%s14509_s0 + $0x40] sm:$0xff] }
 0x1fa   :  { %10613 = vmatprep.subr.bf16.mxu1 %v11543_v27  ;;  %v10313_v40 = vpop.f32.mrb[35].mxu1  ;;  %v2015_v28 = vcombine.high %v30_v22, %v30_v22  ;;  %v11584_v34 = vld [vmem:[%s14510_s1 + $0x11c0] sm:$0xff]  }
 0x1fb   :  { %v13564_v42 = vadd.f32 %v10311_v36, %v7710_v35  ;;  %10592 = vmatpush3.bf16.msra.mxu0 %v11542_v25  ;;  %v2022_v25 = vrot.slane %v30_v22, %v11997_v41  ;;  %v11585_v36 = vld [vmem:[%s14510_s1 + $0x1180] sm:$0xff]  }
 0x1fc   :  { %10593 = vmatprep.subr.bf16.mxu0 %v11545_v32  ;;  %v11583_v32 = vld [vmem:[%s14510_s1 + $0x1100] sm:$0xff]   ;;  %v13682_v33 = vrot.slane %v2015_v28, %v11997_v41  ;;  %v11622_v28 = vld [vmem:[%s14510_s1 + $0x1288] sm:$0xff]  }
 0x1fd   :  { %10614 = vmatpush3.bf16.msra.mxu1 %v11544_v31  ;;  %v2030_v30 = vcombine.high %v2022_v25, %v2022_v25  ;;  %v2038_v31 = vrot.slane %v2022_v25, %v11997_v41  ;;  %v11617_v22 = vld [vmem:[%s14510_s1 + $0x12c0] sm:$0xff]   ;;  %v11619_v25 = vld [vmem:[%s14510_s1 + $0x1248] sm:$0xff]  }
 0x1fe   :  { %10615 = vmatprep.subr.bf16.mxu1 %v11547_v39  ;;  %v11586_v39 = vld [vmem:[%s14510_s1 + $0x1148] sm:$0xff]  }
 0x1ff   :  { %10594 = vmatpush3.bf16.msra.mxu0 %v11546_v37  ;;  %v2052_v35 = vrot.slane %v2030_v30, %v11997_v41  ;;  %v2031_v37 = vcombine.high %v13682_v33, %v13682_v33  ;;  %v2060_v38 = vcombine.high %v2038_v31, %v2038_v31  ;;  %v11624_v30 = vld [vmem:[%s14510_s1 + $0x1210] sm:$0xff]  }
 0x200   :  { %10623 = vmatprep.subr.bf16.mxu0 %v11550_v45  ;;  %v11589_v45 = vld [vmem:[%s14510_s1 + $0x1188] sm:$0xff]  }
 0x201   :  { %10616 = vmatpush3.bf16.msra.mxu1 %v11549_v43  ;;  %v2062_v40 = vcombine.high %v2052_v35, %v2052_v35  ;;  %v2059_v43 = vrot.slane %v2031_v37, %v11997_v41  ;;  %v11631_v37 = vld [vmem:[%s14510_s1 + $0x1260] sm:$0xff]  }
 0x202   :  { %8268 = vmatmul.mubr.bf16.vlgmr.msra.gmra.mrb[60].mxu0 %v1996_v44  ;;  %10645 = vmatprep.subr.bf16.mxu1 %v11552_v47  ;;  %v11588_v44 = vld [vmem:[%s14510_s1 + $0x11c8] sm:$0xff]   ;;  %v11590_v47 = vld [vmem:[%s14510_s1 + $0x1150] sm:$0xff]  }
 0x203   :  { %10624 = vmatpush3.bf16.msra.mxu0 %v11551_v46  ;;  %8347 = vmatprep.mubr.bf16.mxu0 %v2052_v35  ;;  %v2063_v46 = vcombine.high %v2059_v43, %v2059_v43  ;;  %v11629_v35 = vld [vmem:[%s14510_s1 + $0x12d8] sm:$0xff]  }
 0x204   :  { %8308 = vmatmul.mubr.bf16.vlgmr.msra.gmra.mrb[60].mxu1 %v2012_v49  ;;  %10625 = vmatprep.subr.bf16.mxu0 %v11554_v50  ;;  %v11592_v49 = vld [vmem:[%s14510_s1 + $0x11d0] sm:$0xff]  }
 0x205   :  { %10646 = vmatpush3.bf16.msra.mxu1 %v11553_v48  ;;  %8387 = vmatprep.mubr.bf16.mxu1 %v2062_v40  ;;  %v11591_v48 = vld [vmem:[%s14510_s1 + $0x1110] sm:$0xff]   ;;  %v11634_v40 = vld [vmem:[%s14510_s1 + $0x12a0] sm:$0xff]  }
 0x206   :  { %10647 = vmatprep.subr.bf16.mxu1 %v11556_v52  ;;  %v11593_v50 = vld [vmem:[%s14510_s1 + $0x1190] sm:$0xff]   ;;  %v11595_v52 = vld [vmem:[%s14510_s1 + $0x1118] sm:$0xff]  }
 0x207   :  { %10626 = vmatpush3.bf16.msra.mxu0 %v11555_v51  ;;  %v11594_v51 = vld [vmem:[%s14510_s1 + $0x1158] sm:$0xff]  }
 0x208   :  { %10627 = vmatprep.subr.bf16.mxu0 %v11558_v54  ;;  %v11597_v54 = vld [vmem:[%s14510_s1 + $0x1198] sm:$0xff]  }
 0x209   :  { %10648 = vmatpush3.bf16.msra.mxu1 %v11557_v53  ;;  %v11596_v53 = vld [vmem:[%s14510_s1 + $0x11d8] sm:$0xff]  }
 0x20a   :  { %10649 = vmatprep.subr.bf16.mxu1 %v11560_v56  ;;  %v11599_v56 = vld [vmem:[%s14510_s1 + $0x1120] sm:$0xff]  }
 0x20b   :  { %10628 = vmatpush3.bf16.msra.mxu0 %v11559_v55  ;;  %v11598_v55 = vld [vmem:[%s14510_s1 + $0x1160] sm:$0xff]  }
 0x20c   :  { %10629 = vmatprep.subr.bf16.mxu0 %v11562_v58  ;;  %v11601_v58 = vld [vmem:[%s14510_s1 + $0x11a0] sm:$0xff]  }
 0x20d   :  { %10650 = vmatpush3.bf16.msra.mxu1 %v11561_v57  ;;  %v11600_v57 = vld [vmem:[%s14510_s1 + $0x11e0] sm:$0xff]  }
 0x20e   :  { %10651 = vmatprep.subr.bf16.mxu1 %v11564_v60  ;;  %v11603_v60 = vld [vmem:[%s14510_s1 + $0x1128] sm:$0xff]  }
 0x20f   :  { %10630 = vmatpush3.bf16.msra.mxu0 %v11563_v59  ;;  %v11602_v59 = vld [vmem:[%s14510_s1 + $0x1168] sm:$0xff]  }
 0x210   :  { %10631 = vmatprep.subr.bf16.mxu0 %v11566_v62  ;;  %v11605_v62 = vld [vmem:[%s14510_s1 + $0x11a8] sm:$0xff]  }
 0x211   :  { %10652 = vmatpush3.bf16.msra.mxu1 %v11565_v61  ;;  %v11604_v61 = vld [vmem:[%s14510_s1 + $0x11e8] sm:$0xff]  }
 0x212   :  { %10653 = vmatprep.subr.bf16.mxu1 %v11568_v0 }
 0x213   :  { %10632 = vmatpush3.bf16.msra.mxu0 %v11567_v63  ;;  %v11606_v63 = vld [vmem:[%s14510_s1 + $0x1170] sm:$0xff]  }
 0x214   :  { %10633 = vmatprep.subr.bf16.mxu0 %v11570_v2 }
 0x215   :  { %v10331_v7 = vpop.f32.mrb[36].mxu0  ;;  %10654 = vmatpush3.bf16.msra.mxu1 %v11569_v1  ;;  %v11607_v1 = vld [vmem:[%s14510_s1 + $0x1130] sm:$0xff]  }
 0x216   :  { %v10332_v9 = vpop.f32.mrb[37].mxu0  ;;  %10655 = vmatprep.subr.bf16.mxu1 %v11572_v4 }
 0x217   :  { %v10333_v11 = vadd.f32 %v10332_v9, %v10331_v7  ;;  %v10334_v12 = vpop.f32.mrb[38].mxu0  ;;  %v10353_v13 = vpop.f32.mrb[36].mxu1  ;;  %10634 = vmatpush3.bf16.msra.mxu0 %v11571_v3  ;;  %v11608_v3 = vld [vmem:[%s14510_s1 + $0x11f0] sm:$0xff]  }
 0x218   :  { %v10335_v14 = vpop.f32.mrb[39].mxu0  ;;  %v10354_v15 = vpop.f32.mrb[37].mxu1  ;;  %10635 = vmatprep.subr.bf16.mxu0 %v11574_v6  ;;  %v11609_v7 = vld [vmem:[%s14510_s1 + $0x11b0] sm:$0xff]  }
 0x219   :  { %v7790_v18 = vadd.f32 %v10333_v11, %v13564_v42  ;;  %v10355_v19 = vadd.f32 %v10354_v15, %v10353_v13  ;;  %10656 = vmatpush3.bf16.msra.mxu1 %v11573_v5  ;;  %v10356_v23 = vpop.f32.mrb[38].mxu1  ;;  %v11587_v42 = vld [vmem:[%s14510_s1 + $0x1108] sm:$0xff]   ;;  %v11611_v13 = vld [vmem:[%s14510_s1 + $0x1138] sm:$0xff]  }
 0x21a   :  { %10657 = vmatprep.subr.bf16.mxu1 %v11576_v10  ;;  %v10357_v27 = vpop.f32.mrb[39].mxu1  ;;  %v11612_v15 = vld [vmem:[%s14510_s1 + $0x11f8] sm:$0xff]   ;;  %v11618_v23 = vld [vmem:[%s14510_s1 + $0x1280] sm:$0xff]  }
 0x21b   :  { %v13668_v24 = vadd.f32 %v10355_v19, %v7790_v18  ;;  %10636 = vmatpush3.bf16.msra.mxu0 %v11575_v8  ;;  %v11610_v8 = vld [vmem:[%s14510_s1 + $0x1178] sm:$0xff]   ;;  %v2045_v19 = vrot.slane %v13682_v33, %v11997_v41  ;;  %v11621_v27 = vld [vmem:[%s14510_s1 + $0x12c8] sm:$0xff]  }
 0x21c   :  { %10637 = vmatprep.subr.bf16.mxu0 %v11578_v17  ;;  %v11614_v18 = vld [vmem:[%s14510_s1 + $0x11b8] sm:$0xff]  }
 0x21d   :  { %10658 = vmatpush3.bf16.msra.mxu1 %v11577_v16  ;;  %v11627_v33 = vld [vmem:[%s14510_s1 + $0x1258] sm:$0xff]  }
 0x21e   :  { %10659 = vmatprep.subr.bf16.mxu1 %v11580_v21  ;;  %v11616_v21 = vld [vmem:[%s14510_s1 + $0x1200] sm:$0xff]  }
 0x21f   :  { %10638 = vmatpush3.bf16.msra.mxu0 %v11579_v20  ;;  %v11615_v20 = vld [vmem:[%s14510_s1 + $0x1240] sm:$0xff]  }
 0x220   :  { %10667 = vmatprep.subr.bf16.mxu0 %v11582_v29  ;;  %v11623_v29 = vld [vmem:[%s14510_s1 + $0x1250] sm:$0xff]  }
 0x221   :  { %10660 = vmatpush3.bf16.msra.mxu1 %v11581_v26  ;;  %v11620_v26 = vld [vmem:[%s14510_s1 + $0x1208] sm:$0xff]  }
 0x222   :  { %8348 = vmatmul.mubr.bf16.vlgmr.msra.gmra.mrb[64].mxu0 %v2038_v31  ;;  %10689 = vmatprep.subr.bf16.mxu1 %v11584_v34  ;;  %v11625_v31 = vld [vmem:[%s14510_s1 + $0x12d0] sm:$0xff]   ;;  %v11628_v34 = vld [vmem:[%s14510_s1 + $0x1218] sm:$0xff]  }
 0x223   :  { %10668 = vmatpush3.bf16.msra.mxu0 %v11583_v32  ;;  %8427 = vmatprep.mubr.bf16.mxu0 %v2059_v43  ;;  %v11626_v32 = vld [vmem:[%s14510_s1 + $0x1290] sm:$0xff]   ;;  %v11636_v43 = vld [vmem:[%s14510_s1 + $0x1228] sm:$0xff]  }
 0x224   :  { %8388 = vmatmul.mubr.bf16.vlgmr.msra.gmra.mrb[64].mxu1 %v2060_v38  ;;  %10669 = vmatprep.subr.bf16.mxu0 %v11586_v39  ;;  %v11632_v38 = vld [vmem:[%s14510_s1 + $0x1220] sm:$0xff]  }
 0x225   :  { %10690 = vmatpush3.bf16.msra.mxu1 %v11585_v36  ;;  %8467 = vmatprep.mubr.bf16.mxu1 %v2063_v46  ;;  %v11630_v36 = vld [vmem:[%s14510_s1 + $0x1298] sm:$0xff]   ;;  %v11633_v39 = vld [vmem:[%s14510_s1 + $0x12e0] sm:$0xff]   ;;  %v11639_v46 = vld [vmem:[%s14510_s1 + $0x1270] sm:$0xff]  }
 0x226   :  { %10691 = vmatprep.subr.bf16.mxu1 %v11588_v44  ;;  %v11637_v44 = vld [vmem:[%s14510_s1 + $0x12e8] sm:$0xff]  }
 0x227   :  { %10670 = vmatpush3.bf16.msra.mxu0 %v11587_v42  ;;  %v11635_v42 = vld [vmem:[%s14510_s1 + $0x1268] sm:$0xff]  }
 0x228   :  { %10671 = vmatprep.subr.bf16.mxu0 %v11590_v47 }
 0x229   :  { %10692 = vmatpush3.bf16.msra.mxu1 %v11589_v45  ;;  %v11638_v45 = vld [vmem:[%s14510_s1 + $0x12a8] sm:$0xff]  }
 0x22a   :  { %10693 = vmatprep.subr.bf16.mxu1 %v11592_v49 }
 0x22b   :  { %10672 = vmatpush3.bf16.msra.mxu0 %v11591_v48  ;;  %v11640_v48 = vld [vmem:[%s14510_s1 + $0x1230] sm:$0xff]  }
 0x22c   :  { %10673 = vmatprep.subr.bf16.mxu0 %v11594_v51 }
 0x22d   :  { %10694 = vmatpush3.bf16.msra.mxu1 %v11593_v50  ;;  %v11641_v50 = vld [vmem:[%s14510_s1 + $0x12f0] sm:$0xff]  }
 0x22e   :  { %10695 = vmatprep.subr.bf16.mxu1 %v11596_v53 }
 0x22f   :  { %10674 = vmatpush3.bf16.msra.mxu0 %v11595_v52 }
 0x230   :  { %10675 = vmatprep.subr.bf16.mxu0 %v11598_v55 }
 0x231   :  { %10696 = vmatpush3.bf16.msra.mxu1 %v11597_v54 }
 0x232   :  { %10697 = vmatprep.subr.bf16.mxu1 %v11600_v57  ;;  %v11643_v57 = vld [vmem:[%s14510_s1 + $0x1278] sm:$0xff]  }
 0x233   :  { %10676 = vmatpush3.bf16.msra.mxu0 %v11599_v56  ;;  %v11642_v56 = vld [vmem:[%s14510_s1 + $0x12b0] sm:$0xff]  }
 0x234   :  { %10677 = vmatprep.subr.bf16.mxu0 %v11602_v59 }
 0x235   :  { %v10375_v0 = vpop.f32.mrb[40].mxu0  ;;  %10698 = vmatpush3.bf16.msra.mxu1 %v11601_v58 }
 0x236   :  { %v10376_v2 = vpop.f32.mrb[41].mxu0  ;;  %10699 = vmatprep.subr.bf16.mxu1 %v11604_v61 }
 0x237   :  { %v10377_v4 = vadd.f32 %v10376_v2, %v10375_v0  ;;  %v10378_v5 = vpop.f32.mrb[42].mxu0  ;;  %v10397_v6 = vpop.f32.mrb[40].mxu1  ;;  %10678 = vmatpush3.bf16.msra.mxu0 %v11603_v60  ;;  %v11644_v60 = vld [vmem:[%s14510_s1 + $0x1238] sm:$0xff]   ;;  %v31_v0 = vld [vmem:[%s14509_s0 + $0x48] sm:$0xff] }
 0x238   :  { %v10379_v9 = vpop.f32.mrb[43].mxu0  ;;  %v10398_v10 = vpop.f32.mrb[41].mxu1  ;;  %10679 = vmatprep.subr.bf16.mxu0 %v11606_v63  ;;  %v11645_v63 = vld [vmem:[%s14510_s1 + $0x12f8] sm:$0xff]   ;;  %v2071_v2 = vrot.slane %v31_v0, %v11997_v41  ;;  %v11647_v5 = vld [vmem:[%s14510_s1 + $0x1340] sm:$0xff]  }
 0x239   :  { %v7870_v11 = vadd.f32 %v10377_v4, %v13668_v24  ;;  %v10399_v12 = vadd.f32 %v10398_v10, %v10397_v6  ;;  %10700 = vmatpush3.bf16.msra.mxu1 %v11605_v62  ;;  %v10400_v14 = vpop.f32.mrb[42].mxu1  ;;  %v2061_v24 = vcombine.high %v2045_v19, %v2045_v19  ;;  %v2064_v4 = vcombine.high %v31_v0, %v31_v0  ;;  %v11649_v9 = vld [vmem:[%s14510_s1 + $0x13c0] sm:$0xff]  }
 0x23a   :  { %10701 = vmatprep.subr.bf16.mxu1 %v11608_v3  ;;  %v10401_v16 = vpop.f32.mrb[43].mxu1  ;;  %v11646_v3 = vld [vmem:[%s14510_s1 + $0x12b8] sm:$0xff]   ;;  %v2079_v6 = vcombine.high %v2071_v2, %v2071_v2  ;;  %v11651_v14 = vld [vmem:[%s14510_s1 + $0x1348] sm:$0xff]  }
 0x23b   :  { %v13776_v17 = vadd.f32 %v10399_v12, %v7870_v11  ;;  %10680 = vmatpush3.bf16.msra.mxu0 %v11607_v1  ;;  %v11648_v11 = vld [vmem:[%s14510_s1 + $0x1300] sm:$0xff]  }
 0x23c   :  { %10681 = vmatprep.subr.bf16.mxu0 %v11610_v8  ;;  %v13891_v8 = vrot.slane %v2064_v4, %v11997_v41  ;;  %v2101_v10 = vrot.slane %v2079_v6, %v11997_v41  ;;  %v11650_v16 = vld [vmem:[%s14510_s1 + $0x1380] sm:$0xff]   ;;  %v11687_v4 = vld [vmem:[%s14510_s1 + $0x1488] sm:$0xff]   ;;  %v11689_v6 = vld [vmem:[%s14510_s1 + $0x1410] sm:$0xff]  }
 0x23d   :  { %10702 = vmatpush3.bf16.msra.mxu1 %v11609_v7  ;;  %v2087_v7 = vrot.slane %v2071_v2, %v11997_v41  ;;  %v11685_v2 = vld [vmem:[%s14510_s1 + $0x1408] sm:$0xff]  }
 0x23e   :  { %10703 = vmatprep.subr.bf16.mxu1 %v11612_v15  ;;  %v2080_v12 = vcombine.high %v13891_v8, %v13891_v8  ;;  %v2111_v15 = vcombine.high %v2101_v10, %v2101_v10 }
 0x23f   :  { %10682 = vmatpush3.bf16.msra.mxu0 %v11611_v13  ;;  %v2109_v13 = vcombine.high %v2087_v7, %v2087_v7 }
 0x240   :  { %10711 = vmatprep.subr.bf16.mxu0 %v11615_v20 }
 0x241   :  { %10704 = vmatpush3.bf16.msra.mxu1 %v11614_v18  ;;  %v11653_v18 = vld [vmem:[%s14510_s1 + $0x13c8] sm:$0xff]  }
 0x242   :  { %8428 = vmatmul.mubr.bf16.vlgmr.msra.gmra.mrb[68].mxu0 %v2045_v19  ;;  %10733 = vmatprep.subr.bf16.mxu1 %v11617_v22  ;;  %v11652_v19 = vld [vmem:[%s14510_s1 + $0x1308] sm:$0xff]  }
 0x243   :  { %10712 = vmatpush3.bf16.msra.mxu0 %v11616_v21  ;;  %8507 = vmatprep.mubr.bf16.mxu0 %v2101_v10  ;;  %v11655_v21 = vld [vmem:[%s14510_s1 + $0x1350] sm:$0xff]   ;;  %v11654_v22 = vld [vmem:[%s14510_s1 + $0x1388] sm:$0xff]   ;;  %v11693_v10 = vld [vmem:[%s14510_s1 + $0x1418] sm:$0xff]  }
 0x244   :  { %8468 = vmatmul.mubr.bf16.vlgmr.msra.gmra.mrb[68].mxu1 %v2061_v24  ;;  %10713 = vmatprep.subr.bf16.mxu0 %v11619_v25  ;;  %v11656_v24 = vld [vmem:[%s14510_s1 + $0x1310] sm:$0xff]   ;;  %v11659_v25 = vld [vmem:[%s14510_s1 + $0x1358] sm:$0xff]  }
 0x245   :  { %10734 = vmatpush3.bf16.msra.mxu1 %v11618_v23  ;;  %8547 = vmatprep.mubr.bf16.mxu1 %v2111_v15  ;;  %v11657_v23 = vld [vmem:[%s14510_s1 + $0x13d0] sm:$0xff]   ;;  %v11698_v15 = vld [vmem:[%s14510_s1 + $0x14e0] sm:$0xff]  }
 0x246   :  { %10735 = vmatprep.subr.bf16.mxu1 %v11621_v27  ;;  %v11661_v27 = vld [vmem:[%s14510_s1 + $0x13d8] sm:$0xff]  }
 0x247   :  { %10714 = vmatpush3.bf16.msra.mxu0 %v11620_v26  ;;  %v11658_v26 = vld [vmem:[%s14510_s1 + $0x1390] sm:$0xff]  }
 0x248   :  { %10715 = vmatprep.subr.bf16.mxu0 %v11623_v29  ;;  %v11663_v29 = vld [vmem:[%s14510_s1 + $0x1360] sm:$0xff]  }
 0x249   :  { %10736 = vmatpush3.bf16.msra.mxu1 %v11622_v28  ;;  %v11660_v28 = vld [vmem:[%s14510_s1 + $0x1318] sm:$0xff]  }
 0x24a   :  { %10737 = vmatprep.subr.bf16.mxu1 %v11625_v31  ;;  %v11665_v31 = vld [vmem:[%s14510_s1 + $0x13e0] sm:$0xff]  }
 0x24b   :  { %10716 = vmatpush3.bf16.msra.mxu0 %v11624_v30  ;;  %v11662_v30 = vld [vmem:[%s14510_s1 + $0x1398] sm:$0xff]  }
 0x24c   :  { %10717 = vmatprep.subr.bf16.mxu0 %v11627_v33  ;;  %v11667_v33 = vld [vmem:[%s14510_s1 + $0x1368] sm:$0xff]  }
 0x24d   :  { %10738 = vmatpush3.bf16.msra.mxu1 %v11626_v32  ;;  %v11664_v32 = vld [vmem:[%s14510_s1 + $0x1320] sm:$0xff]  }
 0x24e   :  { %10739 = vmatprep.subr.bf16.mxu1 %v11629_v35  ;;  %v11669_v35 = vld [vmem:[%s14510_s1 + $0x13e8] sm:$0xff]  }
 0x24f   :  { %10718 = vmatpush3.bf16.msra.mxu0 %v11628_v34  ;;  %v11666_v34 = vld [vmem:[%s14510_s1 + $0x13a0] sm:$0xff]  }
 0x250   :  { %10719 = vmatprep.subr.bf16.mxu0 %v11631_v37 }
 0x251   :  { %10740 = vmatpush3.bf16.msra.mxu1 %v11630_v36  ;;  %v11668_v36 = vld [vmem:[%s14510_s1 + $0x1328] sm:$0xff]  }
 0x252   :  { %10741 = vmatprep.subr.bf16.mxu1 %v11633_v39 }
 0x253   :  { %10720 = vmatpush3.bf16.msra.mxu0 %v11632_v38  ;;  %v11671_v38 = vld [vmem:[%s14510_s1 + $0x1370] sm:$0xff]  }
 0x254   :  { %10721 = vmatprep.subr.bf16.mxu0 %v11635_v42 }
 0x255   :  { %v10419_v47 = vpop.f32.mrb[44].mxu0  ;;  %10742 = vmatpush3.bf16.msra.mxu1 %v11634_v40  ;;  %v11670_v40 = vld [vmem:[%s14510_s1 + $0x13a8] sm:$0xff]  }
 0x256   :  { %v10420_v49 = vpop.f32.mrb[45].mxu0  ;;  %10743 = vmatprep.subr.bf16.mxu1 %v11637_v44 }
 0x257   :  { %v10421_v51 = vadd.f32 %v10420_v49, %v10419_v47  ;;  %v10422_v52 = vpop.f32.mrb[46].mxu0  ;;  %v10441_v53 = vpop.f32.mrb[44].mxu1  ;;  %10722 = vmatpush3.bf16.msra.mxu0 %v11636_v43  ;;  %v11674_v49 = vld [vmem:[%s14510_s1 + $0x13b0] sm:$0xff]  }
 0x258   :  { %v10423_v54 = vpop.f32.mrb[47].mxu0  ;;  %v10442_v55 = vpop.f32.mrb[45].mxu1  ;;  %10723 = vmatprep.subr.bf16.mxu0 %v11639_v46  ;;  %v11673_v46 = vld [vmem:[%s14510_s1 + $0x13f0] sm:$0xff]   ;;  %v11675_v52 = vld [vmem:[%s14510_s1 + $0x1378] sm:$0xff]  }
 0x259   :  { %v7950_v58 = vadd.f32 %v10421_v51, %v13776_v17  ;;  %v10443_v59 = vadd.f32 %v10442_v55, %v10441_v53  ;;  %10744 = vmatpush3.bf16.msra.mxu1 %v11638_v45  ;;  %v10444_v61 = vpop.f32.mrb[46].mxu1  ;;  %v2108_v17 = vrot.slane %v2080_v12, %v11997_v41  ;;  %v11672_v45 = vld [vmem:[%s14510_s1 + $0x1330] sm:$0xff]   ;;  %v11676_v54 = vld [vmem:[%s14510_s1 + $0x1338] sm:$0xff]  }
 0x25a   :  { %10745 = vmatprep.subr.bf16.mxu1 %v11641_v50  ;;  %v10445_v1 = vpop.f32.mrb[47].mxu1  ;;  %v11681_v61 = vld [vmem:[%s14510_s1 + $0x1400] sm:$0xff]   ;;  %v11695_v12 = vld [vmem:[%s14510_s1 + $0x1498] sm:$0xff]  }
 0x25b   :  { %v13874_v62 = vadd.f32 %v10443_v59, %v7950_v58  ;;  %10724 = vmatpush3.bf16.msra.mxu0 %v11640_v48  ;;  %v2112_v20 = vcombine.high %v2108_v17, %v2108_v17  ;;  %v11679_v58 = vld [vmem:[%s14510_s1 + $0x13b8] sm:$0xff]   ;;  %v2094_v59 = vrot.slane %v13891_v8, %v11997_v41  ;;  %v11684_v1 = vld [vmem:[%s14510_s1 + $0x1448] sm:$0xff]   ;;  %v11691_v8 = vld [vmem:[%s14510_s1 + $0x1490] sm:$0xff]  }
 0x25c   :  { %10725 = vmatprep.subr.bf16.mxu0 %v11643_v57  ;;  %v11677_v57 = vld [vmem:[%s14510_s1 + $0x13f8] sm:$0xff]  }
 0x25d   :  { %10746 = vmatpush3.bf16.msra.mxu1 %v11642_v56  ;;  %v2110_v0 = vcombine.high %v2094_v59, %v2094_v59 }
 0x25e   :  { %10747 = vmatprep.subr.bf16.mxu1 %v11645_v63  ;;  %v11683_v63 = vld [vmem:[%s14510_s1 + $0x1480] sm:$0xff]  }
 0x25f   :  { %10726 = vmatpush3.bf16.msra.mxu0 %v11644_v60  ;;  %v11680_v60 = vld [vmem:[%s14510_s1 + $0x1440] sm:$0xff]  }
 0x260   :  { %10755 = vmatprep.subr.bf16.mxu0 %v11647_v5  ;;  %v11688_v5 = vld [vmem:[%s14510_s1 + $0x1450] sm:$0xff]  }
 0x261   :  { %10748 = vmatpush3.bf16.msra.mxu1 %v11646_v3  ;;  %v11686_v3 = vld [vmem:[%s14510_s1 + $0x14c8] sm:$0xff]  }
 0x262   :  { %10777 = vmatprep.subr.bf16.mxu1 %v11649_v9  ;;  %8508 = vmatmul.mubr.bf16.vlgmr.msra.gmra.mrb[72].mxu0 %v2087_v7  ;;  %v11690_v7 = vld [vmem:[%s14510_s1 + $0x14d0] sm:$0xff]   ;;  %v11692_v9 = vld [vmem:[%s14510_s1 + $0x1458] sm:$0xff]  }
 0x263   :  { %10756 = vmatpush3.bf16.msra.mxu0 %v11648_v11  ;;  %8587 = vmatprep.mubr.bf16.mxu0 %v2108_v17  ;;  %v11694_v11 = vld [vmem:[%s14510_s1 + $0x14d8] sm:$0xff]   ;;  %v11700_v17 = vld [vmem:[%s14510_s1 + $0x1468] sm:$0xff]  }
 0x264   :  { %8548 = vmatmul.mubr.bf16.vlgmr.msra.gmra.mrb[72].mxu1 %v2109_v13  ;;  %10757 = vmatprep.subr.bf16.mxu0 %v11651_v14  ;;  %v11696_v13 = vld [vmem:[%s14510_s1 + $0x1460] sm:$0xff]  }
 0x265   :  { %10778 = vmatpush3.bf16.msra.mxu1 %v11650_v16  ;;  %8627 = vmatprep.mubr.bf16.mxu1 %v2112_v20  ;;  %v11697_v14 = vld [vmem:[%s14510_s1 + $0x1420] sm:$0xff]   ;;  %v11703_v20 = vld [vmem:[%s14510_s1 + $0x14a8] sm:$0xff]  }
 0x266   :  { %10779 = vmatprep.subr.bf16.mxu1 %v11653_v18  ;;  %v11699_v16 = vld [vmem:[%s14510_s1 + $0x14a0] sm:$0xff]   ;;  %v11701_v18 = vld [vmem:[%s14510_s1 + $0x1428] sm:$0xff]  }
 0x267   :  { %10758 = vmatpush3.bf16.msra.mxu0 %v11652_v19  ;;  %v11702_v19 = vld [vmem:[%s14510_s1 + $0x14e8] sm:$0xff]  }
 0x268   :  { %10759 = vmatprep.subr.bf16.mxu0 %v11655_v21 }
 0x269   :  { %10780 = vmatpush3.bf16.msra.mxu1 %v11654_v22  ;;  %v11704_v22 = vld [vmem:[%s14510_s1 + $0x1470] sm:$0xff]  }
 0x26a   :  { %10781 = vmatprep.subr.bf16.mxu1 %v11657_v23 }
 0x26b   :  { %10760 = vmatpush3.bf16.msra.mxu0 %v11656_v24  ;;  %v11705_v24 = vld [vmem:[%s14510_s1 + $0x1430] sm:$0xff]  }
 0x26c   :  { %10761 = vmatprep.subr.bf16.mxu0 %v11659_v25 }
 0x26d   :  { %10782 = vmatpush3.bf16.msra.mxu1 %v11658_v26 }
 0x26e   :  { %10783 = vmatprep.subr.bf16.mxu1 %v11661_v27 }
 0x26f   :  { %10762 = vmatpush3.bf16.msra.mxu0 %v11660_v28 }
 0x270   :  { %10763 = vmatprep.subr.bf16.mxu0 %v11663_v29 }
 0x271   :  { %10784 = vmatpush3.bf16.msra.mxu1 %v11662_v30  ;;  %v11706_v30 = vld [vmem:[%s14510_s1 + $0x14f0] sm:$0xff]  }
 0x272   :  { %10785 = vmatprep.subr.bf16.mxu1 %v11665_v31  ;;  %v11707_v31 = vld [vmem:[%s14510_s1 + $0x14b0] sm:$0xff]  }
 0x273   :  { %10764 = vmatpush3.bf16.msra.mxu0 %v11664_v32 }
 0x274   :  { %10765 = vmatprep.subr.bf16.mxu0 %v11667_v33 }
 0x275   :  { %v10463_v37 = vpop.f32.mrb[48].mxu0  ;;  %10786 = vmatpush3.bf16.msra.mxu1 %v11666_v34  ;;  %v11708_v34 = vld [vmem:[%s14510_s1 + $0x1478] sm:$0xff]  }
 0x276   :  { %v10464_v39 = vpop.f32.mrb[49].mxu0  ;;  %10787 = vmatprep.subr.bf16.mxu1 %v11669_v35 }
 0x277   :  { %v10465_v42 = vadd.f32 %v10464_v39, %v10463_v37  ;;  %v10466_v43 = vpop.f32.mrb[50].mxu0  ;;  %v10485_v44 = vpop.f32.mrb[48].mxu1  ;;  %10766 = vmatpush3.bf16.msra.mxu0 %v11668_v36  ;;  %v11709_v37 = vld [vmem:[%s14510_s1 + $0x1438] sm:$0xff]  }
 0x278   :  { %v10467_v47 = vpop.f32.mrb[51].mxu0  ;;  %v10486_v48 = vpop.f32.mrb[49].mxu1  ;;  %10767 = vmatprep.subr.bf16.mxu0 %v11671_v38  ;;  %v11710_v39 = vld [vmem:[%s14510_s1 + $0x14f8] sm:$0xff]  }
 0x279   :  { %v8030_v50 = vadd.f32 %v10465_v42, %v13874_v62  ;;  %v10487_v51 = vadd.f32 %v10486_v48, %v10485_v44  ;;  %v10488_v53 = vpop.f32.mrb[50].mxu1  ;;  %10788 = vmatpush3.bf16.msra.mxu1 %v11670_v40  ;;  %v11682_v62 = vld [vmem:[%s14510_s1 + $0x14c0] sm:$0xff]   ;;  %v32_v40 = vld [vmem:[%s14509_s0 + $0x50] sm:$0xff]  ;;  %v11711_v43 = vld [vmem:[%s14510_s1 + $0x14b8] sm:$0xff]  }
 0x27a   :  { %v10489_v55 = vpop.f32.mrb[51].mxu1  ;;  %10789 = vmatprep.subr.bf16.mxu1 %v11673_v46  ;;  %v2120_v42 = vrot.slane %v32_v40, %v11997_v41  ;;  %v2113_v44 = vcombine.high %v32_v40, %v32_v40  ;;  %v11713_v48 = vld [vmem:[%s14510_s1 + $0x1500] sm:$0xff]   ;;  %v11749_v40 = vld [vmem:[%s14510_s1 + $0x1648] sm:$0xff]  }
 0x27b   :  { %v13985_v56 = vadd.f32 %v10487_v51, %v8030_v50  ;;  %10768 = vmatpush3.bf16.msra.mxu0 %v11672_v45  ;;  %v11712_v45 = vld [vmem:[%s14510_s1 + $0x1540] sm:$0xff]   ;;  %v11716_v55 = vld [vmem:[%s14510_s1 + $0x1548] sm:$0xff]  }
 0x27c   :  { %10769 = vmatprep.subr.bf16.mxu0 %v11675_v52  ;;  %v2128_v46 = vcombine.high %v2120_v42, %v2120_v42  ;;  %v2136_v47 = vrot.slane %v2120_v42, %v11997_v41  ;;  %v11714_v50 = vld [vmem:[%s14510_s1 + $0x15c0] sm:$0xff]   ;;  %v11750_v42 = vld [vmem:[%s14510_s1 + $0x1608] sm:$0xff]  }
 0x27d   :  { %10790 = vmatpush3.bf16.msra.mxu1 %v11674_v49  ;;  %v14106_v49 = vrot.slane %v2113_v44, %v11997_v41  ;;  %v11715_v52 = vld [vmem:[%s14510_s1 + $0x1580] sm:$0xff]   ;;  %v11752_v44 = vld [vmem:[%s14510_s1 + $0x1688] sm:$0xff]  }
 0x27e   :  { %10791 = vmatprep.subr.bf16.mxu1 %v11677_v57  ;;  %v2150_v51 = vrot.slane %v2128_v46, %v11997_v41  ;;  %v11717_v57 = vld [vmem:[%s14510_s1 + $0x1508] sm:$0xff]   ;;  %v11754_v46 = vld [vmem:[%s14510_s1 + $0x1610] sm:$0xff]  }
 0x27f   :  { %10770 = vmatpush3.bf16.msra.mxu0 %v11676_v54  ;;  %v2129_v53 = vcombine.high %v14106_v49, %v14106_v49  ;;  %v2158_v54 = vcombine.high %v2136_v47, %v2136_v47 }
 0x280   :  { %10799 = vmatprep.subr.bf16.mxu0 %v11680_v60  ;;  %v11719_v60 = vld [vmem:[%s14510_s1 + $0x1588] sm:$0xff]  }
 0x281   :  { %10792 = vmatpush3.bf16.msra.mxu1 %v11679_v58  ;;  %v2157_v58 = vrot.slane %v2129_v53, %v11997_v41  ;;  %v11761_v53 = vld [vmem:[%s14510_s1 + $0x1660] sm:$0xff]  }
 0x282   :  { %8588 = vmatmul.mubr.bf16.vlgmr.msra.gmra.mrb[76].mxu0 %v2094_v59  ;;  %10821 = vmatprep.subr.bf16.mxu1 %v11682_v62  ;;  %v11718_v59 = vld [vmem:[%s14510_s1 + $0x15c8] sm:$0xff]   ;;  %v11720_v62 = vld [vmem:[%s14510_s1 + $0x1550] sm:$0xff]  }
 0x283   :  { %10800 = vmatpush3.bf16.msra.mxu0 %v11681_v61  ;;  %8667 = vmatprep.mubr.bf16.mxu0 %v2150_v51  ;;  %v2161_v61 = vcombine.high %v2157_v58, %v2157_v58 }
 0x284   :  { %8628 = vmatmul.mubr.bf16.vlgmr.msra.gmra.mrb[76].mxu1 %v2110_v0  ;;  %10801 = vmatprep.subr.bf16.mxu0 %v11684_v1  ;;  %v11722_v0 = vld [vmem:[%s14510_s1 + $0x15d0] sm:$0xff]  }
 0x285   :  { %10822 = vmatpush3.bf16.msra.mxu1 %v11683_v63  ;;  %v11721_v63 = vld [vmem:[%s14510_s1 + $0x1510] sm:$0xff]  }
 0x286   :  { %10823 = vmatprep.subr.bf16.mxu1 %v11686_v3  ;;  %v11723_v1 = vld [vmem:[%s14510_s1 + $0x1590] sm:$0xff]   ;;  %v11725_v3 = vld [vmem:[%s14510_s1 + $0x1518] sm:$0xff]  }
 0x287   :  { %10802 = vmatpush3.bf16.msra.mxu0 %v11685_v2  ;;  %v11724_v2 = vld [vmem:[%s14510_s1 + $0x1558] sm:$0xff]  }
 0x288   :  { %10803 = vmatprep.subr.bf16.mxu0 %v11688_v5  ;;  %v11727_v5 = vld [vmem:[%s14510_s1 + $0x1598] sm:$0xff]  }
 0x289   :  { %10824 = vmatpush3.bf16.msra.mxu1 %v11687_v4  ;;  %v11726_v4 = vld [vmem:[%s14510_s1 + $0x15d8] sm:$0xff]  }
 0x28a   :  { %10825 = vmatprep.subr.bf16.mxu1 %v11690_v7  ;;  %v11729_v7 = vld [vmem:[%s14510_s1 + $0x1520] sm:$0xff]  }
 0x28b   :  { %10804 = vmatpush3.bf16.msra.mxu0 %v11689_v6  ;;  %v11728_v6 = vld [vmem:[%s14510_s1 + $0x1560] sm:$0xff]  }
 0x28c   :  { %10805 = vmatprep.subr.bf16.mxu0 %v11692_v9  ;;  %v11731_v9 = vld [vmem:[%s14510_s1 + $0x15a0] sm:$0xff]  }
 0x28d   :  { %10826 = vmatpush3.bf16.msra.mxu1 %v11691_v8  ;;  %v11730_v8 = vld [vmem:[%s14510_s1 + $0x15e0] sm:$0xff]  }
 0x28e   :  { %10827 = vmatprep.subr.bf16.mxu1 %v11694_v11  ;;  %v11733_v11 = vld [vmem:[%s14510_s1 + $0x1528] sm:$0xff]  }
 0x28f   :  { %10806 = vmatpush3.bf16.msra.mxu0 %v11693_v10  ;;  %v11732_v10 = vld [vmem:[%s14510_s1 + $0x1568] sm:$0xff]  }
 0x290   :  { %10807 = vmatprep.subr.bf16.mxu0 %v11696_v13 }
 0x291   :  { %10828 = vmatpush3.bf16.msra.mxu1 %v11695_v12  ;;  %v11734_v12 = vld [vmem:[%s14510_s1 + $0x15e8] sm:$0xff]  }
 0x292   :  { %10829 = vmatprep.subr.bf16.mxu1 %v11698_v15 }
 0x293   :  { %10808 = vmatpush3.bf16.msra.mxu0 %v11697_v14  ;;  %v11735_v14 = vld [vmem:[%s14510_s1 + $0x15a8] sm:$0xff]  }
 0x294   :  { %10809 = vmatprep.subr.bf16.mxu0 %v11700_v17 }
 0x295   :  { %v10507_v21 = vpop.f32.mrb[52].mxu0  ;;  %10830 = vmatpush3.bf16.msra.mxu1 %v11699_v16  ;;  %v11736_v16 = vld [vmem:[%s14510_s1 + $0x1570] sm:$0xff]  }
 0x296   :  { %v10508_v23 = vpop.f32.mrb[53].mxu0  ;;  %10831 = vmatprep.subr.bf16.mxu1 %v11702_v19 }
 0x297   :  { %v10509_v25 = vadd.f32 %v10508_v23, %v10507_v21  ;;  %v10510_v26 = vpop.f32.mrb[54].mxu0  ;;  %v10529_v27 = vpop.f32.mrb[52].mxu1  ;;  %10810 = vmatpush3.bf16.msra.mxu0 %v11701_v18  ;;  %v11738_v21 = vld [vmem:[%s14510_s1 + $0x15f0] sm:$0xff]  }
 0x298   :  { %v10511_v28 = vpop.f32.mrb[55].mxu0  ;;  %v10530_v29 = vpop.f32.mrb[53].mxu1  ;;  %10811 = vmatprep.subr.bf16.mxu0 %v11704_v22  ;;  %v11739_v26 = vld [vmem:[%s14510_s1 + $0x15b0] sm:$0xff]  }
 0x299   :  { %v8110_v32 = vadd.f32 %v10509_v25, %v13985_v56  ;;  %v10531_v33 = vadd.f32 %v10530_v29, %v10529_v27  ;;  %10832 = vmatpush3.bf16.msra.mxu1 %v11703_v20  ;;  %v10532_v35 = vpop.f32.mrb[54].mxu1  ;;  %v2160_v56 = vcombine.high %v2150_v51, %v2150_v51  ;;  %v11737_v20 = vld [vmem:[%s14510_s1 + $0x1530] sm:$0xff]   ;;  %v11740_v28 = vld [vmem:[%s14510_s1 + $0x1578] sm:$0xff]  }
 0x29a   :  { %10833 = vmatprep.subr.bf16.mxu1 %v11706_v30  ;;  %v10533_v38 = vpop.f32.mrb[55].mxu1  ;;  %v11745_v35 = vld [vmem:[%s14510_s1 + $0x1640] sm:$0xff]   ;;  %v11759_v51 = vld [vmem:[%s14510_s1 + $0x16d8] sm:$0xff]  }
 0x29b   :  { %v14083_v36 = vadd.f32 %v10531_v33, %v8110_v32  ;;  %10812 = vmatpush3.bf16.msra.mxu0 %v11705_v24  ;;  %8707 = vmatprep.mubr.bf16.mxu1 %v2160_v56  ;;  %v11742_v32 = vld [vmem:[%s14510_s1 + $0x15f8] sm:$0xff]   ;;  %v11748_v38 = vld [vmem:[%s14510_s1 + $0x1680] sm:$0xff]  }
 0x29c   :  { %10813 = vmatprep.subr.bf16.mxu0 %v11708_v34  ;;  %v11744_v33 = vld [vmem:[%s14510_s1 + $0x15b8] sm:$0xff]   ;;  %v2143_v34 = vrot.slane %v14106_v49, %v11997_v41  ;;  %v11764_v56 = vld [vmem:[%s14510_s1 + $0x16a0] sm:$0xff]  }
 0x29d   :  { %10834 = vmatpush3.bf16.msra.mxu1 %v11707_v31  ;;  %v11741_v31 = vld [vmem:[%s14510_s1 + $0x1538] sm:$0xff]  }
 0x29e   :  { %10835 = vmatprep.subr.bf16.mxu1 %v11710_v39  ;;  %v2159_v39 = vcombine.high %v2143_v34, %v2143_v34  ;;  %v11757_v49 = vld [vmem:[%s14510_s1 + $0x1658] sm:$0xff]  }
 0x29f   :  { %10814 = vmatpush3.bf16.msra.mxu0 %v11709_v37  ;;  %v11747_v37 = vld [vmem:[%s14510_s1 + $0x16c0] sm:$0xff]  }
 0x2a0   :  { %10843 = vmatprep.subr.bf16.mxu0 %v11712_v45  ;;  %v11753_v45 = vld [vmem:[%s14510_s1 + $0x1650] sm:$0xff]  }
 0x2a1   :  { %10836 = vmatpush3.bf16.msra.mxu1 %v11711_v43  ;;  %v11751_v43 = vld [vmem:[%s14510_s1 + $0x16c8] sm:$0xff]  }
 0x2a2   :  { %10865 = vmatprep.subr.bf16.mxu1 %v11714_v50  ;;  %8668 = vmatmul.mubr.bf16.vlgmr.msra.gmra.mrb[80].mxu0 %v2136_v47  ;;  %v11755_v47 = vld [vmem:[%s14510_s1 + $0x16d0] sm:$0xff]   ;;  %v11758_v50 = vld [vmem:[%s14510_s1 + $0x1618] sm:$0xff]  }
 0x2a3   :  { %10844 = vmatpush3.bf16.msra.mxu0 %v11713_v48  ;;  %8747 = vmatprep.mubr.bf16.mxu0 %v2157_v58  ;;  %v11756_v48 = vld [vmem:[%s14510_s1 + $0x1690] sm:$0xff]   ;;  %v11766_v58 = vld [vmem:[%s14510_s1 + $0x1628] sm:$0xff]  }
 0x2a4   :  { %8708 = vmatmul.mubr.bf16.vlgmr.msra.gmra.mrb[80].mxu1 %v2158_v54  ;;  %10845 = vmatprep.subr.bf16.mxu0 %v11716_v55  ;;  %v11762_v54 = vld [vmem:[%s14510_s1 + $0x1620] sm:$0xff]  }
 0x2a5   :  { %10866 = vmatpush3.bf16.msra.mxu1 %v11715_v52  ;;  %8787 = vmatprep.mubr.bf16.mxu1 %v2161_v61  ;;  %v11760_v52 = vld [vmem:[%s14510_s1 + $0x1698] sm:$0xff]   ;;  %v11763_v55 = vld [vmem:[%s14510_s1 + $0x16e0] sm:$0xff]   ;;  %v11768_v61 = vld [vmem:[%s14510_s1 + $0x16a8] sm:$0xff]  }
 0x2a6   :  { %10867 = vmatprep.subr.bf16.mxu1 %v11718_v59  ;;  %v11767_v59 = vld [vmem:[%s14510_s1 + $0x16e8] sm:$0xff]  }
 0x2a7   :  { %10846 = vmatpush3.bf16.msra.mxu0 %v11717_v57  ;;  %v11765_v57 = vld [vmem:[%s14510_s1 + $0x1668] sm:$0xff]  }
 0x2a8   :  { %10847 = vmatprep.subr.bf16.mxu0 %v11720_v62 }
 0x2a9   :  { %10868 = vmatpush3.bf16.msra.mxu1 %v11719_v60 }
 0x2aa   :  { %10869 = vmatprep.subr.bf16.mxu1 %v11722_v0 }
 0x2ab   :  { %10848 = vmatpush3.bf16.msra.mxu0 %v11721_v63  ;;  %v11769_v63 = vld [vmem:[%s14510_s1 + $0x1670] sm:$0xff]  }
 0x2ac   :  { %10849 = vmatprep.subr.bf16.mxu0 %v11724_v2 }
 0x2ad   :  { %10870 = vmatpush3.bf16.msra.mxu1 %v11723_v1 }
 0x2ae   :  { %10871 = vmatprep.subr.bf16.mxu1 %v11726_v4 }
 0x2af   :  { %10850 = vmatpush3.bf16.msra.mxu0 %v11725_v3 }
 0x2b0   :  { %10851 = vmatprep.subr.bf16.mxu0 %v11728_v6  ;;  %v11771_v6 = vld [vmem:[%s14510_s1 + $0x16f0] sm:$0xff]  }
 0x2b1   :  { %10872 = vmatpush3.bf16.msra.mxu1 %v11727_v5  ;;  %v11770_v5 = vld [vmem:[%s14510_s1 + $0x1630] sm:$0xff]  }
 0x2b2   :  { %10873 = vmatprep.subr.bf16.mxu1 %v11730_v8 }
 0x2b3   :  { %10852 = vmatpush3.bf16.msra.mxu0 %v11729_v7 }
 0x2b4   :  { %10853 = vmatprep.subr.bf16.mxu0 %v11732_v10 }
 0x2b5   :  { %v10551_v13 = vpop.f32.mrb[56].mxu0  ;;  %10874 = vmatpush3.bf16.msra.mxu1 %v11731_v9  ;;  %v11772_v9 = vld [vmem:[%s14510_s1 + $0x16b0] sm:$0xff]  }
 0x2b6   :  { %v10552_v15 = vpop.f32.mrb[57].mxu0  ;;  %10875 = vmatprep.subr.bf16.mxu1 %v11734_v12  ;;  %v11773_v12 = vld [vmem:[%s14510_s1 + $0x1678] sm:$0xff]  }
 0x2b7   :  { %v10553_v17 = vadd.f32 %v10552_v15, %v10551_v13  ;;  %v10554_v18 = vpop.f32.mrb[58].mxu0  ;;  %v10573_v19 = vpop.f32.mrb[56].mxu1  ;;  %10854 = vmatpush3.bf16.msra.mxu0 %v11733_v11  ;;  %v11775_v15 = vld [vmem:[%s14510_s1 + $0x16f8] sm:$0xff]  }
 0x2b8   :  { %v10555_v22 = vpop.f32.mrb[59].mxu0  ;;  %v10574_v23 = vpop.f32.mrb[57].mxu1  ;;  %10855 = vmatprep.subr.bf16.mxu0 %v11736_v16  ;;  %v33_v16 = vld [vmem:[%s14509_s0 + $0x58] sm:$0xff] }
 0x2b9   :  { %v8190_v24 = vadd.f32 %v10553_v17, %v14083_v36  ;;  %v10575_v25 = vadd.f32 %v10574_v23, %v10573_v19  ;;  %v10576_v27 = vpop.f32.mrb[58].mxu1  ;;  %10876 = vmatpush3.bf16.msra.mxu1 %v11735_v14  ;;  %v11746_v36 = vld [vmem:[%s14510_s1 + $0x1600] sm:$0xff]   ;;  %v11774_v14 = vld [vmem:[%s14510_s1 + $0x1638] sm:$0xff]   ;;  %v2169_v17 = vrot.slane %v33_v16, %v11997_v41  ;;  %v2162_v19 = vcombine.high %v33_v16, %v33_v16  ;;  %v11814_v16 = vld [vmem:[%s14510_s1 + $0x1850] sm:$0xff]  }
 0x2ba   :  { %v10577_v29 = vpop.f32.mrb[59].mxu1  ;;  %10877 = vmatprep.subr.bf16.mxu1 %v11738_v21  ;;  %v11776_v18 = vld [vmem:[%s14510_s1 + $0x16b8] sm:$0xff]  }
 0x2bb   :  { %v14194_v30 = vadd.f32 %v10575_v25, %v8190_v24  ;;  %10856 = vmatpush3.bf16.msra.mxu0 %v11737_v20  ;;  %v11777_v20 = vld [vmem:[%s14510_s1 + $0x1740] sm:$0xff]   ;;  %v2177_v21 = vcombine.high %v2169_v17, %v2169_v17  ;;  %v2185_v22 = vrot.slane %v2169_v17, %v11997_v41  ;;  %v14315_v23 = vrot.slane %v2162_v19, %v11997_v41  ;;  %v11781_v29 = vld [vmem:[%s14510_s1 + $0x1748] sm:$0xff]   ;;  %v11815_v17 = vld [vmem:[%s14510_s1 + $0x1810] sm:$0xff]  }
 0x2bc   :  { %10857 = vmatprep.subr.bf16.mxu0 %v11740_v28  ;;  %v11779_v24 = vld [vmem:[%s14510_s1 + $0x17c0] sm:$0xff]   ;;  %v11817_v19 = vld [vmem:[%s14510_s1 + $0x1818] sm:$0xff]  }
 0x2bd   :  { %10878 = vmatpush3.bf16.msra.mxu1 %v11739_v26  ;;  %v2199_v25 = vrot.slane %v2177_v21, %v11997_v41  ;;  %v11778_v26 = vld [vmem:[%s14510_s1 + $0x1700] sm:$0xff]   ;;  %v2178_v27 = vcombine.high %v14315_v23, %v14315_v23  ;;  %v2207_v28 = vcombine.high %v2185_v22, %v2185_v22 }
 0x2be   :  { %10879 = vmatprep.subr.bf16.mxu1 %v11742_v32  ;;  %v9125_v21 = vld.sshfl [vmem:[%s14509_s0 + $0x60] sm:$0x11 pattern:$0x75316420] }
 0x2bf   :  { %10858 = vmatpush3.bf16.msra.mxu0 %v11741_v31  ;;  %v11780_v31 = vld [vmem:[%s14510_s1 + $0x1780] sm:$0xff]   ;;  %v2206_v32 = vrot.slane %v2178_v27, %v11997_v41 }
 0x2c0   :  { %10887 = vmatprep.subr.bf16.mxu0 %v11745_v35 }
 0x2c1   :  { %10880 = vmatpush3.bf16.msra.mxu1 %v11744_v33  ;;  %v11783_v33 = vld [vmem:[%s14510_s1 + $0x17c8] sm:$0xff]   ;;  %v2210_v35 = vcombine.high %v2206_v32, %v2206_v32 }
 0x2c2   :  { %8748 = vmatmul.mubr.bf16.vlgmr.msra.gmra.mrb[84].mxu0 %v2143_v34  ;;  %10909 = vmatprep.subr.bf16.mxu1 %v11747_v37  ;;  %v11782_v34 = vld [vmem:[%s14510_s1 + $0x1708] sm:$0xff]  }
 0x2c3   :  { %10888 = vmatpush3.bf16.msra.mxu0 %v11746_v36  ;;  %8827 = vmatprep.mubr.bf16.mxu0 %v2199_v25  ;;  %v11785_v36 = vld [vmem:[%s14510_s1 + $0x1750] sm:$0xff]   ;;  %v11784_v37 = vld [vmem:[%s14510_s1 + $0x1788] sm:$0xff]  }
 0x2c4   :  { %8788 = vmatmul.mubr.bf16.vlgmr.msra.gmra.mrb[84].mxu1 %v2159_v39  ;;  %10889 = vmatprep.subr.bf16.mxu0 %v11749_v40  ;;  %v11786_v39 = vld [vmem:[%s14510_s1 + $0x1710] sm:$0xff]   ;;  %v11789_v40 = vld [vmem:[%s14510_s1 + $0x1758] sm:$0xff]  }
 0x2c5   :  { %10910 = vmatpush3.bf16.msra.mxu1 %v11748_v38  ;;  %v11787_v38 = vld [vmem:[%s14510_s1 + $0x17d0] sm:$0xff]  }
 0x2c6   :  { %10911 = vmatprep.subr.bf16.mxu1 %v11751_v43  ;;  %v11791_v43 = vld [vmem:[%s14510_s1 + $0x17d8] sm:$0xff]  }
 0x2c7   :  { %10890 = vmatpush3.bf16.msra.mxu0 %v11750_v42  ;;  %v11788_v42 = vld [vmem:[%s14510_s1 + $0x1790] sm:$0xff]  }
 0x2c8   :  { %10891 = vmatprep.subr.bf16.mxu0 %v11753_v45  ;;  %v11793_v45 = vld [vmem:[%s14510_s1 + $0x1760] sm:$0xff]  }
 0x2c9   :  { %10912 = vmatpush3.bf16.msra.mxu1 %v11752_v44  ;;  %v11790_v44 = vld [vmem:[%s14510_s1 + $0x1718] sm:$0xff]  }
 0x2ca   :  { %10913 = vmatprep.subr.bf16.mxu1 %v11755_v47  ;;  %v11795_v47 = vld [vmem:[%s14510_s1 + $0x17e0] sm:$0xff]  }
 0x2cb   :  { %10892 = vmatpush3.bf16.msra.mxu0 %v11754_v46  ;;  %v11792_v46 = vld [vmem:[%s14510_s1 + $0x1798] sm:$0xff]  }
 0x2cc   :  { %10893 = vmatprep.subr.bf16.mxu0 %v11757_v49  ;;  %v11797_v49 = vld [vmem:[%s14510_s1 + $0x1768] sm:$0xff]  }
 0x2cd   :  { %10914 = vmatpush3.bf16.msra.mxu1 %v11756_v48  ;;  %v11794_v48 = vld [vmem:[%s14510_s1 + $0x1720] sm:$0xff]  }
 0x2ce   :  { %10915 = vmatprep.subr.bf16.mxu1 %v11759_v51 }
 0x2cf   :  { %10894 = vmatpush3.bf16.msra.mxu0 %v11758_v50  ;;  %v11796_v50 = vld [vmem:[%s14510_s1 + $0x17a0] sm:$0xff]  }
 0x2d0   :  { %10895 = vmatprep.subr.bf16.mxu0 %v11761_v53 }
 0x2d1   :  { %10916 = vmatpush3.bf16.msra.mxu1 %v11760_v52  ;;  %v11799_v52 = vld [vmem:[%s14510_s1 + $0x17e8] sm:$0xff]  }
 0x2d2   :  { %10917 = vmatprep.subr.bf16.mxu1 %v11763_v55 }
 0x2d3   :  { %10896 = vmatpush3.bf16.msra.mxu0 %v11762_v54  ;;  %v11798_v54 = vld [vmem:[%s14510_s1 + $0x1728] sm:$0xff]  }
 0x2d4   :  { %10897 = vmatprep.subr.bf16.mxu0 %v11765_v57 }
 0x2d5   :  { %v10595_v60 = vpop.f32.mrb[60].mxu0  ;;  %10918 = vmatpush3.bf16.msra.mxu1 %v11764_v56 }
 0x2d6   :  { %v10596_v62 = vpop.f32.mrb[61].mxu0  ;;  %10919 = vmatprep.subr.bf16.mxu1 %v11767_v59  ;;  %v11801_v59 = vld [vmem:[%s14510_s1 + $0x1770] sm:$0xff]  }
 0x2d7   :  { %v10597_v0 = vadd.f32 %v10596_v62, %v10595_v60  ;;  %v10598_v1 = vpop.f32.mrb[62].mxu0  ;;  %v10617_v2 = vpop.f32.mrb[60].mxu1  ;;  %10898 = vmatpush3.bf16.msra.mxu0 %v11766_v58  ;;  %v11800_v58 = vld [vmem:[%s14510_s1 + $0x17a8] sm:$0xff]  }
 0x2d8   :  { %v10599_v3 = vpop.f32.mrb[63].mxu0  ;;  %v10618_v4 = vpop.f32.mrb[61].mxu1  ;;  %10899 = vmatprep.subr.bf16.mxu0 %v11769_v63 }
 0x2d9   :  { %v8270_v7 = vadd.f32 %v10597_v0, %v14194_v30  ;;  %v10619_v8 = vadd.f32 %v10618_v4, %v10617_v2  ;;  %v10620_v10 = vpop.f32.mrb[62].mxu1  ;;  %10920 = vmatpush3.bf16.msra.mxu1 %v11768_v61  ;;  %v2209_v30 = vcombine.high %v2199_v25, %v2199_v25  ;;  %v11803_v0 = vld [vmem:[%s14510_s1 + $0x17f0] sm:$0xff]  }
 0x2da   :  { %v10621_v13 = vpop.f32.mrb[63].mxu1  ;;  %10921 = vmatprep.subr.bf16.mxu1 %v11771_v6  ;;  %v11802_v2 = vld [vmem:[%s14510_s1 + $0x1730] sm:$0xff]   ;;  %v11810_v10 = vld [vmem:[%s14510_s1 + $0x1840] sm:$0xff]  }
 0x2db   :  { %v14292_v11 = vadd.f32 %v10619_v8, %v8270_v7  ;;  %10900 = vmatpush3.bf16.msra.mxu0 %v11770_v5  ;;  %8867 = vmatprep.mubr.bf16.mxu1 %v2209_v30  ;;  %v11805_v5 = vld [vmem:[%s14510_s1 + $0x1778] sm:$0xff]   ;;  %v11804_v6 = vld [vmem:[%s14510_s1 + $0x17b0] sm:$0xff]  }
 0x2dc   :  { %10901 = vmatprep.subr.bf16.mxu0 %v11773_v12  ;;  %v11807_v7 = vld [vmem:[%s14510_s1 + $0x17f8] sm:$0xff]   ;;  %v11811_v12 = vld [vmem:[%s14510_s1 + $0x1800] sm:$0xff]  }
 0x2dd   :  { %10922 = vmatpush3.bf16.msra.mxu1 %v11772_v9  ;;  %v11806_v8 = vld [vmem:[%s14510_s1 + $0x1738] sm:$0xff]   ;;  %v2192_v9 = vrot.slane %v14315_v23, %v11997_v41  ;;  %v2218_v23 = vcombine.high %v9125_v21, %v9125_v21 }
 0x2de   :  { %10923 = vmatprep.subr.bf16.mxu1 %v11775_v15  ;;  %v11813_v15 = vld [vmem:[%s14510_s1 + $0x1808] sm:$0xff]  }
 0x2df   :  { %10902 = vmatpush3.bf16.msra.mxu0 %v11774_v14  ;;  %v2208_v13 = vcombine.high %v2192_v9, %v2192_v9  ;;  %v11812_v14 = vld [vmem:[%s14510_s1 + $0x1848] sm:$0xff]   ;;  %v2232_v25 = vrot.slane %v2218_v23, %v11997_v41 }
 0x2e0   :  { %10931 = vmatprep.subr.bf16.mxu0 %v11777_v20  ;;  %v11818_v20 = vld [vmem:[%s14510_s1 + $0x1860] sm:$0xff]  }
 0x2e1   :  { %10924 = vmatpush3.bf16.msra.mxu1 %v11776_v18  ;;  %v11816_v18 = vld [vmem:[%s14510_s1 + $0x1858] sm:$0xff]  }
 0x2e2   :  { %10953 = vmatprep.subr.bf16.mxu1 %v11779_v24  ;;  %8828 = vmatmul.mubr.bf16.vlgmr.msra.gmra.mrb[88].mxu0 %v2185_v22  ;;  %v11819_v22 = vld [vmem:[%s14510_s1 + $0x1820] sm:$0xff]   ;;  %v11820_v24 = vld [vmem:[%s14510_s1 + $0x1868] sm:$0xff]  }
 0x2e3   :  { %10932 = vmatpush3.bf16.msra.mxu0 %v11778_v26  ;;  %8907 = vmatprep.mubr.bf16.mxu0 %v2206_v32 }
 0x2e4   :  { %8868 = vmatmul.mubr.bf16.vlgmr.msra.gmra.mrb[88].mxu1 %v2207_v28  ;;  %10933 = vmatprep.subr.bf16.mxu0 %v11781_v29 }
 0x2e5   :  { %10954 = vmatpush3.bf16.msra.mxu1 %v11780_v31  ;;  %8947 = vmatprep.mubr.bf16.mxu1 %v2210_v35 }
 0x2e6   :  { %10955 = vmatprep.subr.bf16.mxu1 %v11783_v33 }
 0x2e7   :  { %10934 = vmatpush3.bf16.msra.mxu0 %v11782_v34 }
 0x2e8   :  { %10935 = vmatprep.subr.bf16.mxu0 %v11785_v36 }
 0x2e9   :  { %10956 = vmatpush3.bf16.msra.mxu1 %v11784_v37 }
 0x2ea   :  { %10957 = vmatprep.subr.bf16.mxu1 %v11787_v38 }
 0x2eb   :  { %10936 = vmatpush3.bf16.msra.mxu0 %v11786_v39 }
 0x2ec   :  { %10937 = vmatprep.subr.bf16.mxu0 %v11789_v40 }
 0x2ed   :  { %10958 = vmatpush3.bf16.msra.mxu1 %v11788_v42 }
 0x2ee   :  { %10959 = vmatprep.subr.bf16.mxu1 %v11791_v43 }
 0x2ef   :  { %10938 = vmatpush3.bf16.msra.mxu0 %v11790_v44 }
 0x2f0   :  { %10939 = vmatprep.subr.bf16.mxu0 %v11793_v45 }
 0x2f1   :  { %10960 = vmatpush3.bf16.msra.mxu1 %v11792_v46 }
 0x2f2   :  { %10961 = vmatprep.subr.bf16.mxu1 %v11795_v47 }
 0x2f3   :  { %10940 = vmatpush3.bf16.msra.mxu0 %v11794_v48 }
 0x2f4   :  { %10941 = vmatprep.subr.bf16.mxu0 %v11797_v49 }
 0x2f5   :  { %v10639_v51 = vpop.f32.mrb[64].mxu0  ;;  %10962 = vmatpush3.bf16.msra.mxu1 %v11796_v50 }
 0x2f6   :  { %v10640_v53 = vpop.f32.mrb[65].mxu0  ;;  %10963 = vmatprep.subr.bf16.mxu1 %v11799_v52 }
 0x2f7   :  { %v10641_v55 = vadd.f32 %v10640_v53, %v10639_v51  ;;  %v10642_v56 = vpop.f32.mrb[66].mxu0  ;;  %v10661_v57 = vpop.f32.mrb[64].mxu1  ;;  %10942 = vmatpush3.bf16.msra.mxu0 %v11798_v54 }
 0x2f8   :  { %v10643_v60 = vpop.f32.mrb[67].mxu0  ;;  %v10662_v61 = vpop.f32.mrb[65].mxu1  ;;  %10943 = vmatprep.subr.bf16.mxu0 %v11801_v59 }
 0x2f9   :  { %v8350_v62 = vadd.f32 %v10641_v55, %v14292_v11  ;;  %v10663_v63 = vadd.f32 %v10662_v61, %v10661_v57  ;;  %v10664_v1 = vpop.f32.mrb[66].mxu1  ;;  %10964 = vmatpush3.bf16.msra.mxu1 %v11800_v58  ;;  %v11809_v11 = vld [vmem:[%s14510_s1 + $0x17b8] sm:$0xff]  }
 0x2fa   :  { %v10665_v3 = vpop.f32.mrb[67].mxu1  ;;  %10965 = vmatprep.subr.bf16.mxu1 %v11803_v0 }
 0x2fb   :  { %v8390_v4 = vadd.f32 %v10663_v63, %v8350_v62  ;;  %10944 = vmatpush3.bf16.msra.mxu0 %v11802_v2 }
 0x2fc   :  { %10945 = vmatprep.subr.bf16.mxu0 %v11805_v5 }
 0x2fd   :  { %10966 = vmatpush3.bf16.msra.mxu1 %v11804_v6 }
 0x2fe   :  { %10967 = vmatprep.subr.bf16.mxu1 %v11807_v7 }
 0x2ff   :  { %10946 = vmatpush3.bf16.msra.mxu0 %v11806_v8 }
 0x300   :  { %10975 = vmatprep.subr.bf16.mxu0 %v11810_v10 }
 0x301   :  { %10968 = vmatpush3.bf16.msra.mxu1 %v11809_v11 }
 0x302   :  { %8908 = vmatmul.mubr.bf16.vlgmr.msra.gmra.mrb[92].mxu0 %v2192_v9 }
 0x303   :  { %10976 = vmatpush3.bf16.msra.mxu0 %v11811_v12  ;;  %8987 = vmatprep.mubr.bf16.mxu0 %v2232_v25 }
 0x304   :  { %8948 = vmatmul.mubr.bf16.vlgmr.msra.gmra.mrb[92].mxu1 %v2208_v13  ;;  %10977 = vmatprep.subr.bf16.mxu0 %v11812_v14 }
 0x307   :  { %10978 = vmatpush3.bf16.msra.mxu0 %v11813_v15 }
 0x308   :  { %10979 = vmatprep.subr.bf16.mxu0 %v11814_v16 }
 0x30b   :  { %10980 = vmatpush3.bf16.msra.mxu0 %v11815_v17 }
 0x30c   :  { %10981 = vmatprep.subr.bf16.mxu0 %v11816_v18 }
 0x30f   :  { %10982 = vmatpush3.bf16.msra.mxu0 %v11817_v19 }
 0x310   :  { %10983 = vmatprep.subr.bf16.mxu0 %v11818_v20 }
 0x315   :  { %v10683_v26 = vpop.f32.mrb[68].mxu0 }
 0x316   :  { %10 = vsyncpa [#allocation3], 0  ;;  %10984 = vmatpush3.bf16.msra.mxu0 %v11819_v22  ;;  %v10684_v27 = vpop.f32.mrb[69].mxu0  ;;  %v11821_v28 = vld [vmem:[%s14510_s1 + $0x1828] sm:$0xff]   ;;  %v11822_v32 = vld [vmem:[%s14510_s1 + $0x1870] sm:$0xff]   ;;  %v2225_v44 = vrot.slane %v9125_v21, %v11997_v41  ;;  %v11859_v5 = vmov 0.0  }
 0x317   :  { %v10685_v29 = vadd.f32 %v10684_v27, %v10683_v26  ;;  %10985 = vmatprep.subr.bf16.mxu0 %v11820_v24  ;;  %v10686_v30 = vpop.f32.mrb[70].mxu0  ;;  %v10705_v31 = vpop.f32.mrb[68].mxu1  ;;  %v11823_v38 = vld [vmem:[%s14510_s1 + $0x1830] sm:$0xff]   ;;  %v11824_v42 = vld [vmem:[%s14510_s1 + $0x1878] sm:$0xff]   ;;  %11006 = vmatprep.subr.bf16.mxu1 %v11859_v5  ;;  %v11827_v6 = vld [vmem:[%s14512_s3 + $0x8] sm:$0xff]   ;;  %vm11860_vm0 = vmmov 0  }
 0x318   :  { %v10687_v33 = vpop.f32.mrb[71].mxu0  ;;  %v10706_v34 = vpop.f32.mrb[69].mxu1  ;;  %v11825_v43 = vld [vmem:[%s14510_s1 + $0x1838] sm:$0xff]   ;;  %v11828_v7 = vld [vmem:[%s14512_s3 + $0x10] sm:$0xff]   ;;  %v11830_v9 = vld [vmem:[%s14512_s3 + $0x20] sm:$0xff]   ;;  %11022 = vmatprep.mubr.msk.bf16.mxu1 %vm11860_vm0, %v11859_v5  ;;  %s11861_s11 = smov [#allocation2]  }
 0x319   :  { %v8430_v35 = vadd.f32 %v10685_v29, %v8390_v4  ;;  %v10707_v36 = vadd.f32 %v10706_v34, %v10705_v31  ;;  %v10708_v37 = vpop.f32.mrb[70].mxu1  ;;  %v11826_v4 = vld [vmem:[%s14512_s3] sm:$0xff]   ;;  %v11829_v8 = vld [vmem:[%s14512_s3 + $0x18] sm:$0xff]   ;;  %v11831_v10 = vld [vmem:[%s14512_s3 + $0x28] sm:$0xff]   ;;  %s9116_s12 = sshll.u32 %s11861_s11, 4  ;;  %vm9108_vm1 = vcmask 74752   ;;  %s9117_s12 = int_to_ptr.vmem [resolvable:$true] %s9116_s12 }
 0x31a   :  { %10986 = vmatpush3.bf16.msra.mxu0 %v11821_v28  ;;  %v10709_v39 = vpop.f32.mrb[71].mxu1  ;;  %11007 = vmatpush3.bf16.msra.mxu1 %v11826_v4  ;;  %v11832_v16 = vld [vmem:[%s14512_s3 + $0x30] sm:$0xff]   ;;  %v11833_v24 = vld [vmem:[%s14512_s3 + $0x38] sm:$0xff]   ;;  %s11834_s0 = scalar_lea.vmem %s9117_s12, 32  ;;  %p11839_p1 = scmp.lt.s32.totalorder %s9117_s12, %s9117_s12 }
 0x31b   :  { %v8470_v40 = vadd.f32 %v10707_v36, %v8430_v35  ;;  %10987 = vmatprep.subr.bf16.mxu0 %v11822_v32  ;;  %11008 = vmatprep.subr.bf16.mxu1 %v11859_v5  ;;  %p11835_p0 = scmp.ne.s32.totalorder %s9117_s12, %s11834_s0  ;;  %p11840_p2 = scmp.lt.s32.totalorder %s11834_s0, %s11834_s0 }
 0x31d   :  { %p11841_p3 = por %p11840_p2, %p11839_p1 }
 0x31e   :  { %10988 = vmatpush3.bf16.msra.mxu0 %v11823_v38  ;;  %11009 = vmatpush3.bf16.msra.mxu1 %v11827_v6 }
 0x31f   :  { %10989 = vmatprep.subr.bf16.mxu0 %v11824_v42  ;;  %11010 = vmatprep.subr.bf16.mxu1 %v11859_v5  ;;  %p11842_p4 = pnand %p11841_p3, %p11835_p0 }
 0x322   :  { %10990 = vmatpush3.bf16.msra.mxu0 %v11825_v43  ;;  %11011 = vmatpush3.bf16.msra.mxu1 %v11828_v7 }
 0x323   :  { %11012 = vmatprep.subr.bf16.mxu1 %v11859_v5 }
 0x325   :  { %8988 = vmatmul.mubr.bf16.vlgmr.msra.gmra.mrb[96].mxu0 %v2225_v44 }
 0x326   :  { %11013 = vmatpush3.bf16.msra.mxu1 %v11829_v8 }
 0x327   :  { %11014 = vmatprep.subr.bf16.mxu1 %v11859_v5 }
 0x32a   :  { %11015 = vmatpush3.bf16.msra.mxu1 %v11830_v9 }
 0x32b   :  { %11016 = vmatprep.subr.bf16.mxu1 %v11859_v5 }
 0x32e   :  { %11017 = vmatpush3.bf16.msra.mxu1 %v11831_v10 }
 0x32f   :  { %11018 = vmatprep.subr.bf16.mxu1 %v11859_v5 }
 0x332   :  { %11019 = vmatpush3.bf16.msra.mxu1 %v11832_v16 }
 0x333   :  { %11020 = vmatprep.subr.bf16.mxu1 %v11859_v5  ;;  %v9910_v5 = vld [vmem:[%s14513_s4] ss:$0 sm:$0xff] }
 0x335   :  { %v10727_v45 = vpop.f32.mrb[72].mxu0 }
 0x336   :  { %v10728_v46 = vpop.f32.mrb[73].mxu0  ;;  %11021 = vmatpush3.bf16.msra.mxu1 %v11833_v24 }
 0x337   :  { %v10729_v47 = vadd.f32 %v10728_v46, %v10727_v45  ;;  %v10730_v48 = vpop.f32.mrb[74].mxu0  ;;  %v10749_v49 = vpop.f32.mrb[72].mxu1 }
 0x338   :  { %v10731_v50 = vpop.f32.mrb[75].mxu0  ;;  %v10750_v51 = vpop.f32.mrb[73].mxu1 }
 0x339   :  { %v8510_v52 = vadd.f32 %v10729_v47, %v8470_v40  ;;  %v10751_v53 = vadd.f32 %v10750_v51, %v10749_v49  ;;  %v10752_v54 = vpop.f32.mrb[74].mxu1 }
 0x33a   :  { %v10753_v55 = vpop.f32.mrb[75].mxu1 }
 0x33b   :  { %v8550_v56 = vadd.f32 %v10751_v53, %v8510_v52 }
 0x355   :  { %v10771_v57 = vpop.f32.mrb[76].mxu0 }
 0x356   :  { %v10772_v58 = vpop.f32.mrb[77].mxu0 }
 0x357   :  { %v10773_v59 = vadd.f32 %v10772_v58, %v10771_v57  ;;  %v10774_v60 = vpop.f32.mrb[78].mxu0  ;;  %v10793_v61 = vpop.f32.mrb[76].mxu1 }
 0x358   :  { %v10775_v41 = vpop.f32.mrb[79].mxu0  ;;  %v10794_v62 = vpop.f32.mrb[77].mxu1 }
 0x359   :  { %v8590_v63 = vadd.f32 %v10773_v59, %v8550_v56  ;;  %v10795_v0 = vadd.f32 %v10794_v62, %v10793_v61  ;;  %v10796_v1 = vpop.f32.mrb[78].mxu1 }
 0x35a   :  { %v10797_v2 = vpop.f32.mrb[79].mxu1 }
 0x35b   :  { %v8630_v3 = vadd.f32 %v10795_v0, %v8590_v63 }
 0x375   :  { %v10815_v11 = vpop.f32.mrb[80].mxu0 }
 0x376   :  { %v10816_v12 = vpop.f32.mrb[81].mxu0 }
 0x377   :  { %v10817_v13 = vadd.f32 %v10816_v12, %v10815_v11  ;;  %v10818_v14 = vpop.f32.mrb[82].mxu0  ;;  %v10837_v15 = vpop.f32.mrb[80].mxu1 }
 0x378   :  { %v10819_v17 = vpop.f32.mrb[83].mxu0  ;;  %v10838_v18 = vpop.f32.mrb[81].mxu1 }
 0x379   :  { %v8670_v19 = vadd.f32 %v10817_v13, %v8630_v3  ;;  %v10839_v20 = vadd.f32 %v10838_v18, %v10837_v15  ;;  %v10840_v21 = vpop.f32.mrb[82].mxu1 }
 0x37a   :  { %v10841_v22 = vpop.f32.mrb[83].mxu1 }
 0x37b   :  { %v8710_v23 = vadd.f32 %v10839_v20, %v8670_v19 }
 0x395   :  { %v10859_v25 = vpop.f32.mrb[84].mxu0 }
 0x396   :  { %v10860_v26 = vpop.f32.mrb[85].mxu0 }
 0x397   :  { %v10861_v27 = vadd.f32 %v10860_v26, %v10859_v25  ;;  %v10862_v28 = vpop.f32.mrb[86].mxu0  ;;  %v10881_v29 = vpop.f32.mrb[84].mxu1 }
 0x398   :  { %v10863_v30 = vpop.f32.mrb[87].mxu0  ;;  %v10882_v31 = vpop.f32.mrb[85].mxu1 }
 0x399   :  { %v8750_v32 = vadd.f32 %v10861_v27, %v8710_v23  ;;  %v10883_v33 = vadd.f32 %v10882_v31, %v10881_v29  ;;  %v10884_v34 = vpop.f32.mrb[86].mxu1 }
 0x39a   :  { %v10885_v35 = vpop.f32.mrb[87].mxu1 }
 0x39b   :  { %v8790_v36 = vadd.f32 %v10883_v33, %v8750_v32 }
 0x3b5   :  { %v10903_v37 = vpop.f32.mrb[88].mxu0 }
 0x3b6   :  { %v10904_v38 = vpop.f32.mrb[89].mxu0 }
 0x3b7   :  { %v10905_v39 = vadd.f32 %v10904_v38, %v10903_v37  ;;  %v10906_v40 = vpop.f32.mrb[90].mxu0  ;;  %v10925_v42 = vpop.f32.mrb[88].mxu1 }
 0x3b8   :  { %v10907_v43 = vpop.f32.mrb[91].mxu0  ;;  %v10926_v44 = vpop.f32.mrb[89].mxu1 }
 0x3b9   :  { %v8830_v45 = vadd.f32 %v10905_v39, %v8790_v36  ;;  %v10927_v46 = vadd.f32 %v10926_v44, %v10925_v42  ;;  %v10928_v47 = vpop.f32.mrb[90].mxu1 }
 0x3ba   :  { %v10929_v48 = vpop.f32.mrb[91].mxu1 }
 0x3bb   :  { %v8870_v49 = vadd.f32 %v10927_v46, %v8830_v45 }
 0x3d5   :  { %v10947_v50 = vpop.f32.mrb[92].mxu0 }
 0x3d6   :  { %v10948_v51 = vpop.f32.mrb[93].mxu0 }
 0x3d7   :  { %v10949_v52 = vadd.f32 %v10948_v51, %v10947_v50  ;;  %v10950_v53 = vpop.f32.mrb[94].mxu0  ;;  %v10969_v54 = vpop.f32.mrb[92].mxu1 }
 0x3d8   :  { %v10951_v55 = vpop.f32.mrb[95].mxu0  ;;  %v10970_v56 = vpop.f32.mrb[93].mxu1 }
 0x3d9   :  { %v8910_v57 = vadd.f32 %v10949_v52, %v8870_v49  ;;  %v10971_v58 = vadd.f32 %v10970_v56, %v10969_v54  ;;  %v10972_v59 = vpop.f32.mrb[94].mxu1 }
 0x3da   :  { %v10973_v60 = vpop.f32.mrb[95].mxu1 }
 0x3db   :  { %v8950_v61 = vadd.f32 %v10971_v58, %v8910_v57 }
 0x3f8   :  { %v10991_v41 = vpop.f32.mrb[96].mxu0 }
 0x3f9   :  { %v10992_v62 = vpop.f32.mrb[97].mxu0 }
 0x3fa   :  { %v10993_v63 = vadd.f32 %v10992_v62, %v10991_v41  ;;  %v10994_v0 = vpop.f32.mrb[98].mxu0 }
 0x3fb   :  { %v10995_v1 = vpop.f32.mrb[99].mxu0 }
 0x3fc   :  { %v8990_v2 = vadd.f32 %v10993_v63, %v8950_v61 }
 0x3fe   :  { %v8995_v3 = vmax.f32 %v8990_v2, 0.0 }
 0x400   :  { %v8996_v4 = vpack.c.bf16 %v8995_v3, %v8995_v3 }
 0x402   :  { %11023 = vmatmul.mubr.bf16.vlgmr.msra.gmra.mrb[96].mxu1 %v8996_v4 }
 0x4d5   :  { %v9102_v6 = vpop.f32.mrb[96].mxu1 }
 0x4d6   :  { %v9103_v7 = vadd.f32 %v9910_v5, %v9102_v6  ;;  %v11024_v8 = vpop.f32.mrb[97].mxu1 }
 0x4d7   :  { %v9105_v9 = vpop.f32.mrb[98].mxu1 }
 0x4d8   :  { %v11025_v10 = vpop.f32.mrb[99].mxu1  ;;  %9109 = vst.msk [vmem:[#allocation2] sm:$0x3] %vm9108_vm1, %v9103_v7 }
 0x4d9   :  { %11845 = shalt.err (!%p11842_p4)
}
 0x4da   :  { %s11846_s4 = scalar_lea.hbm %s14514_s5, 32 }
 0x4db   :  { %p11847_p5 = scmp.ne.s32.totalorder %s14514_s5, %s11846_s4  ;;  %p11850_p6 = scmp.lt.u32.totalorder %s11846_s4, %s14514_s5 }
 0x4dd   :  { %p11852_p7 = pnand %p11850_p6, %p11847_p5 }
 0x4df   :  { %11855 = shalt.err (!%p11852_p7)
}
 0x4e0   :  { %9119 = dma.vmem_to_hbm [thread:$0]  %s9117_s12, 32, %s14514_s5, [#allocation3]  }
 0x4e1   :  { %11856 = dma.done.wait [#allocation3], 32  }
 0x4e2   :  { %11857 = vsyncadd [#allocation3], 4294967264 }
 0x4e3   :  { %9123 = vsyncpa [#allocation3], 1 }

// kernel: convnet_forward.2
= control target key start
LH: loop header
LB: loop body
LE: loop exit
PB: predicated region body
PF: predicated region fallthrough
CT: control target
= control target key end

     0   :  { %11 = vsyncpa [#allocation5], 0  ;;  %s17797_s0 = inlined_call_operand.vmem [shape: bf16[2,1024,27], index: 0, kind: input, shape index: {}]   ;;  %s17798_s1 = inlined_call_operand.hbm [shape: bf16[27,96], index: 1, kind: input, shape index: {}]   ;;  %s17799_s2 = inlined_call_operand.hbm [shape: f32[1,96], index: 2, kind: input, shape index: {}]   ;;  %s17800_s3 = inlined_call_operand.vmem [shape: bf16[1024,96], index: 3, kind: input, shape index: {}]   ;;  %s17801_s4 = inlined_call_operand.vmem [shape: bf16[3,96,64], index: 4, kind: input, shape index: {}]   ;;  %s17802_s5 = inlined_call_operand.hbm [shape: f32[1,64], index: 5, kind: input, shape index: {}]   ;;  %s17803_s6 = inlined_call_operand.vmem [shape: bf16[2,14,14,64], index: 6, kind: output, shape index: {}]  }
   0x1   :  { %12 = vsyncpa [#allocation7], 0  ;;  %s13970_s21 = smov [#allocation6]   ;;  %s13971_s23 = smov [#allocation4]  }
   0x2   :  { %s33_s22 = sshll.u32 %s13970_s21, 4  ;;  %s20_s24 = sshll.u32 %s13971_s23, 4  ;;  %s34_s22 = int_to_ptr.vmem [resolvable:$true] %s33_s22  ;;  %s14011_s24 = int_to_ptr.vmem [resolvable:$true] %s20_s24 }
   0x3   :  { %s13900_s27 = scalar_lea.hbm %s17799_s2, 16 }
   0x4   :  { %p13901_p0 = scmp.ne.s32.totalorder %s17799_s2, %s13900_s27  ;;  %p13904_p1 = scmp.lt.u32.totalorder %s13900_s27, %s17799_s2 }
   0x6   :  { %p13906_p2 = pnand %p13904_p1, %p13901_p0 }
   0x8   :  { %13909 = shalt.err (!%p13906_p2)
}
   0x9   :  { %s13910_s8 = scalar_lea.vmem %s34_s22, 16  ;;  %s13914_s9 = scalar_lea.vmem %s34_s22, 32 }
   0xa   :  { %p13911_p3 = scmp.ne.s32.totalorder %s34_s22, %s13910_s8  ;;  %p13915_p4 = scmp.lt.s32.totalorder %s34_s22, %s34_s22 }
   0xb   :  { %p13916_p5 = scmp.lt.s32.totalorder %s13914_s9, %s13910_s8 }
   0xd   :  { %p13917_p6 = por %p13916_p5, %p13915_p4 }
   0xf   :  { %p13918_p7 = pnand %p13917_p6, %p13911_p3 }
  0x11   :  { %13921 = shalt.err (!%p13918_p7)
}
  0x12   :  { %36 = dma.hbm_to_vmem [thread:$0]  %s17799_s2, 16, %s34_s22, [#allocation7]  }
  0x13   :  { %s13922_s14 = scalar_lea.hbm %s17798_s1, 256 }
  0x14   :  { %p13923_p8 = scmp.ne.s32.totalorder %s17798_s1, %s13922_s14  ;;  %p13926_p9 = scmp.lt.u32.totalorder %s13922_s14, %s17798_s1 }
  0x16   :  { %p13928_p10 = pnand %p13926_p9, %p13923_p8 }
  0x18   :  { %13931 = shalt.err (!%p13928_p10)
}
  0x19   :  { %s13932_s19 = scalar_lea.vmem %s14011_s24, 256  ;;  %p13937_p12 = scmp.lt.s32.totalorder %s14011_s24, %s14011_s24 }
  0x1a   :  { %p13933_p11 = scmp.ne.s32.totalorder %s14011_s24, %s13932_s19  ;;  %p13938_p13 = scmp.lt.s32.totalorder %s13932_s19, %s13932_s19 }
  0x1c   :  { %p13939_p0 = por %p13938_p13, %p13937_p12 }
  0x1e   :  { %p13940_p1 = pnand %p13939_p0, %p13933_p11 }
  0x20   :  { %13943 = shalt.err (!%p13940_p1)
}
  0x21   :  { %s13972_s2 = smov 64   ;;  %s13973_s20 = smov 4  }
  0x22   :  { %26 = dma.hbm_to_vmem [thread:$0]  %s17798_s1, 256, %s14011_s24, [#allocation5], %s13972_s2, %s13972_s2, %s13973_s20  }
  0x23   :  { %s13974_s23 = smov [#allocation8]   ;;  %s13944_s28 = scalar_lea.hbm %s17802_s5, 16 }
  0x24   :  { %s47_s25 = sshll.u32 %s13974_s23, 4  ;;  %p13945_p2 = scmp.ne.s32.totalorder %s17802_s5, %s13944_s28  ;;  %s48_s25 = int_to_ptr.vmem [resolvable:$true] %s47_s25 }
  0x25   :  { %p13948_p3 = scmp.lt.u32.totalorder %s13944_s28, %s17802_s5 }
  0x27   :  { %p13950_p4 = pnand %p13948_p3, %p13945_p2 }
  0x29   :  { %13953 = shalt.err (!%p13950_p4)
}
  0x2a   :  { %s13954_s9 = scalar_lea.vmem %s48_s25, 16  ;;  %s13958_s1 = scalar_lea.vmem %s48_s25, 32 }
  0x2b   :  { %p13955_p5 = scmp.ne.s32.totalorder %s48_s25, %s13954_s9  ;;  %p13959_p6 = scmp.lt.s32.totalorder %s48_s25, %s48_s25 }
  0x2c   :  { %p13960_p7 = scmp.lt.s32.totalorder %s13958_s1, %s13954_s9 }
  0x2e   :  { %p13961_p8 = por %p13960_p7, %p13959_p6 }
  0x30   :  { %p13962_p9 = pnand %p13961_p8, %p13955_p5 }
  0x32   :  { %13965 = shalt.err (!%p13962_p9)
}
  0x33   :  { %50 = dma.hbm_to_vmem [thread:$0]  %s17802_s5, 16, %s48_s25, [#allocation7]  }
  0x34   :  { %13966 = dma.done.wait [#allocation5], 256  }
  0x35   :  { %13967 = vsyncadd [#allocation5], 4294967040 }
  0x36   :  { %13968 = dma.done.wait [#allocation7], 32  }
  0x37   :  { %13969 = vsyncadd [#allocation7], 4294967264  ;;  %vm244_vm0 = vcmask 1044480   ;;  %vm245_vm1 = vcmask 1045504   ;;  %v13975_v0 = vmov 65535   ;;  %v13697_v2 = vld [vmem:[#allocation4] sm:$0xff]  }
  0x38   :  { %v246_v1 = vsel %vm244_vm0, 4294967295, %v13975_v0  ;;  %vm195_vm2 = vcmask 220160   ;;  %v13698_v3 = vld [vmem:[#allocation4] sm:$0xff]   ;;  %12199 = vmatprep.subr.bf16.mxu0 %v13697_v2  ;;  %v13699_v5 = vld [vmem:[#allocation4 + $0x8] sm:$0x3f]   ;;  %v13706_v14 = vld [vmem:[%s17797_s0 + $0x10] sm:$0xff]  }
  0x39   :  { %v14054_v4 = vsel %vm245_vm1, %v246_v1, 0  ;;  %12235 = vmatprep.subr.bf16.mxu1 %v13698_v3  ;;  %12200 = vmatpush3.bf16.msra.mxu0 %v13697_v2  ;;  %v13700_v6 = vld [vmem:[#allocation4 + $0x8] sm:$0x3f]   ;;  %v13701_v8 = vld [vmem:[%s17797_s0] sm:$0xff]   ;;  %v13707_v15 = vld [vmem:[%s17797_s0 + $0x90] sm:$0xff]   ;;  %vm556_vm3 = vcmask 785408  }
  0x3a   :  { %12236 = vmatpush3.bf16.msra.mxu1 %v13698_v3  ;;  %v249_v7 = vand.u32 %v13699_v5, %v14054_v4  ;;  %v756_v9 = vand.u32 %v13700_v6, %v14054_v4  ;;  %v13702_v10 = vld [vmem:[%s17797_s0 + $0x80] sm:$0xff]   ;;  %12203 = vmatprep.mubr.msk.bf16.mxu0 %vm195_vm2, %v13701_v8  ;;  %v13703_v11 = vld [vmem:[%s17797_s0 + $0x8] sm:$0xff]   ;;  %v13708_v16 = vld [vmem:[%s17797_s0 + $0x18] sm:$0xff]   ;;  %vm4479_vm4 = vcmask 523264   ;;  %vm5069_vm5 = vcmask 518144  }
  0x3b   :  { %v13704_v12 = vld [vmem:[%s17797_s0 + $0x88] sm:$0xff]   ;;  %12239 = vmatprep.mubr.msk.bf16.mxu1 %vm195_vm2, %v13702_v10  ;;  %v13705_v13 = vld [vmem:[#allocation4] sm:$0xff]   ;;  %v13709_v17 = vld [vmem:[%s17797_s0 + $0x98] sm:$0xff]   ;;  %vm5067_vm6 = vcmask 519168  }
  0x3c   :  { %12201 = vmatprep.subr.bf16.mxu0 %v249_v7  ;;  %12237 = vmatprep.subr.bf16.mxu1 %v756_v9  ;;  %v13710_v18 = vld [vmem:[%s17797_s0 + $0x20] sm:$0xff]   ;;  %v13712_v20 = vld [vmem:[%s17797_s0 + $0x28] sm:$0xff]   ;;  %v13714_v22 = vld [vmem:[%s17797_s0 + $0x30] sm:$0xff]  }
  0x3d   :  { %12202 = vmatpush3.bf16.msra.mxu0 %v249_v7  ;;  %v13711_v19 = vld [vmem:[%s17797_s0 + $0xa0] sm:$0xff]   ;;  %v13713_v21 = vld [vmem:[%s17797_s0 + $0xa8] sm:$0xff]   ;;  %v13715_v23 = vld [vmem:[%s17797_s0 + $0xb0] sm:$0xff]  }
  0x3e   :  { %12238 = vmatpush3.bf16.msra.mxu1 %v756_v9  ;;  %v13722_v24 = vld [vmem:[#allocation4 + $0x8] sm:$0x3f]   ;;  %v13716_v26 = vld [vmem:[%s17797_s0 + $0x38] sm:$0xff]   ;;  %v13718_v28 = vld [vmem:[%s17797_s0 + $0x40] sm:$0xff]  }
  0x3f   :  { %12307 = vmatprep.subr.bf16.mxu1 %v13705_v13  ;;  %v1768_v25 = vand.u32 %v13722_v24, %v14054_v4  ;;  %v13717_v27 = vld [vmem:[%s17797_s0 + $0xb8] sm:$0xff]   ;;  %v13719_v29 = vld [vmem:[%s17797_s0 + $0xc0] sm:$0xff]   ;;  %v13720_v30 = vld [vmem:[%s17797_s0 + $0x48] sm:$0xff]  }
  0x40   :  { %12204 = vmatmul.mubr.msk.bf16.vlgmr.msra.gmra.mrb[0].mxu0 %vm195_vm2, %v13703_v11  ;;  %v13721_v31 = vld [vmem:[%s17797_s0 + $0xc8] sm:$0xff]   ;;  %v13735_v32 = vld [vmem:[#allocation4] sm:$0xff]   ;;  %v13723_v33 = vld [vmem:[%s17797_s0 + $0x50] sm:$0xff]  }
  0x41   :  { %12240 = vmatmul.mubr.msk.bf16.vlgmr.msra.gmra.mrb[0].mxu1 %vm195_vm2, %v13704_v12  ;;  %12207 = vmatprep.mubr.msk.bf16.mxu0 %vm195_vm2, %v13706_v14  ;;  %v13724_v34 = vld [vmem:[%s17797_s0 + $0xd0] sm:$0xff]   ;;  %v13738_v35 = vld [vmem:[#allocation4] sm:$0xff]   ;;  %v13725_v36 = vld [vmem:[%s17797_s0 + $0x58] sm:$0xff]  }
  0x42   :  { %12308 = vmatpush3.bf16.msra.mxu1 %v13705_v13  ;;  %12243 = vmatprep.mubr.msk.bf16.mxu1 %vm195_vm2, %v13707_v15  ;;  %v13726_v37 = vld [vmem:[%s17797_s0 + $0xd8] sm:$0xff]   ;;  %v13727_v38 = vld [vmem:[%s17797_s0 + $0x60] sm:$0xff]   ;;  %v13745_v40 = vld [vmem:[#allocation4 + $0x8] sm:$0x3f]  }
  0x43   :  { %12309 = vmatprep.subr.bf16.mxu1 %v1768_v25  ;;  %12271 = vmatprep.subr.bf16.mxu0 %v13735_v32  ;;  %v13728_v39 = vld [vmem:[%s17797_s0 + $0xe0] sm:$0xff]   ;;  %v1262_v41 = vand.u32 %v13745_v40, %v14054_v4  ;;  %v13729_v42 = vld [vmem:[%s17797_s0 + $0x68] sm:$0xff]   ;;  %v13731_v44 = vld [vmem:[%s17797_s0 + $0x70] sm:$0xff]  }
  0x44   :  { %12272 = vmatpush3.bf16.msra.mxu0 %v13735_v32  ;;  %v13730_v43 = vld [vmem:[%s17797_s0 + $0xe8] sm:$0xff]   ;;  %v13732_v45 = vld [vmem:[%s17797_s0 + $0xf0] sm:$0xff]   ;;  %v13733_v46 = vld [vmem:[%s17797_s0 + $0x78] sm:$0xff]  }
  0x45   :  { %12273 = vmatprep.subr.bf16.mxu0 %v1262_v41  ;;  %v13734_v47 = vld [vmem:[%s17797_s0 + $0xf8] sm:$0xff]   ;;  %v13755_v48 = vld [vmem:[%s17797_s0 + $0x100] sm:$0xff]   ;;  %v13737_v50 = vld [vmem:[%s17797_s0 + $0x188] sm:$0xff]  }
  0x46   :  { %12310 = vmatpush3.bf16.msra.mxu1 %v1768_v25  ;;  %v13736_v49 = vld [vmem:[%s17797_s0 + $0x180] sm:$0xff]   ;;  %v13748_v51 = vld [vmem:[#allocation4 + $0x8] sm:$0x3f]   ;;  %v13760_v53 = vld [vmem:[%s17797_s0 + $0x110] sm:$0xff]  }
  0x47   :  { %12715 = vmatprep.subr.bf16.mxu1 %v13738_v35  ;;  %v13756_v52 = vld [vmem:[%s17797_s0 + $0x108] sm:$0xff]   ;;  %v13739_v54 = vld [vmem:[%s17797_s0 + $0x190] sm:$0xff]   ;;  %v5281_v55 = vand.u32 %v13748_v51, %v14054_v4  ;;  %v13740_v56 = vld [vmem:[%s17797_s0 + $0x198] sm:$0xff]  }
  0x48   :  { %12208 = vmatmul.mubr.msk.bf16.gmra.mrb[4].mxu0 %vm195_vm2, %v13708_v16  ;;  %v14216_v57 = vld [vmem:[#allocation4] sm:$0xff]   ;;  %v13761_v58 = vld [vmem:[%s17797_s0 + $0x118] sm:$0xff]   ;;  %v13742_v61 = vld [vmem:[%s17797_s0 + $0x1a8] sm:$0xff]  }
  0x49   :  { %12244 = vmatmul.mubr.msk.bf16.gmra.mrb[4].mxu1 %vm195_vm2, %v13709_v17  ;;  %12211 = vmatprep.mubr.msk.bf16.mxu0 %vm195_vm2, %v13710_v18  ;;  %v13764_v59 = vld [vmem:[%s17797_s0 + $0x120] sm:$0xff]   ;;  %v13765_v62 = vld [vmem:[%s17797_s0 + $0x128] sm:$0xff]   ;;  %v13783_v63 = vld [vmem:[%s17801_s4 + $0x30] sm:$0xff]  }
  0x4a   :  { %12247 = vmatprep.mubr.msk.bf16.mxu1 %vm195_vm2, %v13711_v19  ;;  %12274 = vmatpush3.bf16.msra.mxu0 %v1262_v41  ;;  %v13741_v60 = vld [vmem:[%s17797_s0 + $0x1a0] sm:$0xff]   ;;  %v13768_v0 = vld [vmem:[%s17797_s0 + $0x130] sm:$0xff]   ;;  %v13744_v2 = vld [vmem:[%s17797_s0 + $0x1b8] sm:$0xff]  }
  0x4b   :  { %v13743_v1 = vld [vmem:[%s17797_s0 + $0x1b0] sm:$0xff]   ;;  %12343 = vmatprep.subr.bf16.mxu0 %v13783_v63  ;;  %v13790_v3 = vld [vmem:[%s17801_s4 + $0x38] sm:$0xff]   ;;  %v13772_v6 = vld [vmem:[%s17797_s0 + $0x140] sm:$0xff]  }
  0x4c   :  { %v13769_v5 = vld [vmem:[%s17797_s0 + $0x138] sm:$0xff]   ;;  %v13746_v7 = vld [vmem:[%s17797_s0 + $0x1c0] sm:$0xff]   ;;  %v13797_v9 = vld [vmem:[%s17801_s4 + $0x48] sm:$0xff]  }
  0x4d   :  { %v13794_v8 = vld [vmem:[%s17801_s4 + $0x40] sm:$0xff]   ;;  %v13773_v10 = vld [vmem:[%s17797_s0 + $0x148] sm:$0xff]   ;;  %v13777_v12 = vld [vmem:[%s17797_s0 + $0x150] sm:$0xff]  }
  0x4e   :  { %v13747_v11 = vld [vmem:[%s17797_s0 + $0x1c8] sm:$0xff]   ;;  %v13749_v13 = vld [vmem:[%s17797_s0 + $0x1d0] sm:$0xff]   ;;  %v13750_v15 = vld [vmem:[%s17797_s0 + $0x1d8] sm:$0xff]  }
  0x4f   :  { %v13802_v14 = vld [vmem:[%s17801_s4 + $0x50] sm:$0xff]   ;;  %v13778_v16 = vld [vmem:[%s17797_s0 + $0x158] sm:$0xff]   ;;  %v13781_v17 = vld [vmem:[%s17797_s0 + $0x160] sm:$0xff]  }
  0x50   :  { %12212 = vmatmul.mubr.msk.bf16.gmra.mrb[8].mxu0 %vm195_vm2, %v13712_v20  ;;  %v13751_v18 = vld [vmem:[%s17797_s0 + $0x1e0] sm:$0xff]   ;;  %v13782_v19 = vld [vmem:[%s17797_s0 + $0x168] sm:$0xff]   ;;  %v13787_v24 = vld [vmem:[%s17797_s0 + $0x178] sm:$0xff]  }
  0x51   :  { %12248 = vmatmul.mubr.msk.bf16.gmra.mrb[8].mxu1 %vm195_vm2, %v13713_v21  ;;  %12215 = vmatprep.mubr.msk.bf16.mxu0 %vm195_vm2, %v13714_v22  ;;  %v13752_v20 = vld [vmem:[%s17797_s0 + $0x1e8] sm:$0xff]   ;;  %v13786_v21 = vld [vmem:[%s17797_s0 + $0x170] sm:$0xff]   ;;  %v13806_v22 = vld [vmem:[%s17801_s4 + $0x58] sm:$0xff]  }
  0x52   :  { %12251 = vmatprep.mubr.msk.bf16.mxu1 %vm195_vm2, %v13715_v23  ;;  %v13753_v23 = vld [vmem:[%s17797_s0 + $0x1f0] sm:$0xff]   ;;  %v13754_v25 = vld [vmem:[%s17797_s0 + $0x1f8] sm:$0xff]   ;;  %v13793_v32 = vld [vmem:[#allocation4] sm:$0xff]  }
  0x53   :  { %v13779_v40 = vld [vmem:[%s17797_s0 + $0x250] sm:$0xff]   ;;  %v13780_v41 = vld [vmem:[%s17797_s0 + $0x258] sm:$0xff]   ;;  %v14425_v51 = vld [vmem:[%s17800_s3 + $0x8] sm:$0xff]  }
  0x58   :  { %12216 = vmatmul.mubr.msk.bf16.gmra.mrb[12].mxu0 %vm195_vm2, %v13716_v26  ;;  %v13757_v26 = vld [vmem:[%s17797_s0 + $0x200] sm:$0xff]  }
  0x59   :  { %12252 = vmatmul.mubr.msk.bf16.gmra.mrb[12].mxu1 %vm195_vm2, %v13717_v27  ;;  %12219 = vmatprep.mubr.msk.bf16.mxu0 %vm195_vm2, %v13718_v28  ;;  %v14343_v27 = vld [vmem:[%s17801_s4] sm:$0xff]   ;;  %v13776_v28 = vld [vmem:[#allocation4 + $0x8] sm:$0x3f]  }
  0x5a   :  { %12255 = vmatprep.mubr.msk.bf16.mxu1 %vm195_vm2, %v13719_v29  ;;  %v13758_v29 = vld [vmem:[%s17797_s0 + $0x208] sm:$0xff]  }
  0x60   :  { %12220 = vmatmul.mubr.msk.bf16.gmra.mrb[16].mxu0 %vm195_vm2, %v13720_v30  ;;  %v13762_v30 = vld [vmem:[%s17797_s0 + $0x210] sm:$0xff]  }
  0x61   :  { %12256 = vmatmul.mubr.msk.bf16.gmra.mrb[16].mxu1 %vm195_vm2, %v13721_v31  ;;  %12223 = vmatprep.mubr.msk.bf16.mxu0 %vm195_vm2, %v13723_v33  ;;  %v5787_v31 = vand.u32 %v13776_v28, %v14054_v4  ;;  %v13763_v33 = vld [vmem:[%s17797_s0 + $0x218] sm:$0xff]  }
  0x62   :  { %12259 = vmatprep.mubr.msk.bf16.mxu1 %vm195_vm2, %v13724_v34  ;;  %v13766_v34 = vld [vmem:[%s17797_s0 + $0x220] sm:$0xff]  }
  0x68   :  { %12224 = vmatmul.mubr.msk.bf16.gmra.mrb[20].mxu0 %vm195_vm2, %v13725_v36  ;;  %v13770_v36 = vld [vmem:[%s17797_s0 + $0x230] sm:$0xff]  }
  0x69   :  { %12260 = vmatmul.mubr.msk.bf16.gmra.mrb[20].mxu1 %vm195_vm2, %v13726_v37  ;;  %12227 = vmatprep.mubr.msk.bf16.mxu0 %vm195_vm2, %v13727_v38  ;;  %v13771_v37 = vld [vmem:[%s17797_s0 + $0x238] sm:$0xff]   ;;  %v13774_v38 = vld [vmem:[%s17797_s0 + $0x240] sm:$0xff]  }
  0x6a   :  { %12263 = vmatprep.mubr.msk.bf16.mxu1 %vm195_vm2, %v13728_v39  ;;  %v13775_v39 = vld [vmem:[%s17797_s0 + $0x248] sm:$0xff]  }
  0x70   :  { %12228 = vmatmul.mubr.msk.bf16.gmra.mrb[24].mxu0 %vm195_vm2, %v13729_v42  ;;  %v13784_v42 = vld [vmem:[%s17797_s0 + $0x260] sm:$0xff]  }
  0x71   :  { %12264 = vmatmul.mubr.msk.bf16.gmra.mrb[24].mxu1 %vm195_vm2, %v13730_v43  ;;  %12231 = vmatprep.mubr.msk.bf16.mxu0 %vm195_vm2, %v13731_v44  ;;  %v13785_v43 = vld [vmem:[%s17797_s0 + $0x268] sm:$0xff]   ;;  %v13788_v44 = vld [vmem:[%s17797_s0 + $0x270] sm:$0xff]  }
  0x72   :  { %12267 = vmatprep.mubr.msk.bf16.mxu1 %vm195_vm2, %v13732_v45  ;;  %v13789_v45 = vld [vmem:[%s17797_s0 + $0x278] sm:$0xff]  }
  0x78   :  { %12232 = vmatmul.mubr.msk.bf16.gmra.mrb[28].mxu0 %vm195_vm2, %v13733_v46  ;;  %v13791_v46 = vld [vmem:[%s17797_s0 + $0x280] sm:$0xff]  }
  0x79   :  { %12268 = vmatmul.mubr.msk.bf16.gmra.mrb[28].mxu1 %vm195_vm2, %v13734_v47  ;;  %12275 = vmatprep.mubr.msk.bf16.mxu0 %vm195_vm2, %v13755_v48  ;;  %v13805_v47 = vld [vmem:[#allocation4 + $0x8] sm:$0x3f]  }
  0x7a   :  { %12311 = vmatprep.mubr.msk.bf16.mxu1 %vm195_vm2, %v13736_v49  ;;  %v13792_v48 = vld [vmem:[%s17797_s0 + $0x288] sm:$0xff]   ;;  %v13795_v49 = vld [vmem:[%s17797_s0 + $0x290] sm:$0xff]  }
  0x80   :  { %12276 = vmatmul.mubr.msk.bf16.vlgmr.msra.gmra.mrb[32].mxu0 %vm195_vm2, %v13756_v52  ;;  %v14430_v52 = vld [vmem:[%s17800_s3 + $0x88] sm:$0xff]  }
  0x81   :  { %12312 = vmatmul.mubr.msk.bf16.vlgmr.msra.gmra.mrb[32].mxu1 %vm195_vm2, %v13737_v50  ;;  %12279 = vmatprep.mubr.msk.bf16.mxu0 %vm195_vm2, %v13760_v53  ;;  %v6293_v50 = vand.u32 %v13805_v47, %v14054_v4  ;;  %v14436_v53 = vld [vmem:[%s17800_s3] sm:$0xff]   ;;  %v14635_v47 = vld [vmem:[%s17800_s3 + $0xf8] sm:$0xff]  }
  0x82   :  { %12716 = vmatpush3.bf16.msra.mxu1 %v13738_v35  ;;  %12315 = vmatprep.mubr.msk.bf16.mxu1 %vm195_vm2, %v13739_v54  ;;  %v13767_v35 = vld [vmem:[%s17797_s0 + $0x228] sm:$0xff]   ;;  %v14441_v54 = vld [vmem:[%s17800_s3 + $0x80] sm:$0xff]  }
  0x83   :  { %12717 = vmatprep.subr.bf16.mxu1 %v5281_v55  ;;  %12344 = vmatpush3.bf16.msra.mxu0 %v13783_v63  ;;  %v14469_v63 = vld [vmem:[%s17800_s3 + $0x90] sm:$0xff]  }
  0x84   :  { %12345 = vmatprep.subr.bf16.mxu0 %v13790_v3 }
  0x86   :  { %12718 = vmatpush3.bf16.msra.mxu1 %v5281_v55  ;;  %v14446_v55 = vld [vmem:[%s17800_s3 + $0x18] sm:$0xff]  }
  0x87   :  { %12751 = vmatprep.subr.bf16.mxu1 %v14216_v57  ;;  %12346 = vmatpush3.bf16.msra.mxu0 %v13790_v3 }
  0x88   :  { %12280 = vmatmul.mubr.msk.bf16.gmra.mrb[36].mxu0 %vm195_vm2, %v13761_v58  ;;  %12347 = vmatprep.subr.bf16.mxu0 %v13794_v8  ;;  %v13796_v58 = vld [vmem:[%s17797_s0 + $0x298] sm:$0xff]  }
  0x89   :  { %12316 = vmatmul.mubr.msk.bf16.gmra.mrb[36].mxu1 %vm195_vm2, %v13740_v56  ;;  %12283 = vmatprep.mubr.msk.bf16.mxu0 %vm195_vm2, %v13764_v59  ;;  %v14451_v56 = vld [vmem:[%s17800_s3 + $0x98] sm:$0xff]   ;;  %v11051_v59 = vunpack.c.l.bf16 %v14425_v51 }
  0x8a   :  { %12319 = vmatprep.mubr.msk.bf16.mxu1 %vm195_vm2, %v13741_v60  ;;  %v11115_v60 = vunpack.c.l.bf16 %v14430_v52 }
  0x8b   :  { %12348 = vmatpush3.bf16.msra.mxu0 %v13794_v8  ;;  %v13798_v8 = vld [vmem:[%s17797_s0 + $0x2a0] sm:$0xff]  }
  0x8c   :  { %12349 = vmatprep.subr.bf16.mxu0 %v13797_v9 }
  0x8f   :  { %12350 = vmatpush3.bf16.msra.mxu0 %v13797_v9 }
  0x90   :  { %12284 = vmatmul.mubr.msk.bf16.gmra.mrb[40].mxu0 %vm195_vm2, %v13765_v62  ;;  %12351 = vmatprep.subr.bf16.mxu0 %v13802_v14  ;;  %v14464_v62 = vld [vmem:[%s17800_s3 + $0x10] sm:$0xff]  }
  0x91   :  { %12320 = vmatmul.mubr.msk.bf16.gmra.mrb[40].mxu1 %vm195_vm2, %v13742_v61  ;;  %12287 = vmatprep.mubr.msk.bf16.mxu0 %vm195_vm2, %v13768_v0 }
  0x92   :  { %12323 = vmatprep.mubr.msk.bf16.mxu1 %vm195_vm2, %v13743_v1 }
  0x93   :  { %12352 = vmatpush3.bf16.msra.mxu0 %v13802_v14 }
  0x94   :  { %12353 = vmatprep.subr.bf16.mxu0 %v13806_v22 }
  0x97   :  { %12354 = vmatpush3.bf16.msra.mxu0 %v13806_v22 }
  0x98   :  { %12288 = vmatmul.mubr.msk.bf16.gmra.mrb[44].mxu0 %vm195_vm2, %v13769_v5  ;;  %12467 = vmatprep.subr.bf16.mxu0 %v14343_v27  ;;  %v14478_v5 = vld [vmem:[%s17800_s3 + $0x28] sm:$0xff]  }
  0x99   :  { %12324 = vmatmul.mubr.msk.bf16.gmra.mrb[44].mxu1 %vm195_vm2, %v13744_v2  ;;  %12291 = vmatprep.mubr.msk.bf16.mxu0 %vm195_vm2, %v13772_v6  ;;  %v14483_v6 = vld [vmem:[%s17800_s3 + $0xa8] sm:$0xff]  }
  0x9a   :  { %12327 = vmatprep.mubr.msk.bf16.mxu1 %vm195_vm2, %v13746_v7  ;;  %v14488_v7 = vld [vmem:[%s17800_s3 + $0x20] sm:$0xff]  }
  0xa0   :  { %12292 = vmatmul.mubr.msk.bf16.gmra.mrb[48].mxu0 %vm195_vm2, %v13773_v10 }
  0xa1   :  { %12328 = vmatmul.mubr.msk.bf16.gmra.mrb[48].mxu1 %vm195_vm2, %v13747_v11  ;;  %12295 = vmatprep.mubr.msk.bf16.mxu0 %vm195_vm2, %v13777_v12 }
  0xa2   :  { %12331 = vmatprep.mubr.msk.bf16.mxu1 %vm195_vm2, %v13749_v13  ;;  %v14500_v13 = vld [vmem:[%s17800_s3 + $0xa0] sm:$0xff]  }
  0xa8   :  { %12296 = vmatmul.mubr.msk.bf16.gmra.mrb[52].mxu0 %vm195_vm2, %v13778_v16  ;;  %v13801_v16 = vld [vmem:[%s17797_s0 + $0x2b8] sm:$0xff]  }
  0xa9   :  { %12332 = vmatmul.mubr.msk.bf16.gmra.mrb[52].mxu1 %vm195_vm2, %v13750_v15  ;;  %12299 = vmatprep.mubr.msk.bf16.mxu0 %vm195_vm2, %v13781_v17  ;;  %v13803_v15 = vld [vmem:[%s17797_s0 + $0x2c0] sm:$0xff]  }
  0xaa   :  { %12335 = vmatprep.mubr.msk.bf16.mxu1 %vm195_vm2, %v13751_v18  ;;  %v14509_v18 = vld [vmem:[%s17800_s3 + $0x38] sm:$0xff]  }
  0xb0   :  { %12300 = vmatmul.mubr.msk.bf16.gmra.mrb[56].mxu0 %vm195_vm2, %v13782_v19  ;;  %v14514_v19 = vld [vmem:[%s17800_s3 + $0xb8] sm:$0xff]  }
  0xb1   :  { %12336 = vmatmul.mubr.msk.bf16.gmra.mrb[56].mxu1 %vm195_vm2, %v13752_v20  ;;  %12303 = vmatprep.mubr.msk.bf16.mxu0 %vm195_vm2, %v13786_v21  ;;  %v14519_v20 = vld [vmem:[%s17800_s3 + $0x30] sm:$0xff]  }
  0xb2   :  { %12339 = vmatprep.mubr.msk.bf16.mxu1 %vm195_vm2, %v13753_v23  ;;  %v14696_v21 = vld [vmem:[%s17800_s3 + $0x190] sm:$0xff]  }
  0xb8   :  { %12304 = vmatmul.mubr.msk.bf16.gmra.mrb[60].mxu0 %vm195_vm2, %v13787_v24 }
  0xb9   :  { %12340 = vmatmul.mubr.msk.bf16.gmra.mrb[60].mxu1 %vm195_vm2, %v13754_v25  ;;  %v14529_v25 = vld [vmem:[%s17800_s3 + $0xb0] sm:$0xff]  }
  0xba   :  { %12719 = vmatprep.mubr.msk.bf16.mxu1 %vm195_vm2, %v13757_v26 }
  0xc1   :  { %12720 = vmatmul.mubr.msk.bf16.vlgmr.msra.gmra.mrb[64].mxu1 %vm195_vm2, %v13758_v29 }
  0xc2   :  { %12752 = vmatpush3.bf16.msra.mxu1 %v14216_v57  ;;  %12723 = vmatprep.mubr.msk.bf16.mxu1 %vm195_vm2, %v13762_v30  ;;  %v14453_v57 = vld [vmem:[#allocation4] sm:$0xff]   ;;  %v14652_v30 = vld [vmem:[#allocation6] ss:$0 sm:$0xff] }
  0xc3   :  { %12753 = vmatprep.subr.bf16.mxu1 %v5787_v31 }
  0xc6   :  { %12754 = vmatpush3.bf16.msra.mxu1 %v5787_v31  ;;  %v14539_v31 = vld [vmem:[%s17800_s3 + $0x48] sm:$0xff]  }
  0xc7   :  { %12787 = vmatprep.subr.bf16.mxu1 %v13793_v32 }
  0xc9   :  { %12724 = vmatmul.mubr.msk.bf16.gmra.mrb[68].mxu1 %vm195_vm2, %v13763_v33  ;;  %v14549_v33 = vld [vmem:[%s17800_s3 + $0x40] sm:$0xff]  }
  0xca   :  { %12727 = vmatprep.mubr.msk.bf16.mxu1 %vm195_vm2, %v13766_v34  ;;  %v14666_v34 = vld [vmem:[%s17800_s3 + $0x180] sm:$0xff]  }
  0xd1   :  { %12728 = vmatmul.mubr.msk.bf16.gmra.mrb[72].mxu1 %vm195_vm2, %v13767_v35 }
  0xd2   :  { %12731 = vmatprep.mubr.msk.bf16.mxu1 %vm195_vm2, %v13770_v36 }
  0xd9   :  { %12732 = vmatmul.mubr.msk.bf16.gmra.mrb[76].mxu1 %vm195_vm2, %v13771_v37  ;;  %v14649_v37 = vld [vmem:[%s17800_s3 + $0xf0] sm:$0xff]  }
  0xda   :  { %12735 = vmatprep.mubr.msk.bf16.mxu1 %vm195_vm2, %v13774_v38  ;;  %v14559_v38 = vld [vmem:[%s17800_s3 + $0xc0] sm:$0xff]  }
  0xe1   :  { %12736 = vmatmul.mubr.msk.bf16.gmra.mrb[80].mxu1 %vm195_vm2, %v13775_v39  ;;  %v14640_v39 = vld [vmem:[%s17800_s3 + $0x70] sm:$0xff]  }
  0xe2   :  { %12739 = vmatprep.mubr.msk.bf16.mxu1 %vm195_vm2, %v13779_v40  ;;  %v14621_v40 = vld [vmem:[%s17800_s3 + $0xe0] sm:$0xff]  }
  0xe9   :  { %12740 = vmatmul.mubr.msk.bf16.gmra.mrb[84].mxu1 %vm195_vm2, %v13780_v41  ;;  %v13800_v41 = vld [vmem:[%s17797_s0 + $0x2b0] sm:$0xff]  }
  0xea   :  { %12743 = vmatprep.mubr.msk.bf16.mxu1 %vm195_vm2, %v13784_v42  ;;  %v14630_v42 = vld [vmem:[%s17800_s3 + $0x78] sm:$0xff]  }
  0xf1   :  { %12744 = vmatmul.mubr.msk.bf16.gmra.mrb[88].mxu1 %vm195_vm2, %v13785_v43  ;;  %v14568_v43 = vld [vmem:[%s17800_s3 + $0x58] sm:$0xff]  }
  0xf2   :  { %12747 = vmatprep.mubr.msk.bf16.mxu1 %vm195_vm2, %v13788_v44  ;;  %v14573_v44 = vld [vmem:[%s17800_s3 + $0xd8] sm:$0xff]  }
  0xf9   :  { %12748 = vmatmul.mubr.msk.bf16.gmra.mrb[92].mxu1 %vm195_vm2, %v13789_v45  ;;  %v14578_v45 = vld [vmem:[%s17800_s3 + $0x50] sm:$0xff]  }
  0xfa   :  { %12755 = vmatprep.mubr.msk.bf16.mxu1 %vm195_vm2, %v13791_v46  ;;  %v13799_v46 = vld [vmem:[%s17797_s0 + $0x2a8] sm:$0xff]  }
 0x101   :  { %12756 = vmatmul.mubr.msk.bf16.vlgmr.msra.gmra.mrb[96].mxu1 %vm195_vm2, %v13792_v48  ;;  %v14599_v48 = vld [vmem:[%s17800_s3 + $0x68] sm:$0xff]  }
 0x102   :  { %12788 = vmatpush3.bf16.msra.mxu1 %v13793_v32  ;;  %12759 = vmatprep.mubr.msk.bf16.mxu1 %vm195_vm2, %v13795_v49  ;;  %v14544_v32 = vld [vmem:[%s17800_s3 + $0xc8] sm:$0xff]  }
 0x103   :  { %12789 = vmatprep.subr.bf16.mxu1 %v6293_v50  ;;  %v14661_v49 = vld [vmem:[%s17800_s3 + $0x188] sm:$0xff]  }
 0x106   :  { %12790 = vmatpush3.bf16.msra.mxu1 %v6293_v50  ;;  %v14604_v50 = vld [vmem:[%s17800_s3 + $0xe8] sm:$0xff]  }
 0x107   :  { %12823 = vmatprep.subr.bf16.mxu1 %v14453_v57 }
 0x109   :  { %12760 = vmatmul.mubr.msk.bf16.gmra.mrb[100].mxu1 %vm195_vm2, %v13796_v58  ;;  %v14590_v58 = vld [vmem:[%s17800_s3 + $0xd0] sm:$0xff]  }
 0x10a   :  { %12763 = vmatprep.mubr.msk.bf16.mxu1 %vm195_vm2, %v13798_v8  ;;  %v14609_v8 = vld [vmem:[%s17800_s3 + $0x60] sm:$0xff]  }
 0x111   :  { %12764 = vmatmul.mubr.msk.bf16.gmra.mrb[104].mxu1 %vm195_vm2, %v13799_v46 }
 0x112   :  { %12767 = vmatprep.mubr.msk.bf16.mxu1 %vm195_vm2, %v13800_v41  ;;  %v14680_v41 = vld [vmem:[%s17800_s3 + $0x198] sm:$0xff]  }
 0x113   :  { %v12205_v29 = vpop.f32.mrb[0].mxu0 }
 0x114   :  { %v294_v24 = vadd.f32 %v12205_v29, %v14652_v30  ;;  %v12241_v35 = vpop.f32.mrb[0].mxu1  ;;  %v285_v46 = vpop.f32.mrb[1].mxu0 }
 0x115   :  { %v801_v26 = vadd.f32 %v12241_v35, %v14652_v30  ;;  %v286_v22 = vadd.f32 %v14652_v30, %v285_v46  ;;  %v792_v23 = vpop.f32.mrb[1].mxu1  ;;  %v12206_v17 = vpop.f32.mrb[2].mxu0 }
 0x116   :  { %v414_v28 = vmax.f32 %v294_v24, 0.0  ;;  %v793_v35 = vadd.f32 %v14652_v30, %v792_v23  ;;  %v297_v46 = vadd.f32 %v12206_v17, %v14652_v30  ;;  %v12242_v36 = vpop.f32.mrb[2].mxu1  ;;  %v288_v12 = vpop.f32.mrb[3].mxu0 }
 0x117   :  { %v921_v10 = vmax.f32 %v801_v26, 0.0  ;;  %v412_v14 = vmax.f32 %v286_v22, 0.0  ;;  %v804_v11 = vadd.f32 %v12242_v36, %v14652_v30  ;;  %v289_v9 = vadd.f32 %v14652_v30, %v288_v12  ;;  %v795_v3 = vpop.f32.mrb[3].mxu1  ;;  %v14715_v12 = vld [vmem:[%s17800_s3 + $0x1a8] sm:$0xff]  }
 0x118   :  { %v919_v24 = vmax.f32 %v793_v35, 0.0  ;;  %v415_v2 = vmax.f32 %v297_v46, 0.0  ;;  %v796_v23 = vadd.f32 %v14652_v30, %v795_v3  ;;  %v510_v26 = vmul.f32 %v11051_v59, %v414_v28 }
 0x119   :  { %v1017_v0 = vmul.f32 %v11115_v60, %v921_v10  ;;  %v922_v61 = vmax.f32 %v804_v11, 0.0  ;;  %v413_v1 = vmax.f32 %v289_v9, 0.0  ;;  %12768 = vmatmul.mubr.msk.bf16.gmra.mrb[108].mxu1 %vm195_vm2, %v13801_v16  ;;  %v17827_v3 = vunpack.c.l.bf16 %v14441_v54 }
 0x11a   :  { %v17828_v35 = vunpack.c.h.bf16 %v14425_v51  ;;  %v920_v10 = vmax.f32 %v796_v23, 0.0  ;;  %12771 = vmatprep.mubr.msk.bf16.mxu1 %vm195_vm2, %v13803_v15  ;;  %v17829_v9 = vunpack.c.l.bf16 %v14436_v53  ;;  %v17830_v16 = vunpack.c.h.bf16 %v14430_v52 }
 0x11b   :  { %v1015_v36 = vmul.f32 %v17827_v3, %v919_v24  ;;  %v17831_v22 = vunpack.c.h.bf16 %v14436_v53  ;;  %v12209_v29 = vpop.f32.mrb[4].mxu0  ;;  %v11248_v59 = vunpack.c.h.bf16 %v14696_v21  ;;  %v17832_v24 = vunpack.c.h.bf16 %v14441_v54  ;;  %v14743_v54 = vld [vmem:[%s17800_s3 + $0x1a0] sm:$0xff]  }
 0x11c   :  { %v511_v60 = vmul.f32 %v17828_v35, %v415_v2  ;;  %v508_v11 = vmul.f32 %v17829_v9, %v412_v14  ;;  %v1018_v46 = vmul.f32 %v17830_v16, %v922_v61  ;;  %v310_v2 = vadd.f32 %v12209_v29, %v14652_v30  ;;  %v12245_v23 = vpop.f32.mrb[4].mxu1  ;;  %v301_v15 = vpop.f32.mrb[5].mxu0  ;;  %v13807_v9 = vld [vmem:[%s17797_s0 + $0x2d0] sm:$0xff]  }
 0x11d   :  { %v509_v17 = vmul.f32 %v17831_v22, %v413_v1  ;;  %v1016_v51 = vmul.f32 %v17832_v24, %v920_v10  ;;  %v11259_v3 = vunpack.c.l.bf16 %v14715_v12  ;;  %v817_v52 = vadd.f32 %v12245_v23, %v14652_v30  ;;  %v808_v61 = vpop.f32.mrb[5].mxu1  ;;  %v12210_v1 = vpop.f32.mrb[6].mxu0  ;;  %v13804_v22 = vld [vmem:[%s17797_s0 + $0x2c8] sm:$0xff]  }
 0x11e   :  { %v541_v28 = vpack.c.bf16 %v511_v60, %v510_v26  ;;  %v1048_v14 = vpack.c.bf16 %v1018_v46, %v1017_v0  ;;  %v302_v53 = vadd.f32 %v14652_v30, %v301_v15  ;;  %v418_v0 = vmax.f32 %v310_v2, 0.0  ;;  %v12246_v60 = vpop.f32.mrb[6].mxu1  ;;  %v304_v10 = vpop.f32.mrb[7].mxu0  ;;  %v13826_v24 = vld [vmem:[#allocation4 + $0x8] sm:$0x3f]  }
 0x11f   :  { %v540_v35 = vpack.c.bf16 %v509_v17, %v508_v11  ;;  %v1047_v29 = vpack.c.bf16 %v1016_v51, %v1015_v36  ;;  %v809_v17 = vadd.f32 %v14652_v30, %v808_v61  ;;  %v313_v26 = vadd.f32 %v12210_v1, %v14652_v30 }
 0x120   :  { %558 = vst.msk [vmem:[#allocation2 + $0x8] sm:$0xff] %vm556_vm3, %v541_v28  ;;  %1064 = vst.msk [vmem:[#allocation2 + $0x88] sm:$0xff] %vm556_vm3, %v1048_v14  ;;  %v925_v11 = vmax.f32 %v817_v52, 0.0  ;;  %v416_v16 = vmax.f32 %v302_v53, 0.0  ;;  %v820_v46 = vadd.f32 %v12246_v60, %v14652_v30  ;;  %v305_v36 = vadd.f32 %v14652_v30, %v304_v10  ;;  %v811_v28 = vpop.f32.mrb[7].mxu1 }
 0x121   :  { %557 = vst.msk [vmem:[#allocation2] sm:$0xff] %vm556_vm3, %v540_v35  ;;  %1063 = vst.msk [vmem:[#allocation2 + $0x80] sm:$0xff] %vm556_vm3, %v1047_v29  ;;  %v923_v51 = vmax.f32 %v809_v17, 0.0  ;;  %v419_v2 = vmax.f32 %v313_v26, 0.0  ;;  %v812_v23 = vadd.f32 %v14652_v30, %v811_v28  ;;  %v17833_v14 = vunpack.c.l.bf16 %v14451_v56  ;;  %12772 = vmatmul.mubr.msk.bf16.gmra.mrb[112].mxu1 %vm195_vm2, %v13804_v22 }
 0x122   :  { %v926_v35 = vmax.f32 %v820_v46, 0.0  ;;  %v417_v52 = vmax.f32 %v305_v36, 0.0  ;;  %v17834_v1 = vunpack.c.l.bf16 %v14446_v55  ;;  %v17835_v29 = vunpack.c.l.bf16 %v14469_v63  ;;  %12775 = vmatprep.mubr.msk.bf16.mxu1 %vm195_vm2, %v13807_v9 }
 0x123   :  { %v1021_v61 = vmul.f32 %v17833_v14, %v925_v11  ;;  %v17836_v26 = vunpack.c.h.bf16 %v14446_v55  ;;  %v924_v28 = vmax.f32 %v812_v23, 0.0  ;;  %v17837_v11 = vunpack.c.l.bf16 %v14464_v62  ;;  %v12213_v15 = vpop.f32.mrb[8].mxu0 }
 0x124   :  { %v514_v60 = vmul.f32 %v17834_v1, %v418_v0  ;;  %v1019_v17 = vmul.f32 %v17835_v29, %v923_v51  ;;  %v17838_v36 = vunpack.c.h.bf16 %v14451_v56  ;;  %v17839_v14 = vunpack.c.h.bf16 %v14464_v62  ;;  %v12249_v9 = vpop.f32.mrb[8].mxu1  ;;  %v317_v1 = vpop.f32.mrb[9].mxu0 }
 0x125   :  { %v515_v10 = vmul.f32 %v17836_v26, %v419_v2  ;;  %v512_v46 = vmul.f32 %v17837_v11, %v416_v16  ;;  %v14776_v0 = vand.u32 %v13826_v24, %v14054_v4  ;;  %v17840_v55 = vunpack.c.h.bf16 %v14469_v63  ;;  %v12214_v26 = vpop.f32.mrb[10].mxu0  ;;  %v13808_v4 = vld [vmem:[%s17797_s0 + $0x2d8] sm:$0xff]   ;;  %v14801_v11 = vld [vmem:[%s17800_s3 + $0x1b0] sm:$0xff]  }
 0x126   :  { %v1022_v22 = vmul.f32 %v17838_v36, %v926_v35  ;;  %v513_v53 = vmul.f32 %v17839_v14, %v417_v52  ;;  %v326_v23 = vadd.f32 %v12213_v15, %v14652_v30  ;;  %v11256_v16 = vunpack.c.h.bf16 %v14743_v54  ;;  %v824_v52 = vpop.f32.mrb[9].mxu1  ;;  %v14790_v63 = vld [vmem:[%s17800_s3 + $0x1b8] sm:$0xff]  }
 0x127   :  { %v543_v51 = vpack.c.bf16 %v515_v10, %v514_v60  ;;  %v1020_v2 = vmul.f32 %v17840_v55, %v924_v28  ;;  %v833_v35 = vadd.f32 %v12249_v9, %v14652_v30  ;;  %v318_v62 = vadd.f32 %v14652_v30, %v317_v1  ;;  %v12250_v60 = vpop.f32.mrb[10].mxu1  ;;  %v320_v10 = vpop.f32.mrb[11].mxu0  ;;  %v13810_v28 = vld [vmem:[%s17797_s0 + $0x2e0] sm:$0xff]  }
 0x128   :  { %v1050_v29 = vpack.c.bf16 %v1022_v22, %v1021_v61  ;;  %v542_v56 = vpack.c.bf16 %v513_v53, %v512_v46  ;;  %v422_v15 = vmax.f32 %v326_v23, 0.0  ;;  %v825_v61 = vadd.f32 %v14652_v30, %v824_v52  ;;  %v827_v14 = vpop.f32.mrb[11].mxu1 }
 0x129   :  { %560 = vst.msk [vmem:[#allocation2 + $0x18] sm:$0xff] %vm556_vm3, %v543_v51  ;;  %v1049_v24 = vpack.c.bf16 %v1020_v2, %v1019_v17  ;;  %v329_v53 = vadd.f32 %v12214_v26, %v14652_v30  ;;  %v929_v17 = vmax.f32 %v833_v35, 0.0  ;;  %v420_v46 = vmax.f32 %v318_v62, 0.0  ;;  %12776 = vmatmul.mubr.msk.bf16.gmra.mrb[116].mxu1 %vm195_vm2, %v13808_v4 }
 0x12a   :  { %1066 = vst.msk [vmem:[#allocation2 + $0x98] sm:$0xff] %vm556_vm3, %v1050_v29  ;;  %559 = vst.msk [vmem:[#allocation2 + $0x10] sm:$0xff] %vm556_vm3, %v542_v56  ;;  %v836_v36 = vadd.f32 %v12250_v60, %v14652_v30  ;;  %v321_v22 = vadd.f32 %v14652_v30, %v320_v10  ;;  %v927_v51 = vmax.f32 %v825_v61, 0.0  ;;  %v828_v2 = vadd.f32 %v14652_v30, %v827_v14 }
 0x12b   :  { %1065 = vst.msk [vmem:[#allocation2 + $0x90] sm:$0xff] %vm556_vm3, %v1049_v24  ;;  %v423_v55 = vmax.f32 %v329_v53, 0.0  ;;  %v11267_v23 = vunpack.c.l.bf16 %v14790_v63  ;;  %v17841_v9 = vunpack.c.l.bf16 %v14483_v6  ;;  %v11263_v35 = vunpack.c.l.bf16 %v14801_v11  ;;  %12779 = vmatprep.mubr.msk.bf16.mxu1 %vm195_vm2, %v13810_v28 }
 0x12c   :  { %v930_v29 = vmax.f32 %v836_v36, 0.0  ;;  %v421_v56 = vmax.f32 %v321_v22, 0.0  ;;  %v17842_v62 = vunpack.c.l.bf16 %v14478_v5  ;;  %v17843_v26 = vunpack.c.l.bf16 %v14500_v13 }
 0x12d   :  { %v1025_v1 = vmul.f32 %v17841_v9, %v929_v17  ;;  %v17844_v61 = vunpack.c.h.bf16 %v14478_v5  ;;  %v928_v60 = vmax.f32 %v828_v2, 0.0  ;;  %v17845_v10 = vunpack.c.l.bf16 %v14488_v7  ;;  %v12217_v9 = vpop.f32.mrb[12].mxu0  ;;  %v12253_v2 = vpop.f32.mrb[12].mxu1 }
 0x12e   :  { %v518_v52 = vmul.f32 %v17842_v62, %v422_v15  ;;  %v1023_v24 = vmul.f32 %v17843_v26, %v927_v51  ;;  %v17846_v36 = vunpack.c.h.bf16 %v14483_v6  ;;  %v17847_v22 = vunpack.c.h.bf16 %v14488_v7  ;;  %v333_v28 = vpop.f32.mrb[13].mxu0 }
 0x12f   :  { %v519_v53 = vmul.f32 %v17844_v61, %v423_v55  ;;  %v516_v17 = vmul.f32 %v17845_v10, %v420_v46  ;;  %v17848_v51 = vunpack.c.h.bf16 %v14500_v13  ;;  %v342_v55 = vadd.f32 %v12217_v9, %v14652_v30  ;;  %v13812_v13 = vld [vmem:[%s17797_s0 + $0x2f0] sm:$0xff]   ;;  %v14856_v9 = vld [vmem:[%s17800_s3 + $0x1c0] sm:$0xff]  }
 0x130   :  { %v1026_v4 = vmul.f32 %v17846_v36, %v930_v29  ;;  %v517_v14 = vmul.f32 %v17847_v22, %v421_v56  ;;  %v849_v6 = vadd.f32 %v12253_v2, %v14652_v30  ;;  %v334_v7 = vadd.f32 %v14652_v30, %v333_v28  ;;  %v840_v29 = vpop.f32.mrb[13].mxu1  ;;  %v12218_v56 = vpop.f32.mrb[14].mxu0  ;;  %v14864_v2 = vld [vmem:[#allocation2 + $0x18] sm:$0xff] }
 0x131   :  { %v545_v62 = vpack.c.bf16 %v519_v53, %v518_v52  ;;  %v1024_v5 = vmul.f32 %v17848_v51, %v928_v60  ;;  %v13811_v52 = vld [vmem:[%s17797_s0 + $0x2e8] sm:$0xff]   ;;  %v426_v60 = vmax.f32 %v342_v55, 0.0  ;;  %v841_v10 = vadd.f32 %v14652_v30, %v840_v29  ;;  %v12254_v36 = vpop.f32.mrb[14].mxu1  ;;  %v14848_v22 = vld [vmem:[#allocation2 + $0x10] sm:$0xff] }
 0x132   :  { %v1052_v46 = vpack.c.bf16 %v1026_v4, %v1025_v1  ;;  %v544_v61 = vpack.c.bf16 %v517_v14, %v516_v17  ;;  %v14843_v53 = vld [vmem:[%s17800_s3 + $0x1c8] sm:$0xff]   ;;  %v345_v17 = vadd.f32 %v12218_v56, %v14652_v30  ;;  %v336_v4 = vpop.f32.mrb[15].mxu0  ;;  %v852_v51 = vadd.f32 %v12254_v36, %v14652_v30  ;;  %v843_v55 = vpop.f32.mrb[15].mxu1  ;;  %12355 = vmatprep.mubr.msk.bf16.mxu0 %vm556_vm3, %v14848_v22 }
 0x133   :  { %562 = vst.msk [vmem:[#allocation2 + $0x28] sm:$0xff] %vm556_vm3, %v545_v62  ;;  %v1051_v1 = vpack.c.bf16 %v1024_v5, %v1023_v24  ;;  %v13821_v14 = vld [vmem:[%s17801_s4 + $0x8] sm:$0xff]   ;;  %v933_v24 = vmax.f32 %v849_v6, 0.0  ;;  %v424_v62 = vmax.f32 %v334_v7, 0.0  ;;  %v337_v5 = vadd.f32 %v14652_v30, %v336_v4  ;;  %12356 = vmatmul.mubr.msk.bf16.vlgmr.msra.gmra.mrb[64].mxu0 %vm556_vm3, %v14864_v2  ;;  %12780 = vmatmul.mubr.msk.bf16.gmra.mrb[120].mxu1 %vm195_vm2, %v13811_v52 }
 0x134   :  { %1068 = vst.msk [vmem:[#allocation2 + $0xa8] sm:$0xff] %vm556_vm3, %v1052_v46  ;;  %561 = vst.msk [vmem:[#allocation2 + $0x20] sm:$0xff] %vm556_vm3, %v544_v61  ;;  %v931_v28 = vmax.f32 %v841_v10, 0.0  ;;  %v427_v29 = vmax.f32 %v345_v17, 0.0  ;;  %v844_v46 = vadd.f32 %v14652_v30, %v843_v55  ;;  %v17849_v6 = vunpack.c.l.bf16 %v14514_v19  ;;  %12468 = vmatpush3.bf16.msra.mxu0 %v14343_v27  ;;  %12783 = vmatprep.mubr.msk.bf16.mxu1 %vm195_vm2, %v13812_v13  ;;  %v13833_v27 = vld [vmem:[%s17801_s4 + $0x10] sm:$0xff]  }
 0x135   :  { %1067 = vst.msk [vmem:[#allocation2 + $0xa0] sm:$0xff] %vm556_vm3, %v1051_v1  ;;  %v934_v56 = vmax.f32 %v852_v51, 0.0  ;;  %v425_v36 = vmax.f32 %v337_v5, 0.0  ;;  %v17850_v10 = vunpack.c.l.bf16 %v14509_v18  ;;  %v17851_v4 = vunpack.c.l.bf16 %v14529_v25  ;;  %12469 = vmatprep.subr.bf16.mxu0 %v13821_v14 }
 0x136   :  { %v1029_v7 = vmul.f32 %v17849_v6, %v933_v24  ;;  %v17852_v26 = vunpack.c.h.bf16 %v14509_v18  ;;  %v932_v15 = vmax.f32 %v844_v46, 0.0  ;;  %v17853_v52 = vunpack.c.l.bf16 %v14519_v20  ;;  %v12221_v6 = vpop.f32.mrb[16].mxu0 }
 0x137   :  { %v522_v17 = vmul.f32 %v17850_v10, %v426_v60  ;;  %v1027_v55 = vmul.f32 %v17851_v4, %v931_v28  ;;  %v17854_v51 = vunpack.c.h.bf16 %v14514_v19  ;;  %v17855_v5 = vunpack.c.h.bf16 %v14519_v20  ;;  %v12257_v10 = vpop.f32.mrb[16].mxu1  ;;  %v349_v4 = vpop.f32.mrb[17].mxu0 }
 0x138   :  { %v523_v61 = vmul.f32 %v17852_v26, %v427_v29  ;;  %v520_v24 = vmul.f32 %v17853_v52, %v424_v62  ;;  %v17856_v13 = vunpack.c.h.bf16 %v14529_v25  ;;  %v358_v46 = vadd.f32 %v12221_v6, %v14652_v30  ;;  %v13814_v25 = vld [vmem:[%s17797_s0 + $0x300] sm:$0xff]   ;;  %12470 = vmatpush3.bf16.msra.mxu0 %v13821_v14  ;;  %v14918_v14 = vld [vmem:[%s17800_s3 + $0x1d0] sm:$0xff]   ;;  %v13842_v6 = vld [vmem:[%s17801_s4 + $0x18] sm:$0xff]  }
 0x139   :  { %v1030_v60 = vmul.f32 %v17854_v51, %v934_v56  ;;  %v521_v28 = vmul.f32 %v17855_v5, %v425_v36  ;;  %v865_v19 = vadd.f32 %v12257_v10, %v14652_v30  ;;  %v350_v20 = vadd.f32 %v14652_v30, %v349_v4  ;;  %v856_v56 = vpop.f32.mrb[17].mxu1  ;;  %v12222_v36 = vpop.f32.mrb[18].mxu0  ;;  %12471 = vmatprep.subr.bf16.mxu0 %v13833_v27 }
 0x13a   :  { %v547_v26 = vpack.c.bf16 %v523_v61, %v522_v17  ;;  %v1028_v29 = vmul.f32 %v17856_v13, %v932_v15  ;;  %v13813_v61 = vld [vmem:[%s17797_s0 + $0x2f8] sm:$0xff]   ;;  %v430_v17 = vmax.f32 %v358_v46, 0.0  ;;  %v361_v51 = vadd.f32 %v12222_v36, %v14652_v30  ;;  %v352_v5 = vpop.f32.mrb[19].mxu0  ;;  %v14929_v10 = vld [vmem:[#allocation2 + $0x28] sm:$0xff] }
 0x13b   :  { %v1054_v62 = vpack.c.bf16 %v1030_v60, %v1029_v7  ;;  %v546_v52 = vpack.c.bf16 %v521_v28, %v520_v24  ;;  %v14908_v15 = vld [vmem:[%s17800_s3 + $0x1d8] sm:$0xff]   ;;  %v857_v24 = vadd.f32 %v14652_v30, %v856_v56  ;;  %v12258_v60 = vpop.f32.mrb[18].mxu1  ;;  %v14913_v28 = vld [vmem:[#allocation2 + $0x20] sm:$0xff]  ;;  %12784 = vmatmul.mubr.msk.bf16.gmra.mrb[124].mxu1 %vm195_vm2, %v13813_v61  ;;  %v17860_v1 = vunpack.c.h.bf16 %v14539_v31 }
 0x13c   :  { %564 = vst.msk [vmem:[#allocation2 + $0x38] sm:$0xff] %vm556_vm3, %v547_v26  ;;  %v1053_v7 = vpack.c.bf16 %v1028_v29, %v1027_v55  ;;  %v937_v55 = vmax.f32 %v865_v19, 0.0  ;;  %v428_v26 = vmax.f32 %v350_v20, 0.0  ;;  %v868_v13 = vadd.f32 %v12258_v60, %v14652_v30  ;;  %v859_v46 = vpop.f32.mrb[19].mxu1  ;;  %12359 = vmatprep.mubr.msk.bf16.mxu0 %vm556_vm3, %v14913_v28  ;;  %12472 = vmatpush3.bf16.msra.mxu0 %v13833_v27 }
 0x13d   :  { %1070 = vst.msk [vmem:[#allocation2 + $0xb8] sm:$0xff] %vm556_vm3, %v1054_v62  ;;  %563 = vst.msk [vmem:[#allocation2 + $0x30] sm:$0xff] %vm556_vm3, %v546_v52  ;;  %v353_v29 = vadd.f32 %v14652_v30, %v352_v5  ;;  %v935_v4 = vmax.f32 %v857_v24, 0.0  ;;  %v431_v56 = vmax.f32 %v361_v51, 0.0  ;;  %v860_v62 = vadd.f32 %v14652_v30, %v859_v46  ;;  %12360 = vmatmul.mubr.msk.bf16.gmra.mrb[68].mxu0 %vm556_vm3, %v14929_v10 }
 0x13e   :  { %1069 = vst.msk [vmem:[#allocation2 + $0xb0] sm:$0xff] %vm556_vm3, %v1053_v7  ;;  %v17857_v19 = vunpack.c.l.bf16 %v14544_v32  ;;  %v938_v36 = vmax.f32 %v868_v13, 0.0  ;;  %v11279_v5 = vunpack.c.l.bf16 %v14918_v14  ;;  %v17858_v7 = vunpack.c.l.bf16 %v14539_v31  ;;  %12791 = vmatprep.mubr.msk.bf16.mxu1 %vm195_vm2, %v13814_v25  ;;  %12473 = vmatprep.subr.bf16.mxu0 %v13842_v6  ;;  %v12261_v25 = vpop.f32.mrb[20].mxu1 }
 0x13f   :  { %v429_v60 = vmax.f32 %v353_v29, 0.0  ;;  %v17859_v51 = vunpack.c.l.bf16 %v14559_v38  ;;  %v527_v18 = vmul.f32 %v17860_v1, %v431_v56  ;;  %v936_v52 = vmax.f32 %v860_v62, 0.0 }
 0x140   :  { %v1033_v20 = vmul.f32 %v17857_v19, %v937_v55  ;;  %v526_v24 = vmul.f32 %v17858_v7, %v430_v17  ;;  %v17861_v55 = vunpack.c.l.bf16 %v14549_v33  ;;  %v17862_v27 = vunpack.c.h.bf16 %v14544_v32  ;;  %v12225_v17 = vpop.f32.mrb[20].mxu0  ;;  %12474 = vmatpush3.bf16.msra.mxu0 %v13842_v6 }
 0x141   :  { %v1031_v46 = vmul.f32 %v17859_v51, %v935_v4  ;;  %v17863_v29 = vunpack.c.h.bf16 %v14549_v33  ;;  %v11284_v7 = vunpack.c.h.bf16 %v14908_v15  ;;  %v17864_v31 = vunpack.c.h.bf16 %v14559_v38  ;;  %v365_v62 = vpop.f32.mrb[21].mxu0 }
 0x142   :  { %v524_v13 = vmul.f32 %v17861_v55, %v428_v26  ;;  %v1034_v61 = vmul.f32 %v17862_v27, %v938_v36  ;;  %v549_v4 = vpack.c.bf16 %v527_v18, %v526_v24  ;;  %v374_v56 = vadd.f32 %v12225_v17, %v14652_v30  ;;  %v872_v36 = vpop.f32.mrb[21].mxu1  ;;  %v13815_v18 = vld [vmem:[%s17797_s0 + $0x308] sm:$0xff]  }
 0x143   :  { %v525_v19 = vmul.f32 %v17863_v29, %v429_v60  ;;  %v1032_v1 = vmul.f32 %v17864_v31, %v936_v52  ;;  %v11280_v51 = vunpack.c.h.bf16 %v14918_v14  ;;  %v881_v32 = vadd.f32 %v12261_v25, %v14652_v30  ;;  %v12226_v60 = vpop.f32.mrb[22].mxu0  ;;  %v13817_v29 = vld [vmem:[%s17797_s0 + $0x310] sm:$0xff]   ;;  %v14977_v31 = vld [vmem:[#allocation2 + $0x38] sm:$0xff]  ;;  %12792 = vmatmul.mubr.msk.bf16.vlgmr.msra.gmra.mrb[128].mxu1 %vm195_vm2, %v13815_v18 }
 0x144   :  { %v1056_v26 = vpack.c.bf16 %v1034_v61, %v1033_v20  ;;  %v366_v33 = vadd.f32 %v14652_v30, %v365_v62  ;;  %566 = vst.msk [vmem:[#allocation2 + $0x48] sm:$0xff] %vm556_vm3, %v549_v4  ;;  %v434_v52 = vmax.f32 %v374_v56, 0.0  ;;  %v873_v24 = vadd.f32 %v14652_v30, %v872_v36  ;;  %v368_v27 = vpop.f32.mrb[23].mxu0  ;;  %v14966_v61 = vld [vmem:[#allocation2 + $0x30] sm:$0xff]  ;;  %12824 = vmatpush3.bf16.msra.mxu1 %v14453_v57 }
 0x145   :  { %v548_v55 = vpack.c.bf16 %v525_v19, %v524_v13  ;;  %v1055_v38 = vpack.c.bf16 %v1032_v1, %v1031_v46  ;;  %v377_v20 = vadd.f32 %v12226_v60, %v14652_v30  ;;  %v12262_v13 = vpop.f32.mrb[22].mxu1  ;;  %v941_v6 = vmax.f32 %v881_v32, 0.0  ;;  %12363 = vmatprep.mubr.msk.bf16.mxu0 %vm556_vm3, %v14966_v61  ;;  %12795 = vmatprep.mubr.msk.bf16.mxu1 %vm195_vm2, %v13817_v29 }
 0x146   :  { %1072 = vst.msk [vmem:[#allocation2 + $0xc8] sm:$0xff] %vm556_vm3, %v1056_v26  ;;  %v432_v19 = vmax.f32 %v366_v33, 0.0  ;;  %v884_v46 = vadd.f32 %v12262_v13, %v14652_v30  ;;  %v369_v17 = vadd.f32 %v14652_v30, %v368_v27  ;;  %v875_v4 = vpop.f32.mrb[23].mxu1  ;;  %v939_v1 = vmax.f32 %v873_v24, 0.0  ;;  %12364 = vmatmul.mubr.msk.bf16.gmra.mrb[72].mxu0 %vm556_vm3, %v14977_v31  ;;  %12825 = vmatprep.subr.bf16.mxu1 %v14776_v0 }
 0x147   :  { %565 = vst.msk [vmem:[#allocation2 + $0x40] sm:$0xff] %vm556_vm3, %v548_v55  ;;  %1071 = vst.msk [vmem:[#allocation2 + $0xc0] sm:$0xff] %vm556_vm3, %v1055_v38  ;;  %v435_v56 = vmax.f32 %v377_v20, 0.0  ;;  %v876_v25 = vadd.f32 %v14652_v30, %v875_v4  ;;  %v17865_v62 = vunpack.c.l.bf16 %v14573_v44  ;;  %v17866_v33 = vunpack.c.l.bf16 %v14568_v43  ;;  %v12229_v4 = vpop.f32.mrb[24].mxu0 }
 0x148   :  { %v942_v55 = vmax.f32 %v884_v46, 0.0  ;;  %v433_v32 = vmax.f32 %v369_v17, 0.0  ;;  %v17867_v60 = vunpack.c.l.bf16 %v14590_v58  ;;  %v17868_v24 = vunpack.c.h.bf16 %v14568_v43  ;;  %v381_v29 = vpop.f32.mrb[25].mxu0  ;;  %12826 = vmatpush3.bf16.msra.mxu1 %v14776_v0 }
 0x149   :  { %v1037_v26 = vmul.f32 %v17865_v62, %v941_v6  ;;  %v530_v36 = vmul.f32 %v17866_v33, %v434_v52  ;;  %v940_v13 = vmax.f32 %v876_v25, 0.0  ;;  %v17869_v27 = vunpack.c.l.bf16 %v14578_v45  ;;  %v12265_v25 = vpop.f32.mrb[24].mxu1 }
 0x14a   :  { %v1035_v38 = vmul.f32 %v17867_v60, %v939_v1  ;;  %v531_v20 = vmul.f32 %v17868_v24, %v435_v56  ;;  %v17870_v46 = vunpack.c.h.bf16 %v14573_v44  ;;  %v17871_v17 = vunpack.c.h.bf16 %v14578_v45  ;;  %v12230_v45 = vpop.f32.mrb[26].mxu0 }
 0x14b   :  { %v528_v6 = vmul.f32 %v17869_v27, %v432_v19  ;;  %v17872_v43 = vunpack.c.h.bf16 %v14590_v58  ;;  %v390_v57 = vadd.f32 %v12229_v4, %v14652_v30  ;;  %v897_v19 = vadd.f32 %v12265_v25, %v14652_v30  ;;  %v13819_v27 = vld [vmem:[%s17797_s0 + $0x320] sm:$0xff]  }
 0x14c   :  { %v1038_v18 = vmul.f32 %v17870_v46, %v942_v55  ;;  %v529_v52 = vmul.f32 %v17871_v17, %v433_v32  ;;  %v551_v1 = vpack.c.bf16 %v531_v20, %v530_v36  ;;  %v382_v44 = vadd.f32 %v14652_v30, %v381_v29  ;;  %v888_v55 = vpop.f32.mrb[25].mxu1  ;;  %v13818_v32 = vld [vmem:[%s17797_s0 + $0x318] sm:$0xff]   ;;  %v384_v20 = vpop.f32.mrb[27].mxu0 }
 0x14d   :  { %v1036_v56 = vmul.f32 %v17872_v43, %v940_v13  ;;  %v438_v36 = vmax.f32 %v390_v57, 0.0  ;;  %v889_v60 = vadd.f32 %v14652_v30, %v888_v55  ;;  %v393_v24 = vadd.f32 %v12230_v45, %v14652_v30  ;;  %12796 = vmatmul.mubr.msk.bf16.gmra.mrb[132].mxu1 %vm195_vm2, %v13818_v32 }
 0x14e   :  { %v1058_v62 = vpack.c.bf16 %v1038_v18, %v1037_v26  ;;  %v550_v33 = vpack.c.bf16 %v529_v52, %v528_v6  ;;  %568 = vst.msk [vmem:[#allocation2 + $0x58] sm:$0xff] %vm556_vm3, %v551_v1  ;;  %v12266_v26 = vpop.f32.mrb[26].mxu1  ;;  %v15012_v13 = vld [vmem:[#allocation2 + $0x40] sm:$0xff]  ;;  %v436_v6 = vmax.f32 %v382_v44, 0.0  ;;  %v385_v18 = vadd.f32 %v14652_v30, %v384_v20  ;;  %v15024_v52 = vld [vmem:[#allocation2 + $0x48] sm:$0xff]  ;;  %12799 = vmatprep.mubr.msk.bf16.mxu1 %vm195_vm2, %v13819_v27 }
 0x14f   :  { %v1057_v58 = vpack.c.bf16 %v1036_v56, %v1035_v38  ;;  %v945_v38 = vmax.f32 %v897_v19, 0.0  ;;  %v900_v46 = vadd.f32 %v12266_v26, %v14652_v30  ;;  %v891_v17 = vpop.f32.mrb[27].mxu1  ;;  %12367 = vmatprep.mubr.msk.bf16.mxu0 %vm556_vm3, %v15012_v13  ;;  %v943_v4 = vmax.f32 %v889_v60, 0.0 }
 0x150   :  { %1074 = vst.msk [vmem:[#allocation2 + $0xd8] sm:$0xff] %vm556_vm3, %v1058_v62  ;;  %567 = vst.msk [vmem:[#allocation2 + $0x50] sm:$0xff] %vm556_vm3, %v550_v33  ;;  %v439_v0 = vmax.f32 %v393_v24, 0.0  ;;  %v892_v1 = vadd.f32 %v14652_v30, %v891_v17  ;;  %12368 = vmatmul.mubr.msk.bf16.gmra.mrb[76].mxu0 %vm556_vm3, %v15024_v52  ;;  %v17873_v43 = vunpack.c.l.bf16 %v14604_v50  ;;  %v437_v25 = vmax.f32 %v385_v18, 0.0  ;;  %v12269_v17 = vpop.f32.mrb[28].mxu1 }
 0x151   :  { %1073 = vst.msk [vmem:[#allocation2 + $0xd0] sm:$0xff] %vm556_vm3, %v1057_v58  ;;  %v946_v57 = vmax.f32 %v900_v46, 0.0  ;;  %v17874_v29 = vunpack.c.l.bf16 %v14599_v48  ;;  %v17875_v33 = vunpack.c.l.bf16 %v14621_v40  ;;  %v17876_v44 = vunpack.c.h.bf16 %v14599_v48  ;;  %v13845_v58 = vld [vmem:[%s17801_s4 + $0x20] sm:$0xff]  }
 0x152   :  { %v1041_v56 = vmul.f32 %v17873_v43, %v945_v38  ;;  %v944_v45 = vmax.f32 %v892_v1, 0.0  ;;  %v17877_v60 = vunpack.c.l.bf16 %v14609_v8  ;;  %v17878_v32 = vunpack.c.h.bf16 %v14604_v50  ;;  %v12233_v38 = vpop.f32.mrb[28].mxu0  ;;  %12475 = vmatprep.subr.bf16.mxu0 %v13845_v58  ;;  %v904_v43 = vpop.f32.mrb[29].mxu1 }
 0x153   :  { %v534_v62 = vmul.f32 %v17874_v29, %v438_v36  ;;  %v1039_v19 = vmul.f32 %v17875_v33, %v943_v4  ;;  %v535_v55 = vmul.f32 %v17876_v44, %v439_v0  ;;  %v17879_v36 = vunpack.c.h.bf16 %v14609_v8  ;;  %v397_v4 = vpop.f32.mrb[29].mxu0  ;;  %v13820_v8 = vld [vmem:[%s17797_s0 + $0x328] sm:$0xff]   ;;  %12476 = vmatpush3.bf16.msra.mxu0 %v13845_v58  ;;  %v12270_v33 = vpop.f32.mrb[30].mxu1  ;;  %v15073_v58 = vld [vmem:[%s17800_s3 + $0x100] sm:$0xff]  }
 0x154   :  { %v532_v24 = vmul.f32 %v17877_v60, %v436_v6  ;;  %v1042_v26 = vmul.f32 %v17878_v32, %v946_v57  ;;  %v17880_v48 = vunpack.c.h.bf16 %v14621_v40  ;;  %v406_v27 = vadd.f32 %v12233_v38, %v14652_v30  ;;  %v12234_v57 = vpop.f32.mrb[30].mxu0  ;;  %v15060_v40 = vld [vmem:[%s17800_s3 + $0x108] sm:$0xff]  }
 0x155   :  { %v533_v20 = vmul.f32 %v17879_v36, %v437_v25  ;;  %v553_v46 = vpack.c.bf16 %v535_v55, %v534_v62  ;;  %v913_v6 = vadd.f32 %v12269_v17, %v14652_v30  ;;  %v398_v50 = vadd.f32 %v14652_v30, %v397_v4  ;;  %v400_v44 = vpop.f32.mrb[31].mxu0  ;;  %v15081_v36 = vld [vmem:[#allocation2 + $0x58] sm:$0xff]  ;;  %12800 = vmatmul.mubr.msk.bf16.gmra.mrb[136].mxu1 %vm195_vm2, %v13820_v8 }
 0x156   :  { %v1040_v18 = vmul.f32 %v17880_v48, %v944_v45  ;;  %v1060_v0 = vpack.c.bf16 %v1042_v26, %v1041_v56  ;;  %v442_v25 = vmax.f32 %v406_v27, 0.0  ;;  %v905_v29 = vadd.f32 %v14652_v30, %v904_v43  ;;  %v13822_v45 = vld [vmem:[%s17797_s0 + $0x330] sm:$0xff]   ;;  %v907_v26 = vpop.f32.mrb[31].mxu1 }
 0x157   :  { %v552_v1 = vpack.c.bf16 %v533_v20, %v532_v24  ;;  %570 = vst.msk [vmem:[#allocation2 + $0x68] sm:$0xff] %vm556_vm3, %v553_v46  ;;  %v409_v62 = vadd.f32 %v12234_v57, %v14652_v30  ;;  %v15065_v55 = vld [vmem:[#allocation2 + $0x50] sm:$0xff]  ;;  %v440_v60 = vmax.f32 %v398_v50, 0.0  ;;  %v916_v24 = vadd.f32 %v12270_v33, %v14652_v30  ;;  %12803 = vmatprep.mubr.msk.bf16.mxu1 %vm195_vm2, %v13822_v45 }
 0x158   :  { %v1059_v56 = vpack.c.bf16 %v1040_v18, %v1039_v19  ;;  %1076 = vst.msk [vmem:[#allocation2 + $0xe8] sm:$0xff] %vm556_vm3, %v1060_v0  ;;  %v949_v19 = vmax.f32 %v913_v6, 0.0  ;;  %v401_v32 = vadd.f32 %v14652_v30, %v400_v44  ;;  %12371 = vmatprep.mubr.msk.bf16.mxu0 %vm556_vm3, %v15065_v55  ;;  %v947_v20 = vmax.f32 %v905_v29, 0.0  ;;  %v15098_v29 = vld [vmem:[#allocation6] ss:$0 sm:$0xff] }
 0x159   :  { %569 = vst.msk [vmem:[#allocation2 + $0x60] sm:$0xff] %vm556_vm3, %v552_v1  ;;  %v443_v38 = vmax.f32 %v409_v62, 0.0  ;;  %v908_v46 = vadd.f32 %v14652_v30, %v907_v26  ;;  %12372 = vmatmul.mubr.msk.bf16.gmra.mrb[80].mxu0 %vm556_vm3, %v15081_v36  ;;  %v11179_v48 = vunpack.c.l.bf16 %v15060_v40  ;;  %v17881_v18 = vunpack.c.l.bf16 %v14635_v47 }
 0x15a   :  { %1075 = vst.msk [vmem:[#allocation2 + $0xe0] sm:$0xff] %vm556_vm3, %v1059_v56  ;;  %v950_v17 = vmax.f32 %v916_v24, 0.0  ;;  %v441_v4 = vmax.f32 %v401_v32, 0.0  ;;  %v11175_v0 = vunpack.c.l.bf16 %v15073_v58  ;;  %v17882_v1 = vunpack.c.l.bf16 %v14630_v42  ;;  %v12277_v24 = vpop.f32.mrb[32].mxu0 }
 0x15b   :  { %v1045_v27 = vmul.f32 %v17881_v18, %v949_v19  ;;  %v17883_v50 = vunpack.c.l.bf16 %v14649_v37  ;;  %v17884_v43 = vunpack.c.h.bf16 %v14630_v42  ;;  %v948_v56 = vmax.f32 %v908_v46, 0.0  ;;  %v1298_v45 = vpop.f32.mrb[33].mxu0 }
 0x15c   :  { %v538_v6 = vmul.f32 %v17882_v1, %v442_v25  ;;  %v17885_v62 = vunpack.c.l.bf16 %v14640_v39  ;;  %v17886_v8 = vunpack.c.h.bf16 %v14635_v47  ;;  %v17887_v19 = vunpack.c.h.bf16 %v14640_v39  ;;  %v13823_v39 = vld [vmem:[%s17797_s0 + $0x338] sm:$0xff]  }
 0x15d   :  { %v1043_v30 = vmul.f32 %v17883_v50, %v947_v20  ;;  %v539_v57 = vmul.f32 %v17884_v43, %v443_v38  ;;  %v11180_v32 = vunpack.c.h.bf16 %v15060_v40  ;;  %v17888_v42 = vunpack.c.h.bf16 %v14649_v37  ;;  %v12313_v38 = vpop.f32.mrb[32].mxu1  ;;  %12804 = vmatmul.mubr.msk.bf16.gmra.mrb[140].mxu1 %vm195_vm2, %v13823_v39 }
 0x15e   :  { %v536_v33 = vmul.f32 %v17885_v62, %v440_v60  ;;  %v1046_v44 = vmul.f32 %v17886_v8, %v950_v17  ;;  %v537_v25 = vmul.f32 %v17887_v19, %v441_v4  ;;  %v1307_v46 = vadd.f32 %v12277_v24, %v15098_v29  ;;  %v1804_v17 = vpop.f32.mrb[33].mxu1  ;;  %v12278_v4 = vpop.f32.mrb[34].mxu0  ;;  %v15130_v8 = vld [vmem:[#allocation2 + $0x68] sm:$0xff] }
 0x15f   :  { %v555_v26 = vpack.c.bf16 %v539_v57, %v538_v6  ;;  %v1044_v20 = vmul.f32 %v17888_v42, %v948_v56  ;;  %v11176_v18 = vunpack.c.h.bf16 %v15073_v58  ;;  %v1813_v47 = vadd.f32 %v12313_v38, %v15098_v29  ;;  %v12314_v50 = vpop.f32.mrb[34].mxu1  ;;  %v13824_v58 = vld [vmem:[%s17797_s0 + $0x340] sm:$0xff]   ;;  %v1301_v56 = vpop.f32.mrb[35].mxu0  ;;  %v15145_v38 = vld [vmem:[%s17800_s3 + $0x110] sm:$0xff]  }
 0x160   :  { %v1062_v60 = vpack.c.bf16 %v1046_v44, %v1045_v27  ;;  %v554_v1 = vpack.c.bf16 %v537_v25, %v536_v33  ;;  %v1299_v40 = vadd.f32 %v15098_v29, %v1298_v45  ;;  %v1805_v6 = vadd.f32 %v15098_v29, %v1804_v17  ;;  %v15119_v43 = vld [vmem:[#allocation2 + $0x60] sm:$0xff]  ;;  %v1807_v33 = vpop.f32.mrb[35].mxu1  ;;  %v15136_v25 = vld [vmem:[%s17800_s3 + $0x118] sm:$0xff]   ;;  %12807 = vmatprep.mubr.msk.bf16.mxu1 %vm195_vm2, %v13824_v58 }
 0x161   :  { %572 = vst.msk [vmem:[#allocation2 + $0x78] sm:$0xff] %vm556_vm3, %v555_v26  ;;  %v1061_v37 = vpack.c.bf16 %v1044_v20, %v1043_v30  ;;  %v1427_v27 = vmax.f32 %v1307_v46, 0.0  ;;  %v1310_v57 = vadd.f32 %v12278_v4, %v15098_v29  ;;  %v1933_v62 = vmax.f32 %v1813_v47, 0.0  ;;  %12375 = vmatprep.mubr.msk.bf16.mxu0 %vm556_vm3, %v15119_v43 }
 0x162   :  { %1078 = vst.msk [vmem:[#allocation2 + $0xf8] sm:$0xff] %vm556_vm3, %v1062_v60  ;;  %571 = vst.msk [vmem:[#allocation2 + $0x70] sm:$0xff] %vm556_vm3, %v554_v1  ;;  %v1816_v30 = vadd.f32 %v12314_v50, %v15098_v29  ;;  %v1425_v44 = vmax.f32 %v1299_v40, 0.0  ;;  %v1302_v19 = vadd.f32 %v15098_v29, %v1301_v56  ;;  %v1931_v24 = vmax.f32 %v1805_v6, 0.0  ;;  %12376 = vmatmul.mubr.msk.bf16.gmra.mrb[84].mxu0 %vm556_vm3, %v15130_v8 }
 0x163   :  { %1077 = vst.msk [vmem:[#allocation2 + $0xf0] sm:$0xff] %vm556_vm3, %v1061_v37  ;;  %v1808_v26 = vadd.f32 %v15098_v29, %v1807_v33  ;;  %v1523_v42 = vmul.f32 %v11179_v48, %v1427_v27  ;;  %v1428_v20 = vmax.f32 %v1310_v57, 0.0  ;;  %v17889_v46 = vunpack.c.l.bf16 %v14661_v49  ;;  %v12281_v57 = vpop.f32.mrb[36].mxu0 }
 0x164   :  { %v1934_v60 = vmax.f32 %v1816_v30, 0.0  ;;  %v1521_v1 = vmul.f32 %v11175_v0, %v1425_v44  ;;  %v1426_v47 = vmax.f32 %v1302_v19, 0.0  ;;  %v17890_v17 = vunpack.c.l.bf16 %v14666_v34  ;;  %v12317_v30 = vpop.f32.mrb[36].mxu1  ;;  %v1314_v58 = vpop.f32.mrb[37].mxu0 }
 0x165   :  { %v2029_v45 = vmul.f32 %v17889_v46, %v1933_v62  ;;  %v1932_v4 = vmax.f32 %v1808_v26, 0.0  ;;  %v1524_v48 = vmul.f32 %v11180_v32, %v1428_v20  ;;  %v11187_v37 = vunpack.c.l.bf16 %v15136_v25 }
 0x166   :  { %v2027_v40 = vmul.f32 %v17890_v17, %v1931_v24  ;;  %v17891_v6 = vunpack.c.h.bf16 %v14661_v49  ;;  %v1522_v27 = vmul.f32 %v11176_v18, %v1426_v47  ;;  %v11183_v56 = vunpack.c.l.bf16 %v15145_v38  ;;  %v1820_v24 = vpop.f32.mrb[37].mxu1  ;;  %v13825_v18 = vld [vmem:[%s17797_s0 + $0x348] sm:$0xff]  }
 0x167   :  { %v11188_v39 = vunpack.c.h.bf16 %v15136_v25  ;;  %v17892_v0 = vunpack.c.h.bf16 %v14666_v34  ;;  %v1554_v33 = vpack.c.bf16 %v1524_v48, %v1523_v42  ;;  %v1323_v44 = vadd.f32 %v12281_v57, %v15098_v29  ;;  %v12282_v34 = vpop.f32.mrb[38].mxu0  ;;  %v12318_v46 = vpop.f32.mrb[38].mxu1  ;;  %12808 = vmatmul.mubr.msk.bf16.gmra.mrb[144].mxu1 %vm195_vm2, %v13825_v18 }
 0x168   :  { %v2030_v50 = vmul.f32 %v17891_v6, %v1934_v60  ;;  %v11184_v32 = vunpack.c.h.bf16 %v15145_v38  ;;  %v1829_v49 = vadd.f32 %v12317_v30, %v15098_v29  ;;  %v1553_v26 = vpack.c.bf16 %v1522_v27, %v1521_v1  ;;  %v13827_v38 = vld [vmem:[%s17797_s0 + $0x350] sm:$0xff]   ;;  %v1317_v17 = vpop.f32.mrb[39].mxu0  ;;  %v15179_v48 = vld [vmem:[#allocation2 + $0x78] sm:$0xff]  ;;  %v15186_v27 = vld [vmem:[%s17800_s3 + $0x128] sm:$0xff]  }
 0x169   :  { %v2028_v62 = vmul.f32 %v17892_v0, %v1932_v4  ;;  %v1315_v25 = vadd.f32 %v15098_v29, %v1314_v58  ;;  %v1821_v42 = vadd.f32 %v15098_v29, %v1820_v24  ;;  %v15168_v60 = vld [vmem:[#allocation2 + $0x70] sm:$0xff]  ;;  %1570 = vst.msk [vmem:[#allocation2 + $0x108] sm:$0xff] %vm556_vm3, %v1554_v33  ;;  %v1326_v47 = vadd.f32 %v12282_v34, %v15098_v29  ;;  %v1823_v4 = vpop.f32.mrb[39].mxu1 }
 0x16a   :  { %v2060_v19 = vpack.c.bf16 %v2030_v50, %v2029_v45  ;;  %v1431_v45 = vmax.f32 %v1323_v44, 0.0  ;;  %v1937_v1 = vmax.f32 %v1829_v49, 0.0  ;;  %12379 = vmatprep.mubr.msk.bf16.mxu0 %vm556_vm3, %v15168_v60  ;;  %1569 = vst.msk [vmem:[#allocation2 + $0x100] sm:$0xff] %vm556_vm3, %v1553_v26  ;;  %v1318_v50 = vadd.f32 %v15098_v29, %v1317_v17  ;;  %v15197_v44 = vld [vmem:[%s17800_s3 + $0x120] sm:$0xff]   ;;  %12811 = vmatprep.mubr.msk.bf16.mxu1 %vm195_vm2, %v13827_v38  ;;  %v12285_v17 = vpop.f32.mrb[40].mxu0 }
 0x16b   :  { %v2059_v20 = vpack.c.bf16 %v2028_v62, %v2027_v40  ;;  %v1832_v40 = vadd.f32 %v12318_v46, %v15098_v29  ;;  %v1429_v6 = vmax.f32 %v1315_v25, 0.0  ;;  %v1935_v57 = vmax.f32 %v1821_v42, 0.0  ;;  %12380 = vmatmul.mubr.msk.bf16.gmra.mrb[88].mxu0 %vm556_vm3, %v15179_v48  ;;  %v15192_v62 = vld [vmem:[#allocation2 + $0x80] sm:$0xff]  ;;  %v1330_v38 = vpop.f32.mrb[41].mxu0 }
 0x16c   :  { %2076 = vst.msk [vmem:[#allocation2 + $0x188] sm:$0xff] %vm556_vm3, %v2060_v19  ;;  %v1824_v0 = vadd.f32 %v15098_v29, %v1823_v4  ;;  %v1527_v30 = vmul.f32 %v11187_v37, %v1431_v45  ;;  %v1432_v33 = vmax.f32 %v1326_v47, 0.0  ;;  %v17893_v58 = vunpack.c.l.bf16 %v14680_v41  ;;  %12383 = vmatprep.mubr.msk.bf16.mxu0 %vm556_vm3, %v15192_v62 }
 0x16d   :  { %2075 = vst.msk [vmem:[#allocation2 + $0x180] sm:$0xff] %vm556_vm3, %v2059_v20  ;;  %v1938_v49 = vmax.f32 %v1832_v40, 0.0  ;;  %v1525_v24 = vmul.f32 %v11183_v56, %v1429_v6  ;;  %v1430_v26 = vmax.f32 %v1318_v50, 0.0  ;;  %v17894_v25 = vunpack.c.l.bf16 %v14696_v21  ;;  %v12321_v40 = vpop.f32.mrb[40].mxu1  ;;  %v12286_v21 = vpop.f32.mrb[42].mxu0 }
 0x16e   :  { %v2033_v19 = vmul.f32 %v17893_v58, %v1937_v1  ;;  %v1936_v34 = vmax.f32 %v1824_v0, 0.0  ;;  %v1528_v20 = vmul.f32 %v11188_v39, %v1432_v33  ;;  %v11195_v42 = vunpack.c.l.bf16 %v15186_v27 }
 0x16f   :  { %v2031_v37 = vmul.f32 %v17894_v25, %v1935_v57  ;;  %v17895_v46 = vunpack.c.h.bf16 %v14680_v41  ;;  %v1526_v47 = vmul.f32 %v11184_v32, %v1430_v26  ;;  %v11191_v18 = vunpack.c.l.bf16 %v15197_v44  ;;  %v1836_v57 = vpop.f32.mrb[41].mxu1  ;;  %v13828_v32 = vld [vmem:[%s17797_s0 + $0x358] sm:$0xff]  }
 0x170   :  { %v11196_v1 = vunpack.c.h.bf16 %v15186_v27  ;;  %v2032_v56 = vmul.f32 %v11248_v59, %v1936_v34  ;;  %v1556_v4 = vpack.c.bf16 %v1528_v20, %v1527_v30  ;;  %v1339_v6 = vadd.f32 %v12285_v17, %v15098_v29  ;;  %v12322_v33 = vpop.f32.mrb[42].mxu1  ;;  %v15242_v17 = vld [vmem:[#allocation2 + $0x90] sm:$0xff]  ;;  %12812 = vmatmul.mubr.msk.bf16.gmra.mrb[148].mxu1 %vm195_vm2, %v13828_v32 }
 0x171   :  { %v2034_v45 = vmul.f32 %v17895_v46, %v1938_v49  ;;  %v11192_v39 = vunpack.c.h.bf16 %v15197_v44  ;;  %v1845_v41 = vadd.f32 %v12321_v40, %v15098_v29  ;;  %v1555_v0 = vpack.c.bf16 %v1526_v47, %v1525_v24  ;;  %v13829_v44 = vld [vmem:[%s17797_s0 + $0x360] sm:$0xff]   ;;  %v1333_v49 = vpop.f32.mrb[43].mxu0  ;;  %v1839_v25 = vpop.f32.mrb[43].mxu1  ;;  %v15236_v46 = vld [vmem:[%s17800_s3 + $0x138] sm:$0xff]  }
 0x172   :  { %v1331_v27 = vadd.f32 %v15098_v29, %v1330_v38  ;;  %v2061_v59 = vpack.c.bf16 %v2032_v56, %v2031_v37  ;;  %v1837_v30 = vadd.f32 %v15098_v29, %v1836_v57  ;;  %1572 = vst.msk [vmem:[#allocation2 + $0x118] sm:$0xff] %vm556_vm3, %v1556_v4  ;;  %v1435_v58 = vmax.f32 %v1339_v6, 0.0  ;;  %v15229_v37 = vld [vmem:[#allocation2 + $0x88] sm:$0xff]  ;;  %v15247_v4 = vld [vmem:[%s17800_s3 + $0x130] sm:$0xff]   ;;  %12815 = vmatprep.mubr.msk.bf16.mxu1 %vm195_vm2, %v13829_v44 }
 0x173   :  { %v2062_v50 = vpack.c.bf16 %v2034_v45, %v2033_v19  ;;  %v1342_v19 = vadd.f32 %v12286_v21, %v15098_v29  ;;  %v1941_v24 = vmax.f32 %v1845_v41, 0.0  ;;  %v1848_v26 = vadd.f32 %v12322_v33, %v15098_v29  ;;  %1571 = vst.msk [vmem:[#allocation2 + $0x110] sm:$0xff] %vm556_vm3, %v1555_v0  ;;  %12384 = vmatmul.mubr.msk.bf16.gmra.mrb[92].mxu0 %vm556_vm3, %v15229_v37  ;;  %v12289_v33 = vpop.f32.mrb[44].mxu0 }
 0x174   :  { %v1433_v34 = vmax.f32 %v1331_v27, 0.0  ;;  %v1334_v20 = vadd.f32 %v15098_v29, %v1333_v49  ;;  %2077 = vst.msk [vmem:[#allocation2 + $0x190] sm:$0xff] %vm556_vm3, %v2061_v59  ;;  %v1939_v45 = vmax.f32 %v1837_v30, 0.0  ;;  %v1840_v47 = vadd.f32 %v15098_v29, %v1839_v25  ;;  %12387 = vmatprep.mubr.msk.bf16.mxu0 %vm556_vm3, %v15242_v17  ;;  %v1346_v44 = vpop.f32.mrb[45].mxu0 }
 0x175   :  { %2078 = vst.msk [vmem:[#allocation2 + $0x198] sm:$0xff] %vm556_vm3, %v2062_v50  ;;  %v1531_v56 = vmul.f32 %v11195_v42, %v1435_v58  ;;  %v1436_v40 = vmax.f32 %v1342_v19, 0.0  ;;  %v2037_v6 = vmul.f32 %v11259_v3, %v1941_v24  ;;  %v1942_v38 = vmax.f32 %v1848_v26, 0.0  ;;  %v12325_v19 = vpop.f32.mrb[44].mxu1 }
 0x176   :  { %v1529_v50 = vmul.f32 %v11191_v18, %v1433_v34  ;;  %v1434_v41 = vmax.f32 %v1334_v20, 0.0  ;;  %v17896_v57 = vunpack.c.l.bf16 %v14743_v54  ;;  %v1940_v0 = vmax.f32 %v1840_v47, 0.0  ;;  %v1852_v25 = vpop.f32.mrb[45].mxu1  ;;  %v12290_v54 = vpop.f32.mrb[46].mxu0  ;;  %v13831_v47 = vld [vmem:[%s17797_s0 + $0x370] sm:$0xff]  }
 0x177   :  { %v1532_v27 = vmul.f32 %v11196_v1, %v1436_v40  ;;  %v11203_v21 = vunpack.c.l.bf16 %v15236_v46  ;;  %v17897_v59 = vunpack.c.h.bf16 %v14715_v12  ;;  %v11199_v32 = vunpack.c.l.bf16 %v15247_v4 }
 0x178   :  { %v2035_v42 = vmul.f32 %v17896_v57, %v1939_v45  ;;  %v1530_v30 = vmul.f32 %v11192_v39, %v1434_v41  ;;  %v11204_v58 = vunpack.c.h.bf16 %v15236_v46  ;;  %v2036_v18 = vmul.f32 %v11256_v16, %v1940_v0  ;;  %v13830_v39 = vld [vmem:[%s17797_s0 + $0x368] sm:$0xff]   ;;  %v12326_v45 = vpop.f32.mrb[46].mxu1  ;;  %v15279_v41 = vld [vmem:[#allocation2 + $0x98] sm:$0xff] }
 0x179   :  { %v2038_v3 = vmul.f32 %v17897_v59, %v1942_v38  ;;  %v1558_v49 = vpack.c.bf16 %v1532_v27, %v1531_v56  ;;  %v1355_v24 = vadd.f32 %v12289_v33, %v15098_v29  ;;  %v11200_v1 = vunpack.c.h.bf16 %v15247_v4  ;;  %v1349_v4 = vpop.f32.mrb[47].mxu0  ;;  %v15286_v0 = vld [vmem:[%s17800_s3 + $0x148] sm:$0xff]   ;;  %12816 = vmatmul.mubr.msk.bf16.gmra.mrb[152].mxu1 %vm195_vm2, %v13830_v39 }
 0x17a   :  { %v1861_v12 = vadd.f32 %v12325_v19, %v15098_v29  ;;  %v1557_v34 = vpack.c.bf16 %v1530_v30, %v1529_v50  ;;  %v1347_v20 = vadd.f32 %v15098_v29, %v1346_v44  ;;  %v2063_v16 = vpack.c.bf16 %v2036_v18, %v2035_v42  ;;  %v1855_v50 = vpop.f32.mrb[47].mxu1  ;;  %v15297_v18 = vld [vmem:[%s17800_s3 + $0x140] sm:$0xff]   ;;  %v13846_v19 = vld [vmem:[%s17801_s4 + $0x28] sm:$0xff]   ;;  %12819 = vmatprep.mubr.msk.bf16.mxu1 %vm195_vm2, %v13831_v47  ;;  %v12293_v39 = vpop.f32.mrb[48].mxu0 }
 0x17b   :  { %v2064_v26 = vpack.c.bf16 %v2038_v3, %v2037_v6  ;;  %v1853_v46 = vadd.f32 %v15098_v29, %v1852_v25  ;;  %1574 = vst.msk [vmem:[#allocation2 + $0x128] sm:$0xff] %vm556_vm3, %v1558_v49  ;;  %v1439_v56 = vmax.f32 %v1355_v24, 0.0  ;;  %v1358_v40 = vadd.f32 %v12290_v54, %v15098_v29  ;;  %12388 = vmatmul.mubr.msk.bf16.gmra.mrb[96].mxu0 %vm556_vm3, %v15279_v41  ;;  %v15292_v3 = vld [vmem:[#allocation2 + $0xa0] sm:$0xff]  ;;  %v1362_v47 = vpop.f32.mrb[49].mxu0 }
 0x17c   :  { %v1945_v6 = vmax.f32 %v1861_v12, 0.0  ;;  %v1864_v38 = vadd.f32 %v12326_v45, %v15098_v29  ;;  %1573 = vst.msk [vmem:[#allocation2 + $0x120] sm:$0xff] %vm556_vm3, %v1557_v34  ;;  %v1437_v57 = vmax.f32 %v1347_v20, 0.0  ;;  %v1350_v42 = vadd.f32 %v15098_v29, %v1349_v4  ;;  %2079 = vst.msk [vmem:[#allocation2 + $0x1a0] sm:$0xff] %vm556_vm3, %v2063_v16  ;;  %12391 = vmatprep.mubr.msk.bf16.mxu0 %vm556_vm3, %v15292_v3  ;;  %v12329_v45 = vpop.f32.mrb[48].mxu1 }
 0x17d   :  { %2080 = vst.msk [vmem:[#allocation2 + $0x1a8] sm:$0xff] %vm556_vm3, %v2064_v26  ;;  %v1943_v27 = vmax.f32 %v1853_v46, 0.0  ;;  %v1856_v59 = vadd.f32 %v15098_v29, %v1855_v50  ;;  %v1535_v30 = vmul.f32 %v11203_v21, %v1439_v56  ;;  %v1440_v33 = vmax.f32 %v1358_v40, 0.0  ;;  %12477 = vmatprep.subr.bf16.mxu0 %v13846_v19 }
 0x17e   :  { %v2041_v49 = vmul.f32 %v11267_v23, %v1945_v6  ;;  %v1946_v24 = vmax.f32 %v1864_v38, 0.0  ;;  %v1533_v21 = vmul.f32 %v11199_v32, %v1437_v57  ;;  %v1438_v44 = vmax.f32 %v1350_v42, 0.0  ;;  %12478 = vmatpush3.bf16.msra.mxu0 %v13846_v19  ;;  %v13832_v6 = vld [vmem:[%s17797_s0 + $0x378] sm:$0xff]  }
 0x17f   :  { %v2039_v26 = vmul.f32 %v11263_v35, %v1943_v27  ;;  %v1944_v12 = vmax.f32 %v1856_v59, 0.0  ;;  %v1536_v25 = vmul.f32 %v11204_v58, %v1440_v33  ;;  %v11211_v34 = vunpack.c.l.bf16 %v15286_v0  ;;  %v13834_v27 = vld [vmem:[%s17797_s0 + $0x380] sm:$0xff]  }
 0x180   :  { %v17898_v23 = vunpack.c.h.bf16 %v14790_v63  ;;  %v1534_v54 = vmul.f32 %v11200_v1, %v1438_v44  ;;  %v11207_v16 = vunpack.c.l.bf16 %v15297_v18  ;;  %v11212_v32 = vunpack.c.h.bf16 %v15286_v0  ;;  %v1868_v1 = vpop.f32.mrb[49].mxu1 }
 0x181   :  { %v17899_v46 = vunpack.c.h.bf16 %v14801_v11  ;;  %v1560_v56 = vpack.c.bf16 %v1536_v25, %v1535_v30  ;;  %v1371_v58 = vadd.f32 %v12293_v39, %v15098_v29  ;;  %v11208_v40 = vunpack.c.h.bf16 %v15297_v18  ;;  %v12294_v11 = vpop.f32.mrb[50].mxu0  ;;  %v12330_v0 = vpop.f32.mrb[50].mxu1  ;;  %v15350_v39 = vld [vmem:[%s17800_s3 + $0x150] sm:$0xff]   ;;  %12820 = vmatmul.mubr.msk.bf16.gmra.mrb[156].mxu1 %vm195_vm2, %v13832_v6 }
 0x182   :  { %v2042_v20 = vmul.f32 %v17898_v23, %v1946_v24  ;;  %v1877_v63 = vadd.f32 %v12329_v45, %v15098_v29  ;;  %v1559_v38 = vpack.c.bf16 %v1534_v54, %v1533_v21  ;;  %v1363_v50 = vadd.f32 %v15098_v29, %v1362_v47  ;;  %v1365_v33 = vpop.f32.mrb[51].mxu0  ;;  %v15332_v24 = vld [vmem:[#allocation2 + $0xa8] sm:$0xff]  ;;  %v15345_v23 = vld [vmem:[#allocation2 + $0xb0] sm:$0xff]  ;;  %12827 = vmatprep.mubr.msk.bf16.mxu1 %vm195_vm2, %v13834_v27 }
 0x183   :  { %v2040_v35 = vmul.f32 %v17899_v46, %v1944_v12  ;;  %v1869_v42 = vadd.f32 %v15098_v29, %v1868_v1  ;;  %1576 = vst.msk [vmem:[#allocation2 + $0x138] sm:$0xff] %vm556_vm3, %v1560_v56  ;;  %v1443_v59 = vmax.f32 %v1371_v58, 0.0  ;;  %v1374_v30 = vadd.f32 %v12294_v11, %v15098_v29  ;;  %12392 = vmatmul.mubr.msk.bf16.gmra.mrb[100].mxu0 %vm556_vm3, %v15332_v24  ;;  %v15355_v46 = vld [vmem:[%s17801_s4 + $0x30] sm:$0xff]  }
 0x184   :  { %v2066_v4 = vpack.c.bf16 %v2042_v20, %v2041_v49  ;;  %v1949_v18 = vmax.f32 %v1877_v63, 0.0  ;;  %v1880_v19 = vadd.f32 %v12330_v0, %v15098_v29  ;;  %v1871_v49 = vpop.f32.mrb[51].mxu1  ;;  %1575 = vst.msk [vmem:[#allocation2 + $0x130] sm:$0xff] %vm556_vm3, %v1559_v38  ;;  %v1441_v21 = vmax.f32 %v1363_v50, 0.0  ;;  %12395 = vmatprep.mubr.msk.bf16.mxu0 %vm556_vm3, %v15345_v23  ;;  %13231 = vmatprep.subr.bf16.mxu1 %v15355_v46 }
 0x185   :  { %v2065_v57 = vpack.c.bf16 %v2040_v35, %v2039_v26  ;;  %v1366_v44 = vadd.f32 %v15098_v29, %v1365_v33  ;;  %v15339_v26 = vld [vmem:[%s17800_s3 + $0x158] sm:$0xff]   ;;  %v1947_v12 = vmax.f32 %v1869_v42, 0.0  ;;  %v1872_v25 = vadd.f32 %v15098_v29, %v1871_v49 }
 0x186   :  { %2082 = vst.msk [vmem:[#allocation2 + $0x1b8] sm:$0xff] %vm556_vm3, %v2066_v4  ;;  %v1539_v20 = vmul.f32 %v11211_v34, %v1443_v59  ;;  %v1444_v54 = vmax.f32 %v1374_v30, 0.0  ;;  %v17900_v35 = vunpack.c.l.bf16 %v14843_v53  ;;  %v1950_v56 = vmax.f32 %v1880_v19, 0.0  ;;  %v12333_v30 = vpop.f32.mrb[52].mxu1 }
 0x187   :  { %2081 = vst.msk [vmem:[#allocation2 + $0x1b0] sm:$0xff] %vm556_vm3, %v2065_v57  ;;  %v1537_v34 = vmul.f32 %v11207_v16, %v1441_v21  ;;  %v1442_v58 = vmax.f32 %v1366_v44, 0.0  ;;  %v17901_v47 = vunpack.c.l.bf16 %v14856_v9  ;;  %v1948_v63 = vmax.f32 %v1872_v25, 0.0  ;;  %v12297_v57 = vpop.f32.mrb[52].mxu0  ;;  %v1884_v49 = vpop.f32.mrb[53].mxu1 }
 0x188   :  { %v2045_v45 = vmul.f32 %v17900_v35, %v1949_v18  ;;  %v1540_v1 = vmul.f32 %v11212_v32, %v1444_v54  ;;  %v11219_v38 = vunpack.c.l.bf16 %v15339_v26  ;;  %v17902_v50 = vunpack.c.h.bf16 %v14843_v53  ;;  %v1378_v27 = vpop.f32.mrb[53].mxu0  ;;  %v12334_v25 = vpop.f32.mrb[54].mxu1 }
 0x189   :  { %v2043_v4 = vmul.f32 %v17901_v47, %v1947_v12  ;;  %v1538_v6 = vmul.f32 %v11208_v40, %v1442_v58  ;;  %v11215_v42 = vunpack.c.l.bf16 %v15350_v39  ;;  %v11220_v16 = vunpack.c.h.bf16 %v15339_v26  ;;  %v13835_v40 = vld [vmem:[%s17797_s0 + $0x388] sm:$0xff]   ;;  %v15388_v58 = vld [vmem:[#allocation2 + $0xb8] sm:$0xff] }
 0x18a   :  { %v2046_v11 = vmul.f32 %v17902_v50, %v1950_v56  ;;  %v17903_v0 = vunpack.c.h.bf16 %v14856_v9  ;;  %v1562_v33 = vpack.c.bf16 %v1540_v1, %v1539_v20  ;;  %v1387_v32 = vadd.f32 %v12297_v57, %v15098_v29  ;;  %v12298_v9 = vpop.f32.mrb[54].mxu0  ;;  %v13836_v20 = vld [vmem:[%s17797_s0 + $0x390] sm:$0xff]   ;;  %12828 = vmatmul.mubr.msk.bf16.vlgmr.msra.gmra.mrb[160].mxu1 %vm195_vm2, %v13835_v40  ;;  %v13848_v40 = vld [vmem:[%s17801_s4 + $0x38] sm:$0xff]  }
 0x18b   :  { %v11216_v18 = vunpack.c.h.bf16 %v15350_v39  ;;  %v1893_v53 = vadd.f32 %v12333_v30, %v15098_v29  ;;  %v1561_v21 = vpack.c.bf16 %v1538_v6, %v1537_v34  ;;  %v1379_v44 = vadd.f32 %v15098_v29, %v1378_v27  ;;  %v1381_v35 = vpop.f32.mrb[55].mxu0  ;;  %v1887_v34 = vpop.f32.mrb[55].mxu1  ;;  %12396 = vmatmul.mubr.msk.bf16.gmra.mrb[104].mxu0 %vm556_vm3, %v15388_v58  ;;  %12831 = vmatprep.mubr.msk.bf16.mxu1 %vm195_vm2, %v13836_v20 }
 0x18c   :  { %v2044_v59 = vmul.f32 %v17903_v0, %v1948_v63  ;;  %v2068_v19 = vpack.c.bf16 %v2046_v11, %v2045_v45  ;;  %v1885_v12 = vadd.f32 %v15098_v29, %v1884_v49  ;;  %1578 = vst.msk [vmem:[#allocation2 + $0x148] sm:$0xff] %vm556_vm3, %v1562_v33  ;;  %v1447_v54 = vmax.f32 %v1387_v32, 0.0  ;;  %v15395_v63 = vld [vmem:[%s17800_s3 + $0x168] sm:$0xff]   ;;  %v15401_v11 = vld [vmem:[#allocation2 + $0xc0] sm:$0xff]  ;;  %13237 = vmatpush3.bf16.msra.mxu1 %v15355_v46 }
 0x18d   :  { %v1390_v39 = vadd.f32 %v12298_v9, %v15098_v29  ;;  %v1953_v45 = vmax.f32 %v1893_v53, 0.0  ;;  %v1896_v56 = vadd.f32 %v12334_v25, %v15098_v29  ;;  %1577 = vst.msk [vmem:[#allocation2 + $0x140] sm:$0xff] %vm556_vm3, %v1561_v21  ;;  %v1445_v47 = vmax.f32 %v1379_v44, 0.0  ;;  %v11600_v0 = vld [vmem:[%s17800_s3 + $0x160] sm:$0xff]   ;;  %12399 = vmatprep.mubr.msk.bf16.mxu0 %vm556_vm3, %v15401_v11  ;;  %v12301_v44 = vpop.f32.mrb[56].mxu0  ;;  %13232 = vmatprep.subr.bf16.mxu1 %v13848_v40 }
 0x18e   :  { %v2067_v26 = vpack.c.bf16 %v2044_v59, %v2043_v4  ;;  %2084 = vst.msk [vmem:[#allocation2 + $0x1c8] sm:$0xff] %vm556_vm3, %v2068_v19  ;;  %v1382_v4 = vadd.f32 %v15098_v29, %v1381_v35  ;;  %v1951_v1 = vmax.f32 %v1885_v12, 0.0  ;;  %v1888_v50 = vadd.f32 %v15098_v29, %v1887_v34  ;;  %v1394_v46 = vpop.f32.mrb[57].mxu0 }
 0x18f   :  { %v1543_v6 = vmul.f32 %v11219_v38, %v1447_v54  ;;  %v1448_v57 = vmax.f32 %v1390_v39, 0.0  ;;  %v17904_v59 = vunpack.c.l.bf16 %v14908_v15  ;;  %v1954_v33 = vmax.f32 %v1896_v56, 0.0  ;;  %v13837_v15 = vld [vmem:[%s17797_s0 + $0x398] sm:$0xff]   ;;  %v12302_v35 = vpop.f32.mrb[58].mxu0 }
 0x190   :  { %2083 = vst.msk [vmem:[#allocation2 + $0x1c0] sm:$0xff] %vm556_vm3, %v2067_v26  ;;  %v1541_v32 = vmul.f32 %v11215_v42, %v1445_v47  ;;  %v1446_v27 = vmax.f32 %v1382_v4, 0.0  ;;  %v2047_v19 = vmul.f32 %v11279_v5, %v1951_v1  ;;  %v1952_v38 = vmax.f32 %v1888_v50, 0.0  ;;  %v1397_v47 = vpop.f32.mrb[59].mxu0  ;;  %13238 = vmatpush3.bf16.msra.mxu1 %v13848_v40 }
 0x191   :  { %v2049_v30 = vmul.f32 %v17904_v59, %v1953_v45  ;;  %v1544_v53 = vmul.f32 %v11220_v16, %v1448_v57  ;;  %v11227_v49 = vunpack.c.l.bf16 %v15395_v63  ;;  %v2050_v21 = vmul.f32 %v11284_v7, %v1954_v33  ;;  %v12337_v16 = vpop.f32.mrb[56].mxu1  ;;  %v15445_v57 = vld [vmem:[#allocation2 + $0xd0] sm:$0xff] }
 0x192   :  { %v1542_v42 = vmul.f32 %v11216_v18, %v1446_v27  ;;  %v11223_v9 = vunpack.c.l.bf16 %v11600_v0  ;;  %v11228_v5 = vunpack.c.h.bf16 %v15395_v63  ;;  %v2048_v26 = vmul.f32 %v11280_v51, %v1952_v38  ;;  %v1900_v39 = vpop.f32.mrb[57].mxu1  ;;  %v13838_v51 = vld [vmem:[%s17797_s0 + $0x3a0] sm:$0xff]   ;;  %v15435_v63 = vld [vmem:[#allocation2 + $0xc8] sm:$0xff]  ;;  %12832 = vmatmul.mubr.msk.bf16.gmra.mrb[164].mxu1 %vm195_vm2, %v13837_v15 }
 0x193   :  { %v1564_v12 = vpack.c.bf16 %v1544_v53, %v1543_v6  ;;  %v1403_v25 = vadd.f32 %v12301_v44, %v15098_v29  ;;  %v11224_v20 = vunpack.c.h.bf16 %v11600_v0  ;;  %v2070_v54 = vpack.c.bf16 %v2050_v21, %v2049_v30  ;;  %v12338_v14 = vpop.f32.mrb[58].mxu1  ;;  %v11603_v6 = vld [vmem:[%s17800_s3 + $0x178] sm:$0xff]   ;;  %12400 = vmatmul.mubr.msk.bf16.gmra.mrb[108].mxu0 %vm556_vm3, %v15435_v63  ;;  %v11602_v30 = vld [vmem:[%s17800_s3 + $0x170] sm:$0xff]   ;;  %12835 = vmatprep.mubr.msk.bf16.mxu1 %vm195_vm2, %v13838_v51  ;;  %v12305_v53 = vpop.f32.mrb[60].mxu0  ;;  %v15470_v51 = vld [vmem:[#allocation2 + $0xe0] sm:$0xff] }
 0x194   :  { %v1563_v7 = vpack.c.bf16 %v1542_v42, %v1541_v32  ;;  %v1395_v18 = vadd.f32 %v15098_v29, %v1394_v46  ;;  %v2069_v45 = vpack.c.bf16 %v2048_v26, %v2047_v19  ;;  %v1406_v34 = vadd.f32 %v12302_v35, %v15098_v29  ;;  %v1903_v4 = vpop.f32.mrb[59].mxu1  ;;  %12403 = vmatprep.mubr.msk.bf16.mxu0 %vm556_vm3, %v15445_v57  ;;  %v1410_v26 = vpop.f32.mrb[61].mxu0  ;;  %v15464_v35 = vld [vmem:[#allocation2 + $0xd8] sm:$0xff] }
 0x195   :  { %1580 = vst.msk [vmem:[#allocation2 + $0x158] sm:$0xff] %vm556_vm3, %v1564_v12  ;;  %v1451_v56 = vmax.f32 %v1403_v25, 0.0  ;;  %2086 = vst.msk [vmem:[#allocation2 + $0x1d8] sm:$0xff] %vm556_vm3, %v2070_v54  ;;  %v1398_v50 = vadd.f32 %v15098_v29, %v1397_v47  ;;  %v11235_v19 = vunpack.c.l.bf16 %v11603_v6  ;;  %v11231_v40 = vunpack.c.l.bf16 %v11602_v30  ;;  %v12341_v21 = vpop.f32.mrb[60].mxu1  ;;  %v13849_v47 = vld [vmem:[%s17801_s4 + $0x40] sm:$0xff]  }
 0x196   :  { %1579 = vst.msk [vmem:[#allocation2 + $0x150] sm:$0xff] %vm556_vm3, %v1563_v7  ;;  %v1449_v1 = vmax.f32 %v1395_v18, 0.0  ;;  %2085 = vst.msk [vmem:[#allocation2 + $0x1d0] sm:$0xff] %vm556_vm3, %v2069_v45  ;;  %v1452_v59 = vmax.f32 %v1406_v34, 0.0  ;;  %v1419_v44 = vadd.f32 %v12305_v53, %v15098_v29  ;;  %v11232_v16 = vunpack.c.h.bf16 %v11602_v30  ;;  %v1916_v12 = vpop.f32.mrb[61].mxu1  ;;  %13233 = vmatprep.subr.bf16.mxu1 %v13849_v47 }
 0x197   :  { %v1547_v0 = vmul.f32 %v11227_v49, %v1451_v56  ;;  %v1450_v32 = vmax.f32 %v1398_v50, 0.0  ;;  %v11236_v49 = vunpack.c.h.bf16 %v11603_v6  ;;  %v1411_v46 = vadd.f32 %v15098_v29, %v1410_v26  ;;  %v12342_v54 = vpop.f32.mrb[62].mxu1  ;;  %v11620_v50 = vld [vmem:[%s17800_s3 + $0x8] sm:$0xff]   ;;  %13239 = vmatpush3.bf16.msra.mxu1 %v13849_v47 }
 0x198   :  { %v1545_v33 = vmul.f32 %v11223_v9, %v1449_v1  ;;  %v1548_v27 = vmul.f32 %v11228_v5, %v1452_v59  ;;  %v13839_v9 = vld [vmem:[%s17797_s0 + $0x3a8] sm:$0xff]   ;;  %v12306_v5 = vpop.f32.mrb[62].mxu0  ;;  %v1455_v39 = vmax.f32 %v1419_v44, 0.0  ;;  %v1919_v18 = vpop.f32.mrb[63].mxu1  ;;  %v15501_v54 = vld [vmem:[#allocation2 + $0xf0] sm:$0xff] }
 0x199   :  { %v1546_v38 = vmul.f32 %v11224_v20, %v1450_v32  ;;  %v13840_v20 = vld [vmem:[%s17797_s0 + $0x3b0] sm:$0xff]   ;;  %v1422_v15 = vadd.f32 %v12306_v5, %v15098_v29  ;;  %v1413_v7 = vpop.f32.mrb[63].mxu0  ;;  %v1453_v45 = vmax.f32 %v1411_v46, 0.0  ;;  %v12721_v30 = vpop.f32.mrb[64].mxu1 }
 0x19a   :  { %v1566_v42 = vpack.c.bf16 %v1548_v27, %v1547_v0  ;;  %v1414_v14 = vadd.f32 %v15098_v29, %v1413_v7  ;;  %v1551_v56 = vmul.f32 %v11235_v19, %v1455_v39  ;;  %12836 = vmatmul.mubr.msk.bf16.gmra.mrb[168].mxu1 %vm195_vm2, %v13839_v9  ;;  %v11302_v0 = vld [vmem:[%s17800_s3] sm:$0xff]   ;;  %v5326_v32 = vadd.f32 %v12721_v30, %v15098_v29  ;;  %v5317_v19 = vpop.f32.mrb[65].mxu1  ;;  %v15495_v9 = vld [vmem:[#allocation2 + $0xe8] sm:$0xff] }
 0x19b   :  { %v1565_v25 = vpack.c.bf16 %v1546_v38, %v1545_v33  ;;  %12404 = vmatmul.mubr.msk.bf16.gmra.mrb[112].mxu0 %vm556_vm3, %v15464_v35  ;;  %v1456_v34 = vmax.f32 %v1422_v15, 0.0  ;;  %v1549_v4 = vmul.f32 %v11231_v40, %v1453_v45  ;;  %12839 = vmatprep.mubr.msk.bf16.mxu1 %vm195_vm2, %v13840_v20  ;;  %v11307_v27 = vunpack.c.l.bf16 %v11620_v50  ;;  %v13841_v38 = vld [vmem:[%s17797_s0 + $0x3b8] sm:$0xff]   ;;  %v12722_v21 = vpop.f32.mrb[66].mxu1  ;;  %v15506_v20 = vld [vmem:[%s17801_s4 + $0x60] sm:$0xff]   ;;  %v13851_v39 = vld [vmem:[%s17801_s4 + $0x48] sm:$0xff]  }
 0x19c   :  { %1582 = vst.msk [vmem:[#allocation2 + $0x168] sm:$0xff] %vm556_vm3, %v1566_v42  ;;  %12407 = vmatprep.mubr.msk.bf16.mxu0 %vm556_vm3, %v15470_v51  ;;  %v1454_v1 = vmax.f32 %v1414_v14, 0.0  ;;  %v5318_v40 = vadd.f32 %v15098_v29, %v5317_v19  ;;  %v13843_v42 = vld [vmem:[%s17797_s0 + $0x3c0] sm:$0xff]   ;;  %v5446_v44 = vmax.f32 %v5326_v32, 0.0  ;;  %v5329_v26 = vadd.f32 %v12722_v21, %v15098_v29  ;;  %v5320_v12 = vpop.f32.mrb[67].mxu1  ;;  %v11622_v14 = vld [vmem:[%s17800_s3 + $0x18] sm:$0xff]   ;;  %12591 = vmatprep.subr.bf16.mxu0 %v15506_v20 }
 0x19d   :  { %1581 = vst.msk [vmem:[#allocation2 + $0x160] sm:$0xff] %vm556_vm3, %v1565_v25  ;;  %v1552_v6 = vmul.f32 %v11236_v49, %v1456_v34  ;;  %v11303_v49 = vunpack.c.l.bf16 %v11302_v0  ;;  %v5321_v46 = vadd.f32 %v15098_v29, %v5320_v12  ;;  %v11304_v5 = vunpack.c.h.bf16 %v11302_v0  ;;  %v11621_v34 = vld [vmem:[%s17800_s3 + $0x10] sm:$0xff]   ;;  %13234 = vmatprep.subr.bf16.mxu1 %v13851_v39  ;;  %v15527_v19 = vld [vmem:[#allocation2 + $0x100] sm:$0xff] }
 0x19e   :  { %v1550_v59 = vmul.f32 %v11232_v16, %v1454_v1  ;;  %v11308_v16 = vunpack.c.h.bf16 %v11620_v50  ;;  %v5444_v25 = vmax.f32 %v5318_v40, 0.0  ;;  %v5542_v15 = vmul.f32 %v11307_v27, %v5446_v44  ;;  %13240 = vmatpush3.bf16.msra.mxu1 %v13851_v39  ;;  %v15535_v44 = vld [vmem:[#allocation2 + $0xf8] sm:$0xff]  ;;  %v15540_v12 = vld [vmem:[#allocation6] ss:$0 sm:$0xff] }
 0x19f   :  { %v1568_v33 = vpack.c.bf16 %v1552_v6, %v1551_v56  ;;  %v5447_v7 = vmax.f32 %v5329_v26, 0.0  ;;  %v5445_v45 = vmax.f32 %v5321_v46, 0.0  ;;  %v11315_v6 = vunpack.c.l.bf16 %v11622_v14  ;;  %v15537_v26 = vld [vmem:[#allocation2] sm:$0xff] }
 0x1a0   :  { %v1567_v53 = vpack.c.bf16 %v1550_v59, %v1549_v4  ;;  %v5540_v18 = vmul.f32 %v11303_v49, %v5444_v25  ;;  %v12725_v4 = vpop.f32.mrb[68].mxu1  ;;  %v13844_v59 = vld [vmem:[%s17797_s0 + $0x3c8] sm:$0xff]   ;;  %v11311_v32 = vunpack.c.l.bf16 %v11621_v34  ;;  %v11316_v21 = vunpack.c.h.bf16 %v11622_v14  ;;  %v11623_v14 = vld [vmem:[%s17800_s3 + $0x20] sm:$0xff]  }
 0x1a1   :  { %1584 = vst.msk [vmem:[#allocation2 + $0x178] sm:$0xff] %vm556_vm3, %v1568_v33  ;;  %v5543_v56 = vmul.f32 %v11308_v16, %v5447_v7  ;;  %v5541_v47 = vmul.f32 %v11304_v5, %v5445_v45  ;;  %v5342_v50 = vadd.f32 %v12725_v4, %v15098_v29  ;;  %v5333_v0 = vpop.f32.mrb[69].mxu1  ;;  %v11312_v46 = vunpack.c.h.bf16 %v11621_v34  ;;  %v11624_v7 = vld [vmem:[%s17800_s3 + $0x28] sm:$0xff]  }
 0x1a2   :  { %1583 = vst.msk [vmem:[#allocation2 + $0x170] sm:$0xff] %vm556_vm3, %v1567_v53  ;;  %12840 = vmatmul.mubr.msk.bf16.gmra.mrb[172].mxu1 %vm195_vm2, %v13841_v38  ;;  %v5334_v33 = vadd.f32 %v15098_v29, %v5333_v0  ;;  %v12726_v27 = vpop.f32.mrb[70].mxu1  ;;  %v15529_v38 = vld [vmem:[#allocation2 + $0x8] sm:$0xff]  ;;  %v13852_v53 = vld [vmem:[%s17797_s0 + $0x3d0] sm:$0xff]  }
 0x1a3   :  { %12408 = vmatmul.mubr.msk.bf16.gmra.mrb[116].mxu0 %vm556_vm3, %v15495_v9  ;;  %12843 = vmatprep.mubr.msk.bf16.mxu1 %vm195_vm2, %v13843_v42  ;;  %v5573_v1 = vpack.c.bf16 %v5543_v56, %v5542_v15  ;;  %v5572_v30 = vpack.c.bf16 %v5541_v47, %v5540_v18  ;;  %v5450_v40 = vmax.f32 %v5342_v50, 0.0  ;;  %v5345_v49 = vadd.f32 %v12726_v27, %v15098_v29  ;;  %v5336_v42 = vpop.f32.mrb[71].mxu1  ;;  %v13854_v18 = vld [vmem:[%s17801_s4 + $0x50] sm:$0xff]   ;;  %v13855_v27 = vld [vmem:[%s17797_s0 + $0x3e0] sm:$0xff]  }
 0x1a4   :  { %12411 = vmatprep.mubr.msk.bf16.mxu0 %vm556_vm3, %v15501_v54  ;;  %v5448_v16 = vmax.f32 %v5334_v33, 0.0  ;;  %v5337_v25 = vadd.f32 %v15540_v12, %v5336_v42  ;;  %v12729_v34 = vpop.f32.mrb[72].mxu1  ;;  %13235 = vmatprep.subr.bf16.mxu1 %v13854_v18  ;;  %v15571_v42 = vld [vmem:[#allocation2 + $0x108] sm:$0xff] }
 0x1a5   :  { %5589 = vst.msk [vmem:[#allocation2 + $0x8] sm:$0xff] %vm556_vm3, %v5573_v1  ;;  %5588 = vst.msk [vmem:[#allocation2] sm:$0xff] %vm556_vm3, %v5572_v30  ;;  %v5546_v29 = vmul.f32 %v11315_v6, %v5450_v40  ;;  %v5451_v5 = vmax.f32 %v5345_v49, 0.0  ;;  %v5358_v4 = vadd.f32 %v15540_v12, %v12729_v34  ;;  %v11323_v1 = vunpack.c.l.bf16 %v11624_v7  ;;  %v5349_v50 = vpop.f32.mrb[73].mxu1  ;;  %v13853_v6 = vld [vmem:[%s17797_s0 + $0x3d8] sm:$0xff]   ;;  %13241 = vmatpush3.bf16.msra.mxu1 %v13854_v18 }
 0x1a6   :  { %v5544_v39 = vmul.f32 %v11311_v32, %v5448_v16  ;;  %v5449_v15 = vmax.f32 %v5337_v25, 0.0  ;;  %v11319_v30 = vunpack.c.l.bf16 %v11623_v14  ;;  %v12730_v33 = vpop.f32.mrb[74].mxu1  ;;  %v15564_v32 = vld [vmem:[#allocation2 + $0x110] sm:$0xff]  ;;  %v11324_v49 = vunpack.c.h.bf16 %v11624_v7  ;;  %v11626_v7 = vld [vmem:[%s17800_s3 + $0x38] sm:$0xff]  }
 0x1a7   :  { %v5547_v45 = vmul.f32 %v11316_v21, %v5451_v5  ;;  %v5361_v40 = vadd.f32 %v15540_v12, %v12730_v33  ;;  %v5352_v21 = vpop.f32.mrb[75].mxu1 }
 0x1a8   :  { %v5545_v56 = vmul.f32 %v11312_v46, %v5449_v15  ;;  %v5353_v25 = vadd.f32 %v15540_v12, %v5352_v21  ;;  %v11320_v46 = vunpack.c.h.bf16 %v11623_v14 }
 0x1a9   :  { %v5575_v47 = vpack.c.bf16 %v5547_v45, %v5546_v29  ;;  %v5455_v5 = vmax.f32 %v5361_v40, 0.0  ;;  %v11625_v45 = vld [vmem:[%s17800_s3 + $0x30] sm:$0xff]  }
 0x1aa   :  { %12844 = vmatmul.mubr.msk.bf16.gmra.mrb[176].mxu1 %vm195_vm2, %v13844_v59  ;;  %v5574_v0 = vpack.c.bf16 %v5545_v56, %v5544_v39  ;;  %v5350_v59 = vadd.f32 %v15540_v12, %v5349_v50  ;;  %v5453_v15 = vmax.f32 %v5353_v25, 0.0  ;;  %v13856_v50 = vld [vmem:[%s17797_s0 + $0x3e8] sm:$0xff]   ;;  %v11327_v33 = vunpack.c.l.bf16 %v11625_v45  ;;  %v13857_v40 = vld [vmem:[%s17797_s0 + $0x3f0] sm:$0xff]  }
 0x1ab   :  { %12412 = vmatmul.mubr.msk.bf16.gmra.mrb[120].mxu0 %vm556_vm3, %v15535_v44  ;;  %12847 = vmatprep.mubr.msk.bf16.mxu1 %vm195_vm2, %v13852_v53  ;;  %5591 = vst.msk [vmem:[#allocation2 + $0x18] sm:$0xff] %vm556_vm3, %v5575_v47  ;;  %v5454_v53 = vmax.f32 %v5358_v4, 0.0  ;;  %v5551_v18 = vmul.f32 %v11324_v49, %v5455_v5  ;;  %v11331_v4 = vunpack.c.l.bf16 %v11626_v7  ;;  %v15603_v49 = vld [vmem:[#allocation2 + $0x20] sm:$0xff]  ;;  %v11332_v25 = vunpack.c.h.bf16 %v11626_v7 }
 0x1ac   :  { %12415 = vmatprep.mubr.msk.bf16.mxu0 %vm556_vm3, %v15527_v19  ;;  %5590 = vst.msk [vmem:[#allocation2 + $0x10] sm:$0xff] %vm556_vm3, %v5574_v0  ;;  %v5452_v16 = vmax.f32 %v5350_v59, 0.0  ;;  %v5549_v14 = vmul.f32 %v11320_v46, %v5453_v15  ;;  %v12733_v56 = vpop.f32.mrb[76].mxu1  ;;  %v15594_v0 = vld [vmem:[#allocation2 + $0x28] sm:$0xff]  ;;  %17906 = vst [vmem:[#allocation12_spill] sm:$0xff] %v15603_v49  ;;  %v11328_v15 = vunpack.c.h.bf16 %v11625_v45 }
 0x1ad   :  { %v5550_v29 = vmul.f32 %v11323_v1, %v5454_v53  ;;  %v5374_v47 = vadd.f32 %v15540_v12, %v12733_v56  ;;  %v5365_v1 = vpop.f32.mrb[77].mxu1  ;;  %17905 = vst [vmem:[#allocation11_spill] sm:$0xff] %v15594_v0  ;;  %v15597_v53 = vld [vmem:[#allocation2 + $0x120] sm:$0xff] }
 0x1ae   :  { %v5548_v39 = vmul.f32 %v11319_v30, %v5452_v16  ;;  %v5366_v30 = vadd.f32 %v15540_v12, %v5365_v1  ;;  %v15660_v0 = vld [vmem:[#allocation2 + $0x140] sm:$0xff] }
 0x1af   :  { %v5577_v34 = vpack.c.bf16 %v5551_v18, %v5550_v29  ;;  %v5458_v21 = vmax.f32 %v5374_v47, 0.0  ;;  %v15606_v29 = vld [vmem:[#allocation2 + $0x118] sm:$0xff]  ;;  %v11627_v47 = vld [vmem:[%s17800_s3 + $0x40] sm:$0xff]   ;;  %17910 = vst [vmem:[#allocation16_spill] sm:$0xff] %v15660_v0 }
 0x1b0   :  { %v5576_v59 = vpack.c.bf16 %v5549_v14, %v5548_v39  ;;  %v5456_v5 = vmax.f32 %v5366_v30, 0.0 }
 0x1b1   :  { %5593 = vst.msk [vmem:[#allocation2 + $0x28] sm:$0xff] %vm556_vm3, %v5577_v34  ;;  %v5554_v18 = vmul.f32 %v11331_v4, %v5458_v21  ;;  %v11628_v34 = vld [vmem:[%s17800_s3 + $0x48] sm:$0xff]  }
 0x1b2   :  { %12848 = vmatmul.mubr.msk.bf16.gmra.mrb[180].mxu1 %vm195_vm2, %v13853_v6  ;;  %v13859_v6 = vld [vmem:[%s17801_s4 + $0x58] sm:$0xff]   ;;  %5592 = vst.msk [vmem:[#allocation2 + $0x20] sm:$0xff] %vm556_vm3, %v5576_v59  ;;  %v5552_v7 = vmul.f32 %v11327_v33, %v5456_v5  ;;  %v11339_v30 = vunpack.c.l.bf16 %v11628_v34  ;;  %v15632_v5 = vld [vmem:[#allocation2 + $0x30] sm:$0xff] }
 0x1b3   :  { %12416 = vmatmul.mubr.msk.bf16.gmra.mrb[124].mxu0 %vm556_vm3, %v15571_v42  ;;  %12851 = vmatprep.mubr.msk.bf16.mxu1 %vm195_vm2, %v13855_v27  ;;  %v12734_v27 = vpop.f32.mrb[78].mxu1  ;;  %v13858_v33 = vld [vmem:[%s17797_s0 + $0x3f8] sm:$0xff]   ;;  %17908 = vst [vmem:[#allocation14_spill] sm:$0xff] %v15632_v5 }
 0x1b4   :  { %12419 = vmatprep.mubr.msk.bf16.mxu0 %vm556_vm3, %v15564_v32  ;;  %v5377_v16 = vadd.f32 %v15540_v12, %v12734_v27  ;;  %v5368_v46 = vpop.f32.mrb[79].mxu1  ;;  %13236 = vmatprep.subr.bf16.mxu1 %v13859_v6  ;;  %v15626_v27 = vld [vmem:[#allocation2 + $0x38] sm:$0xff] }
 0x1b5   :  { %v5369_v39 = vadd.f32 %v15540_v12, %v5368_v46  ;;  %13242 = vmatpush3.bf16.msra.mxu1 %v13859_v6  ;;  %v12737_v1 = vpop.f32.mrb[80].mxu1  ;;  %17907 = vst [vmem:[#allocation13_spill] sm:$0xff] %v15626_v27  ;;  %v15629_v46 = vld [vmem:[#allocation2 + $0x130] sm:$0xff] }
 0x1b6   :  { %v5459_v14 = vmax.f32 %v5377_v16, 0.0  ;;  %v5390_v59 = vadd.f32 %v15540_v12, %v12737_v1  ;;  %v11335_v16 = vunpack.c.l.bf16 %v11627_v47  ;;  %v15644_v1 = vld [vmem:[%s17801_s4] sm:$0xff]  }
 0x1b7   :  { %v5457_v56 = vmax.f32 %v5369_v39, 0.0  ;;  %12983 = vmatprep.subr.bf16.mxu1 %v15644_v1 }
 0x1b8   :  { %v5555_v45 = vmul.f32 %v11332_v25, %v5459_v14  ;;  %v5462_v39 = vmax.f32 %v5390_v59, 0.0 }
 0x1b9   :  { %v5553_v4 = vmul.f32 %v11328_v15, %v5457_v56  ;;  %v15635_v56 = vld [vmem:[#allocation2 + $0x128] sm:$0xff] }
 0x1ba   :  { %12852 = vmatmul.mubr.msk.bf16.gmra.mrb[184].mxu1 %vm195_vm2, %v13856_v50  ;;  %v5579_v6 = vpack.c.bf16 %v5555_v45, %v5554_v18  ;;  %v5381_v50 = vpop.f32.mrb[81].mxu1  ;;  %v11340_v18 = vunpack.c.h.bf16 %v11628_v34 }
 0x1bb   :  { %12420 = vmatmul.mubr.msk.bf16.gmra.mrb[128].mxu0 %vm556_vm3, %v15606_v29  ;;  %12855 = vmatprep.mubr.msk.bf16.mxu1 %vm195_vm2, %v13857_v40  ;;  %v5578_v21 = vpack.c.bf16 %v5553_v4, %v5552_v7  ;;  %v5382_v40 = vadd.f32 %v15540_v12, %v5381_v50  ;;  %v12738_v25 = vpop.f32.mrb[82].mxu1  ;;  %v11336_v4 = vunpack.c.h.bf16 %v11627_v47  ;;  %v11630_v47 = vld [vmem:[%s17800_s3 + $0x58] sm:$0xff]  }
 0x1bc   :  { %12423 = vmatprep.mubr.msk.bf16.mxu0 %vm556_vm3, %v15597_v53  ;;  %5595 = vst.msk [vmem:[#allocation2 + $0x38] sm:$0xff] %vm556_vm3, %v5579_v6  ;;  %v5393_v15 = vadd.f32 %v15540_v12, %v12738_v25  ;;  %v5384_v14 = vpop.f32.mrb[83].mxu1  ;;  %v5558_v6 = vmul.f32 %v11339_v30, %v5462_v39 }
 0x1bd   :  { %5594 = vst.msk [vmem:[#allocation2 + $0x30] sm:$0xff] %vm556_vm3, %v5578_v21  ;;  %v5460_v7 = vmax.f32 %v5382_v40, 0.0  ;;  %v5385_v45 = vadd.f32 %v15540_v12, %v5384_v14  ;;  %v11629_v40 = vld [vmem:[%s17800_s3 + $0x50] sm:$0xff]   ;;  %v12741_v25 = vpop.f32.mrb[84].mxu1  ;;  %v11347_v14 = vunpack.c.l.bf16 %v11630_v47 }
 0x1be   :  { %v5463_v59 = vmax.f32 %v5393_v15, 0.0  ;;  %v5406_v15 = vadd.f32 %v15540_v12, %v12741_v25  ;;  %v11343_v27 = vunpack.c.l.bf16 %v11629_v40  ;;  %v11344_v25 = vunpack.c.h.bf16 %v11629_v40 }
 0x1bf   :  { %v5556_v34 = vmul.f32 %v11335_v16, %v5460_v7  ;;  %v5461_v50 = vmax.f32 %v5385_v45, 0.0  ;;  %v15657_v16 = vld [vmem:[#allocation2 + $0x48] sm:$0xff] }
 0x1c0   :  { %v5559_v21 = vmul.f32 %v11340_v18, %v5463_v59  ;;  %17909 = vst [vmem:[#allocation15_spill] sm:$0xff] %v15657_v16  ;;  %v15663_v18 = vld [vmem:[#allocation2 + $0x40] sm:$0xff]  ;;  %v11348_v59 = vunpack.c.h.bf16 %v11630_v47  ;;  %v11632_v47 = vld [vmem:[%s17800_s3 + $0x68] sm:$0xff]  }
 0x1c1   :  { %v5557_v30 = vmul.f32 %v11336_v4, %v5461_v50  ;;  %17911 = vst [vmem:[#allocation17_spill] sm:$0xff] %v15663_v18  ;;  %v5466_v4 = vmax.f32 %v5406_v15, 0.0  ;;  %v15681_v18 = vld [vmem:[#allocation2 + $0x58] sm:$0xff] }
 0x1c2   :  { %12856 = vmatmul.mubr.msk.bf16.gmra.mrb[188].mxu1 %vm195_vm2, %v13858_v33  ;;  %v5581_v39 = vpack.c.bf16 %v5559_v21, %v5558_v6  ;;  %v5397_v33 = vpop.f32.mrb[85].mxu1  ;;  %v15666_v21 = vld [vmem:[#allocation2 + $0x138] sm:$0xff]  ;;  %17912 = vst [vmem:[#allocation18_spill] sm:$0xff] %v15681_v18 }
 0x1c3   :  { %12424 = vmatmul.mubr.msk.bf16.gmra.mrb[132].mxu0 %vm556_vm3, %v15635_v56  ;;  %v5580_v7 = vpack.c.bf16 %v5557_v30, %v5556_v34  ;;  %v5398_v45 = vadd.f32 %v15540_v12, %v5397_v33  ;;  %v12742_v5 = vpop.f32.mrb[86].mxu1  ;;  %v5562_v33 = vmul.f32 %v11347_v14, %v5466_v4  ;;  %v11355_v4 = vunpack.c.l.bf16 %v11632_v47 }
 0x1c4   :  { %12427 = vmatprep.mubr.msk.bf16.mxu0 %vm556_vm3, %v15629_v46  ;;  %5597 = vst.msk [vmem:[#allocation2 + $0x48] sm:$0xff] %vm556_vm3, %v5581_v39  ;;  %v5409_v6 = vadd.f32 %v15540_v12, %v12742_v5  ;;  %v5400_v50 = vpop.f32.mrb[87].mxu1 }
 0x1c5   :  { %5596 = vst.msk [vmem:[#allocation2 + $0x40] sm:$0xff] %vm556_vm3, %v5580_v7  ;;  %v5464_v34 = vmax.f32 %v5398_v45, 0.0  ;;  %v5401_v30 = vadd.f32 %v15540_v12, %v5400_v50  ;;  %v11631_v7 = vld [vmem:[%s17800_s3 + $0x60] sm:$0xff]   ;;  %v12745_v45 = vpop.f32.mrb[88].mxu1 }
 0x1c6   :  { %v5467_v39 = vmax.f32 %v5409_v6, 0.0  ;;  %v5422_v14 = vadd.f32 %v15540_v12, %v12745_v45  ;;  %v5413_v6 = vpop.f32.mrb[89].mxu1  ;;  %v11352_v45 = vunpack.c.h.bf16 %v11631_v7 }
 0x1c7   :  { %v5560_v15 = vmul.f32 %v11343_v27, %v5464_v34  ;;  %v5465_v5 = vmax.f32 %v5401_v30, 0.0  ;;  %v5414_v34 = vadd.f32 %v15540_v12, %v5413_v6  ;;  %v11351_v30 = vunpack.c.l.bf16 %v11631_v7  ;;  %v12746_v49 = vpop.f32.mrb[90].mxu1 }
 0x1c8   :  { %v5563_v16 = vmul.f32 %v11348_v59, %v5467_v39  ;;  %v15687_v59 = vld [vmem:[#allocation2 + $0x50] sm:$0xff]  ;;  %v5416_v39 = vpop.f32.mrb[91].mxu1 }
 0x1c9   :  { %v5561_v40 = vmul.f32 %v11344_v25, %v5465_v5  ;;  %17914 = vst [vmem:[#allocation20_spill] sm:$0xff] %v15687_v59  ;;  %v5470_v25 = vmax.f32 %v5422_v14, 0.0  ;;  %v15690_v5 = vld [vmem:[#allocation2 + $0x148] sm:$0xff] }
 0x1ca   :  { %v5583_v50 = vpack.c.bf16 %v5563_v16, %v5562_v33  ;;  %v5425_v16 = vadd.f32 %v15540_v12, %v12746_v49  ;;  %v11356_v33 = vunpack.c.h.bf16 %v11632_v47  ;;  %17915 = vst [vmem:[#allocation21_spill] sm:$0xff] %v15690_v5  ;;  %v11634_v47 = vld [vmem:[%s17800_s3 + $0x78] sm:$0xff]   ;;  %v15705_v59 = vld [vmem:[#allocation2 + $0x68] sm:$0xff] }
 0x1cb   :  { %12428 = vmatmul.mubr.msk.bf16.gmra.mrb[136].mxu0 %vm556_vm3, %v15666_v21  ;;  %v5582_v27 = vpack.c.bf16 %v5561_v40, %v5560_v15  ;;  %v5468_v15 = vmax.f32 %v5414_v34, 0.0  ;;  %v5417_v40 = vadd.f32 %v15540_v12, %v5416_v39  ;;  %v5566_v6 = vmul.f32 %v11355_v4, %v5470_v25  ;;  %17916 = vst [vmem:[#allocation22_spill] sm:$0xff] %v15705_v59 }
 0x1cc   :  { %12431 = vmatprep.mubr.msk.bf16.mxu0 %vm556_vm3, %v15660_v0  ;;  %v15684_v0 = vld [vmem:[#allocation2 + $0x150] sm:$0xff]  ;;  %5599 = vst.msk [vmem:[#allocation2 + $0x58] sm:$0xff] %vm556_vm3, %v5583_v50  ;;  %v5471_v50 = vmax.f32 %v5425_v16, 0.0  ;;  %v12749_v34 = vpop.f32.mrb[92].mxu1  ;;  %v11363_v25 = vunpack.c.l.bf16 %v11634_v47 }
 0x1cd   :  { %17913 = vst [vmem:[#allocation19_spill] sm:$0xff] %v15684_v0  ;;  %5598 = vst.msk [vmem:[#allocation2 + $0x50] sm:$0xff] %vm556_vm3, %v5582_v27  ;;  %v5564_v14 = vmul.f32 %v11351_v30, %v5468_v15  ;;  %v5469_v49 = vmax.f32 %v5417_v40, 0.0  ;;  %v11633_v27 = vld [vmem:[%s17800_s3 + $0x70] sm:$0xff]   ;;  %v5438_v4 = vadd.f32 %v15540_v12, %v12749_v34  ;;  %v5429_v16 = vpop.f32.mrb[93].mxu1 }
 0x1ce   :  { %v5567_v18 = vmul.f32 %v11356_v33, %v5471_v50  ;;  %v5430_v15 = vadd.f32 %v15540_v12, %v5429_v16  ;;  %v11359_v40 = vunpack.c.l.bf16 %v11633_v27  ;;  %v15711_v33 = vld [vmem:[#allocation2 + $0x60] sm:$0xff]  ;;  %v11360_v34 = vunpack.c.h.bf16 %v11633_v27 }
 0x1cf   :  { %v5565_v7 = vmul.f32 %v11352_v45, %v5469_v49  ;;  %17918 = vst [vmem:[#allocation24_spill] sm:$0xff] %v15711_v33  ;;  %v5474_v45 = vmax.f32 %v5438_v4, 0.0  ;;  %v15714_v49 = vld [vmem:[#allocation2 + $0x158] sm:$0xff] }
 0x1d0   :  { %v5585_v39 = vpack.c.bf16 %v5567_v18, %v5566_v6  ;;  %v11364_v6 = vunpack.c.h.bf16 %v11634_v47  ;;  %17919 = vst [vmem:[#allocation25_spill] sm:$0xff] %v15714_v49  ;;  %v15722_v47 = vld [vmem:[#allocation6] ss:$0 sm:$0xff] }
 0x1d1   :  { %v5584_v30 = vpack.c.bf16 %v5565_v7, %v5564_v14  ;;  %v5472_v14 = vmax.f32 %v5430_v15, 0.0  ;;  %v5570_v16 = vmul.f32 %v11363_v25, %v5474_v45 }
 0x1d2   :  { %5601 = vst.msk [vmem:[#allocation2 + $0x68] sm:$0xff] %vm556_vm3, %v5585_v39 }
 0x1d3   :  { %12432 = vmatmul.mubr.msk.bf16.gmra.mrb[140].mxu0 %vm556_vm3, %v15690_v5  ;;  %v15708_v5 = vld [vmem:[#allocation2 + $0x160] sm:$0xff]  ;;  %5600 = vst.msk [vmem:[#allocation2 + $0x60] sm:$0xff] %vm556_vm3, %v5584_v30  ;;  %v5568_v4 = vmul.f32 %v11359_v40, %v5472_v14  ;;  %v11636_v30 = vld [vmem:[%s17800_s3 + $0x88] sm:$0xff]   ;;  %v15731_v40 = vld [vmem:[#allocation2 + $0x78] sm:$0xff] }
 0x1d4   :  { %12435 = vmatprep.mubr.msk.bf16.mxu0 %vm556_vm3, %v15684_v0  ;;  %v12750_v0 = vpop.f32.mrb[94].mxu1  ;;  %17917 = vst [vmem:[#allocation23_spill] sm:$0xff] %v15708_v5  ;;  %17920 = vst [vmem:[#allocation26_spill] sm:$0xff] %v15731_v40 }
 0x1d5   :  { %v5441_v18 = vadd.f32 %v15540_v12, %v12750_v0  ;;  %v5432_v50 = vpop.f32.mrb[95].mxu1 }
 0x1d6   :  { %v5433_v7 = vadd.f32 %v15540_v12, %v5432_v50  ;;  %v11635_v12 = vld [vmem:[%s17800_s3 + $0x80] sm:$0xff]   ;;  %v12757_v50 = vpop.f32.mrb[96].mxu1 }
 0x1d7   :  { %v5475_v39 = vmax.f32 %v5441_v18, 0.0  ;;  %v5832_v45 = vadd.f32 %v12757_v50, %v15722_v47  ;;  %v11371_v18 = vunpack.c.l.bf16 %v11636_v30  ;;  %v5823_v59 = vpop.f32.mrb[97].mxu1  ;;  %v11367_v33 = vunpack.c.l.bf16 %v11635_v12 }
 0x1d8   :  { %v5473_v0 = vmax.f32 %v5433_v7, 0.0  ;;  %v5824_v7 = vadd.f32 %v15722_v47, %v5823_v59 }
 0x1d9   :  { %v5571_v15 = vmul.f32 %v11364_v6, %v5475_v39  ;;  %v15737_v6 = vld [vmem:[#allocation2 + $0x70] sm:$0xff]  ;;  %v11372_v39 = vunpack.c.h.bf16 %v11636_v30  ;;  %v11638_v30 = vld [vmem:[%s17800_s3 + $0x98] sm:$0xff]  }
 0x1da   :  { %v5569_v27 = vmul.f32 %v11360_v34, %v5473_v0  ;;  %17922 = vst [vmem:[#allocation28_spill] sm:$0xff] %v15737_v6  ;;  %v5952_v34 = vmax.f32 %v5832_v45, 0.0  ;;  %v15755_v6 = vld [vmem:[#allocation2 + $0x88] sm:$0xff] }
 0x1db   :  { %12436 = vmatmul.mubr.msk.bf16.gmra.mrb[144].mxu0 %vm556_vm3, %v15714_v49  ;;  %v5587_v25 = vpack.c.bf16 %v5571_v15, %v5570_v16  ;;  %v15734_v49 = vld [vmem:[#allocation2 + $0x170] sm:$0xff]  ;;  %v15740_v15 = vld [vmem:[#allocation2 + $0x168] sm:$0xff]  ;;  %17923 = vst [vmem:[#allocation29_spill] sm:$0xff] %v15755_v6 }
 0x1dc   :  { %12439 = vmatprep.mubr.msk.bf16.mxu0 %vm556_vm3, %v15708_v5  ;;  %v5586_v14 = vpack.c.bf16 %v5569_v27, %v5568_v4  ;;  %v12758_v5 = vpop.f32.mrb[98].mxu1  ;;  %17921 = vst [vmem:[#allocation27_spill] sm:$0xff] %v15734_v49  ;;  %v5950_v4 = vmax.f32 %v5824_v7, 0.0  ;;  %v11368_v27 = vunpack.c.h.bf16 %v11635_v12  ;;  %v6048_v50 = vmul.f32 %v11371_v18, %v5952_v34 }
 0x1dd   :  { %5603 = vst.msk [vmem:[#allocation2 + $0x78] sm:$0xff] %vm556_vm3, %v5587_v25  ;;  %v5835_v16 = vadd.f32 %v12758_v5, %v15722_v47  ;;  %v5826_v0 = vpop.f32.mrb[99].mxu1  ;;  %v11379_v34 = vunpack.c.l.bf16 %v11638_v30 }
 0x1de   :  { %5602 = vst.msk [vmem:[#allocation2 + $0x70] sm:$0xff] %vm556_vm3, %v5586_v14  ;;  %v5827_v59 = vadd.f32 %v15722_v47, %v5826_v0  ;;  %v6046_v45 = vmul.f32 %v11367_v33, %v5950_v4  ;;  %v11637_v14 = vld [vmem:[%s17800_s3 + $0x90] sm:$0xff]   ;;  %v12761_v7 = vpop.f32.mrb[100].mxu1 }
 0x1df   :  { %v5953_v25 = vmax.f32 %v5835_v16, 0.0  ;;  %v5848_v18 = vadd.f32 %v12761_v7, %v15722_v47  ;;  %v5839_v16 = vpop.f32.mrb[101].mxu1 }
 0x1e0   :  { %v5951_v5 = vmax.f32 %v5827_v59, 0.0  ;;  %v5840_v4 = vadd.f32 %v15722_v47, %v5839_v16  ;;  %v11375_v59 = vunpack.c.l.bf16 %v11637_v14  ;;  %v15768_v16 = vld [vmem:[#allocation2 + $0x180] sm:$0xff] }
 0x1e1   :  { %v6049_v40 = vmul.f32 %v11372_v39, %v5953_v25  ;;  %v15759_v39 = vld [vmem:[#allocation2 + $0x80] sm:$0xff]  ;;  %v5956_v25 = vmax.f32 %v5848_v18, 0.0  ;;  %17926 = vst [vmem:[#allocation32_spill] sm:$0xff] %v15768_v16  ;;  %v11640_v18 = vld [vmem:[%s17800_s3 + $0xa8] sm:$0xff]  }
 0x1e2   :  { %v6047_v12 = vmul.f32 %v11368_v27, %v5951_v5  ;;  %17924 = vst [vmem:[#allocation30_spill] sm:$0xff] %v15759_v39  ;;  %v11380_v5 = vunpack.c.h.bf16 %v11638_v30  ;;  %v5954_v7 = vmax.f32 %v5840_v4, 0.0 }
 0x1e3   :  { %12440 = vmatmul.mubr.msk.bf16.gmra.mrb[148].mxu0 %vm556_vm3, %v15740_v15  ;;  %v6079_v0 = vpack.c.bf16 %v6049_v40, %v6048_v50  ;;  %v15762_v50 = vld [vmem:[#allocation2 + $0x178] sm:$0xff] }
 0x1e4   :  { %12443 = vmatprep.mubr.msk.bf16.mxu0 %vm556_vm3, %v15734_v49  ;;  %v6078_v33 = vpack.c.bf16 %v6047_v12, %v6046_v45  ;;  %v12762_v49 = vpop.f32.mrb[102].mxu1  ;;  %17925 = vst [vmem:[#allocation31_spill] sm:$0xff] %v15762_v50  ;;  %v11376_v12 = vunpack.c.h.bf16 %v11637_v14  ;;  %v11639_v14 = vld [vmem:[%s17800_s3 + $0xa0] sm:$0xff]  }
 0x1e5   :  { %6095 = vst.msk [vmem:[#allocation2 + $0x88] sm:$0xff] %vm556_vm3, %v6079_v0  ;;  %v5851_v27 = vadd.f32 %v12762_v49, %v15722_v47  ;;  %v5842_v40 = vpop.f32.mrb[103].mxu1  ;;  %v6052_v0 = vmul.f32 %v11379_v34, %v5956_v25  ;;  %v6050_v49 = vmul.f32 %v11375_v59, %v5954_v7  ;;  %v11387_v25 = vunpack.c.l.bf16 %v11640_v18 }
 0x1e6   :  { %6094 = vst.msk [vmem:[#allocation2 + $0x80] sm:$0xff] %vm556_vm3, %v6078_v33  ;;  %v5843_v45 = vadd.f32 %v15722_v47, %v5842_v40  ;;  %v12765_v40 = vpop.f32.mrb[104].mxu1 }
 0x1e7   :  { %v5957_v6 = vmax.f32 %v5851_v27, 0.0  ;;  %v5864_v34 = vadd.f32 %v12765_v40, %v15722_v47  ;;  %v5855_v27 = vpop.f32.mrb[105].mxu1 }
 0x1e8   :  { %v5955_v30 = vmax.f32 %v5843_v45, 0.0  ;;  %v5856_v7 = vadd.f32 %v15722_v47, %v5855_v27  ;;  %v11383_v45 = vunpack.c.l.bf16 %v11639_v14  ;;  %v15792_v27 = vld [vmem:[#allocation2 + $0x190] sm:$0xff] }
 0x1e9   :  { %v6053_v33 = vmul.f32 %v11380_v5, %v5957_v6  ;;  %v15783_v6 = vld [vmem:[#allocation2 + $0x90] sm:$0xff]  ;;  %v5960_v5 = vmax.f32 %v5864_v34, 0.0  ;;  %17930 = vst [vmem:[#allocation36_spill] sm:$0xff] %v15792_v27  ;;  %v11642_v34 = vld [vmem:[%s17800_s3 + $0xb8] sm:$0xff]  }
 0x1ea   :  { %v6051_v4 = vmul.f32 %v11376_v12, %v5955_v30  ;;  %17928 = vst [vmem:[#allocation34_spill] sm:$0xff] %v15783_v6  ;;  %v11388_v30 = vunpack.c.h.bf16 %v11640_v18  ;;  %v5958_v40 = vmax.f32 %v5856_v7, 0.0 }
 0x1eb   :  { %12444 = vmatmul.mubr.msk.bf16.gmra.mrb[152].mxu0 %vm556_vm3, %v15762_v50  ;;  %v6081_v39 = vpack.c.bf16 %v6053_v33, %v6052_v0  ;;  %v15779_v50 = vld [vmem:[#allocation2 + $0x98] sm:$0xff]  ;;  %v15786_v33 = vld [vmem:[#allocation2 + $0x188] sm:$0xff] }
 0x1ec   :  { %12447 = vmatprep.mubr.msk.bf16.mxu0 %vm556_vm3, %v15768_v16  ;;  %17927 = vst [vmem:[#allocation33_spill] sm:$0xff] %v15779_v50  ;;  %v6080_v59 = vpack.c.bf16 %v6051_v4, %v6050_v49  ;;  %v12766_v16 = vpop.f32.mrb[106].mxu1  ;;  %17929 = vst [vmem:[#allocation35_spill] sm:$0xff] %v15786_v33  ;;  %v11384_v4 = vunpack.c.h.bf16 %v11639_v14  ;;  %v11641_v14 = vld [vmem:[%s17800_s3 + $0xb0] sm:$0xff]  }
 0x1ed   :  { %6097 = vst.msk [vmem:[#allocation2 + $0x98] sm:$0xff] %vm556_vm3, %v6081_v39  ;;  %v5867_v12 = vadd.f32 %v12766_v16, %v15722_v47  ;;  %v5858_v0 = vpop.f32.mrb[107].mxu1  ;;  %v6056_v39 = vmul.f32 %v11387_v25, %v5960_v5  ;;  %v6054_v16 = vmul.f32 %v11383_v45, %v5958_v40  ;;  %v11395_v5 = vunpack.c.l.bf16 %v11642_v34 }
 0x1ee   :  { %6096 = vst.msk [vmem:[#allocation2 + $0x90] sm:$0xff] %vm556_vm3, %v6080_v59  ;;  %v5859_v49 = vadd.f32 %v15722_v47, %v5858_v0  ;;  %v12769_v0 = vpop.f32.mrb[108].mxu1 }
 0x1ef   :  { %v5961_v50 = vmax.f32 %v5867_v12, 0.0  ;;  %v5880_v25 = vadd.f32 %v12769_v0, %v15722_v47  ;;  %v5871_v12 = vpop.f32.mrb[109].mxu1 }
 0x1f0   :  { %v5959_v18 = vmax.f32 %v5859_v49, 0.0  ;;  %v5872_v40 = vadd.f32 %v15722_v47, %v5871_v12  ;;  %v11391_v49 = vunpack.c.l.bf16 %v11641_v14  ;;  %v15816_v12 = vld [vmem:[#allocation2 + $0x1a0] sm:$0xff] }
 0x1f1   :  { %v6057_v59 = vmul.f32 %v11388_v30, %v5961_v50  ;;  %v15807_v50 = vld [vmem:[#allocation2 + $0xa0] sm:$0xff]  ;;  %v5964_v30 = vmax.f32 %v5880_v25, 0.0  ;;  %17934 = vst [vmem:[#allocation40_spill] sm:$0xff] %v15816_v12  ;;  %v11644_v25 = vld [vmem:[%s17800_s3 + $0xc8] sm:$0xff]  }
 0x1f2   :  { %v6055_v7 = vmul.f32 %v11384_v4, %v5959_v18  ;;  %17932 = vst [vmem:[#allocation38_spill] sm:$0xff] %v15807_v50  ;;  %v11396_v18 = vunpack.c.h.bf16 %v11642_v34  ;;  %v5962_v0 = vmax.f32 %v5872_v40, 0.0 }
 0x1f3   :  { %12448 = vmatmul.mubr.msk.bf16.gmra.mrb[156].mxu0 %vm556_vm3, %v15786_v33  ;;  %v6083_v6 = vpack.c.bf16 %v6057_v59, %v6056_v39  ;;  %v15803_v33 = vld [vmem:[#allocation2 + $0xa8] sm:$0xff]  ;;  %v15810_v59 = vld [vmem:[#allocation2 + $0x198] sm:$0xff] }
 0x1f4   :  { %12451 = vmatprep.mubr.msk.bf16.mxu0 %vm556_vm3, %v15792_v27  ;;  %17931 = vst [vmem:[#allocation37_spill] sm:$0xff] %v15803_v33  ;;  %v6082_v45 = vpack.c.bf16 %v6055_v7, %v6054_v16  ;;  %v12770_v27 = vpop.f32.mrb[110].mxu1  ;;  %17933 = vst [vmem:[#allocation39_spill] sm:$0xff] %v15810_v59  ;;  %v11392_v7 = vunpack.c.h.bf16 %v11641_v14  ;;  %v11643_v14 = vld [vmem:[%s17800_s3 + $0xc0] sm:$0xff]  }
 0x1f5   :  { %6099 = vst.msk [vmem:[#allocation2 + $0xa8] sm:$0xff] %vm556_vm3, %v6083_v6  ;;  %v5883_v4 = vadd.f32 %v12770_v27, %v15722_v47  ;;  %v5874_v39 = vpop.f32.mrb[111].mxu1  ;;  %v6060_v6 = vmul.f32 %v11395_v5, %v5964_v30  ;;  %v6058_v27 = vmul.f32 %v11391_v49, %v5962_v0  ;;  %v11403_v30 = vunpack.c.l.bf16 %v11644_v25 }
 0x1f6   :  { %6098 = vst.msk [vmem:[#allocation2 + $0xa0] sm:$0xff] %vm556_vm3, %v6082_v45  ;;  %v5875_v16 = vadd.f32 %v15722_v47, %v5874_v39  ;;  %v12773_v39 = vpop.f32.mrb[112].mxu1 }
 0x1f7   :  { %v5965_v33 = vmax.f32 %v5883_v4, 0.0  ;;  %v5896_v5 = vadd.f32 %v12773_v39, %v15722_v47  ;;  %v5887_v4 = vpop.f32.mrb[113].mxu1 }
 0x1f8   :  { %v5963_v34 = vmax.f32 %v5875_v16, 0.0  ;;  %v5888_v0 = vadd.f32 %v15722_v47, %v5887_v4  ;;  %v11399_v16 = vunpack.c.l.bf16 %v11643_v14  ;;  %v15840_v4 = vld [vmem:[#allocation2 + $0x1b0] sm:$0xff] }
 0x1f9   :  { %v6061_v45 = vmul.f32 %v11396_v18, %v5965_v33  ;;  %v15831_v33 = vld [vmem:[#allocation2 + $0xb0] sm:$0xff]  ;;  %v5968_v18 = vmax.f32 %v5896_v5, 0.0  ;;  %17938 = vst [vmem:[#allocation44_spill] sm:$0xff] %v15840_v4  ;;  %v11646_v5 = vld [vmem:[%s17800_s3 + $0xd8] sm:$0xff]  }
 0x1fa   :  { %v6059_v40 = vmul.f32 %v11392_v7, %v5963_v34  ;;  %17936 = vst [vmem:[#allocation42_spill] sm:$0xff] %v15831_v33  ;;  %v11404_v34 = vunpack.c.h.bf16 %v11644_v25  ;;  %v5966_v39 = vmax.f32 %v5888_v0, 0.0 }
 0x1fb   :  { %12452 = vmatmul.mubr.msk.bf16.gmra.mrb[160].mxu0 %vm556_vm3, %v15810_v59  ;;  %v6085_v50 = vpack.c.bf16 %v6061_v45, %v6060_v6  ;;  %v15827_v59 = vld [vmem:[#allocation2 + $0xb8] sm:$0xff]  ;;  %v15834_v45 = vld [vmem:[#allocation2 + $0x1a8] sm:$0xff] }
 0x1fc   :  { %12455 = vmatprep.mubr.msk.bf16.mxu0 %vm556_vm3, %v15816_v12  ;;  %17935 = vst [vmem:[#allocation41_spill] sm:$0xff] %v15827_v59  ;;  %v6084_v49 = vpack.c.bf16 %v6059_v40, %v6058_v27  ;;  %v12774_v12 = vpop.f32.mrb[114].mxu1  ;;  %17937 = vst [vmem:[#allocation43_spill] sm:$0xff] %v15834_v45  ;;  %v11400_v40 = vunpack.c.h.bf16 %v11643_v14  ;;  %v11645_v14 = vld [vmem:[%s17800_s3 + $0xd0] sm:$0xff]  }
 0x1fd   :  { %6101 = vst.msk [vmem:[#allocation2 + $0xb8] sm:$0xff] %vm556_vm3, %v6085_v50  ;;  %v5899_v7 = vadd.f32 %v12774_v12, %v15722_v47  ;;  %v5890_v6 = vpop.f32.mrb[115].mxu1  ;;  %v6064_v50 = vmul.f32 %v11403_v30, %v5968_v18  ;;  %v6062_v12 = vmul.f32 %v11399_v16, %v5966_v39  ;;  %v11411_v18 = vunpack.c.l.bf16 %v11646_v5 }
 0x1fe   :  { %6100 = vst.msk [vmem:[#allocation2 + $0xb0] sm:$0xff] %vm556_vm3, %v6084_v49  ;;  %v5891_v27 = vadd.f32 %v15722_v47, %v5890_v6  ;;  %v12777_v6 = vpop.f32.mrb[116].mxu1 }
 0x1ff   :  { %v5969_v59 = vmax.f32 %v5899_v7, 0.0  ;;  %v5912_v30 = vadd.f32 %v12777_v6, %v15722_v47  ;;  %v5903_v7 = vpop.f32.mrb[117].mxu1 }
 0x200   :  { %v5967_v25 = vmax.f32 %v5891_v27, 0.0  ;;  %v5904_v39 = vadd.f32 %v15722_v47, %v5903_v7  ;;  %v11407_v27 = vunpack.c.l.bf16 %v11645_v14  ;;  %v2159_v7 = vld [vmem:[#allocation2 + $0x1c0] sm:$0xff] }
 0x201   :  { %v6065_v49 = vmul.f32 %v11404_v34, %v5969_v59  ;;  %v15855_v59 = vld [vmem:[#allocation2 + $0xc0] sm:$0xff]  ;;  %v5972_v34 = vmax.f32 %v5912_v30, 0.0 }
 0x202   :  { %v6063_v0 = vmul.f32 %v11400_v40, %v5967_v25  ;;  %17940 = vst [vmem:[#allocation46_spill] sm:$0xff] %v15855_v59  ;;  %v11412_v25 = vunpack.c.h.bf16 %v11646_v5  ;;  %v5970_v6 = vmax.f32 %v5904_v39, 0.0  ;;  %v11648_v5 = vld [vmem:[%s17800_s3 + $0xe8] sm:$0xff]  }
 0x203   :  { %12456 = vmatmul.mubr.msk.bf16.gmra.mrb[164].mxu0 %vm556_vm3, %v15834_v45  ;;  %v6087_v33 = vpack.c.bf16 %v6065_v49, %v6064_v50  ;;  %v15851_v45 = vld [vmem:[#allocation2 + $0xc8] sm:$0xff]  ;;  %v15858_v49 = vld [vmem:[#allocation2 + $0x1b8] sm:$0xff] }
 0x204   :  { %12459 = vmatprep.mubr.msk.bf16.mxu0 %vm556_vm3, %v15840_v4  ;;  %17939 = vst [vmem:[#allocation45_spill] sm:$0xff] %v15851_v45  ;;  %v6086_v16 = vpack.c.bf16 %v6063_v0, %v6062_v12  ;;  %v12778_v4 = vpop.f32.mrb[118].mxu1  ;;  %17941 = vst [vmem:[#allocation47_spill] sm:$0xff] %v15858_v49  ;;  %v11408_v0 = vunpack.c.h.bf16 %v11645_v14  ;;  %v6066_v30 = vmul.f32 %v11407_v27, %v5970_v6 }
 0x205   :  { %6103 = vst.msk [vmem:[#allocation2 + $0xc8] sm:$0xff] %vm556_vm3, %v6087_v33  ;;  %v5915_v40 = vadd.f32 %v12778_v4, %v15722_v47  ;;  %v5906_v50 = vpop.f32.mrb[119].mxu1  ;;  %v6068_v33 = vmul.f32 %v11411_v18, %v5972_v34  ;;  %v11419_v18 = vunpack.c.l.bf16 %v11648_v5 }
 0x206   :  { %6102 = vst.msk [vmem:[#allocation2 + $0xc0] sm:$0xff] %vm556_vm3, %v6086_v16  ;;  %v5907_v12 = vadd.f32 %v15722_v47, %v5906_v50  ;;  %v11647_v16 = vld [vmem:[%s17800_s3 + $0xe0] sm:$0xff]   ;;  %v12781_v39 = vpop.f32.mrb[120].mxu1 }
 0x207   :  { %v5973_v45 = vmax.f32 %v5915_v40, 0.0  ;;  %v5919_v34 = vpop.f32.mrb[121].mxu1  ;;  %v15872_v40 = vld [vmem:[#allocation2 + $0xd8] sm:$0xff] }
 0x208   :  { %v5971_v4 = vmax.f32 %v5907_v12, 0.0  ;;  %17942 = vst [vmem:[#allocation48_spill] sm:$0xff] %v15872_v40  ;;  %v5920_v6 = vadd.f32 %v15722_v47, %v5919_v34  ;;  %v11415_v12 = vunpack.c.l.bf16 %v11647_v16 }
 0x209   :  { %v6069_v59 = vmul.f32 %v11412_v25, %v5973_v45  ;;  %v15876_v45 = vld [vmem:[#allocation2 + $0xd0] sm:$0xff] }
 0x20a   :  { %v6067_v14 = vmul.f32 %v11408_v0, %v5971_v4  ;;  %v11420_v4 = vunpack.c.h.bf16 %v11648_v5  ;;  %v11650_v5 = vld [vmem:[%s17800_s3 + $0xf8] sm:$0xff]  }
 0x20b   :  { %12460 = vmatmul.mubr.msk.bf16.gmra.mrb[168].mxu0 %vm556_vm3, %v15858_v49  ;;  %v6089_v50 = vpack.c.bf16 %v6069_v59, %v6068_v33  ;;  %v5928_v49 = vadd.f32 %v12781_v39, %v15722_v47  ;;  %v2160_v33 = vld [vmem:[#allocation2 + $0x1c8] sm:$0xff]  ;;  %v5974_v39 = vmax.f32 %v5920_v6, 0.0 }
 0x20c   :  { %12463 = vmatprep.mubr.msk.bf16.mxu0 %vm556_vm3, %v2159_v7  ;;  %v6088_v27 = vpack.c.bf16 %v6067_v14, %v6066_v30  ;;  %v12782_v7 = vpop.f32.mrb[122].mxu1  ;;  %v11416_v30 = vunpack.c.h.bf16 %v11647_v16 }
 0x20d   :  { %6105 = vst.msk [vmem:[#allocation2 + $0xd8] sm:$0xff] %vm556_vm3, %v6089_v50  ;;  %v5976_v25 = vmax.f32 %v5928_v49, 0.0  ;;  %v5931_v0 = vadd.f32 %v12782_v7, %v15722_v47  ;;  %v5922_v59 = vpop.f32.mrb[123].mxu1  ;;  %v6070_v50 = vmul.f32 %v11415_v12, %v5974_v39 }
 0x20e   :  { %6104 = vst.msk [vmem:[#allocation2 + $0xd0] sm:$0xff] %vm556_vm3, %v6088_v27  ;;  %v5923_v40 = vadd.f32 %v15722_v47, %v5922_v59  ;;  %v11649_v27 = vld [vmem:[%s17800_s3 + $0xf0] sm:$0xff]   ;;  %v12785_v16 = vpop.f32.mrb[124].mxu1 }
 0x20f   :  { %v6072_v14 = vmul.f32 %v11419_v18, %v5976_v25  ;;  %v5977_v34 = vmax.f32 %v5931_v0, 0.0  ;;  %v5944_v18 = vadd.f32 %v12785_v16, %v15722_v47  ;;  %v11427_v25 = vunpack.c.l.bf16 %v11650_v5  ;;  %v5935_v0 = vpop.f32.mrb[125].mxu1 }
 0x210   :  { %v5975_v49 = vmax.f32 %v5923_v40, 0.0  ;;  %v5936_v40 = vadd.f32 %v15722_v47, %v5935_v0  ;;  %v11423_v12 = vunpack.c.l.bf16 %v11649_v27  ;;  %v12786_v39 = vpop.f32.mrb[126].mxu1  ;;  %v11424_v16 = vunpack.c.h.bf16 %v11649_v27  ;;  %v13864_v27 = vld [vmem:[%s17801_s4 + $0x70] sm:$0xff]  }
 0x211   :  { %v6073_v7 = vmul.f32 %v11420_v4, %v5977_v34  ;;  %v13861_v4 = vld [vmem:[%s17801_s4 + $0x68] sm:$0xff]   ;;  %v5947_v34 = vadd.f32 %v12786_v39, %v15722_v47 }
 0x212   :  { %v6071_v6 = vmul.f32 %v11416_v30, %v5975_v49  ;;  %v15898_v30 = vld [vmem:[#allocation2 + $0xe0] sm:$0xff]  ;;  %v11428_v49 = vunpack.c.h.bf16 %v11650_v5  ;;  %v11652_v5 = vld [vmem:[%s17800_s3 + $0x108] sm:$0xff]  }
 0x213   :  { %12464 = vmatmul.mubr.msk.bf16.gmra.mrb[172].mxu0 %vm556_vm3, %v2160_v33  ;;  %v6091_v59 = vpack.c.bf16 %v6073_v7, %v6072_v14  ;;  %v15891_v33 = vld [vmem:[#allocation2 + $0xe8] sm:$0xff]  ;;  %v5980_v14 = vmax.f32 %v5944_v18, 0.0  ;;  %v5938_v7 = vpop.f32.mrb[127].mxu1 }
 0x214   :  { %12479 = vmatprep.mubr.msk.bf16.mxu0 %vm556_vm3, %v15537_v26  ;;  %17943 = vst [vmem:[#allocation49_spill] sm:$0xff] %v15891_v33  ;;  %v6090_v26 = vpack.c.bf16 %v6071_v6, %v6070_v50  ;;  %v5978_v50 = vmax.f32 %v5936_v40, 0.0  ;;  %v5939_v6 = vadd.f32 %v15722_v47, %v5938_v7  ;;  %v5981_v33 = vmax.f32 %v5947_v34, 0.0 }
 0x215   :  { %6107 = vst.msk [vmem:[#allocation2 + $0xe8] sm:$0xff] %vm556_vm3, %v6091_v59  ;;  %v6076_v0 = vmul.f32 %v11427_v25, %v5980_v14  ;;  %v15918_v14 = vld [vmem:[#allocation2 + $0xf8] sm:$0xff] }
 0x216   :  { %6106 = vst.msk [vmem:[#allocation2 + $0xe0] sm:$0xff] %vm556_vm3, %v6090_v26  ;;  %v6074_v59 = vmul.f32 %v11423_v12, %v5978_v50  ;;  %v5979_v18 = vmax.f32 %v5939_v6, 0.0  ;;  %v6077_v26 = vmul.f32 %v11428_v49, %v5981_v33  ;;  %v12793_v25 = vpop.f32.mrb[128].mxu1  ;;  %v11435_v12 = vunpack.c.l.bf16 %v11652_v5  ;;  %v13867_v33 = vld [vmem:[%s17801_s4 + $0x78] sm:$0xff]   ;;  %v15925_v49 = vld [vmem:[#allocation2 + $0xf0] sm:$0xff] }
 0x217   :  { %v6329_v39 = vpop.f32.mrb[129].mxu1 }
 0x218   :  { %v6093_v40 = vpack.c.bf16 %v6077_v26, %v6076_v0  ;;  %v6330_v7 = vadd.f32 %v15722_v47, %v6329_v39  ;;  %v12794_v6 = vpop.f32.mrb[130].mxu1 }
 0x219   :  { %v6341_v0 = vadd.f32 %v12794_v6, %v15722_v47 }
 0x21a   :  { %6109 = vst.msk [vmem:[#allocation2 + $0xf8] sm:$0xff] %vm556_vm3, %v6093_v40 }
 0x21b   :  { %12480 = vmatmul.mubr.msk.bf16.vlgmr.msra.gmra.mrb[64].mxu0 %vm556_vm3, %v15529_v38  ;;  %v11651_v38 = vld [vmem:[%s17800_s3 + $0x100] sm:$0xff]   ;;  %v6459_v39 = vmax.f32 %v6341_v0, 0.0 }
 0x21c   :  { %12592 = vmatpush3.bf16.msra.mxu0 %v15506_v20  ;;  %12483 = vmatprep.mubr.msk.bf16.mxu0 %vm556_vm3, %v14848_v22  ;;  %v6075_v20 = vmul.f32 %v11424_v16, %v5979_v18  ;;  %v6338_v22 = vadd.f32 %v12793_v25, %v15722_v47  ;;  %v11431_v50 = vunpack.c.l.bf16 %v11651_v38  ;;  %v6332_v18 = vpop.f32.mrb[131].mxu1 }
 0x21d   :  { %12593 = vmatprep.subr.bf16.mxu0 %v13861_v4  ;;  %v6333_v26 = vadd.f32 %v15722_v47, %v6332_v18 }
 0x21e   :  { %v6092_v34 = vpack.c.bf16 %v6075_v20, %v6074_v59  ;;  %v6458_v16 = vmax.f32 %v6338_v22, 0.0  ;;  %v6456_v59 = vmax.f32 %v6330_v7, 0.0  ;;  %v11432_v20 = vunpack.c.h.bf16 %v11651_v38  ;;  %v11653_v38 = vld [vmem:[%s17800_s3 + $0x110] sm:$0xff]  }
 0x21f   :  { %v6457_v22 = vmax.f32 %v6333_v26, 0.0  ;;  %v11439_v18 = vunpack.c.l.bf16 %v11653_v38 }
 0x220   :  { %12594 = vmatpush3.bf16.msra.mxu0 %v13861_v4  ;;  %v11436_v4 = vunpack.c.h.bf16 %v11652_v5  ;;  %6108 = vst.msk [vmem:[#allocation2 + $0xf0] sm:$0xff] %vm556_vm3, %v6092_v34  ;;  %v6554_v25 = vmul.f32 %v11435_v12, %v6458_v16  ;;  %v6552_v40 = vmul.f32 %v11431_v50, %v6456_v59  ;;  %v11654_v5 = vld [vmem:[%s17800_s3 + $0x118] sm:$0xff]  }
 0x221   :  { %12595 = vmatprep.subr.bf16.mxu0 %v13864_v27  ;;  %v6553_v7 = vmul.f32 %v11432_v20, %v6457_v22  ;;  %v11443_v16 = vunpack.c.l.bf16 %v11654_v5 }
 0x222   :  { %v6555_v34 = vmul.f32 %v11436_v4, %v6459_v39  ;;  %v15945_v4 = vld [vmem:[#allocation2 + $0x100] sm:$0xff] }
 0x223   :  { %12484 = vmatmul.mubr.msk.bf16.gmra.mrb[68].mxu0 %vm556_vm3, %v14864_v2  ;;  %v12797_v2 = vpop.f32.mrb[132].mxu1  ;;  %v6584_v50 = vpack.c.bf16 %v6553_v7, %v6552_v40 }
 0x224   :  { %12487 = vmatprep.mubr.msk.bf16.mxu0 %vm556_vm3, %v14913_v28  ;;  %12596 = vmatpush3.bf16.msra.mxu0 %v13864_v27  ;;  %v6585_v12 = vpack.c.bf16 %v6555_v34, %v6554_v25  ;;  %v6354_v6 = vadd.f32 %v12797_v2, %v15722_v47  ;;  %v6345_v28 = vpop.f32.mrb[133].mxu1  ;;  %v15941_v27 = vld [vmem:[#allocation2 + $0x108] sm:$0xff]  ;;  %v11444_v25 = vunpack.c.h.bf16 %v11654_v5  ;;  %v11440_v34 = vunpack.c.h.bf16 %v11653_v38 }
 0x225   :  { %12597 = vmatprep.subr.bf16.mxu0 %v13867_v33  ;;  %v6346_v0 = vadd.f32 %v15722_v47, %v6345_v28  ;;  %v12798_v59 = vpop.f32.mrb[134].mxu1  ;;  %6600 = vst.msk [vmem:[#allocation2 + $0x100] sm:$0xff] %vm556_vm3, %v6584_v50  ;;  %v11656_v5 = vld [vmem:[%s17800_s3 + $0x128] sm:$0xff]  }
 0x226   :  { %6601 = vst.msk [vmem:[#allocation2 + $0x108] sm:$0xff] %vm556_vm3, %v6585_v12  ;;  %v6462_v26 = vmax.f32 %v6354_v6, 0.0  ;;  %v6357_v20 = vadd.f32 %v12798_v59, %v15722_v47  ;;  %v6348_v39 = vpop.f32.mrb[135].mxu1  ;;  %v13870_v6 = vld [vmem:[%s17801_s4 + $0x80] sm:$0xff]   ;;  %v15964_v59 = vld [vmem:[#allocation2 + $0x118] sm:$0xff] }
 0x227   :  { %v6460_v22 = vmax.f32 %v6346_v0, 0.0  ;;  %v11451_v0 = vunpack.c.l.bf16 %v11656_v5 }
 0x228   :  { %12598 = vmatpush3.bf16.msra.mxu0 %v13867_v33  ;;  %v6349_v33 = vadd.f32 %v15722_v47, %v6348_v39  ;;  %v6558_v40 = vmul.f32 %v11443_v16, %v6462_v26  ;;  %v6463_v7 = vmax.f32 %v6357_v20, 0.0  ;;  %v12801_v16 = vpop.f32.mrb[136].mxu1 }
 0x229   :  { %v6556_v2 = vmul.f32 %v11439_v18, %v6460_v22  ;;  %12599 = vmatprep.subr.bf16.mxu0 %v13870_v6  ;;  %v6361_v18 = vpop.f32.mrb[137].mxu1  ;;  %v15968_v22 = vld [vmem:[#allocation2 + $0x110] sm:$0xff] }
 0x22a   :  { %v6461_v12 = vmax.f32 %v6349_v33, 0.0  ;;  %v6559_v28 = vmul.f32 %v11444_v25, %v6463_v7  ;;  %v6362_v20 = vadd.f32 %v15722_v47, %v6361_v18  ;;  %v12802_v25 = vpop.f32.mrb[138].mxu1  ;;  %v11657_v18 = vld [vmem:[%s17800_s3 + $0x130] sm:$0xff]  }
 0x22b   :  { %12488 = vmatmul.mubr.msk.bf16.gmra.mrb[72].mxu0 %vm556_vm3, %v14929_v10  ;;  %v11655_v10 = vld [vmem:[%s17800_s3 + $0x120] sm:$0xff]   ;;  %v6364_v7 = vpop.f32.mrb[139].mxu1 }
 0x22c   :  { %12491 = vmatprep.mubr.msk.bf16.mxu0 %vm556_vm3, %v14966_v61  ;;  %v6557_v38 = vmul.f32 %v11440_v34, %v6461_v12  ;;  %v6587_v50 = vpack.c.bf16 %v6559_v28, %v6558_v40  ;;  %v6370_v61 = vadd.f32 %v12801_v16, %v15722_v47  ;;  %12600 = vmatpush3.bf16.msra.mxu0 %v13870_v6  ;;  %v11447_v39 = vunpack.c.l.bf16 %v11655_v10 }
 0x22d   :  { %v6373_v34 = vadd.f32 %v12802_v25, %v15722_v47  ;;  %v11452_v40 = vunpack.c.h.bf16 %v11656_v5  ;;  %v6464_v12 = vmax.f32 %v6362_v20, 0.0  ;;  %v6365_v6 = vadd.f32 %v15722_v47, %v6364_v7  ;;  %v11658_v5 = vld [vmem:[%s17800_s3 + $0x138] sm:$0xff]  }
 0x22e   :  { %v6586_v26 = vpack.c.bf16 %v6557_v38, %v6556_v2  ;;  %6603 = vst.msk [vmem:[#allocation2 + $0x118] sm:$0xff] %vm556_vm3, %v6587_v50  ;;  %v6466_v33 = vmax.f32 %v6370_v61, 0.0  ;;  %v11448_v28 = vunpack.c.h.bf16 %v11655_v10 }
 0x22f   :  { %v6467_v38 = vmax.f32 %v6373_v34, 0.0  ;;  %v6560_v16 = vmul.f32 %v11447_v39, %v6464_v12  ;;  %v6465_v50 = vmax.f32 %v6365_v6, 0.0  ;;  %v11455_v34 = vunpack.c.l.bf16 %v11657_v18 }
 0x230   :  { %6602 = vst.msk [vmem:[#allocation2 + $0x110] sm:$0xff] %vm556_vm3, %v6586_v26  ;;  %v6562_v2 = vmul.f32 %v11451_v0, %v6466_v33  ;;  %v12805_v26 = vpop.f32.mrb[140].mxu1  ;;  %v11459_v0 = vunpack.c.l.bf16 %v11658_v5  ;;  %v15984_v33 = vld [vmem:[#allocation2 + $0x128] sm:$0xff] }
 0x231   :  { %v6563_v61 = vmul.f32 %v11452_v40, %v6467_v38  ;;  %v6561_v10 = vmul.f32 %v11448_v28, %v6465_v50  ;;  %v6377_v25 = vpop.f32.mrb[141].mxu1  ;;  %v15988_v40 = vld [vmem:[#allocation2 + $0x120] sm:$0xff]  ;;  %v11460_v28 = vunpack.c.h.bf16 %v11658_v5  ;;  %v13862_v50 = vld [vmem:[%s17801_s4 + $0x8] sm:$0xff]  }
 0x232   :  { %v6378_v39 = vadd.f32 %v15722_v47, %v6377_v25  ;;  %v12806_v7 = vpop.f32.mrb[142].mxu1 }
 0x233   :  { %12492 = vmatmul.mubr.msk.bf16.gmra.mrb[76].mxu0 %vm556_vm3, %v14977_v31  ;;  %v6589_v20 = vpack.c.bf16 %v6563_v61, %v6562_v2  ;;  %v6386_v31 = vadd.f32 %v12805_v26, %v15722_v47  ;;  %v6389_v6 = vadd.f32 %v12806_v7, %v15722_v47  ;;  %v6380_v2 = vpop.f32.mrb[143].mxu1 }
 0x234   :  { %12495 = vmatprep.mubr.msk.bf16.mxu0 %vm556_vm3, %v15012_v13  ;;  %v6588_v13 = vpack.c.bf16 %v6561_v10, %v6560_v16  ;;  %v6468_v16 = vmax.f32 %v6378_v39, 0.0  ;;  %v6381_v61 = vadd.f32 %v15722_v47, %v6380_v2  ;;  %v11456_v10 = vunpack.c.h.bf16 %v11657_v18  ;;  %v11660_v18 = vld [vmem:[%s17800_s3 + $0x148] sm:$0xff]  }
 0x235   :  { %6605 = vst.msk [vmem:[#allocation2 + $0x128] sm:$0xff] %vm556_vm3, %v6589_v20  ;;  %v6470_v12 = vmax.f32 %v6386_v31, 0.0  ;;  %v7157_v26 = vld [vmem:[#allocation2 + $0x118] sm:$0xff]  ;;  %v6471_v5 = vmax.f32 %v6389_v6, 0.0 }
 0x236   :  { %6604 = vst.msk [vmem:[#allocation2 + $0x120] sm:$0xff] %vm556_vm3, %v6588_v13  ;;  %v6564_v31 = vmul.f32 %v11455_v34, %v6468_v16  ;;  %v6469_v25 = vmax.f32 %v6381_v61, 0.0  ;;  %v16013_v6 = vld [vmem:[#allocation2 + $0x138] sm:$0xff]  ;;  %v16017_v61 = vld [vmem:[#allocation2 + $0x130] sm:$0xff] }
 0x237   :  { %v7156_v38 = vld [vmem:[#allocation2 + $0x110] sm:$0xff]  ;;  %v6566_v20 = vmul.f32 %v11459_v0, %v6470_v12  ;;  %v6567_v13 = vmul.f32 %v11460_v28, %v6471_v5  ;;  %17944 = vst [vmem:[#allocation50_spill] sm:$0xff] %v16013_v6  ;;  %17945 = vst [vmem:[#allocation51_spill] sm:$0xff] %v16017_v61  ;;  %v16300_v61 = vld [vmem:[#allocation2 + $0x1d8] sm:$0xff] }
 0x238   :  { %12935 = vmatprep.mubr.msk.bf16.mxu1 %vm556_vm3, %v7156_v38  ;;  %v13863_v0 = vld [vmem:[%s17801_s4 + $0x10] sm:$0xff]   ;;  %v6565_v39 = vmul.f32 %v11456_v10, %v6469_v25 }
 0x239   :  { %12936 = vmatmul.mubr.msk.bf16.vlgmr.msra.gmra.mrb[192].mxu1 %vm556_vm3, %v7157_v26  ;;  %v6591_v34 = vpack.c.bf16 %v6567_v13, %v6566_v20  ;;  %v11468_v20 = vunpack.c.h.bf16 %v11660_v18 }
 0x23a   :  { %12984 = vmatpush3.bf16.msra.mxu1 %v15644_v1  ;;  %v11467_v1 = vunpack.c.l.bf16 %v11660_v18  ;;  %v6590_v2 = vpack.c.bf16 %v6565_v39, %v6564_v31  ;;  %v13865_v31 = vld [vmem:[%s17801_s4 + $0x18] sm:$0xff]  }
 0x23b   :  { %12496 = vmatmul.mubr.msk.bf16.gmra.mrb[80].mxu0 %vm556_vm3, %v15024_v52  ;;  %v11659_v52 = vld [vmem:[%s17800_s3 + $0x140] sm:$0xff]   ;;  %12985 = vmatprep.subr.bf16.mxu1 %v13862_v50  ;;  %6607 = vst.msk [vmem:[#allocation2 + $0x138] sm:$0xff] %vm556_vm3, %v6591_v34 }
 0x23c   :  { %12499 = vmatprep.mubr.msk.bf16.mxu0 %vm556_vm3, %v15065_v55  ;;  %v12809_v55 = vpop.f32.mrb[144].mxu1  ;;  %v11463_v38 = vunpack.c.l.bf16 %v11659_v52  ;;  %6606 = vst.msk [vmem:[#allocation2 + $0x130] sm:$0xff] %vm556_vm3, %v6590_v2  ;;  %v11464_v39 = vunpack.c.h.bf16 %v11659_v52  ;;  %v11662_v2 = vld [vmem:[%s17800_s3 + $0x158] sm:$0xff]  }
 0x23d   :  { %v6402_v7 = vadd.f32 %v12809_v55, %v15722_v47  ;;  %v6393_v12 = vpop.f32.mrb[145].mxu1  ;;  %v7158_v25 = vld [vmem:[#allocation2 + $0x120] sm:$0xff]  ;;  %v7159_v55 = vld [vmem:[#allocation2 + $0x128] sm:$0xff] }
 0x23e   :  { %v6394_v28 = vadd.f32 %v15722_v47, %v6393_v12  ;;  %v12810_v16 = vpop.f32.mrb[146].mxu1  ;;  %12986 = vmatpush3.bf16.msra.mxu1 %v13862_v50  ;;  %12939 = vmatprep.mubr.msk.bf16.mxu1 %vm556_vm3, %v7158_v25 }
 0x23f   :  { %v6474_v26 = vmax.f32 %v6402_v7, 0.0  ;;  %v6405_v10 = vadd.f32 %v12810_v16, %v15722_v47  ;;  %v6396_v5 = vpop.f32.mrb[147].mxu1  ;;  %12987 = vmatprep.subr.bf16.mxu1 %v13863_v0 }
 0x240   :  { %v6472_v13 = vmax.f32 %v6394_v28, 0.0  ;;  %v6397_v50 = vadd.f32 %v15722_v47, %v6396_v5  ;;  %v16041_v5 = vld [vmem:[#allocation2 + $0x148] sm:$0xff] }
 0x241   :  { %v6570_v18 = vmul.f32 %v11467_v1, %v6474_v26  ;;  %v6475_v34 = vmax.f32 %v6405_v10, 0.0  ;;  %12940 = vmatmul.mubr.msk.bf16.gmra.mrb[196].mxu1 %vm556_vm3, %v7159_v55  ;;  %v13866_v1 = vld [vmem:[%s17801_s4 + $0x20] sm:$0xff]   ;;  %v11475_v26 = vunpack.c.l.bf16 %v11662_v2  ;;  %17946 = vst [vmem:[#allocation52_spill] sm:$0xff] %v16041_v5 }
 0x242   :  { %v6568_v7 = vmul.f32 %v11463_v38, %v6472_v13  ;;  %v6473_v12 = vmax.f32 %v6397_v50, 0.0  ;;  %12988 = vmatpush3.bf16.msra.mxu1 %v13863_v0  ;;  %v16045_v50 = vld [vmem:[#allocation2 + $0x140] sm:$0xff] }
 0x243   :  { %12500 = vmatmul.mubr.msk.bf16.gmra.mrb[84].mxu0 %vm556_vm3, %v15081_v36  ;;  %v6571_v52 = vmul.f32 %v11468_v20, %v6475_v34  ;;  %v11661_v36 = vld [vmem:[%s17800_s3 + $0x150] sm:$0xff]   ;;  %12989 = vmatprep.subr.bf16.mxu1 %v13865_v31  ;;  %v12813_v16 = vpop.f32.mrb[148].mxu1  ;;  %17947 = vst [vmem:[#allocation53_spill] sm:$0xff] %v16045_v50 }
 0x244   :  { %12503 = vmatprep.mubr.msk.bf16.mxu0 %vm556_vm3, %v15119_v43  ;;  %v6569_v28 = vmul.f32 %v11464_v39, %v6473_v12  ;;  %v6418_v38 = vadd.f32 %v12813_v16, %v15722_v47  ;;  %v6409_v10 = vpop.f32.mrb[149].mxu1  ;;  %v11471_v25 = vunpack.c.l.bf16 %v11661_v36  ;;  %v16048_v12 = vld [vmem:[#allocation2 + $0x130] sm:$0xff] }
 0x245   :  { %v6593_v43 = vpack.c.bf16 %v6571_v52, %v6570_v18  ;;  %v6410_v20 = vadd.f32 %v15722_v47, %v6409_v10  ;;  %v12814_v13 = vpop.f32.mrb[150].mxu1  ;;  %v11476_v18 = vunpack.c.h.bf16 %v11662_v2  ;;  %12943 = vmatprep.mubr.msk.bf16.mxu1 %vm556_vm3, %v16048_v12  ;;  %v16059_v2 = vld [vmem:[#allocation2 + $0x138] sm:$0xff] }
 0x246   :  { %v6592_v0 = vpack.c.bf16 %v6569_v28, %v6568_v7  ;;  %12990 = vmatpush3.bf16.msra.mxu1 %v13865_v31  ;;  %v6478_v55 = vmax.f32 %v6418_v38, 0.0  ;;  %v6421_v39 = vadd.f32 %v12814_v13, %v15722_v47  ;;  %v6412_v34 = vpop.f32.mrb[151].mxu1  ;;  %v13868_v7 = vld [vmem:[%s17801_s4 + $0x28] sm:$0xff]   ;;  %v11472_v28 = vunpack.c.h.bf16 %v11661_v36 }
 0x247   :  { %6609 = vst.msk [vmem:[#allocation2 + $0x148] sm:$0xff] %vm556_vm3, %v6593_v43  ;;  %12991 = vmatprep.subr.bf16.mxu1 %v13866_v1  ;;  %v6476_v52 = vmax.f32 %v6410_v20, 0.0  ;;  %v6413_v31 = vadd.f32 %v15722_v47, %v6412_v34  ;;  %v11664_v36 = vld [vmem:[%s17800_s3 + $0x168] sm:$0xff]  }
 0x248   :  { %6608 = vst.msk [vmem:[#allocation2 + $0x140] sm:$0xff] %vm556_vm3, %v6592_v0  ;;  %v6574_v16 = vmul.f32 %v11475_v26, %v6478_v55  ;;  %v6479_v43 = vmax.f32 %v6421_v39, 0.0  ;;  %v16074_v26 = vld [vmem:[%s17801_s4 + $0x60] sm:$0xff]   ;;  %v11483_v55 = vunpack.c.l.bf16 %v11664_v36 }
 0x249   :  { %12944 = vmatmul.mubr.msk.bf16.gmra.mrb[200].mxu1 %vm556_vm3, %v16059_v2  ;;  %v6572_v38 = vmul.f32 %v11471_v25, %v6476_v52  ;;  %v6477_v10 = vmax.f32 %v6413_v31, 0.0  ;;  %v16079_v31 = vld [vmem:[#allocation2 + $0x150] sm:$0xff] }
 0x24a   :  { %12992 = vmatpush3.bf16.msra.mxu1 %v13866_v1  ;;  %v6575_v0 = vmul.f32 %v11476_v18, %v6479_v43  ;;  %17948 = vst [vmem:[#allocation54_spill] sm:$0xff] %v16079_v31 }
 0x24b   :  { %12504 = vmatmul.mubr.msk.bf16.gmra.mrb[88].mxu0 %vm556_vm3, %v15130_v8  ;;  %v11663_v8 = vld [vmem:[%s17800_s3 + $0x160] sm:$0xff]   ;;  %12993 = vmatprep.subr.bf16.mxu1 %v13868_v7  ;;  %v6573_v20 = vmul.f32 %v11472_v28, %v6477_v10  ;;  %v11484_v28 = vunpack.c.h.bf16 %v11664_v36 }
 0x24c   :  { %12507 = vmatprep.mubr.msk.bf16.mxu0 %vm556_vm3, %v15168_v60  ;;  %v12817_v60 = vpop.f32.mrb[152].mxu1  ;;  %v6595_v25 = vpack.c.bf16 %v6575_v0, %v6574_v16  ;;  %v11479_v18 = vunpack.c.l.bf16 %v11663_v8 }
 0x24d   :  { %v6434_v13 = vadd.f32 %v12817_v60, %v15722_v47  ;;  %v6425_v39 = vpop.f32.mrb[153].mxu1  ;;  %v6594_v34 = vpack.c.bf16 %v6573_v20, %v6572_v38  ;;  %v11480_v20 = vunpack.c.h.bf16 %v11663_v8 }
 0x24e   :  { %v6426_v1 = vadd.f32 %v15722_v47, %v6425_v39  ;;  %v12818_v52 = vpop.f32.mrb[154].mxu1  ;;  %12994 = vmatpush3.bf16.msra.mxu1 %v13868_v7  ;;  %6611 = vst.msk [vmem:[#allocation2 + $0x158] sm:$0xff] %vm556_vm3, %v6595_v25  ;;  %v16091_v7 = vld [vmem:[#allocation2 + $0x148] sm:$0xff] }
 0x24f   :  { %v6482_v43 = vmax.f32 %v6434_v13, 0.0  ;;  %v6437_v5 = vadd.f32 %v12818_v52, %v15722_v47  ;;  %v6428_v10 = vpop.f32.mrb[155].mxu1  ;;  %v16082_v16 = vld [vmem:[#allocation2 + $0x140] sm:$0xff]  ;;  %13107 = vmatprep.subr.bf16.mxu1 %v16074_v26  ;;  %6610 = vst.msk [vmem:[#allocation2 + $0x150] sm:$0xff] %vm556_vm3, %v6594_v34 }
 0x250   :  { %v6480_v38 = vmax.f32 %v6426_v1, 0.0  ;;  %v6429_v0 = vadd.f32 %v15722_v47, %v6428_v10  ;;  %12947 = vmatprep.mubr.msk.bf16.mxu1 %vm556_vm3, %v16082_v16  ;;  %v11666_v47 = vld [vmem:[%s17800_s3 + $0x178] sm:$0xff]  }
 0x251   :  { %v6578_v36 = vmul.f32 %v11483_v55, %v6482_v43  ;;  %v6483_v60 = vmax.f32 %v6437_v5, 0.0  ;;  %12948 = vmatmul.mubr.msk.bf16.gmra.mrb[204].mxu1 %vm556_vm3, %v16091_v7  ;;  %v11665_v5 = vld [vmem:[%s17800_s3 + $0x170] sm:$0xff]   ;;  %v16106_v43 = vld [vmem:[#allocation2 + $0x168] sm:$0xff] }
 0x252   :  { %v6576_v25 = vmul.f32 %v11479_v18, %v6480_v38  ;;  %v6481_v13 = vmax.f32 %v6429_v0, 0.0  ;;  %v11491_v18 = vunpack.c.l.bf16 %v11666_v47  ;;  %17949 = vst [vmem:[#allocation55_spill] sm:$0xff] %v16106_v43  ;;  %v11487_v0 = vunpack.c.l.bf16 %v11665_v5 }
 0x253   :  { %12508 = vmatmul.mubr.msk.bf16.gmra.mrb[92].mxu0 %vm556_vm3, %v15179_v48  ;;  %v13872_v48 = vld [vmem:[%s17801_s4 + $0x88] sm:$0xff]   ;;  %v6579_v8 = vmul.f32 %v11484_v28, %v6483_v60  ;;  %v16111_v28 = vld [vmem:[%s17801_s4 + $0x30] sm:$0xff]  }
 0x254   :  { %12511 = vmatprep.mubr.msk.bf16.mxu0 %vm556_vm3, %v15192_v62  ;;  %v6577_v55 = vmul.f32 %v11480_v20, %v6481_v13  ;;  %v12821_v39 = vpop.f32.mrb[156].mxu1  ;;  %12601 = vmatprep.subr.bf16.mxu0 %v13872_v48  ;;  %v13878_v62 = vld [vmem:[#allocation6] ss:$0 sm:$0xff]  ;;  %v16115_v20 = vld [vmem:[#allocation2 + $0x160] sm:$0xff]  ;;  %v11492_v13 = vunpack.c.h.bf16 %v11666_v47 }
 0x255   :  { %v6597_v34 = vpack.c.bf16 %v6579_v8, %v6578_v36  ;;  %v6450_v1 = vadd.f32 %v13878_v62, %v12821_v39  ;;  %v6441_v52 = vpop.f32.mrb[157].mxu1  ;;  %12602 = vmatpush3.bf16.msra.mxu0 %v13872_v48  ;;  %17950 = vst [vmem:[#allocation56_spill] sm:$0xff] %v16115_v20  ;;  %v11488_v39 = vunpack.c.h.bf16 %v11665_v5  ;;  %v11668_v5 = vld [vmem:[%s17800_s3 + $0x188] sm:$0xff]  }
 0x256   :  { %v6596_v10 = vpack.c.bf16 %v6577_v55, %v6576_v25  ;;  %v6442_v38 = vadd.f32 %v13878_v62, %v6441_v52  ;;  %v12822_v31 = vpop.f32.mrb[158].mxu1  ;;  %12859 = vmatprep.subr.bf16.mxu0 %v16111_v28  ;;  %v16117_v8 = vld [vmem:[#allocation2 + $0x150] sm:$0xff] }
 0x257   :  { %6613 = vst.msk [vmem:[#allocation2 + $0x168] sm:$0xff] %vm556_vm3, %v6597_v34  ;;  %v6486_v36 = vmax.f32 %v6450_v1, 0.0  ;;  %v6453_v60 = vadd.f32 %v13878_v62, %v12822_v31  ;;  %v6444_v48 = vpop.f32.mrb[159].mxu1  ;;  %12951 = vmatprep.mubr.msk.bf16.mxu1 %vm556_vm3, %v16117_v8  ;;  %v16124_v34 = vld [vmem:[#allocation2 + $0x158] sm:$0xff] }
 0x258   :  { %6612 = vst.msk [vmem:[#allocation2 + $0x160] sm:$0xff] %vm556_vm3, %v6596_v10  ;;  %v6484_v25 = vmax.f32 %v6442_v38, 0.0  ;;  %v6445_v55 = vadd.f32 %v13878_v62, %v6444_v48  ;;  %v16130_v62 = vld [vmem:[#allocation6] ss:$0 sm:$0xff]  ;;  %v11499_v48 = vunpack.c.l.bf16 %v11668_v5 }
 0x259   :  { %v6582_v52 = vmul.f32 %v11491_v18, %v6486_v36  ;;  %v6487_v1 = vmax.f32 %v6453_v60, 0.0  ;;  %12952 = vmatmul.mubr.msk.bf16.gmra.mrb[208].mxu1 %vm556_vm3, %v16124_v34 }
 0x25a   :  { %v6580_v31 = vmul.f32 %v11487_v0, %v6484_v25  ;;  %v6485_v47 = vmax.f32 %v6445_v55, 0.0  ;;  %v16139_v0 = vld [vmem:[#allocation2 + $0x178] sm:$0xff] }
 0x25b   :  { %12512 = vmatmul.mubr.msk.bf16.gmra.mrb[96].mxu0 %vm556_vm3, %v15229_v37  ;;  %v6583_v10 = vmul.f32 %v11492_v13, %v6487_v1  ;;  %v11667_v37 = vld [vmem:[%s17800_s3 + $0x180] sm:$0xff]   ;;  %17951 = vst [vmem:[#allocation57_spill] sm:$0xff] %v16139_v0  ;;  %v16143_v13 = vld [vmem:[#allocation2 + $0x170] sm:$0xff] }
 0x25c   :  { %12515 = vmatprep.mubr.msk.bf16.mxu0 %vm556_vm3, %v15242_v17  ;;  %v6581_v18 = vmul.f32 %v11488_v39, %v6485_v47  ;;  %v11495_v43 = vunpack.c.l.bf16 %v11667_v37  ;;  %17952 = vst [vmem:[#allocation58_spill] sm:$0xff] %v16143_v13  ;;  %v11500_v47 = vunpack.c.h.bf16 %v11668_v5  ;;  %v16167_v13 = vld [vmem:[#allocation2 + $0x188] sm:$0xff] }
 0x25d   :  { %v12829_v38 = vpop.f32.mrb[160].mxu1  ;;  %v6599_v36 = vpack.c.bf16 %v6583_v10, %v6582_v52  ;;  %17953 = vst [vmem:[#allocation59_spill] sm:$0xff] %v16167_v13 }
 0x25e   :  { %v6844_v60 = vadd.f32 %v12829_v38, %v16130_v62  ;;  %v6835_v17 = vpop.f32.mrb[161].mxu1  ;;  %v6598_v25 = vpack.c.bf16 %v6581_v18, %v6580_v31  ;;  %v11496_v18 = vunpack.c.h.bf16 %v11667_v37  ;;  %v11670_v37 = vld [vmem:[%s17800_s3 + $0x198] sm:$0xff]  }
 0x25f   :  { %v6836_v55 = vadd.f32 %v16130_v62, %v6835_v17  ;;  %v12830_v20 = vpop.f32.mrb[162].mxu1  ;;  %6615 = vst.msk [vmem:[#allocation2 + $0x178] sm:$0xff] %vm556_vm3, %v6599_v36  ;;  %v16146_v10 = vld [vmem:[#allocation2 + $0x160] sm:$0xff]  ;;  %v16154_v36 = vld [vmem:[#allocation2 + $0x168] sm:$0xff] }
 0x260   :  { %v6964_v1 = vmax.f32 %v6844_v60, 0.0  ;;  %v6847_v39 = vadd.f32 %v12830_v20, %v16130_v62  ;;  %v6838_v52 = vpop.f32.mrb[163].mxu1  ;;  %6614 = vst.msk [vmem:[#allocation2 + $0x170] sm:$0xff] %vm556_vm3, %v6598_v25  ;;  %12955 = vmatprep.mubr.msk.bf16.mxu1 %vm556_vm3, %v16146_v10 }
 0x261   :  { %v6962_v38 = vmax.f32 %v6836_v55, 0.0  ;;  %v6839_v31 = vadd.f32 %v16130_v62, %v6838_v52  ;;  %12956 = vmatmul.mubr.msk.bf16.gmra.mrb[212].mxu1 %vm556_vm3, %v16154_v36  ;;  %v11507_v52 = vunpack.c.l.bf16 %v11670_v37 }
 0x262   :  { %v7060_v60 = vmul.f32 %v11499_v48, %v6964_v1  ;;  %v6965_v20 = vmax.f32 %v6847_v39, 0.0 }
 0x263   :  { %12516 = vmatmul.mubr.msk.bf16.gmra.mrb[100].mxu0 %vm556_vm3, %v15279_v41  ;;  %v7058_v5 = vmul.f32 %v11495_v43, %v6962_v38  ;;  %v6963_v17 = vmax.f32 %v6839_v31, 0.0  ;;  %v11669_v41 = vld [vmem:[%s17800_s3 + $0x190] sm:$0xff]  }
 0x264   :  { %12519 = vmatprep.mubr.msk.bf16.mxu0 %vm556_vm3, %v15292_v3  ;;  %v7061_v25 = vmul.f32 %v11500_v47, %v6965_v20  ;;  %v11503_v38 = vunpack.c.l.bf16 %v11669_v41  ;;  %v16171_v47 = vld [vmem:[#allocation2 + $0x180] sm:$0xff] }
 0x265   :  { %v7059_v55 = vmul.f32 %v11496_v18, %v6963_v17  ;;  %v12833_v48 = vpop.f32.mrb[164].mxu1  ;;  %17954 = vst [vmem:[#allocation60_spill] sm:$0xff] %v16171_v47  ;;  %v11508_v17 = vunpack.c.h.bf16 %v11670_v37  ;;  %v16195_v47 = vld [vmem:[#allocation2 + $0x198] sm:$0xff] }
 0x266   :  { %v7091_v1 = vpack.c.bf16 %v7061_v25, %v7060_v60  ;;  %v6860_v39 = vadd.f32 %v12833_v48, %v16130_v62  ;;  %v6851_v0 = vpop.f32.mrb[165].mxu1  ;;  %17955 = vst [vmem:[#allocation61_spill] sm:$0xff] %v16195_v47 }
 0x267   :  { %v7090_v3 = vpack.c.bf16 %v7059_v55, %v7058_v5  ;;  %v6852_v43 = vadd.f32 %v16130_v62, %v6851_v0  ;;  %v12834_v31 = vpop.f32.mrb[166].mxu1  ;;  %v16174_v25 = vld [vmem:[#allocation2 + $0x170] sm:$0xff]  ;;  %v11504_v55 = vunpack.c.h.bf16 %v11669_v41  ;;  %v16182_v0 = vld [vmem:[#allocation2 + $0x178] sm:$0xff]  ;;  %v11672_v41 = vld [vmem:[%s17800_s3 + $0x1a8] sm:$0xff]  }
 0x268   :  { %7107 = vst.msk [vmem:[#allocation2 + $0x188] sm:$0xff] %vm556_vm3, %v7091_v1  ;;  %v6968_v20 = vmax.f32 %v6860_v39, 0.0  ;;  %v6863_v18 = vadd.f32 %v12834_v31, %v16130_v62  ;;  %v6854_v60 = vpop.f32.mrb[167].mxu1  ;;  %12959 = vmatprep.mubr.msk.bf16.mxu1 %vm556_vm3, %v16174_v25 }
 0x269   :  { %7106 = vst.msk [vmem:[#allocation2 + $0x180] sm:$0xff] %vm556_vm3, %v7090_v3  ;;  %v6966_v48 = vmax.f32 %v6852_v43, 0.0  ;;  %v6855_v5 = vadd.f32 %v16130_v62, %v6854_v60  ;;  %12960 = vmatmul.mubr.msk.bf16.gmra.mrb[216].mxu1 %vm556_vm3, %v16182_v0  ;;  %v11515_v60 = vunpack.c.l.bf16 %v11672_v41 }
 0x26a   :  { %v7064_v1 = vmul.f32 %v11507_v52, %v6968_v20  ;;  %v6969_v39 = vmax.f32 %v6863_v18, 0.0 }
 0x26b   :  { %12520 = vmatmul.mubr.msk.bf16.gmra.mrb[104].mxu0 %vm556_vm3, %v15332_v24  ;;  %v7062_v37 = vmul.f32 %v11503_v38, %v6966_v48  ;;  %v6967_v3 = vmax.f32 %v6855_v5, 0.0  ;;  %v11671_v24 = vld [vmem:[%s17800_s3 + $0x1a0] sm:$0xff]  }
 0x26c   :  { %12523 = vmatprep.mubr.msk.bf16.mxu0 %vm556_vm3, %v15345_v23  ;;  %v7065_v43 = vmul.f32 %v11508_v17, %v6969_v39  ;;  %v11511_v48 = vunpack.c.l.bf16 %v11671_v24  ;;  %v16199_v17 = vld [vmem:[#allocation2 + $0x190] sm:$0xff] }
 0x26d   :  { %v7063_v31 = vmul.f32 %v11504_v55, %v6967_v3  ;;  %v12837_v52 = vpop.f32.mrb[168].mxu1  ;;  %17956 = vst [vmem:[#allocation62_spill] sm:$0xff] %v16199_v17  ;;  %v11516_v3 = vunpack.c.h.bf16 %v11672_v41  ;;  %v16223_v17 = vld [vmem:[#allocation2 + $0x1a8] sm:$0xff] }
 0x26e   :  { %v7093_v20 = vpack.c.bf16 %v7065_v43, %v7064_v1  ;;  %v6876_v18 = vadd.f32 %v12837_v52, %v16130_v62  ;;  %v6867_v13 = vpop.f32.mrb[169].mxu1  ;;  %17957 = vst [vmem:[#allocation63_spill] sm:$0xff] %v16223_v17 }
 0x26f   :  { %v7092_v23 = vpack.c.bf16 %v7063_v31, %v7062_v37  ;;  %v6868_v38 = vadd.f32 %v16130_v62, %v6867_v13  ;;  %v12838_v5 = vpop.f32.mrb[170].mxu1  ;;  %v11512_v31 = vunpack.c.h.bf16 %v11671_v24  ;;  %v16210_v13 = vld [vmem:[#allocation2 + $0x188] sm:$0xff]  ;;  %v11674_v24 = vld [vmem:[%s17800_s3 + $0x1b8] sm:$0xff]  }
 0x270   :  { %7109 = vst.msk [vmem:[#allocation2 + $0x198] sm:$0xff] %vm556_vm3, %v7093_v20  ;;  %v6972_v39 = vmax.f32 %v6876_v18, 0.0  ;;  %v6879_v55 = vadd.f32 %v12838_v5, %v16130_v62  ;;  %v6870_v1 = vpop.f32.mrb[171].mxu1  ;;  %v16202_v43 = vld [vmem:[#allocation2 + $0x180] sm:$0xff] }
 0x271   :  { %7108 = vst.msk [vmem:[#allocation2 + $0x190] sm:$0xff] %vm556_vm3, %v7092_v23  ;;  %v6970_v52 = vmax.f32 %v6868_v38, 0.0  ;;  %v6871_v37 = vadd.f32 %v16130_v62, %v6870_v1  ;;  %12963 = vmatprep.mubr.msk.bf16.mxu1 %vm556_vm3, %v16202_v43  ;;  %v11523_v1 = vunpack.c.l.bf16 %v11674_v24 }
 0x272   :  { %v7068_v20 = vmul.f32 %v11515_v60, %v6972_v39  ;;  %v6973_v18 = vmax.f32 %v6879_v55, 0.0  ;;  %12964 = vmatmul.mubr.msk.bf16.gmra.mrb[220].mxu1 %vm556_vm3, %v16210_v13 }
 0x273   :  { %12524 = vmatmul.mubr.msk.bf16.gmra.mrb[108].mxu0 %vm556_vm3, %v15388_v58  ;;  %v7066_v41 = vmul.f32 %v11511_v48, %v6970_v52  ;;  %v6971_v23 = vmax.f32 %v6871_v37, 0.0  ;;  %v11673_v58 = vld [vmem:[%s17800_s3 + $0x1b0] sm:$0xff]  }
 0x274   :  { %12527 = vmatprep.mubr.msk.bf16.mxu0 %vm556_vm3, %v15401_v11  ;;  %v7069_v38 = vmul.f32 %v11516_v3, %v6973_v18  ;;  %v11519_v52 = vunpack.c.l.bf16 %v11673_v58  ;;  %v16227_v3 = vld [vmem:[#allocation2 + $0x1a0] sm:$0xff] }
 0x275   :  { %v7067_v5 = vmul.f32 %v11512_v31, %v6971_v23  ;;  %v12841_v60 = vpop.f32.mrb[172].mxu1  ;;  %17958 = vst [vmem:[#allocation64_spill] sm:$0xff] %v16227_v3  ;;  %v11524_v23 = vunpack.c.h.bf16 %v11674_v24  ;;  %v16251_v3 = vld [vmem:[#allocation2 + $0x1b8] sm:$0xff] }
 0x276   :  { %v7095_v39 = vpack.c.bf16 %v7069_v38, %v7068_v20  ;;  %v6892_v55 = vadd.f32 %v12841_v60, %v16130_v62  ;;  %v6883_v47 = vpop.f32.mrb[173].mxu1  ;;  %17959 = vst [vmem:[#allocation65_spill] sm:$0xff] %v16251_v3 }
 0x277   :  { %v7094_v11 = vpack.c.bf16 %v7067_v5, %v7066_v41  ;;  %v6884_v48 = vadd.f32 %v16130_v62, %v6883_v47  ;;  %v12842_v37 = vpop.f32.mrb[174].mxu1  ;;  %v11520_v5 = vunpack.c.h.bf16 %v11673_v58  ;;  %v16238_v47 = vld [vmem:[#allocation2 + $0x198] sm:$0xff]  ;;  %v11676_v58 = vld [vmem:[%s17800_s3 + $0x1c8] sm:$0xff]  }
 0x278   :  { %7111 = vst.msk [vmem:[#allocation2 + $0x1a8] sm:$0xff] %vm556_vm3, %v7095_v39  ;;  %v6976_v18 = vmax.f32 %v6892_v55, 0.0  ;;  %v6895_v31 = vadd.f32 %v12842_v37, %v16130_v62  ;;  %v6886_v20 = vpop.f32.mrb[175].mxu1  ;;  %v16230_v38 = vld [vmem:[#allocation2 + $0x190] sm:$0xff] }
 0x279   :  { %7110 = vst.msk [vmem:[#allocation2 + $0x1a0] sm:$0xff] %vm556_vm3, %v7094_v11  ;;  %v6974_v60 = vmax.f32 %v6884_v48, 0.0  ;;  %v6887_v41 = vadd.f32 %v16130_v62, %v6886_v20  ;;  %12967 = vmatprep.mubr.msk.bf16.mxu1 %vm556_vm3, %v16230_v38  ;;  %v11531_v20 = vunpack.c.l.bf16 %v11676_v58 }
 0x27a   :  { %v7072_v39 = vmul.f32 %v11523_v1, %v6976_v18  ;;  %v6977_v55 = vmax.f32 %v6895_v31, 0.0  ;;  %12968 = vmatmul.mubr.msk.bf16.gmra.mrb[224].mxu1 %vm556_vm3, %v16238_v47 }
 0x27b   :  { %12528 = vmatmul.mubr.msk.bf16.gmra.mrb[112].mxu0 %vm556_vm3, %v15435_v63  ;;  %v7070_v24 = vmul.f32 %v11519_v52, %v6974_v60  ;;  %v6975_v11 = vmax.f32 %v6887_v41, 0.0  ;;  %v11675_v63 = vld [vmem:[%s17800_s3 + $0x1c0] sm:$0xff]  }
 0x27c   :  { %12531 = vmatprep.mubr.msk.bf16.mxu0 %vm556_vm3, %v15445_v57  ;;  %v7073_v48 = vmul.f32 %v11524_v23, %v6977_v55  ;;  %v11527_v60 = vunpack.c.l.bf16 %v11675_v63  ;;  %v16255_v23 = vld [vmem:[#allocation2 + $0x1b0] sm:$0xff] }
 0x27d   :  { %v7071_v37 = vmul.f32 %v11520_v5, %v6975_v11  ;;  %v12845_v1 = vpop.f32.mrb[176].mxu1  ;;  %17960 = vst [vmem:[#allocation66_spill] sm:$0xff] %v16255_v23  ;;  %v11532_v11 = vunpack.c.h.bf16 %v11676_v58  ;;  %v16279_v23 = vld [vmem:[#allocation2 + $0x1c8] sm:$0xff] }
 0x27e   :  { %v7097_v18 = vpack.c.bf16 %v7073_v48, %v7072_v39  ;;  %v6908_v31 = vadd.f32 %v12845_v1, %v16130_v62  ;;  %v6899_v17 = vpop.f32.mrb[177].mxu1  ;;  %17961 = vst [vmem:[#allocation67_spill] sm:$0xff] %v16279_v23 }
 0x27f   :  { %v7096_v57 = vpack.c.bf16 %v7071_v37, %v7070_v24  ;;  %v6900_v52 = vadd.f32 %v16130_v62, %v6899_v17  ;;  %v12846_v41 = vpop.f32.mrb[178].mxu1  ;;  %v11528_v37 = vunpack.c.h.bf16 %v11675_v63  ;;  %v16266_v17 = vld [vmem:[#allocation2 + $0x1a8] sm:$0xff]  ;;  %v11678_v63 = vld [vmem:[%s17800_s3 + $0x1d8] sm:$0xff]  }
 0x280   :  { %7113 = vst.msk [vmem:[#allocation2 + $0x1b8] sm:$0xff] %vm556_vm3, %v7097_v18  ;;  %v6980_v55 = vmax.f32 %v6908_v31, 0.0  ;;  %v6911_v5 = vadd.f32 %v12846_v41, %v16130_v62  ;;  %v6902_v39 = vpop.f32.mrb[179].mxu1  ;;  %v16258_v48 = vld [vmem:[#allocation2 + $0x1a0] sm:$0xff] }
 0x281   :  { %7112 = vst.msk [vmem:[#allocation2 + $0x1b0] sm:$0xff] %vm556_vm3, %v7096_v57  ;;  %v6978_v1 = vmax.f32 %v6900_v52, 0.0  ;;  %v6903_v24 = vadd.f32 %v16130_v62, %v6902_v39  ;;  %12971 = vmatprep.mubr.msk.bf16.mxu1 %vm556_vm3, %v16258_v48  ;;  %v11539_v39 = vunpack.c.l.bf16 %v11678_v63 }
 0x282   :  { %v7076_v18 = vmul.f32 %v11531_v20, %v6980_v55  ;;  %v6981_v31 = vmax.f32 %v6911_v5, 0.0  ;;  %12972 = vmatmul.mubr.msk.bf16.gmra.mrb[228].mxu1 %vm556_vm3, %v16266_v17 }
 0x283   :  { %12532 = vmatmul.mubr.msk.bf16.gmra.mrb[116].mxu0 %vm556_vm3, %v15464_v35  ;;  %v7074_v58 = vmul.f32 %v11527_v60, %v6978_v1  ;;  %v6979_v57 = vmax.f32 %v6903_v24, 0.0  ;;  %v11677_v35 = vld [vmem:[%s17800_s3 + $0x1d0] sm:$0xff]  }
 0x284   :  { %12535 = vmatprep.mubr.msk.bf16.mxu0 %vm556_vm3, %v15470_v51  ;;  %v7077_v52 = vmul.f32 %v11532_v11, %v6981_v31  ;;  %v11535_v1 = vunpack.c.l.bf16 %v11677_v35  ;;  %v16283_v11 = vld [vmem:[#allocation2 + $0x1c0] sm:$0xff] }
 0x285   :  { %v7075_v41 = vmul.f32 %v11528_v37, %v6979_v57  ;;  %v12849_v20 = vpop.f32.mrb[180].mxu1  ;;  %17962 = vst [vmem:[#allocation68_spill] sm:$0xff] %v16283_v11  ;;  %v11540_v57 = vunpack.c.h.bf16 %v11678_v63 }
 0x286   :  { %v7099_v55 = vpack.c.bf16 %v7077_v52, %v7076_v18  ;;  %v6924_v5 = vadd.f32 %v12849_v20, %v16130_v62  ;;  %v6915_v3 = vpop.f32.mrb[181].mxu1  ;;  %v11536_v20 = vunpack.c.h.bf16 %v11677_v35 }
 0x287   :  { %v7098_v51 = vpack.c.bf16 %v7075_v41, %v7074_v58  ;;  %v6916_v60 = vadd.f32 %v16130_v62, %v6915_v3  ;;  %v12850_v24 = vpop.f32.mrb[182].mxu1  ;;  %v16293_v3 = vld [vmem:[#allocation2 + $0x1b8] sm:$0xff] }
 0x288   :  { %7115 = vst.msk [vmem:[#allocation2 + $0x1c8] sm:$0xff] %vm556_vm3, %v7099_v55  ;;  %v16285_v31 = vld [vmem:[#allocation2 + $0x1b0] sm:$0xff]  ;;  %v6984_v37 = vmax.f32 %v6924_v5, 0.0  ;;  %v6927_v18 = vadd.f32 %v12850_v24, %v16130_v62  ;;  %v6918_v52 = vpop.f32.mrb[183].mxu1 }
 0x289   :  { %7114 = vst.msk [vmem:[#allocation2 + $0x1c0] sm:$0xff] %vm556_vm3, %v7098_v51  ;;  %12975 = vmatprep.mubr.msk.bf16.mxu1 %vm556_vm3, %v16285_v31  ;;  %v6982_v58 = vmax.f32 %v6916_v60, 0.0  ;;  %v6919_v41 = vadd.f32 %v16130_v62, %v6918_v52  ;;  %v16302_v52 = vld [vmem:[#allocation2 + $0x1d0] sm:$0xff] }
 0x28a   :  { %12976 = vmatmul.mubr.msk.bf16.gmra.mrb[232].mxu1 %vm556_vm3, %v16293_v3  ;;  %v7080_v63 = vmul.f32 %v11539_v39, %v6984_v37  ;;  %v6985_v55 = vmax.f32 %v6927_v18, 0.0  ;;  %v13875_v18 = vld [vmem:[%s17801_s4 + $0x80] sm:$0xff]  }
 0x28b   :  { %12536 = vmatmul.mubr.msk.bf16.gmra.mrb[120].mxu0 %vm556_vm3, %v15495_v9  ;;  %v7078_v5 = vmul.f32 %v11535_v1, %v6982_v58  ;;  %v6983_v51 = vmax.f32 %v6919_v41, 0.0  ;;  %v17965_v58 = vld [vmem:[#allocation21_spill] sm:$0xff] }
 0x28c   :  { %12539 = vmatprep.mubr.msk.bf16.mxu0 %vm556_vm3, %v15501_v54  ;;  %v7081_v24 = vmul.f32 %v11540_v57, %v6985_v55  ;;  %v16367_v57 = vld [vmem:[#allocation2 + $0x40] sm:$0xff]  ;;  %v16373_v41 = vld [vmem:[#allocation2 + $0x48] sm:$0xff]  ;;  %v16385_v55 = vld [vmem:[#allocation2 + $0x58] sm:$0xff] }
 0x28d   :  { %v7079_v23 = vmul.f32 %v11536_v20, %v6983_v51  ;;  %v12853_v11 = vpop.f32.mrb[184].mxu1  ;;  %v16379_v20 = vld [vmem:[#allocation2 + $0x50] sm:$0xff]  ;;  %v16391_v51 = vld [vmem:[#allocation2 + $0x60] sm:$0xff] }
 0x28e   :  { %v7101_v9 = vpack.c.bf16 %v7081_v24, %v7080_v63  ;;  %v6931_v50 = vpop.f32.mrb[185].mxu1  ;;  %v13871_v11 = vld [vmem:[%s17801_s4 + $0x68] sm:$0xff]  }
 0x28f   :  { %v7100_v6 = vpack.c.bf16 %v7079_v23, %v7078_v5  ;;  %v12854_v60 = vpop.f32.mrb[186].mxu1  ;;  %v7191_v54 = vld [vmem:[#allocation2 + $0x1c8] sm:$0xff]  ;;  %v7122_v50 = vld [vmem:[#allocation2] sm:$0xff]  ;;  %v17968_v5 = vld [vmem:[#allocation23_spill] sm:$0xff] }
 0x290   :  { %v7190_v62 = vld [vmem:[#allocation2 + $0x1c0] sm:$0xff]  ;;  %v6934_v35 = vpop.f32.mrb[187].mxu1  ;;  %7117 = vst.msk [vmem:[#allocation2 + $0x1d8] sm:$0xff] %vm556_vm3, %v7101_v9  ;;  %v16397_v24 = vld [vmem:[#allocation2 + $0x68] sm:$0xff]  ;;  %v17969_v9 = vld [vmem:[#allocation27_spill] sm:$0xff] }
 0x291   :  { %12979 = vmatprep.mubr.msk.bf16.mxu1 %vm556_vm3, %v7190_v62  ;;  %7116 = vst.msk [vmem:[#allocation2 + $0x1d0] sm:$0xff] %vm556_vm3, %v7100_v6  ;;  %v13873_v6 = vld [vmem:[%s17801_s4 + $0x70] sm:$0xff]   ;;  %v17967_v63 = vld [vmem:[#allocation25_spill] sm:$0xff]  ;;  %v16409_v35 = vld [vmem:[#allocation2 + $0x78] sm:$0xff] }
 0x292   :  { %12980 = vmatmul.mubr.msk.bf16.gmra.mrb[236].mxu1 %vm556_vm3, %v7191_v54  ;;  %v16403_v60 = vld [vmem:[#allocation2 + $0x70] sm:$0xff]  ;;  %v16415_v54 = vld [vmem:[#allocation2 + $0x80] sm:$0xff] }
 0x293   :  { %12540 = vmatmul.mubr.msk.bf16.gmra.mrb[124].mxu0 %vm556_vm3, %v15535_v44  ;;  %12995 = vmatprep.mubr.msk.bf16.mxu1 %vm556_vm3, %v7122_v50  ;;  %v7123_v44 = vld [vmem:[#allocation2 + $0x8] sm:$0xff]  ;;  %v17970_v62 = vld [vmem:[#allocation31_spill] sm:$0xff] }
 0x294   :  { %12543 = vmatprep.mubr.msk.bf16.mxu0 %vm556_vm3, %v15527_v19  ;;  %v16321_v19 = vld [vmem:[#allocation2 + $0x10] sm:$0xff]  ;;  %v13876_v50 = vld [vmem:[%s17801_s4 + $0x88] sm:$0xff]  }
 0x295   :  { %v12857_v23 = vpop.f32.mrb[188].mxu1 }
 0x296   :  { %v6947_v39 = vpop.f32.mrb[189].mxu1  ;;  %v17972_v23 = vld [vmem:[#allocation35_spill] sm:$0xff] }
 0x297   :  { %v12858_v1 = vpop.f32.mrb[190].mxu1  ;;  %v16424_v39 = vld [vmem:[#allocation2 + $0x88] sm:$0xff] }
 0x298   :  { %v6950_v37 = vpop.f32.mrb[191].mxu1  ;;  %v17973_v1 = vld [vmem:[#allocation36_spill] sm:$0xff] }
 0x299   :  { %v17974_v37 = vld [vmem:[#allocation39_spill] sm:$0xff] }
 0x29a   :  { %12996 = vmatmul.mubr.msk.bf16.vlgmr.msra.gmra.mrb[240].mxu1 %vm556_vm3, %v7123_v44  ;;  %v16436_v44 = vld [vmem:[#allocation2 + $0x98] sm:$0xff] }
 0x29b   :  { %12544 = vmatmul.mubr.msk.bf16.gmra.mrb[128].mxu0 %vm556_vm3, %v15571_v42  ;;  %12999 = vmatprep.mubr.msk.bf16.mxu1 %vm556_vm3, %v16321_v19  ;;  %v13874_v42 = vld [vmem:[%s17801_s4 + $0x78] sm:$0xff]  }
 0x29c   :  { %12547 = vmatprep.mubr.msk.bf16.mxu0 %vm556_vm3, %v15564_v32  ;;  %13108 = vmatpush3.bf16.msra.mxu1 %v16074_v26  ;;  %v16334_v32 = vld [vmem:[#allocation2 + $0x18] sm:$0xff]  ;;  %v16340_v26 = vld [vmem:[#allocation2 + $0x20] sm:$0xff] }
 0x29d   :  { %13109 = vmatprep.subr.bf16.mxu1 %v13871_v11  ;;  %17963 = vst [vmem:[#allocation69_spill] sm:$0xff] %v16334_v32 }
 0x2a0   :  { %13110 = vmatpush3.bf16.msra.mxu1 %v13871_v11  ;;  %v16430_v11 = vld [vmem:[#allocation2 + $0x90] sm:$0xff] }
 0x2a1   :  { %13111 = vmatprep.subr.bf16.mxu1 %v13873_v6 }
 0x2a2   :  { %13000 = vmatmul.mubr.msk.bf16.gmra.mrb[244].mxu1 %vm556_vm3, %v16334_v32  ;;  %v16524_v32 = vld [vmem:[#allocation2 + $0xf8] sm:$0xff] }
 0x2a3   :  { %12548 = vmatmul.mubr.msk.bf16.gmra.mrb[132].mxu0 %vm556_vm3, %v15606_v29  ;;  %13003 = vmatprep.mubr.msk.bf16.mxu1 %vm556_vm3, %v16340_v26  ;;  %v16346_v29 = vld [vmem:[#allocation2 + $0x28] sm:$0xff]  ;;  %17990 = vst [vmem:[#allocation25_spill] sm:$0xff] %v16524_v32 }
 0x2a4   :  { %12551 = vmatprep.mubr.msk.bf16.mxu0 %vm556_vm3, %v15597_v53  ;;  %13112 = vmatpush3.bf16.msra.mxu1 %v13873_v6  ;;  %v16352_v53 = vld [vmem:[#allocation2 + $0x30] sm:$0xff]  ;;  %v17975_v6 = vld [vmem:[#allocation40_spill] sm:$0xff] }
 0x2a5   :  { %13113 = vmatprep.subr.bf16.mxu1 %v13874_v42 }
 0x2a8   :  { %13114 = vmatpush3.bf16.msra.mxu1 %v13874_v42  ;;  %v16442_v42 = vld [vmem:[#allocation2 + $0xa0] sm:$0xff] }
 0x2a9   :  { %13115 = vmatprep.subr.bf16.mxu1 %v13875_v18 }
 0x2aa   :  { %13004 = vmatmul.mubr.msk.bf16.gmra.mrb[248].mxu1 %vm556_vm3, %v16346_v29 }
 0x2ab   :  { %12552 = vmatmul.mubr.msk.bf16.gmra.mrb[136].mxu0 %vm556_vm3, %v15635_v56  ;;  %13007 = vmatprep.mubr.msk.bf16.mxu1 %vm556_vm3, %v16352_v53  ;;  %v16361_v56 = vld [vmem:[#allocation2 + $0x38] sm:$0xff] }
 0x2ac   :  { %12555 = vmatprep.mubr.msk.bf16.mxu0 %vm556_vm3, %v15629_v46  ;;  %13116 = vmatpush3.bf16.msra.mxu1 %v13875_v18  ;;  %v17964_v46 = vld [vmem:[#allocation16_spill] sm:$0xff]  ;;  %v17976_v18 = vld [vmem:[#allocation43_spill] sm:$0xff] }
 0x2ad   :  { %13117 = vmatprep.subr.bf16.mxu1 %v13876_v50 }
 0x2b0   :  { %13118 = vmatpush3.bf16.msra.mxu1 %v13876_v50  ;;  %v17980_v50 = vld [vmem:[#allocation11_spill] sm:$0xff] }
 0x2b2   :  { %13008 = vmatmul.mubr.msk.bf16.gmra.mrb[252].mxu1 %vm556_vm3, %v16361_v56 }
 0x2b3   :  { %12556 = vmatmul.mubr.msk.bf16.gmra.mrb[140].mxu0 %vm556_vm3, %v15666_v21  ;;  %13011 = vmatprep.mubr.msk.bf16.mxu1 %vm556_vm3, %v16367_v57  ;;  %v17966_v21 = vld [vmem:[#allocation19_spill] sm:$0xff] }
 0x2b4   :  { %12559 = vmatprep.mubr.msk.bf16.mxu0 %vm556_vm3, %v17964_v46  ;;  %v16448_v46 = vld [vmem:[#allocation2 + $0xa8] sm:$0xff] }
 0x2ba   :  { %13012 = vmatmul.mubr.msk.bf16.gmra.mrb[0].mxu1 %vm556_vm3, %v16373_v41 }
 0x2bb   :  { %12560 = vmatmul.mubr.msk.bf16.gmra.mrb[144].mxu0 %vm556_vm3, %v17965_v58  ;;  %13015 = vmatprep.mubr.msk.bf16.mxu1 %vm556_vm3, %v16379_v20  ;;  %v17977_v58 = vld [vmem:[#allocation44_spill] sm:$0xff] }
 0x2bc   :  { %12563 = vmatprep.mubr.msk.bf16.mxu0 %vm556_vm3, %v17966_v21  ;;  %v16454_v21 = vld [vmem:[#allocation2 + $0xb0] sm:$0xff] }
 0x2c2   :  { %13016 = vmatmul.mubr.msk.bf16.gmra.mrb[4].mxu1 %vm556_vm3, %v16385_v55 }
 0x2c3   :  { %12564 = vmatmul.mubr.msk.bf16.gmra.mrb[148].mxu0 %vm556_vm3, %v17967_v63  ;;  %13019 = vmatprep.mubr.msk.bf16.mxu1 %vm556_vm3, %v16391_v51 }
 0x2c4   :  { %12567 = vmatprep.mubr.msk.bf16.mxu0 %vm556_vm3, %v17968_v5  ;;  %v17978_v5 = vld [vmem:[#allocation47_spill] sm:$0xff] }
 0x2ca   :  { %13020 = vmatmul.mubr.msk.bf16.gmra.mrb[8].mxu1 %vm556_vm3, %v16397_v24 }
 0x2cb   :  { %12568 = vmatmul.mubr.msk.bf16.gmra.mrb[152].mxu0 %vm556_vm3, %v15740_v15  ;;  %13023 = vmatprep.mubr.msk.bf16.mxu1 %vm556_vm3, %v16403_v60  ;;  %v17971_v15 = vld [vmem:[#allocation32_spill] sm:$0xff] }
 0x2cc   :  { %12571 = vmatprep.mubr.msk.bf16.mxu0 %vm556_vm3, %v17969_v9  ;;  %v16460_v9 = vld [vmem:[#allocation2 + $0xb8] sm:$0xff] }
 0x2d2   :  { %13024 = vmatmul.mubr.msk.bf16.gmra.mrb[12].mxu1 %vm556_vm3, %v16409_v35 }
 0x2d3   :  { %12572 = vmatmul.mubr.msk.bf16.gmra.mrb[156].mxu0 %vm556_vm3, %v17970_v62  ;;  %13027 = vmatprep.mubr.msk.bf16.mxu1 %vm556_vm3, %v16415_v54  ;;  %v17979_v62 = vld [vmem:[#allocation12_spill] sm:$0xff] }
 0x2d4   :  { %12575 = vmatprep.mubr.msk.bf16.mxu0 %vm556_vm3, %v17971_v15  ;;  %v16466_v15 = vld [vmem:[#allocation2 + $0xc0] sm:$0xff] }
 0x2da   :  { %13028 = vmatmul.mubr.msk.bf16.gmra.mrb[16].mxu1 %vm556_vm3, %v16424_v39 }
 0x2db   :  { %12576 = vmatmul.mubr.msk.bf16.gmra.mrb[160].mxu0 %vm556_vm3, %v17972_v23  ;;  %13031 = vmatprep.mubr.msk.bf16.mxu1 %vm556_vm3, %v16430_v11  ;;  %v16472_v23 = vld [vmem:[#allocation2 + $0xc8] sm:$0xff] }
 0x2dc   :  { %12579 = vmatprep.mubr.msk.bf16.mxu0 %vm556_vm3, %v17973_v1  ;;  %v16477_v1 = vld [vmem:[#allocation2 + $0xd0] sm:$0xff] }
 0x2e2   :  { %13032 = vmatmul.mubr.msk.bf16.gmra.mrb[20].mxu1 %vm556_vm3, %v16436_v44 }
 0x2e3   :  { %12580 = vmatmul.mubr.msk.bf16.gmra.mrb[164].mxu0 %vm556_vm3, %v17974_v37  ;;  %13035 = vmatprep.mubr.msk.bf16.mxu1 %vm556_vm3, %v16442_v42  ;;  %v17981_v37 = vld [vmem:[#allocation14_spill] sm:$0xff] }
 0x2e4   :  { %12583 = vmatprep.mubr.msk.bf16.mxu0 %vm556_vm3, %v17975_v6  ;;  %v13880_v6 = vld [vmem:[%s17801_s4 + $0x38] sm:$0xff]  }
 0x2ea   :  { %13036 = vmatmul.mubr.msk.bf16.gmra.mrb[24].mxu1 %vm556_vm3, %v16448_v46 }
 0x2eb   :  { %12584 = vmatmul.mubr.msk.bf16.gmra.mrb[168].mxu0 %vm556_vm3, %v17976_v18  ;;  %13039 = vmatprep.mubr.msk.bf16.mxu1 %vm556_vm3, %v16454_v21  ;;  %v17982_v18 = vld [vmem:[#allocation13_spill] sm:$0xff] }
 0x2ec   :  { %12587 = vmatprep.mubr.msk.bf16.mxu0 %vm556_vm3, %v17977_v58  ;;  %v16491_v58 = vld [vmem:[#allocation2 + $0xd8] sm:$0xff] }
 0x2f2   :  { %13040 = vmatmul.mubr.msk.bf16.gmra.mrb[28].mxu1 %vm556_vm3, %v16460_v9 }
 0x2f3   :  { %12588 = vmatmul.mubr.msk.bf16.gmra.mrb[172].mxu0 %vm556_vm3, %v17978_v5  ;;  %13043 = vmatprep.mubr.msk.bf16.mxu1 %vm556_vm3, %v16466_v15  ;;  %v17983_v5 = vld [vmem:[#allocation17_spill] sm:$0xff] }
 0x2f4   :  { %12603 = vmatprep.mubr.msk.bf16.mxu0 %vm556_vm3, %v17979_v62  ;;  %v16497_v62 = vld [vmem:[#allocation2 + $0xe0] sm:$0xff] }
 0x2f5   :  { %17984 = vst [vmem:[#allocation16_spill] sm:$0xff] %v16497_v62 }
 0x2fa   :  { %13044 = vmatmul.mubr.msk.bf16.gmra.mrb[32].mxu1 %vm556_vm3, %v16472_v23 }
 0x2fb   :  { %12604 = vmatmul.mubr.msk.bf16.vlgmr.msra.gmra.mrb[64].mxu0 %vm556_vm3, %v17980_v50  ;;  %13047 = vmatprep.mubr.msk.bf16.mxu1 %vm556_vm3, %v16477_v1  ;;  %v13882_v50 = vld [vmem:[%s17801_s4 + $0x48] sm:$0xff]  }
 0x2fc   :  { %12860 = vmatpush3.bf16.msra.mxu0 %v16111_v28  ;;  %12607 = vmatprep.mubr.msk.bf16.mxu0 %vm556_vm3, %v17981_v37  ;;  %v13881_v28 = vld [vmem:[%s17801_s4 + $0x40] sm:$0xff]   ;;  %v13883_v37 = vld [vmem:[%s17801_s4 + $0x50] sm:$0xff]  }
 0x2fd   :  { %12861 = vmatprep.subr.bf16.mxu0 %v13880_v6 }
 0x300   :  { %12862 = vmatpush3.bf16.msra.mxu0 %v13880_v6  ;;  %v17985_v6 = vld [vmem:[#allocation15_spill] sm:$0xff] }
 0x301   :  { %12863 = vmatprep.subr.bf16.mxu0 %v13881_v28 }
 0x302   :  { %13048 = vmatmul.mubr.msk.bf16.gmra.mrb[36].mxu1 %vm556_vm3, %v16491_v58 }
 0x303   :  { %12608 = vmatmul.mubr.msk.bf16.gmra.mrb[68].mxu0 %vm556_vm3, %v17982_v18  ;;  %13051 = vmatprep.mubr.msk.bf16.mxu1 %vm556_vm3, %v16497_v62  ;;  %v16509_v18 = vld [vmem:[#allocation2 + $0xe8] sm:$0xff] }
 0x304   :  { %12611 = vmatprep.mubr.msk.bf16.mxu0 %vm556_vm3, %v17983_v5  ;;  %12864 = vmatpush3.bf16.msra.mxu0 %v13881_v28  ;;  %17986 = vst [vmem:[#allocation21_spill] sm:$0xff] %v16509_v18  ;;  %v17987_v28 = vld [vmem:[#allocation20_spill] sm:$0xff]  ;;  %v16515_v5 = vld [vmem:[#allocation2 + $0xf0] sm:$0xff]  ;;  %v17998_v62 = vld [vmem:[#allocation29_spill] sm:$0xff] }
 0x305   :  { %12865 = vmatprep.subr.bf16.mxu0 %v13882_v50  ;;  %17988 = vst [vmem:[#allocation19_spill] sm:$0xff] %v16515_v5 }
 0x308   :  { %12866 = vmatpush3.bf16.msra.mxu0 %v13882_v50  ;;  %v13884_v50 = vld [vmem:[%s17801_s4 + $0x58] sm:$0xff]  }
 0x309   :  { %12867 = vmatprep.subr.bf16.mxu0 %v13883_v37 }
 0x30a   :  { %13052 = vmatmul.mubr.msk.bf16.gmra.mrb[40].mxu1 %vm556_vm3, %v16509_v18  ;;  %v16530_v18 = vld [vmem:[#allocation2 + $0x100] sm:$0xff] }
 0x30b   :  { %12612 = vmatmul.mubr.msk.bf16.gmra.mrb[72].mxu0 %vm556_vm3, %v17985_v6  ;;  %13055 = vmatprep.mubr.msk.bf16.mxu1 %vm556_vm3, %v16515_v5  ;;  %v17989_v6 = vld [vmem:[#allocation18_spill] sm:$0xff]  ;;  %17992 = vst [vmem:[#allocation23_spill] sm:$0xff] %v16530_v18  ;;  %v13886_v5 = vld [vmem:[#allocation2 + $0x118] sm:$0xff] }
 0x30c   :  { %12615 = vmatprep.mubr.msk.bf16.mxu0 %vm556_vm3, %v17987_v28  ;;  %12868 = vmatpush3.bf16.msra.mxu0 %v13883_v37  ;;  %v17991_v28 = vld [vmem:[#allocation24_spill] sm:$0xff]  ;;  %v17993_v37 = vld [vmem:[#allocation22_spill] sm:$0xff] }
 0x30d   :  { %12869 = vmatprep.subr.bf16.mxu0 %v13884_v50 }
 0x310   :  { %12870 = vmatpush3.bf16.msra.mxu0 %v13884_v50  ;;  %v16536_v50 = vld [vmem:[#allocation2 + $0x108] sm:$0xff] }
 0x311   :  { %17994 = vst [vmem:[#allocation27_spill] sm:$0xff] %v16536_v50 }
 0x312   :  { %13056 = vmatmul.mubr.msk.bf16.gmra.mrb[44].mxu1 %vm556_vm3, %v16524_v32  ;;  %v13885_v32 = vld [vmem:[#allocation2 + $0x110] sm:$0xff] }
 0x313   :  { %12616 = vmatmul.mubr.msk.bf16.gmra.mrb[76].mxu0 %vm556_vm3, %v17989_v6  ;;  %13059 = vmatprep.mubr.msk.bf16.mxu1 %vm556_vm3, %v16530_v18  ;;  %v17995_v6 = vld [vmem:[#allocation28_spill] sm:$0xff]  ;;  %v17997_v18 = vld [vmem:[#allocation30_spill] sm:$0xff] }
 0x314   :  { %12619 = vmatprep.mubr.msk.bf16.mxu0 %vm556_vm3, %v17991_v28  ;;  %v17996_v28 = vld [vmem:[#allocation26_spill] sm:$0xff] }
 0x31a   :  { %13060 = vmatmul.mubr.msk.bf16.gmra.mrb[192].mxu1 %vm556_vm3, %v16536_v50  ;;  %v13888_v50 = vld [vmem:[#allocation2 + $0x128] sm:$0xff] }
 0x31b   :  { %12620 = vmatmul.mubr.msk.bf16.gmra.mrb[80].mxu0 %vm556_vm3, %v17993_v37  ;;  %13063 = vmatprep.mubr.msk.bf16.mxu1 %vm556_vm3, %v13885_v32  ;;  %v13887_v37 = vld [vmem:[#allocation2 + $0x120] sm:$0xff] }
 0x31c   :  { %12623 = vmatprep.mubr.msk.bf16.mxu0 %vm556_vm3, %v17995_v6  ;;  %v17999_v6 = vld [vmem:[#allocation34_spill] sm:$0xff]  ;;  %v18000_v32 = vld [vmem:[#allocation33_spill] sm:$0xff] }
 0x322   :  { %13064 = vmatmul.mubr.msk.bf16.gmra.mrb[196].mxu1 %vm556_vm3, %v13886_v5  ;;  %v18003_v5 = vld [vmem:[#allocation42_spill] sm:$0xff] }
 0x323   :  { %12624 = vmatmul.mubr.msk.bf16.gmra.mrb[84].mxu0 %vm556_vm3, %v17996_v28  ;;  %13067 = vmatprep.mubr.msk.bf16.mxu1 %vm556_vm3, %v13887_v37 }
 0x324   :  { %12627 = vmatprep.mubr.msk.bf16.mxu0 %vm556_vm3, %v17997_v18  ;;  %v18001_v18 = vld [vmem:[#allocation38_spill] sm:$0xff] }
 0x32a   :  { %13068 = vmatmul.mubr.msk.bf16.gmra.mrb[200].mxu1 %vm556_vm3, %v13888_v50 }
 0x32b   :  { %12628 = vmatmul.mubr.msk.bf16.gmra.mrb[88].mxu0 %vm556_vm3, %v17998_v62  ;;  %13071 = vmatprep.mubr.msk.bf16.mxu1 %vm556_vm3, %v16048_v12  ;;  %v18002_v62 = vld [vmem:[#allocation37_spill] sm:$0xff] }
 0x32c   :  { %12631 = vmatprep.mubr.msk.bf16.mxu0 %vm556_vm3, %v17999_v6  ;;  %v18004_v12 = vld [vmem:[#allocation41_spill] sm:$0xff] }
 0x332   :  { %13072 = vmatmul.mubr.msk.bf16.gmra.mrb[204].mxu1 %vm556_vm3, %v16059_v2  ;;  %v18005_v2 = vld [vmem:[#allocation46_spill] sm:$0xff] }
 0x333   :  { %12632 = vmatmul.mubr.msk.bf16.gmra.mrb[92].mxu0 %vm556_vm3, %v18000_v32  ;;  %13075 = vmatprep.mubr.msk.bf16.mxu1 %vm556_vm3, %v16082_v16  ;;  %v18006_v16 = vld [vmem:[#allocation45_spill] sm:$0xff] }
 0x334   :  { %12635 = vmatprep.mubr.msk.bf16.mxu0 %vm556_vm3, %v18001_v18  ;;  %v18028_v18 = vld [vmem:[#allocation16_spill] sm:$0xff] }
 0x33a   :  { %13076 = vmatmul.mubr.msk.bf16.gmra.mrb[208].mxu1 %vm556_vm3, %v16091_v7  ;;  %v18007_v7 = vld [vmem:[#allocation48_spill] sm:$0xff] }
 0x33b   :  { %12636 = vmatmul.mubr.msk.bf16.gmra.mrb[96].mxu0 %vm556_vm3, %v18002_v62  ;;  %13079 = vmatprep.mubr.msk.bf16.mxu1 %vm556_vm3, %v16117_v8  ;;  %v18008_v8 = vld [vmem:[#allocation49_spill] sm:$0xff] }
 0x33c   :  { %12639 = vmatprep.mubr.msk.bf16.mxu0 %vm556_vm3, %v18003_v5 }
 0x342   :  { %13080 = vmatmul.mubr.msk.bf16.gmra.mrb[212].mxu1 %vm556_vm3, %v16124_v34  ;;  %v18019_v34 = vld [vmem:[#allocation59_spill] sm:$0xff] }
 0x343   :  { %12640 = vmatmul.mubr.msk.bf16.gmra.mrb[100].mxu0 %vm556_vm3, %v18004_v12  ;;  %13083 = vmatprep.mubr.msk.bf16.mxu1 %vm556_vm3, %v16146_v10  ;;  %v18020_v10 = vld [vmem:[#allocation62_spill] sm:$0xff] }
 0x344   :  { %12643 = vmatprep.mubr.msk.bf16.mxu0 %vm556_vm3, %v18005_v2 }
 0x34a   :  { %13084 = vmatmul.mubr.msk.bf16.gmra.mrb[216].mxu1 %vm556_vm3, %v16154_v36  ;;  %v18021_v36 = vld [vmem:[#allocation61_spill] sm:$0xff] }
 0x34b   :  { %12644 = vmatmul.mubr.msk.bf16.gmra.mrb[104].mxu0 %vm556_vm3, %v18006_v16  ;;  %13087 = vmatprep.mubr.msk.bf16.mxu1 %vm556_vm3, %v16174_v25  ;;  %v18022_v25 = vld [vmem:[#allocation64_spill] sm:$0xff] }
 0x34c   :  { %12647 = vmatprep.mubr.msk.bf16.mxu0 %vm556_vm3, %v15876_v45  ;;  %v18009_v45 = vld [vmem:[#allocation51_spill] sm:$0xff] }
 0x352   :  { %13088 = vmatmul.mubr.msk.bf16.gmra.mrb[220].mxu1 %vm556_vm3, %v16182_v0  ;;  %v18023_v0 = vld [vmem:[#allocation63_spill] sm:$0xff] }
 0x353   :  { %12648 = vmatmul.mubr.msk.bf16.gmra.mrb[108].mxu0 %vm556_vm3, %v18007_v7  ;;  %13091 = vmatprep.mubr.msk.bf16.mxu1 %vm556_vm3, %v16202_v43  ;;  %v18024_v43 = vld [vmem:[#allocation66_spill] sm:$0xff] }
 0x354   :  { %12651 = vmatprep.mubr.msk.bf16.mxu0 %vm556_vm3, %v15898_v30  ;;  %v18010_v30 = vld [vmem:[#allocation50_spill] sm:$0xff] }
 0x35a   :  { %13092 = vmatmul.mubr.msk.bf16.gmra.mrb[224].mxu1 %vm556_vm3, %v16210_v13  ;;  %v18025_v13 = vld [vmem:[#allocation65_spill] sm:$0xff] }
 0x35b   :  { %12652 = vmatmul.mubr.msk.bf16.gmra.mrb[112].mxu0 %vm556_vm3, %v18008_v8  ;;  %13095 = vmatprep.mubr.msk.bf16.mxu1 %vm556_vm3, %v16230_v38  ;;  %v18026_v38 = vld [vmem:[#allocation68_spill] sm:$0xff] }
 0x35c   :  { %12655 = vmatprep.mubr.msk.bf16.mxu0 %vm556_vm3, %v15925_v49  ;;  %v18012_v49 = vld [vmem:[#allocation52_spill] sm:$0xff] }
 0x362   :  { %13096 = vmatmul.mubr.msk.bf16.gmra.mrb[228].mxu1 %vm556_vm3, %v16238_v47  ;;  %v18027_v47 = vld [vmem:[#allocation67_spill] sm:$0xff] }
 0x363   :  { %12656 = vmatmul.mubr.msk.bf16.gmra.mrb[116].mxu0 %vm556_vm3, %v15918_v14  ;;  %13099 = vmatprep.mubr.msk.bf16.mxu1 %vm556_vm3, %v16258_v48  ;;  %v18011_v14 = vld [vmem:[#allocation53_spill] sm:$0xff]  ;;  %v16714_v48 = vld [vmem:[#allocation8] ss:$0 sm:$0xff] }
 0x364   :  { %12659 = vmatprep.mubr.msk.bf16.mxu0 %vm556_vm3, %v15945_v4  ;;  %v18014_v4 = vld [vmem:[#allocation56_spill] sm:$0xff] }
 0x36a   :  { %13100 = vmatmul.mubr.msk.bf16.gmra.mrb[232].mxu1 %vm556_vm3, %v16266_v17 }
 0x36b   :  { %12660 = vmatmul.mubr.msk.bf16.gmra.mrb[120].mxu0 %vm556_vm3, %v15941_v27  ;;  %13103 = vmatprep.mubr.msk.bf16.mxu1 %vm556_vm3, %v16285_v31  ;;  %v18013_v27 = vld [vmem:[#allocation54_spill] sm:$0xff] }
 0x36c   :  { %12663 = vmatprep.mubr.msk.bf16.mxu0 %vm556_vm3, %v15968_v22  ;;  %v18016_v22 = vld [vmem:[#allocation58_spill] sm:$0xff] }
 0x372   :  { %13104 = vmatmul.mubr.msk.bf16.gmra.mrb[236].mxu1 %vm556_vm3, %v16293_v3 }
 0x373   :  { %12664 = vmatmul.mubr.msk.bf16.gmra.mrb[124].mxu0 %vm556_vm3, %v15964_v59  ;;  %13119 = vmatprep.mubr.msk.bf16.mxu1 %vm556_vm3, %v16340_v26  ;;  %v18015_v59 = vld [vmem:[#allocation55_spill] sm:$0xff] }
 0x374   :  { %12667 = vmatprep.mubr.msk.bf16.mxu0 %vm556_vm3, %v15988_v40  ;;  %v18018_v40 = vld [vmem:[#allocation60_spill] sm:$0xff] }
 0x37a   :  { %13120 = vmatmul.mubr.msk.bf16.vlgmr.msra.gmra.mrb[240].mxu1 %vm556_vm3, %v16346_v29 }
 0x37b   :  { %12668 = vmatmul.mubr.msk.bf16.gmra.mrb[128].mxu0 %vm556_vm3, %v15984_v33  ;;  %13123 = vmatprep.mubr.msk.bf16.mxu1 %vm556_vm3, %v16352_v53  ;;  %v18017_v33 = vld [vmem:[#allocation57_spill] sm:$0xff] }
 0x37c   :  { %12671 = vmatprep.mubr.msk.bf16.mxu0 %vm556_vm3, %v18009_v45 }
 0x382   :  { %13124 = vmatmul.mubr.msk.bf16.gmra.mrb[244].mxu1 %vm556_vm3, %v16361_v56 }
 0x383   :  { %12672 = vmatmul.mubr.msk.bf16.gmra.mrb[132].mxu0 %vm556_vm3, %v18010_v30  ;;  %13127 = vmatprep.mubr.msk.bf16.mxu1 %vm556_vm3, %v16367_v57  ;;  %v18029_v30 = vld [vmem:[#allocation69_spill] sm:$0xff] }
 0x384   :  { %12675 = vmatprep.mubr.msk.bf16.mxu0 %vm556_vm3, %v18011_v14 }
 0x38a   :  { %13128 = vmatmul.mubr.msk.bf16.gmra.mrb[248].mxu1 %vm556_vm3, %v16373_v41 }
 0x38b   :  { %12676 = vmatmul.mubr.msk.bf16.gmra.mrb[136].mxu0 %vm556_vm3, %v18012_v49  ;;  %13131 = vmatprep.mubr.msk.bf16.mxu1 %vm556_vm3, %v16379_v20  ;;  %v18030_v49 = vld [vmem:[#allocation21_spill] sm:$0xff] }
 0x38c   :  { %12679 = vmatprep.mubr.msk.bf16.mxu0 %vm556_vm3, %v18013_v27  ;;  %v18031_v27 = vld [vmem:[#allocation19_spill] sm:$0xff] }
 0x392   :  { %13132 = vmatmul.mubr.msk.bf16.gmra.mrb[252].mxu1 %vm556_vm3, %v16385_v55 }
 0x393   :  { %12680 = vmatmul.mubr.msk.bf16.gmra.mrb[140].mxu0 %vm556_vm3, %v17967_v63  ;;  %13135 = vmatprep.mubr.msk.bf16.mxu1 %vm556_vm3, %v16391_v51 }
 0x394   :  { %12683 = vmatprep.mubr.msk.bf16.mxu0 %vm556_vm3, %v18014_v4 }
 0x39a   :  { %13136 = vmatmul.mubr.msk.bf16.gmra.mrb[0].mxu1 %vm556_vm3, %v16397_v24 }
 0x39b   :  { %12684 = vmatmul.mubr.msk.bf16.gmra.mrb[144].mxu0 %vm556_vm3, %v18015_v59  ;;  %13139 = vmatprep.mubr.msk.bf16.mxu1 %vm556_vm3, %v16403_v60 }
 0x39c   :  { %12687 = vmatprep.mubr.msk.bf16.mxu0 %vm556_vm3, %v18016_v22 }
 0x3a2   :  { %13140 = vmatmul.mubr.msk.bf16.gmra.mrb[4].mxu1 %vm556_vm3, %v16409_v35 }
 0x3a3   :  { %12688 = vmatmul.mubr.msk.bf16.gmra.mrb[148].mxu0 %vm556_vm3, %v18017_v33  ;;  %13143 = vmatprep.mubr.msk.bf16.mxu1 %vm556_vm3, %v16415_v54 }
 0x3a4   :  { %12691 = vmatprep.mubr.msk.bf16.mxu0 %vm556_vm3, %v18018_v40 }
 0x3aa   :  { %13144 = vmatmul.mubr.msk.bf16.gmra.mrb[8].mxu1 %vm556_vm3, %v16424_v39 }
 0x3ab   :  { %12692 = vmatmul.mubr.msk.bf16.gmra.mrb[152].mxu0 %vm556_vm3, %v18019_v34  ;;  %13147 = vmatprep.mubr.msk.bf16.mxu1 %vm556_vm3, %v16430_v11 }
 0x3ac   :  { %12695 = vmatprep.mubr.msk.bf16.mxu0 %vm556_vm3, %v18020_v10 }
 0x3b2   :  { %13148 = vmatmul.mubr.msk.bf16.gmra.mrb[12].mxu1 %vm556_vm3, %v16436_v44 }
 0x3b3   :  { %12696 = vmatmul.mubr.msk.bf16.gmra.mrb[156].mxu0 %vm556_vm3, %v18021_v36  ;;  %13151 = vmatprep.mubr.msk.bf16.mxu1 %vm556_vm3, %v16442_v42 }
 0x3b4   :  { %12699 = vmatprep.mubr.msk.bf16.mxu0 %vm556_vm3, %v18022_v25 }
 0x3ba   :  { %13152 = vmatmul.mubr.msk.bf16.gmra.mrb[16].mxu1 %vm556_vm3, %v16448_v46 }
 0x3bb   :  { %12700 = vmatmul.mubr.msk.bf16.gmra.mrb[160].mxu0 %vm556_vm3, %v18023_v0  ;;  %13155 = vmatprep.mubr.msk.bf16.mxu1 %vm556_vm3, %v16454_v21 }
 0x3bc   :  { %12703 = vmatprep.mubr.msk.bf16.mxu0 %vm556_vm3, %v18024_v43 }
 0x3c2   :  { %13156 = vmatmul.mubr.msk.bf16.gmra.mrb[20].mxu1 %vm556_vm3, %v16460_v9 }
 0x3c3   :  { %12704 = vmatmul.mubr.msk.bf16.gmra.mrb[164].mxu0 %vm556_vm3, %v18025_v13  ;;  %13159 = vmatprep.mubr.msk.bf16.mxu1 %vm556_vm3, %v16466_v15 }
 0x3c4   :  { %12707 = vmatprep.mubr.msk.bf16.mxu0 %vm556_vm3, %v18026_v38 }
 0x3ca   :  { %13160 = vmatmul.mubr.msk.bf16.gmra.mrb[24].mxu1 %vm556_vm3, %v16472_v23 }
 0x3cb   :  { %12708 = vmatmul.mubr.msk.bf16.gmra.mrb[168].mxu0 %vm556_vm3, %v18027_v47  ;;  %13163 = vmatprep.mubr.msk.bf16.mxu1 %vm556_vm3, %v16477_v1 }
 0x3cc   :  { %12711 = vmatprep.mubr.msk.bf16.mxu0 %vm556_vm3, %v16302_v52 }
 0x3ce   :  { %v12605_v17 = vpop.f32.mrb[64].mxu0 }
 0x3cf   :  { %v4257_v31 = vadd.f32 %v12605_v17, %v16714_v48  ;;  %v3689_v3 = vpop.f32.mrb[65].mxu0 }
 0x3d0   :  { %v4255_v63 = vadd.f32 %v16714_v48, %v3689_v3  ;;  %v12606_v50 = vpop.f32.mrb[66].mxu0 }
 0x3d1   :  { %v4369_v28 = vmax.f32 %v4257_v31, 0.0  ;;  %v4258_v37 = vadd.f32 %v12606_v50, %v16714_v48  ;;  %v3692_v23 = vpop.f32.mrb[67].mxu0  ;;  %v18032_v50 = vld [vmem:[#allocation25_spill] sm:$0xff] }
 0x3d2   :  { %v4367_v6 = vmax.f32 %v4255_v63, 0.0  ;;  %v4256_v52 = vadd.f32 %v16714_v48, %v3692_v23  ;;  %13164 = vmatmul.mubr.msk.bf16.gmra.mrb[28].mxu1 %vm556_vm3, %v16491_v58 }
 0x3d3   :  { %4482 = vst.msk [vmem:[#allocation3 + $0x10] sm:$0xff] %vm4479_vm4, %v4369_v28  ;;  %v4370_v32 = vmax.f32 %v4258_v37, 0.0  ;;  %12712 = vmatmul.mubr.msk.bf16.gmra.mrb[172].mxu0 %vm556_vm3, %v16300_v61  ;;  %13167 = vmatprep.mubr.msk.bf16.mxu1 %vm556_vm3, %v18028_v18 }
 0x3d4   :  { %4480 = vst.msk [vmem:[#allocation3] sm:$0xff] %vm4479_vm4, %v4367_v6  ;;  %v4368_v1 = vmax.f32 %v4256_v52, 0.0  ;;  %12871 = vmatprep.mubr.msk.bf16.mxu0 %vm556_vm3, %v16321_v19 }
 0x3d5   :  { %4483 = vst.msk [vmem:[#allocation3 + $0x18] sm:$0xff] %vm4479_vm4, %v4370_v32 }
 0x3d6   :  { %4481 = vst.msk [vmem:[#allocation3 + $0x8] sm:$0xff] %vm4479_vm4, %v4368_v1  ;;  %v12609_v62 = vpop.f32.mrb[68].mxu0 }
 0x3d7   :  { %v4261_v5 = vadd.f32 %v12609_v62, %v16714_v48  ;;  %v3705_v61 = vpop.f32.mrb[69].mxu0 }
 0x3d8   :  { %v4259_v12 = vadd.f32 %v16714_v48, %v3705_v61  ;;  %v12610_v2 = vpop.f32.mrb[70].mxu0 }
 0x3d9   :  { %v4373_v16 = vmax.f32 %v4261_v5, 0.0  ;;  %v4262_v58 = vadd.f32 %v12610_v2, %v16714_v48  ;;  %v3708_v7 = vpop.f32.mrb[71].mxu0 }
 0x3da   :  { %v4371_v8 = vmax.f32 %v4259_v12, 0.0  ;;  %v4260_v19 = vadd.f32 %v16714_v48, %v3708_v7  ;;  %13168 = vmatmul.mubr.msk.bf16.gmra.mrb[32].mxu1 %vm556_vm3, %v18030_v49  ;;  %v4594_v43 = vld [vmem:[#allocation3 + $0x10] sm:$0xff] }
 0x3db   :  { %4486 = vst.msk [vmem:[#allocation3 + $0x30] sm:$0xff] %vm4479_vm4, %v4373_v16  ;;  %v4374_v45 = vmax.f32 %v4262_v58, 0.0  ;;  %12872 = vmatmul.mubr.msk.bf16.vlgmr.msra.gmra.mrb[176].mxu0 %vm556_vm3, %v18029_v30  ;;  %13171 = vmatprep.mubr.msk.bf16.mxu1 %vm556_vm3, %v18031_v27  ;;  %v4592_v17 = vld [vmem:[#allocation3] sm:$0xff] }
 0x3dc   :  { %4484 = vst.msk [vmem:[#allocation3 + $0x20] sm:$0xff] %vm4479_vm4, %v4371_v8  ;;  %v4372_v14 = vmax.f32 %v4260_v19, 0.0  ;;  %12875 = vmatprep.mubr.msk.bf16.mxu0 %vm556_vm3, %v16340_v26  ;;  %v4595_v31 = vld [vmem:[#allocation3 + $0x18] sm:$0xff]  ;;  %v8442_v19 = vld [vmem:[#allocation2 + $0x110] sm:$0xff] }
 0x3dd   :  { %4487 = vst.msk [vmem:[#allocation3 + $0x38] sm:$0xff] %vm4479_vm4, %v4374_v45  ;;  %v4593_v37 = vld [vmem:[#allocation3 + $0x8] sm:$0xff]  ;;  %v18034_v8 = vld [vmem:[#allocation27_spill] sm:$0xff] }
 0x3de   :  { %4485 = vst.msk [vmem:[#allocation3 + $0x28] sm:$0xff] %vm4479_vm4, %v4372_v14  ;;  %v12613_v4 = vpop.f32.mrb[72].mxu0 }
 0x3df   :  { %v4265_v59 = vadd.f32 %v12613_v4, %v16714_v48  ;;  %v3721_v22 = vpop.f32.mrb[73].mxu0 }
 0x3e0   :  { %v4263_v33 = vadd.f32 %v16714_v48, %v3721_v22  ;;  %v12614_v40 = vpop.f32.mrb[74].mxu0 }
 0x3e1   :  { %v4377_v34 = vmax.f32 %v4265_v59, 0.0  ;;  %v4266_v10 = vadd.f32 %v12614_v40, %v16714_v48  ;;  %v3724_v36 = vpop.f32.mrb[75].mxu0 }
 0x3e2   :  { %v4650_v25 = vld [vmem:[#allocation3 + $0x30] sm:$0xff]  ;;  %v4375_v26 = vmax.f32 %v4263_v33, 0.0  ;;  %v4264_v0 = vadd.f32 %v16714_v48, %v3724_v36  ;;  %13172 = vmatmul.mubr.msk.bf16.gmra.mrb[36].mxu1 %vm556_vm3, %v18032_v50 }
 0x3e3   :  { %v4648_v13 = vld [vmem:[#allocation3 + $0x20] sm:$0xff]  ;;  %4490 = vst.msk [vmem:[#allocation3 + $0x50] sm:$0xff] %vm4479_vm4, %v4377_v34  ;;  %v4378_v38 = vmax.f32 %v4266_v10, 0.0  ;;  %12876 = vmatmul.mubr.msk.bf16.gmra.mrb[180].mxu0 %vm556_vm3, %v16346_v29  ;;  %v4706_v47 = vmax.f32 %v4594_v43, %v4650_v25  ;;  %v18033_v29 = vld [vmem:[#allocation23_spill] sm:$0xff] }
 0x3e4   :  { %v4651_v3 = vld [vmem:[#allocation3 + $0x38] sm:$0xff]  ;;  %4488 = vst.msk [vmem:[#allocation3 + $0x40] sm:$0xff] %vm4479_vm4, %v4375_v26  ;;  %v4376_v63 = vmax.f32 %v4264_v0, 0.0  ;;  %12879 = vmatprep.mubr.msk.bf16.mxu0 %vm556_vm3, %v16352_v53  ;;  %v4704_v28 = vmax.f32 %v4592_v17, %v4648_v13  ;;  %13175 = vmatprep.mubr.msk.bf16.mxu1 %vm556_vm3, %v18033_v29 }
 0x3e5   :  { %v4707_v23 = vmax.f32 %v4595_v31, %v4651_v3  ;;  %v4649_v6 = vld [vmem:[#allocation3 + $0x28] sm:$0xff]  ;;  %4491 = vst.msk [vmem:[#allocation3 + $0x58] sm:$0xff] %vm4479_vm4, %v4378_v38  ;;  %4762 = vst.msk [vmem:[#allocation3 + $0x10] sm:$0xff] %vm4479_vm4, %v4706_v47  ;;  %v8443_v47 = vld [vmem:[#allocation2 + $0x118] sm:$0xff] }
 0x3e6   :  { %v4705_v52 = vmax.f32 %v4593_v37, %v4649_v6  ;;  %4489 = vst.msk [vmem:[#allocation3 + $0x48] sm:$0xff] %vm4479_vm4, %v4376_v63  ;;  %v12617_v32 = vpop.f32.mrb[76].mxu0  ;;  %4760 = vst.msk [vmem:[#allocation3] sm:$0xff] %vm4479_vm4, %v4704_v28  ;;  %v8444_v37 = vld [vmem:[#allocation2 + $0x120] sm:$0xff] }
 0x3e7   :  { %4763 = vst.msk [vmem:[#allocation3 + $0x18] sm:$0xff] %vm4479_vm4, %v4707_v23  ;;  %v4269_v53 = vadd.f32 %v12617_v32, %v16714_v48  ;;  %v3737_v1 = vpop.f32.mrb[77].mxu0 }
 0x3e8   :  { %4761 = vst.msk [vmem:[#allocation3 + $0x8] sm:$0xff] %vm4479_vm4, %v4705_v52  ;;  %v4267_v18 = vadd.f32 %v16714_v48, %v3737_v1  ;;  %v12618_v62 = vpop.f32.mrb[78].mxu0 }
 0x3e9   :  { %v4381_v5 = vmax.f32 %v4269_v53, 0.0  ;;  %v4270_v61 = vadd.f32 %v12618_v62, %v16714_v48  ;;  %v3740_v12 = vpop.f32.mrb[79].mxu0 }
 0x3ea   :  { %v4379_v2 = vmax.f32 %v4267_v18, 0.0  ;;  %v4268_v16 = vadd.f32 %v16714_v48, %v3740_v12  ;;  %13176 = vmatmul.mubr.msk.bf16.gmra.mrb[40].mxu1 %vm556_vm3, %v18034_v8  ;;  %v4598_v43 = vld [vmem:[#allocation3 + $0x50] sm:$0xff] }
 0x3eb   :  { %4494 = vst.msk [vmem:[#allocation3 + $0x70] sm:$0xff] %vm4479_vm4, %v4381_v5  ;;  %v4382_v58 = vmax.f32 %v4270_v61, 0.0  ;;  %12880 = vmatmul.mubr.msk.bf16.gmra.mrb[184].mxu0 %vm556_vm3, %v16361_v56  ;;  %13179 = vmatprep.mubr.msk.bf16.mxu1 %vm556_vm3, %v8442_v19  ;;  %v4596_v3 = vld [vmem:[#allocation3 + $0x40] sm:$0xff]  ;;  %v8446_v8 = vld [vmem:[#allocation2 + $0x130] sm:$0xff] }
 0x3ec   :  { %4492 = vst.msk [vmem:[#allocation3 + $0x60] sm:$0xff] %vm4479_vm4, %v4379_v2  ;;  %v4380_v7 = vmax.f32 %v4268_v16, 0.0  ;;  %12883 = vmatprep.mubr.msk.bf16.mxu0 %vm556_vm3, %v16367_v57  ;;  %v4599_v63 = vld [vmem:[#allocation3 + $0x58] sm:$0xff] }
 0x3ed   :  { %4495 = vst.msk [vmem:[#allocation3 + $0x78] sm:$0xff] %vm4479_vm4, %v4382_v58  ;;  %v4597_v23 = vld [vmem:[#allocation3 + $0x48] sm:$0xff] }
 0x3ee   :  { %4493 = vst.msk [vmem:[#allocation3 + $0x68] sm:$0xff] %vm4479_vm4, %v4380_v7  ;;  %v12621_v45 = vpop.f32.mrb[80].mxu0  ;;  %v4818_v30 = vld [vmem:[#allocation3 + $0x10] ss:$2 sm:$0x3f]  ;;  %v8445_v58 = vld [vmem:[#allocation2 + $0x128] sm:$0xff] }
 0x3ef   :  { %v4273_v56 = vadd.f32 %v12621_v45, %v16714_v48  ;;  %v3753_v14 = vpop.f32.mrb[81].mxu0  ;;  %v4874_v49 = vld [vmem:[#allocation3 + $0x11] ss:$2 sm:$0x3f]  ;;  %v4816_v27 = vld [vmem:[#allocation3] ss:$2 sm:$0xff] }
 0x3f0   :  { %v4271_v4 = vadd.f32 %v16714_v48, %v3753_v14  ;;  %v12622_v59 = vpop.f32.mrb[82].mxu0  ;;  %v4928_v22 = vmax.f32 %v4818_v30, %v4874_v49  ;;  %v4872_v33 = vld [vmem:[#allocation3 + $0x1] ss:$2 sm:$0xff] }
 0x3f1   :  { %v4385_v57 = vmax.f32 %v4273_v56, 0.0  ;;  %v4274_v40 = vadd.f32 %v12622_v59, %v16714_v48  ;;  %v3756_v34 = vpop.f32.mrb[83].mxu0  ;;  %v4927_v10 = vmax.f32 %v4816_v27, %v4872_v33 }
 0x3f2   :  { %v4654_v36 = vld [vmem:[#allocation3 + $0x70] sm:$0xff]  ;;  %v4383_v25 = vmax.f32 %v4271_v4, 0.0  ;;  %v4272_v26 = vadd.f32 %v16714_v48, %v3756_v34  ;;  %v10990_v0 = vpack.c.bf16 %v4928_v22, %v4928_v22  ;;  %13180 = vmatmul.mubr.msk.bf16.gmra.mrb[44].mxu1 %vm556_vm3, %v8443_v47 }
 0x3f3   :  { %v4652_v13 = vld [vmem:[#allocation3 + $0x60] sm:$0xff]  ;;  %4498 = vst.msk [vmem:[#allocation3 + $0x90] sm:$0xff] %vm4479_vm4, %v4385_v57  ;;  %v4386_v38 = vmax.f32 %v4274_v40, 0.0  ;;  %12884 = vmatmul.mubr.msk.bf16.gmra.mrb[188].mxu0 %vm556_vm3, %v16373_v41  ;;  %v10989_v17 = vpack.c.bf16 %v4927_v10, %v4927_v10  ;;  %v4710_v31 = vmax.f32 %v4598_v43, %v4654_v36  ;;  %13183 = vmatprep.mubr.msk.bf16.mxu1 %vm556_vm3, %v8444_v37  ;;  %v8447_v43 = vld [vmem:[#allocation2 + $0x138] sm:$0xff] }
 0x3f4   :  { %v4655_v50 = vld [vmem:[#allocation3 + $0x78] sm:$0xff]  ;;  %4496 = vst.msk [vmem:[#allocation3 + $0x80] sm:$0xff] %vm4479_vm4, %v4383_v25  ;;  %v4384_v28 = vmax.f32 %v4272_v26, 0.0  ;;  %12887 = vmatprep.mubr.msk.bf16.mxu0 %vm556_vm3, %v16379_v20  ;;  %v4708_v41 = vmax.f32 %v4596_v3, %v4652_v13 }
 0x3f5   :  { %5070 = vst.msk [vmem:[%s17803_s6 + $0x4] sm:$0x7] %vm5069_vm5, %v10990_v0  ;;  %v4711_v6 = vmax.f32 %v4599_v63, %v4655_v50  ;;  %v4653_v29 = vld [vmem:[#allocation3 + $0x68] sm:$0xff]  ;;  %v8448_v63 = vld [vmem:[#allocation2 + $0x140] sm:$0xff] }
 0x3f6   :  { %4499 = vst.msk [vmem:[#allocation3 + $0x98] sm:$0xff] %vm4479_vm4, %v4386_v38  ;;  %4766 = vst.msk [vmem:[#allocation3 + $0x50] sm:$0xff] %vm4479_vm4, %v4710_v31  ;;  %v4709_v20 = vmax.f32 %v4597_v23, %v4653_v29  ;;  %v12625_v52 = vpop.f32.mrb[84].mxu0 }
 0x3f7   :  { %5068 = vst.msk [vmem:[%s17803_s6] sm:$0xf] %vm5067_vm6, %v10989_v17  ;;  %v4277_v32 = vadd.f32 %v12625_v52, %v16714_v48  ;;  %v3769_v53 = vpop.f32.mrb[85].mxu0 }
 0x3f8   :  { %4497 = vst.msk [vmem:[#allocation3 + $0x88] sm:$0xff] %vm4479_vm4, %v4384_v28  ;;  %4764 = vst.msk [vmem:[#allocation3 + $0x40] sm:$0xff] %vm4479_vm4, %v4708_v41  ;;  %v4275_v1 = vadd.f32 %v16714_v48, %v3769_v53  ;;  %v12626_v18 = vpop.f32.mrb[86].mxu0 }
 0x3f9   :  { %4767 = vst.msk [vmem:[#allocation3 + $0x58] sm:$0xff] %vm4479_vm4, %v4711_v6  ;;  %4765 = vst.msk [vmem:[#allocation3 + $0x48] sm:$0xff] %vm4479_vm4, %v4709_v20  ;;  %v4389_v62 = vmax.f32 %v4277_v32, 0.0  ;;  %v4278_v5 = vadd.f32 %v12626_v18, %v16714_v48  ;;  %v3772_v61 = vpop.f32.mrb[87].mxu0 }
 0x3fa   :  { %v4387_v12 = vmax.f32 %v4275_v1, 0.0  ;;  %v4276_v2 = vadd.f32 %v16714_v48, %v3772_v61  ;;  %13184 = vmatmul.mubr.msk.bf16.gmra.mrb[192].mxu1 %vm556_vm3, %v8445_v58  ;;  %v4602_v25 = vld [vmem:[#allocation3 + $0x90] sm:$0xff] }
 0x3fb   :  { %4502 = vst.msk [vmem:[#allocation3 + $0xb0] sm:$0xff] %vm4479_vm4, %v4389_v62  ;;  %v4390_v16 = vmax.f32 %v4278_v5, 0.0  ;;  %12888 = vmatmul.mubr.msk.bf16.gmra.mrb[192].mxu0 %vm556_vm3, %v16385_v55  ;;  %13187 = vmatprep.mubr.msk.bf16.mxu1 %vm556_vm3, %v8446_v8  ;;  %v4600_v47 = vld [vmem:[#allocation3 + $0x80] sm:$0xff]  ;;  %v8449_v5 = vld [vmem:[#allocation2 + $0x148] sm:$0xff] }
 0x3fc   :  { %4500 = vst.msk [vmem:[#allocation3 + $0xa0] sm:$0xff] %vm4479_vm4, %v4387_v12  ;;  %v4388_v7 = vmax.f32 %v4276_v2, 0.0  ;;  %12891 = vmatprep.mubr.msk.bf16.mxu0 %vm556_vm3, %v16391_v51  ;;  %v8450_v12 = vld [vmem:[#allocation2 + $0x150] sm:$0xff] }
 0x3fd   :  { %4503 = vst.msk [vmem:[#allocation3 + $0xb8] sm:$0xff] %vm4479_vm4, %v4390_v16  ;;  %v4603_v17 = vld [vmem:[#allocation3 + $0x98] sm:$0xff] }
 0x3fe   :  { %4501 = vst.msk [vmem:[#allocation3 + $0xa8] sm:$0xff] %vm4479_vm4, %v4388_v7  ;;  %v12629_v19 = vpop.f32.mrb[88].mxu0 }
 0x3ff   :  { %v4281_v55 = vadd.f32 %v12629_v19, %v16714_v48  ;;  %v3785_v30 = vpop.f32.mrb[89].mxu0  ;;  %v4601_v50 = vld [vmem:[#allocation3 + $0x88] sm:$0xff] }
 0x400   :  { %v4822_v45 = vld [vmem:[#allocation3 + $0x50] ss:$2 sm:$0x3f]  ;;  %v4878_v56 = vld [vmem:[#allocation3 + $0x51] ss:$2 sm:$0x3f]  ;;  %v4279_v49 = vadd.f32 %v16714_v48, %v3785_v30 }
 0x401   :  { %v4820_v14 = vld [vmem:[#allocation3 + $0x40] ss:$2 sm:$0xff]  ;;  %v12630_v27 = vpop.f32.mrb[90].mxu0  ;;  %v4930_v4 = vmax.f32 %v4822_v45, %v4878_v56  ;;  %v4876_v59 = vld [vmem:[#allocation3 + $0x41] ss:$2 sm:$0xff]  ;;  %v4393_v51 = vmax.f32 %v4281_v55, 0.0 }
 0x402   :  { %v4282_v22 = vadd.f32 %v12630_v27, %v16714_v48  ;;  %v3788_v33 = vpop.f32.mrb[91].mxu0  ;;  %v4929_v57 = vmax.f32 %v4820_v14, %v4876_v59  ;;  %v4658_v40 = vld [vmem:[#allocation3 + $0xb0] sm:$0xff]  ;;  %v4391_v34 = vmax.f32 %v4279_v49, 0.0  ;;  %13188 = vmatmul.mubr.msk.bf16.gmra.mrb[196].mxu1 %vm556_vm3, %v8447_v43  ;;  %v8452_v43 = vld [vmem:[#allocation2 + $0x160] sm:$0xff] }
 0x403   :  { %v4280_v10 = vadd.f32 %v16714_v48, %v3788_v33  ;;  %v10992_v36 = vpack.c.bf16 %v4930_v4, %v4930_v4  ;;  %v4656_v26 = vld [vmem:[#allocation3 + $0xa0] sm:$0xff]  ;;  %4506 = vst.msk [vmem:[#allocation3 + $0xd0] sm:$0xff] %vm4479_vm4, %v4393_v51  ;;  %12892 = vmatmul.mubr.msk.bf16.gmra.mrb[196].mxu0 %vm556_vm3, %v16397_v24  ;;  %v4714_v38 = vmax.f32 %v4602_v25, %v4658_v40  ;;  %v8451_v40 = vld [vmem:[#allocation2 + $0x158] sm:$0xff] }
 0x404   :  { %v4394_v0 = vmax.f32 %v4282_v22, 0.0  ;;  %v10991_v13 = vpack.c.bf16 %v4929_v57, %v4929_v57  ;;  %v4659_v31 = vld [vmem:[#allocation3 + $0xb8] sm:$0xff]  ;;  %4504 = vst.msk [vmem:[#allocation3 + $0xc0] sm:$0xff] %vm4479_vm4, %v4391_v34  ;;  %12895 = vmatprep.mubr.msk.bf16.mxu0 %vm556_vm3, %v16403_v60  ;;  %v4712_v24 = vmax.f32 %v4600_v47, %v4656_v26  ;;  %13191 = vmatprep.mubr.msk.bf16.mxu1 %vm556_vm3, %v8448_v63 }
 0x405   :  { %v4392_v3 = vmax.f32 %v4280_v10, 0.0  ;;  %5072 = vst.msk [vmem:[%s17803_s6 + $0xc] sm:$0x7] %vm5069_vm5, %v10992_v36  ;;  %v4715_v28 = vmax.f32 %v4603_v17, %v4659_v31  ;;  %v4657_v37 = vld [vmem:[#allocation3 + $0xa8] sm:$0xff] }
 0x406   :  { %4507 = vst.msk [vmem:[#allocation3 + $0xd8] sm:$0xff] %vm4479_vm4, %v4394_v0  ;;  %4770 = vst.msk [vmem:[#allocation3 + $0x90] sm:$0xff] %vm4479_vm4, %v4714_v38  ;;  %v4713_v60 = vmax.f32 %v4601_v50, %v4657_v37  ;;  %v12633_v41 = vpop.f32.mrb[92].mxu0 }
 0x407   :  { %5071 = vst.msk [vmem:[%s17803_s6 + $0x8] sm:$0xf] %vm5067_vm6, %v10991_v13  ;;  %v4285_v23 = vadd.f32 %v12633_v41, %v16714_v48  ;;  %v3801_v6 = vpop.f32.mrb[93].mxu0 }
 0x408   :  { %4505 = vst.msk [vmem:[#allocation3 + $0xc8] sm:$0xff] %vm4479_vm4, %v4392_v3  ;;  %4768 = vst.msk [vmem:[#allocation3 + $0x80] sm:$0xff] %vm4479_vm4, %v4712_v24  ;;  %v4283_v29 = vadd.f32 %v16714_v48, %v3801_v6  ;;  %v12634_v20 = vpop.f32.mrb[94].mxu0  ;;  %v8453_v6 = vld [vmem:[#allocation2 + $0x168] sm:$0xff] }
 0x409   :  { %4771 = vst.msk [vmem:[#allocation3 + $0x98] sm:$0xff] %vm4479_vm4, %v4715_v28  ;;  %4769 = vst.msk [vmem:[#allocation3 + $0x88] sm:$0xff] %vm4479_vm4, %v4713_v60  ;;  %v4397_v52 = vmax.f32 %v4285_v23, 0.0  ;;  %v4286_v32 = vadd.f32 %v12634_v20, %v16714_v48  ;;  %v3804_v53 = vpop.f32.mrb[95].mxu0  ;;  %v8454_v20 = vld [vmem:[#allocation2 + $0x170] sm:$0xff] }
 0x40a   :  { %v4395_v1 = vmax.f32 %v4283_v29, 0.0  ;;  %v4284_v18 = vadd.f32 %v16714_v48, %v3804_v53  ;;  %13192 = vmatmul.mubr.msk.bf16.gmra.mrb[200].mxu1 %vm556_vm3, %v8449_v5  ;;  %v4606_v22 = vld [vmem:[#allocation3 + $0xd0] sm:$0xff] }
 0x40b   :  { %4510 = vst.msk [vmem:[#allocation3 + $0xf0] sm:$0xff] %vm4479_vm4, %v4397_v52  ;;  %v4398_v62 = vmax.f32 %v4286_v32, 0.0  ;;  %12896 = vmatmul.mubr.msk.bf16.gmra.mrb[200].mxu0 %vm556_vm3, %v16409_v35  ;;  %13195 = vmatprep.mubr.msk.bf16.mxu1 %vm556_vm3, %v8450_v12  ;;  %v4604_v36 = vld [vmem:[#allocation3 + $0xc0] sm:$0xff] }
 0x40c   :  { %4508 = vst.msk [vmem:[#allocation3 + $0xe0] sm:$0xff] %vm4479_vm4, %v4395_v1  ;;  %v4396_v61 = vmax.f32 %v4284_v18, 0.0  ;;  %12899 = vmatprep.mubr.msk.bf16.mxu0 %vm556_vm3, %v16415_v54 }
 0x40d   :  { %4511 = vst.msk [vmem:[#allocation3 + $0xf8] sm:$0xff] %vm4479_vm4, %v4398_v62  ;;  %v4607_v25 = vld [vmem:[#allocation3 + $0xd8] sm:$0xff] }
 0x40e   :  { %4509 = vst.msk [vmem:[#allocation3 + $0xe8] sm:$0xff] %vm4479_vm4, %v4396_v61  ;;  %v12637_v2 = vpop.f32.mrb[96].mxu0 }
 0x40f   :  { %v4289_v35 = vadd.f32 %v12637_v2, %v16714_v48  ;;  %v3817_v58 = vpop.f32.mrb[97].mxu0  ;;  %v4605_v13 = vld [vmem:[#allocation3 + $0xc8] sm:$0xff] }
 0x410   :  { %v4826_v16 = vld [vmem:[#allocation3 + $0x90] ss:$2 sm:$0x3f]  ;;  %v4882_v7 = vld [vmem:[#allocation3 + $0x91] ss:$2 sm:$0x3f]  ;;  %v4287_v19 = vadd.f32 %v16714_v48, %v3817_v58 }
 0x411   :  { %v4824_v8 = vld [vmem:[#allocation3 + $0x80] ss:$2 sm:$0xff]  ;;  %v12638_v45 = vpop.f32.mrb[98].mxu0  ;;  %v4932_v55 = vmax.f32 %v4826_v16, %v4882_v7  ;;  %v4880_v30 = vld [vmem:[#allocation3 + $0x81] ss:$2 sm:$0xff]  ;;  %v4401_v54 = vmax.f32 %v4289_v35, 0.0 }
 0x412   :  { %v4290_v56 = vadd.f32 %v12638_v45, %v16714_v48  ;;  %v3820_v14 = vpop.f32.mrb[99].mxu0  ;;  %v4931_v49 = vmax.f32 %v4824_v8, %v4880_v30  ;;  %v4662_v27 = vld [vmem:[#allocation3 + $0xf0] sm:$0xff]  ;;  %v4399_v4 = vmax.f32 %v4287_v19, 0.0  ;;  %13196 = vmatmul.mubr.msk.bf16.gmra.mrb[204].mxu1 %vm556_vm3, %v8451_v40 }
 0x413   :  { %v4288_v59 = vadd.f32 %v16714_v48, %v3820_v14  ;;  %v10994_v51 = vpack.c.bf16 %v4932_v55, %v4932_v55  ;;  %v4660_v33 = vld [vmem:[#allocation3 + $0xe0] sm:$0xff]  ;;  %4514 = vst.msk [vmem:[#allocation3 + $0x110] sm:$0xff] %vm4479_vm4, %v4401_v54  ;;  %12900 = vmatmul.mubr.msk.bf16.gmra.mrb[204].mxu0 %vm556_vm3, %v16424_v39  ;;  %v4718_v10 = vmax.f32 %v4606_v22, %v4662_v27  ;;  %v8455_v54 = vld [vmem:[#allocation2 + $0x178] sm:$0xff] }
 0x414   :  { %v4402_v57 = vmax.f32 %v4290_v56, 0.0  ;;  %v10993_v34 = vpack.c.bf16 %v4931_v49, %v4931_v49  ;;  %v4663_v26 = vld [vmem:[#allocation3 + $0xf8] sm:$0xff]  ;;  %4512 = vst.msk [vmem:[#allocation3 + $0x100] sm:$0xff] %vm4479_vm4, %v4399_v4  ;;  %12903 = vmatprep.mubr.msk.bf16.mxu0 %vm556_vm3, %v16430_v11  ;;  %v4716_v39 = vmax.f32 %v4604_v36, %v4660_v33  ;;  %13199 = vmatprep.mubr.msk.bf16.mxu1 %vm556_vm3, %v8452_v43 }
 0x415   :  { %v4400_v0 = vmax.f32 %v4288_v59, 0.0  ;;  %5074 = vst.msk [vmem:[%s17803_s6 + $0x14] sm:$0x7] %vm5069_vm5, %v10994_v51  ;;  %v4719_v38 = vmax.f32 %v4607_v25, %v4663_v26  ;;  %v4661_v47 = vld [vmem:[#allocation3 + $0xe8] sm:$0xff]  ;;  %v8456_v51 = vld [vmem:[#allocation2 + $0x180] sm:$0xff] }
 0x416   :  { %4515 = vst.msk [vmem:[#allocation3 + $0x118] sm:$0xff] %vm4479_vm4, %v4402_v57  ;;  %4774 = vst.msk [vmem:[#allocation3 + $0xd0] sm:$0xff] %vm4479_vm4, %v4718_v10  ;;  %v4717_v11 = vmax.f32 %v4605_v13, %v4661_v47  ;;  %v12641_v17 = vpop.f32.mrb[100].mxu0  ;;  %v8457_v47 = vld [vmem:[#allocation2 + $0x188] sm:$0xff] }
 0x417   :  { %5073 = vst.msk [vmem:[%s17803_s6 + $0x10] sm:$0xf] %vm5067_vm6, %v10993_v34  ;;  %v4293_v31 = vadd.f32 %v12641_v17, %v16714_v48  ;;  %v3833_v3 = vpop.f32.mrb[101].mxu0  ;;  %v8458_v17 = vld [vmem:[#allocation2 + $0x190] sm:$0xff] }
 0x418   :  { %4513 = vst.msk [vmem:[#allocation3 + $0x108] sm:$0xff] %vm4479_vm4, %v4400_v0  ;;  %4772 = vst.msk [vmem:[#allocation3 + $0xc0] sm:$0xff] %vm4479_vm4, %v4716_v39  ;;  %v4291_v63 = vadd.f32 %v16714_v48, %v3833_v3  ;;  %v12642_v24 = vpop.f32.mrb[102].mxu0 }
 0x419   :  { %4775 = vst.msk [vmem:[#allocation3 + $0xd8] sm:$0xff] %vm4479_vm4, %v4719_v38  ;;  %4773 = vst.msk [vmem:[#allocation3 + $0xc8] sm:$0xff] %vm4479_vm4, %v4717_v11  ;;  %v4405_v50 = vmax.f32 %v4293_v31, 0.0  ;;  %v4294_v28 = vadd.f32 %v12642_v24, %v16714_v48  ;;  %v3836_v37 = vpop.f32.mrb[103].mxu0 }
 0x41a   :  { %v4403_v60 = vmax.f32 %v4291_v63, 0.0  ;;  %v4292_v41 = vadd.f32 %v16714_v48, %v3836_v37  ;;  %13200 = vmatmul.mubr.msk.bf16.gmra.mrb[208].mxu1 %vm556_vm3, %v8453_v6  ;;  %v4610_v45 = vld [vmem:[#allocation3 + $0x110] sm:$0xff] }
 0x41b   :  { %4518 = vst.msk [vmem:[#allocation3 + $0x130] sm:$0xff] %vm4479_vm4, %v4405_v50  ;;  %v4406_v23 = vmax.f32 %v4294_v28, 0.0  ;;  %12904 = vmatmul.mubr.msk.bf16.gmra.mrb[208].mxu0 %vm556_vm3, %v16436_v44  ;;  %13203 = vmatprep.mubr.msk.bf16.mxu1 %vm556_vm3, %v8454_v20  ;;  %v4608_v49 = vld [vmem:[#allocation3 + $0x100] sm:$0xff] }
 0x41c   :  { %4516 = vst.msk [vmem:[#allocation3 + $0x120] sm:$0xff] %vm4479_vm4, %v4403_v60  ;;  %v4404_v29 = vmax.f32 %v4292_v41, 0.0  ;;  %12907 = vmatprep.mubr.msk.bf16.mxu0 %vm556_vm3, %v16442_v42 }
 0x41d   :  { %4519 = vst.msk [vmem:[#allocation3 + $0x138] sm:$0xff] %vm4479_vm4, %v4406_v23  ;;  %v4611_v27 = vld [vmem:[#allocation3 + $0x118] sm:$0xff] }
 0x41e   :  { %4517 = vst.msk [vmem:[#allocation3 + $0x128] sm:$0xff] %vm4479_vm4, %v4404_v29  ;;  %v12645_v52 = vpop.f32.mrb[104].mxu0 }
 0x41f   :  { %v4297_v44 = vadd.f32 %v12645_v52, %v16714_v48  ;;  %v3849_v53 = vpop.f32.mrb[105].mxu0  ;;  %v4609_v22 = vld [vmem:[#allocation3 + $0x108] sm:$0xff] }
 0x420   :  { %v4830_v32 = vld [vmem:[#allocation3 + $0xd0] ss:$2 sm:$0x3f]  ;;  %v4886_v1 = vld [vmem:[#allocation3 + $0xd1] ss:$2 sm:$0x3f]  ;;  %v4295_v62 = vadd.f32 %v16714_v48, %v3849_v53 }
 0x421   :  { %v4828_v18 = vld [vmem:[#allocation3 + $0xc0] ss:$2 sm:$0xff]  ;;  %v12646_v5 = vpop.f32.mrb[106].mxu0  ;;  %v4934_v61 = vmax.f32 %v4830_v32, %v4886_v1  ;;  %v4884_v12 = vld [vmem:[#allocation3 + $0xc1] ss:$2 sm:$0xff]  ;;  %v4409_v42 = vmax.f32 %v4297_v44, 0.0 }
 0x422   :  { %v4298_v2 = vadd.f32 %v12646_v5, %v16714_v48  ;;  %v3852_v16 = vpop.f32.mrb[107].mxu0  ;;  %v4933_v35 = vmax.f32 %v4828_v18, %v4884_v12  ;;  %v4666_v58 = vld [vmem:[#allocation3 + $0x130] sm:$0xff]  ;;  %v4407_v7 = vmax.f32 %v4295_v62, 0.0  ;;  %13204 = vmatmul.mubr.msk.bf16.gmra.mrb[212].mxu1 %vm556_vm3, %v8455_v54  ;;  %v13889_v62 = vld [vmem:[#allocation2 + $0xc8] sm:$0xff]  ;;  %v8459_v5 = vld [vmem:[#allocation2 + $0x198] sm:$0xff] }
 0x423   :  { %v4296_v8 = vadd.f32 %v16714_v48, %v3852_v16  ;;  %v10996_v19 = vpack.c.bf16 %v4934_v61, %v4934_v61  ;;  %v4664_v55 = vld [vmem:[#allocation3 + $0x120] sm:$0xff]  ;;  %4522 = vst.msk [vmem:[#allocation3 + $0x150] sm:$0xff] %vm4479_vm4, %v4409_v42  ;;  %12908 = vmatmul.mubr.msk.bf16.gmra.mrb[212].mxu0 %vm556_vm3, %v16448_v46  ;;  %v4722_v14 = vmax.f32 %v4610_v45, %v4666_v58  ;;  %v13890_v58 = vld [vmem:[#allocation2 + $0xd0] sm:$0xff] }
 0x424   :  { %v4410_v30 = vmax.f32 %v4298_v2, 0.0  ;;  %v10995_v56 = vpack.c.bf16 %v4933_v35, %v4933_v35  ;;  %v4667_v4 = vld [vmem:[#allocation3 + $0x138] sm:$0xff]  ;;  %4520 = vst.msk [vmem:[#allocation3 + $0x140] sm:$0xff] %vm4479_vm4, %v4407_v7  ;;  %12911 = vmatprep.mubr.msk.bf16.mxu0 %vm556_vm3, %v16454_v21  ;;  %v4720_v46 = vmax.f32 %v4608_v49, %v4664_v55  ;;  %13207 = vmatprep.mubr.msk.bf16.mxu1 %vm556_vm3, %v8456_v51  ;;  %v8460_v7 = vld [vmem:[#allocation2 + $0x1a0] sm:$0xff] }
 0x425   :  { %v4408_v59 = vmax.f32 %v4296_v8, 0.0  ;;  %5076 = vst.msk [vmem:[%s17803_s6 + $0x1c] sm:$0x7] %vm5069_vm5, %v10996_v19  ;;  %v4723_v33 = vmax.f32 %v4611_v27, %v4667_v4  ;;  %v4665_v57 = vld [vmem:[#allocation3 + $0x128] sm:$0xff] }
 0x426   :  { %4523 = vst.msk [vmem:[#allocation3 + $0x158] sm:$0xff] %vm4479_vm4, %v4410_v30  ;;  %4778 = vst.msk [vmem:[#allocation3 + $0x110] sm:$0xff] %vm4479_vm4, %v4722_v14  ;;  %v4721_v21 = vmax.f32 %v4609_v22, %v4665_v57  ;;  %v12649_v40 = vpop.f32.mrb[108].mxu0  ;;  %v13891_v57 = vld [vmem:[#allocation2 + $0xd8] sm:$0xff] }
 0x427   :  { %5075 = vst.msk [vmem:[%s17803_s6 + $0x18] sm:$0xf] %vm5067_vm6, %v10995_v56  ;;  %v4301_v34 = vadd.f32 %v12649_v40, %v16714_v48  ;;  %v3865_v10 = vpop.f32.mrb[109].mxu0 }
 0x428   :  { %4521 = vst.msk [vmem:[#allocation3 + $0x148] sm:$0xff] %vm4479_vm4, %v4408_v59  ;;  %4776 = vst.msk [vmem:[#allocation3 + $0x100] sm:$0xff] %vm4479_vm4, %v4720_v46  ;;  %v4299_v36 = vadd.f32 %v16714_v48, %v3865_v10  ;;  %v12650_v25 = vpop.f32.mrb[110].mxu0  ;;  %v8462_v10 = vld [vmem:[#allocation2 + $0x1b0] sm:$0xff] }
 0x429   :  { %4779 = vst.msk [vmem:[#allocation3 + $0x118] sm:$0xff] %vm4479_vm4, %v4723_v33  ;;  %4777 = vst.msk [vmem:[#allocation3 + $0x108] sm:$0xff] %vm4479_vm4, %v4721_v21  ;;  %v4413_v26 = vmax.f32 %v4301_v34, 0.0  ;;  %v4302_v0 = vadd.f32 %v12650_v25, %v16714_v48  ;;  %v3868_v43 = vpop.f32.mrb[111].mxu0  ;;  %v8461_v21 = vld [vmem:[#allocation2 + $0x1a8] sm:$0xff]  ;;  %v13892_v34 = vld [vmem:[#allocation2 + $0xe0] sm:$0xff] }
 0x42a   :  { %v4411_v39 = vmax.f32 %v4299_v36, 0.0  ;;  %v4300_v13 = vadd.f32 %v16714_v48, %v3868_v43  ;;  %13208 = vmatmul.mubr.msk.bf16.gmra.mrb[216].mxu1 %vm556_vm3, %v8457_v47  ;;  %v4614_v53 = vld [vmem:[#allocation3 + $0x150] sm:$0xff] }
 0x42b   :  { %4526 = vst.msk [vmem:[#allocation3 + $0x170] sm:$0xff] %vm4479_vm4, %v4413_v26  ;;  %v4414_v38 = vmax.f32 %v4302_v0, 0.0  ;;  %12912 = vmatmul.mubr.msk.bf16.gmra.mrb[216].mxu0 %vm556_vm3, %v16460_v9  ;;  %13211 = vmatprep.mubr.msk.bf16.mxu1 %vm556_vm3, %v8458_v17  ;;  %v4612_v42 = vld [vmem:[#allocation3 + $0x140] sm:$0xff] }
 0x42c   :  { %4524 = vst.msk [vmem:[#allocation3 + $0x160] sm:$0xff] %vm4479_vm4, %v4411_v39  ;;  %v4412_v11 = vmax.f32 %v4300_v13, 0.0  ;;  %12915 = vmatprep.mubr.msk.bf16.mxu0 %vm556_vm3, %v16466_v15 }
 0x42d   :  { %4527 = vst.msk [vmem:[#allocation3 + $0x178] sm:$0xff] %vm4479_vm4, %v4414_v38  ;;  %v4615_v2 = vld [vmem:[#allocation3 + $0x158] sm:$0xff] }
 0x42e   :  { %4525 = vst.msk [vmem:[#allocation3 + $0x168] sm:$0xff] %vm4479_vm4, %v4412_v11  ;;  %v12653_v31 = vpop.f32.mrb[112].mxu0 }
 0x42f   :  { %v4305_v9 = vadd.f32 %v12653_v31, %v16714_v48  ;;  %v3881_v63 = vpop.f32.mrb[113].mxu0  ;;  %v4613_v19 = vld [vmem:[#allocation3 + $0x148] sm:$0xff] }
 0x430   :  { %v4834_v3 = vld [vmem:[#allocation3 + $0x110] ss:$2 sm:$0x3f]  ;;  %v4890_v24 = vld [vmem:[#allocation3 + $0x111] ss:$2 sm:$0x3f]  ;;  %v4303_v28 = vadd.f32 %v16714_v48, %v3881_v63 }
 0x431   :  { %v4832_v50 = vld [vmem:[#allocation3 + $0x100] ss:$2 sm:$0xff]  ;;  %v12654_v37 = vpop.f32.mrb[114].mxu0  ;;  %v4936_v60 = vmax.f32 %v4834_v3, %v4890_v24  ;;  %v4888_v41 = vld [vmem:[#allocation3 + $0x101] ss:$2 sm:$0xff]  ;;  %v4417_v15 = vmax.f32 %v4305_v9, 0.0 }
 0x432   :  { %v4306_v23 = vadd.f32 %v12654_v37, %v16714_v48  ;;  %v3884_v6 = vpop.f32.mrb[115].mxu0  ;;  %v4935_v29 = vmax.f32 %v4832_v50, %v4888_v41  ;;  %v4670_v20 = vld [vmem:[#allocation3 + $0x170] sm:$0xff]  ;;  %v4415_v52 = vmax.f32 %v4303_v28, 0.0  ;;  %13212 = vmatmul.mubr.msk.bf16.gmra.mrb[220].mxu1 %vm556_vm3, %v8459_v5 }
 0x433   :  { %v4304_v32 = vadd.f32 %v16714_v48, %v3884_v6  ;;  %v10998_v44 = vpack.c.bf16 %v4936_v60, %v4936_v60  ;;  %v4668_v1 = vld [vmem:[#allocation3 + $0x160] sm:$0xff]  ;;  %4530 = vst.msk [vmem:[#allocation3 + $0x190] sm:$0xff] %vm4479_vm4, %v4417_v15  ;;  %12916 = vmatmul.mubr.msk.bf16.gmra.mrb[220].mxu0 %vm556_vm3, %v13889_v62  ;;  %v4726_v12 = vmax.f32 %v4614_v53, %v4670_v20  ;;  %v13893_v15 = vld [vmem:[#allocation2 + $0xe8] sm:$0xff]  ;;  %v13894_v53 = vld [vmem:[#allocation2 + $0xf0] sm:$0xff] }
 0x434   :  { %v4418_v18 = vmax.f32 %v4306_v23, 0.0  ;;  %v10997_v61 = vpack.c.bf16 %v4935_v29, %v4935_v29  ;;  %v4671_v16 = vld [vmem:[#allocation3 + $0x178] sm:$0xff]  ;;  %4528 = vst.msk [vmem:[#allocation3 + $0x180] sm:$0xff] %vm4479_vm4, %v4415_v52  ;;  %12919 = vmatprep.mubr.msk.bf16.mxu0 %vm556_vm3, %v13890_v58  ;;  %v4724_v8 = vmax.f32 %v4612_v42, %v4668_v1  ;;  %13215 = vmatprep.mubr.msk.bf16.mxu1 %vm556_vm3, %v8460_v7  ;;  %v8464_v1 = vld [vmem:[#allocation2 + $0x1c0] sm:$0xff] }
 0x435   :  { %v4416_v35 = vmax.f32 %v4304_v32, 0.0  ;;  %5078 = vst.msk [vmem:[%s17803_s6 + $0x24] sm:$0x7] %vm5069_vm5, %v10998_v44  ;;  %v4727_v45 = vmax.f32 %v4615_v2, %v4671_v16  ;;  %v4669_v55 = vld [vmem:[#allocation3 + $0x168] sm:$0xff]  ;;  %v8463_v23 = vld [vmem:[#allocation2 + $0x1b8] sm:$0xff] }
 0x436   :  { %4531 = vst.msk [vmem:[#allocation3 + $0x198] sm:$0xff] %vm4479_vm4, %v4418_v18  ;;  %4782 = vst.msk [vmem:[#allocation3 + $0x150] sm:$0xff] %vm4479_vm4, %v4726_v12  ;;  %v4725_v30 = vmax.f32 %v4613_v19, %v4669_v55  ;;  %v12657_v54 = vpop.f32.mrb[116].mxu0 }
 0x437   :  { %5077 = vst.msk [vmem:[%s17803_s6 + $0x20] sm:$0xf] %vm5067_vm6, %v10997_v61  ;;  %v4309_v56 = vadd.f32 %v12657_v54, %v16714_v48  ;;  %v3897_v14 = vpop.f32.mrb[117].mxu0  ;;  %v13895_v54 = vld [vmem:[#allocation2 + $0xf8] sm:$0xff] }
 0x438   :  { %4529 = vst.msk [vmem:[#allocation3 + $0x188] sm:$0xff] %vm4479_vm4, %v4416_v35  ;;  %4780 = vst.msk [vmem:[#allocation3 + $0x140] sm:$0xff] %vm4479_vm4, %v4724_v8  ;;  %v4307_v49 = vadd.f32 %v16714_v48, %v3897_v14  ;;  %v12658_v27 = vpop.f32.mrb[118].mxu0 }
 0x439   :  { %4783 = vst.msk [vmem:[#allocation3 + $0x158] sm:$0xff] %vm4479_vm4, %v4727_v45  ;;  %4781 = vst.msk [vmem:[#allocation3 + $0x148] sm:$0xff] %vm4479_vm4, %v4725_v30  ;;  %v4421_v4 = vmax.f32 %v4309_v56, 0.0  ;;  %v4310_v59 = vadd.f32 %v12658_v27, %v16714_v48  ;;  %v3900_v51 = vpop.f32.mrb[119].mxu0  ;;  %v8465_v56 = vld [vmem:[#allocation2 + $0x1c8] sm:$0xff]  ;;  %v8466_v27 = vld [vmem:[#allocation2 + $0x1d0] sm:$0xff] }
 0x43a   :  { %v4419_v46 = vmax.f32 %v4307_v49, 0.0  ;;  %v4308_v22 = vadd.f32 %v16714_v48, %v3900_v51  ;;  %13216 = vmatmul.mubr.msk.bf16.gmra.mrb[224].mxu1 %vm556_vm3, %v8461_v21  ;;  %v4618_v37 = vld [vmem:[#allocation3 + $0x190] sm:$0xff]  ;;  %v13896_v49 = vld [vmem:[#allocation2 + $0x100] sm:$0xff] }
 0x43b   :  { %4534 = vst.msk [vmem:[#allocation3 + $0x1b0] sm:$0xff] %vm4479_vm4, %v4421_v4  ;;  %v4422_v33 = vmax.f32 %v4310_v59, 0.0  ;;  %12920 = vmatmul.mubr.msk.bf16.gmra.mrb[224].mxu0 %vm556_vm3, %v13891_v57  ;;  %13219 = vmatprep.mubr.msk.bf16.mxu1 %vm556_vm3, %v8462_v10  ;;  %v4616_v20 = vld [vmem:[#allocation3 + $0x180] sm:$0xff]  ;;  %v17017_v59 = vld [vmem:[#allocation8] ss:$0 sm:$0xff] }
 0x43c   :  { %4532 = vst.msk [vmem:[#allocation3 + $0x1a0] sm:$0xff] %vm4479_vm4, %v4419_v46  ;;  %v4420_v40 = vmax.f32 %v4308_v22, 0.0  ;;  %12923 = vmatprep.mubr.msk.bf16.mxu0 %vm556_vm3, %v13892_v34 }
 0x43d   :  { %4535 = vst.msk [vmem:[#allocation3 + $0x1b8] sm:$0xff] %vm4479_vm4, %v4422_v33  ;;  %v4619_v52 = vld [vmem:[#allocation3 + $0x198] sm:$0xff] }
 0x43e   :  { %4533 = vst.msk [vmem:[#allocation3 + $0x1a8] sm:$0xff] %vm4479_vm4, %v4420_v40  ;;  %v12661_v36 = vpop.f32.mrb[120].mxu0 }
 0x43f   :  { %v4313_v26 = vadd.f32 %v12661_v36, %v16714_v48  ;;  %v3913_v0 = vpop.f32.mrb[121].mxu0  ;;  %v4617_v62 = vld [vmem:[#allocation3 + $0x188] sm:$0xff] }
 0x440   :  { %v4838_v25 = vld [vmem:[#allocation3 + $0x150] ss:$2 sm:$0x3f]  ;;  %v4894_v43 = vld [vmem:[#allocation3 + $0x151] ss:$2 sm:$0x3f]  ;;  %v4311_v13 = vadd.f32 %v16714_v48, %v3913_v0 }
 0x441   :  { %v4836_v39 = vld [vmem:[#allocation3 + $0x140] ss:$2 sm:$0xff]  ;;  %v12662_v38 = vpop.f32.mrb[122].mxu0  ;;  %v4938_v47 = vmax.f32 %v4838_v25, %v4894_v43  ;;  %v4892_v11 = vld [vmem:[#allocation3 + $0x141] ss:$2 sm:$0xff]  ;;  %v4425_v17 = vmax.f32 %v4313_v26, 0.0 }
 0x442   :  { %v4314_v31 = vadd.f32 %v12662_v38, %v16714_v48  ;;  %v3916_v3 = vpop.f32.mrb[123].mxu0  ;;  %v4937_v9 = vmax.f32 %v4836_v39, %v4892_v11  ;;  %v4674_v63 = vld [vmem:[#allocation3 + $0x1b0] sm:$0xff]  ;;  %v4423_v24 = vmax.f32 %v4311_v13, 0.0  ;;  %13220 = vmatmul.mubr.msk.bf16.gmra.mrb[228].mxu1 %vm556_vm3, %v8463_v23 }
 0x443   :  { %v4312_v50 = vadd.f32 %v16714_v48, %v3916_v3  ;;  %v11000_v28 = vpack.c.bf16 %v4938_v47, %v4938_v47  ;;  %v4672_v60 = vld [vmem:[#allocation3 + $0x1a0] sm:$0xff]  ;;  %4538 = vst.msk [vmem:[#allocation3 + $0x1d0] sm:$0xff] %vm4479_vm4, %v4425_v17  ;;  %12924 = vmatmul.mubr.msk.bf16.gmra.mrb[228].mxu0 %vm556_vm3, %v13893_v15  ;;  %v4730_v29 = vmax.f32 %v4618_v37, %v4674_v63  ;;  %v13898_v63 = vld [vmem:[#allocation2 + $0x108] sm:$0xff] }
 0x444   :  { %v4426_v41 = vmax.f32 %v4314_v31, 0.0  ;;  %v10999_v6 = vpack.c.bf16 %v4937_v9, %v4937_v9  ;;  %v4675_v32 = vld [vmem:[#allocation3 + $0x1b8] sm:$0xff]  ;;  %4536 = vst.msk [vmem:[#allocation3 + $0x1c0] sm:$0xff] %vm4479_vm4, %v4423_v24  ;;  %12927 = vmatprep.mubr.msk.bf16.mxu0 %vm556_vm3, %v13894_v53  ;;  %v4728_v18 = vmax.f32 %v4616_v20, %v4672_v60  ;;  %13223 = vmatprep.mubr.msk.bf16.mxu1 %vm556_vm3, %v8464_v1 }
 0x445   :  { %v4424_v44 = vmax.f32 %v4312_v50, 0.0  ;;  %5080 = vst.msk [vmem:[%s17803_s6 + $0x2c] sm:$0x7] %vm5069_vm5, %v11000_v28  ;;  %v4731_v5 = vmax.f32 %v4619_v52, %v4675_v32  ;;  %v4673_v61 = vld [vmem:[#allocation3 + $0x1a8] sm:$0xff]  ;;  %v8467_v24 = vld [vmem:[#allocation2 + $0x1d8] sm:$0xff] }
 0x446   :  { %4539 = vst.msk [vmem:[#allocation3 + $0x1d8] sm:$0xff] %vm4479_vm4, %v4426_v41  ;;  %4786 = vst.msk [vmem:[#allocation3 + $0x190] sm:$0xff] %vm4479_vm4, %v4730_v29  ;;  %v4729_v12 = vmax.f32 %v4617_v62, %v4673_v61  ;;  %v12665_v42 = vpop.f32.mrb[124].mxu0 }
 0x447   :  { %5079 = vst.msk [vmem:[%s17803_s6 + $0x28] sm:$0xf] %vm5067_vm6, %v10999_v6  ;;  %v4317_v2 = vadd.f32 %v12665_v42, %v16714_v48  ;;  %v3929_v16 = vpop.f32.mrb[125].mxu0 }
 0x448   :  { %4537 = vst.msk [vmem:[#allocation3 + $0x1c8] sm:$0xff] %vm4479_vm4, %v4424_v44  ;;  %4784 = vst.msk [vmem:[#allocation3 + $0x180] sm:$0xff] %vm4479_vm4, %v4728_v18  ;;  %v4315_v35 = vadd.f32 %v16714_v48, %v3929_v16  ;;  %v12666_v58 = vpop.f32.mrb[126].mxu0 }
 0x449   :  { %4787 = vst.msk [vmem:[#allocation3 + $0x198] sm:$0xff] %vm4479_vm4, %v4731_v5  ;;  %4785 = vst.msk [vmem:[#allocation3 + $0x188] sm:$0xff] %vm4479_vm4, %v4729_v12  ;;  %v4429_v7 = vmax.f32 %v4317_v2, 0.0  ;;  %v4318_v8 = vadd.f32 %v12666_v58, %v16714_v48  ;;  %v3932_v19 = vpop.f32.mrb[127].mxu0 }
 0x44a   :  { %v4427_v45 = vmax.f32 %v4315_v35, 0.0  ;;  %v4316_v55 = vadd.f32 %v16714_v48, %v3932_v19  ;;  %13224 = vmatmul.mubr.msk.bf16.gmra.mrb[232].mxu1 %vm556_vm3, %v8465_v56  ;;  %v4622_v31 = vld [vmem:[#allocation3 + $0x1d0] sm:$0xff] }
 0x44b   :  { %4542 = vst.msk [vmem:[#allocation3 + $0x1f0] sm:$0xff] %vm4479_vm4, %v4429_v7  ;;  %v4430_v30 = vmax.f32 %v4318_v8, 0.0  ;;  %12928 = vmatmul.mubr.msk.bf16.gmra.mrb[232].mxu0 %vm556_vm3, %v13895_v54  ;;  %13227 = vmatprep.mubr.msk.bf16.mxu1 %vm556_vm3, %v8466_v27  ;;  %v4620_v37 = vld [vmem:[#allocation3 + $0x1c0] sm:$0xff] }
 0x44c   :  { %4540 = vst.msk [vmem:[#allocation3 + $0x1e0] sm:$0xff] %vm4479_vm4, %v4427_v45  ;;  %v4428_v14 = vmax.f32 %v4316_v55, 0.0  ;;  %12931 = vmatprep.mubr.msk.bf16.mxu0 %vm556_vm3, %v13896_v49 }
 0x44d   :  { %4543 = vst.msk [vmem:[#allocation3 + $0x1f8] sm:$0xff] %vm4479_vm4, %v4430_v30  ;;  %v17020_v46 = vpop.f32.mrb[240].mxu1  ;;  %v4623_v60 = vld [vmem:[#allocation3 + $0x1d8] sm:$0xff] }
 0x44e   :  { %4541 = vst.msk [vmem:[#allocation3 + $0x1e8] sm:$0xff] %vm4479_vm4, %v4428_v14  ;;  %v12669_v48 = vpop.f32.mrb[128].mxu0  ;;  %v17023_v21 = vpop.f32.mrb[241].mxu1 }
 0x44f   :  { %v4321_v51 = vadd.f32 %v17017_v59, %v12669_v48  ;;  %v3945_v22 = vpop.f32.mrb[129].mxu0  ;;  %v17026_v0 = vpop.f32.mrb[242].mxu1  ;;  %v4621_v6 = vld [vmem:[#allocation3 + $0x1c8] sm:$0xff] }
 0x450   :  { %v4842_v4 = vld [vmem:[#allocation3 + $0x190] ss:$2 sm:$0x3f]  ;;  %v4898_v33 = vld [vmem:[#allocation3 + $0x191] ss:$2 sm:$0x3f]  ;;  %v4319_v57 = vadd.f32 %v17017_v59, %v3945_v22 }
 0x451   :  { %v12670_v40 = vpop.f32.mrb[130].mxu0  ;;  %v4940_v34 = vmax.f32 %v4842_v4, %v4898_v33  ;;  %v4840_v10 = vld [vmem:[#allocation3 + $0x180] ss:$2 sm:$0xff]  ;;  %v4896_v36 = vld [vmem:[#allocation3 + $0x181] ss:$2 sm:$0xff]  ;;  %v4433_v25 = vmax.f32 %v4321_v51, 0.0 }
 0x452   :  { %v4322_v26 = vadd.f32 %v17017_v59, %v12670_v40  ;;  %v3948_v43 = vpop.f32.mrb[131].mxu0  ;;  %v4939_v39 = vmax.f32 %v4840_v10, %v4896_v36  ;;  %v4678_v13 = vld [vmem:[#allocation3 + $0x1f0] sm:$0xff]  ;;  %v4431_v38 = vmax.f32 %v4319_v57, 0.0  ;;  %v17029_v11 = vpop.f32.mrb[243].mxu1  ;;  %13228 = vmatmul.mubr.msk.bf16.gmra.mrb[236].mxu1 %vm556_vm3, %v8467_v24 }
 0x453   :  { %v4320_v47 = vadd.f32 %v17017_v59, %v3948_v43  ;;  %v11002_v17 = vpack.c.bf16 %v4940_v34, %v4940_v34  ;;  %v4676_v3 = vld [vmem:[#allocation3 + $0x1e0] sm:$0xff]  ;;  %4546 = vst.msk [vmem:[#allocation3 + $0x210] sm:$0xff] %vm4479_vm4, %v4433_v25  ;;  %12932 = vmatmul.mubr.msk.bf16.gmra.mrb[236].mxu0 %vm556_vm3, %v13898_v63  ;;  %v4734_v28 = vmax.f32 %v4622_v31, %v4678_v13 }
 0x454   :  { %v4434_v9 = vmax.f32 %v4322_v26, 0.0  ;;  %v11001_v50 = vpack.c.bf16 %v4939_v39, %v4939_v39  ;;  %v4679_v41 = vld [vmem:[#allocation3 + $0x1f8] sm:$0xff]  ;;  %4544 = vst.msk [vmem:[#allocation3 + $0x200] sm:$0xff] %vm4479_vm4, %v4431_v38  ;;  %v4732_v23 = vmax.f32 %v4620_v37, %v4676_v3 }
 0x455   :  { %v4432_v15 = vmax.f32 %v4320_v47, 0.0  ;;  %5082 = vst.msk [vmem:[%s17803_s6 + $0x34] sm:$0x7] %vm5069_vm5, %v11002_v17  ;;  %v4735_v29 = vmax.f32 %v4623_v60, %v4679_v41  ;;  %v4677_v20 = vld [vmem:[#allocation3 + $0x1e8] sm:$0xff]  ;;  %v17049_v53 = vpop.f32.mrb[244].mxu1 }
 0x456   :  { %4547 = vst.msk [vmem:[#allocation3 + $0x218] sm:$0xff] %vm4479_vm4, %v4434_v9  ;;  %4790 = vst.msk [vmem:[#allocation3 + $0x1d0] sm:$0xff] %vm4479_vm4, %v4734_v28  ;;  %v4733_v52 = vmax.f32 %v4621_v6, %v4677_v20  ;;  %v12673_v32 = vpop.f32.mrb[132].mxu0  ;;  %v17053_v62 = vpop.f32.mrb[245].mxu1 }
 0x457   :  { %5081 = vst.msk [vmem:[%s17803_s6 + $0x30] sm:$0xf] %vm5067_vm6, %v11001_v50  ;;  %v4325_v44 = vadd.f32 %v17017_v59, %v12673_v32  ;;  %v3961_v1 = vpop.f32.mrb[133].mxu0  ;;  %v17056_v42 = vpop.f32.mrb[246].mxu1 }
 0x458   :  { %4545 = vst.msk [vmem:[#allocation3 + $0x208] sm:$0xff] %vm4479_vm4, %v4432_v15  ;;  %4788 = vst.msk [vmem:[#allocation3 + $0x1c0] sm:$0xff] %vm4479_vm4, %v4732_v23  ;;  %v4323_v18 = vadd.f32 %v17017_v59, %v3961_v1  ;;  %v12674_v5 = vpop.f32.mrb[134].mxu0  ;;  %v17059_v58 = vpop.f32.mrb[247].mxu1 }
 0x459   :  { %4791 = vst.msk [vmem:[#allocation3 + $0x1d8] sm:$0xff] %vm4479_vm4, %v4735_v29  ;;  %4789 = vst.msk [vmem:[#allocation3 + $0x1c8] sm:$0xff] %vm4479_vm4, %v4733_v52  ;;  %v4437_v61 = vmax.f32 %v4325_v44, 0.0  ;;  %v4326_v12 = vadd.f32 %v17017_v59, %v12674_v5  ;;  %v3964_v2 = vpop.f32.mrb[135].mxu0 }
 0x45a   :  { %v4435_v16 = vmax.f32 %v4323_v18, 0.0  ;;  %v4324_v35 = vadd.f32 %v17017_v59, %v3964_v2  ;;  %v4626_v43 = vld [vmem:[#allocation3 + $0x210] sm:$0xff] }
 0x45b   :  { %4550 = vst.msk [vmem:[#allocation3 + $0x230] sm:$0xff] %vm4479_vm4, %v4437_v61  ;;  %v4438_v7 = vmax.f32 %v4326_v12, 0.0  ;;  %v4624_v17 = vld [vmem:[#allocation3 + $0x200] sm:$0xff] }
 0x45c   :  { %4548 = vst.msk [vmem:[#allocation3 + $0x220] sm:$0xff] %vm4479_vm4, %v4435_v16  ;;  %v4436_v8 = vmax.f32 %v4324_v35, 0.0 }
 0x45d   :  { %4551 = vst.msk [vmem:[#allocation3 + $0x238] sm:$0xff] %vm4479_vm4, %v4438_v7  ;;  %v17066_v30 = vpop.f32.mrb[248].mxu1  ;;  %v4627_v3 = vld [vmem:[#allocation3 + $0x218] sm:$0xff] }
 0x45e   :  { %4549 = vst.msk [vmem:[#allocation3 + $0x228] sm:$0xff] %vm4479_vm4, %v4436_v8  ;;  %v12677_v19 = vpop.f32.mrb[136].mxu0  ;;  %v17069_v49 = vpop.f32.mrb[249].mxu1 }
 0x45f   :  { %v4329_v55 = vadd.f32 %v17017_v59, %v12677_v19  ;;  %v3977_v54 = vpop.f32.mrb[137].mxu0  ;;  %v17072_v57 = vpop.f32.mrb[250].mxu1  ;;  %v4625_v50 = vld [vmem:[#allocation3 + $0x208] sm:$0xff] }
 0x460   :  { %v4846_v45 = vld [vmem:[#allocation3 + $0x1d0] ss:$2 sm:$0x3f]  ;;  %v4902_v56 = vld [vmem:[#allocation3 + $0x1d1] ss:$2 sm:$0x3f]  ;;  %v4327_v14 = vadd.f32 %v17017_v59, %v3977_v54 }
 0x461   :  { %v12678_v27 = vpop.f32.mrb[138].mxu0  ;;  %v4942_v48 = vmax.f32 %v4846_v45, %v4902_v56  ;;  %v4844_v4 = vld [vmem:[#allocation3 + $0x1c0] ss:$2 sm:$0xff]  ;;  %v4900_v51 = vld [vmem:[#allocation3 + $0x1c1] ss:$2 sm:$0xff]  ;;  %v4441_v22 = vmax.f32 %v4329_v55, 0.0 }
 0x462   :  { %v4330_v33 = vadd.f32 %v17017_v59, %v12678_v27  ;;  %v3980_v40 = vpop.f32.mrb[139].mxu0  ;;  %v4941_v34 = vmax.f32 %v4844_v4, %v4900_v51  ;;  %v4682_v10 = vld [vmem:[#allocation3 + $0x230] sm:$0xff]  ;;  %v4439_v36 = vmax.f32 %v4327_v14, 0.0  ;;  %v17075_v26 = vpop.f32.mrb[251].mxu1 }
 0x463   :  { %v4328_v25 = vadd.f32 %v17017_v59, %v3980_v40  ;;  %v11004_v39 = vpack.c.bf16 %v4942_v48, %v4942_v48  ;;  %v4680_v13 = vld [vmem:[#allocation3 + $0x220] sm:$0xff]  ;;  %4554 = vst.msk [vmem:[#allocation3 + $0x250] sm:$0xff] %vm4479_vm4, %v4441_v22  ;;  %v4738_v47 = vmax.f32 %v4626_v43, %v4682_v10 }
 0x464   :  { %v4442_v38 = vmax.f32 %v4330_v33, 0.0  ;;  %v11003_v31 = vpack.c.bf16 %v4941_v34, %v4941_v34  ;;  %v4683_v9 = vld [vmem:[#allocation3 + $0x238] sm:$0xff]  ;;  %4552 = vst.msk [vmem:[#allocation3 + $0x240] sm:$0xff] %vm4479_vm4, %v4439_v36  ;;  %v4736_v24 = vmax.f32 %v4624_v17, %v4680_v13 }
 0x465   :  { %v4440_v63 = vmax.f32 %v4328_v25, 0.0  ;;  %5084 = vst.msk [vmem:[%s17803_s6 + $0x3c] sm:$0x7] %vm5069_vm5, %v11004_v39  ;;  %v4739_v28 = vmax.f32 %v4627_v3, %v4683_v9  ;;  %v4681_v37 = vld [vmem:[#allocation3 + $0x228] sm:$0xff]  ;;  %v17093_v23 = vpop.f32.mrb[252].mxu1 }
 0x466   :  { %4555 = vst.msk [vmem:[#allocation3 + $0x258] sm:$0xff] %vm4479_vm4, %v4442_v38  ;;  %4794 = vst.msk [vmem:[#allocation3 + $0x210] sm:$0xff] %vm4479_vm4, %v4738_v47  ;;  %v4737_v60 = vmax.f32 %v4625_v50, %v4681_v37  ;;  %v12681_v41 = vpop.f32.mrb[140].mxu0  ;;  %v17097_v20 = vpop.f32.mrb[253].mxu1 }
 0x467   :  { %5083 = vst.msk [vmem:[%s17803_s6 + $0x38] sm:$0xf] %vm5067_vm6, %v11003_v31  ;;  %v4333_v15 = vadd.f32 %v17017_v59, %v12681_v41  ;;  %v3993_v6 = vpop.f32.mrb[141].mxu0  ;;  %v17100_v1 = vpop.f32.mrb[254].mxu1 }
 0x468   :  { %4553 = vst.msk [vmem:[#allocation3 + $0x248] sm:$0xff] %vm4479_vm4, %v4440_v63  ;;  %4792 = vst.msk [vmem:[#allocation3 + $0x200] sm:$0xff] %vm4479_vm4, %v4736_v24  ;;  %v4331_v29 = vadd.f32 %v17017_v59, %v3993_v6  ;;  %v12682_v52 = vpop.f32.mrb[142].mxu0  ;;  %v17103_v12 = vpop.f32.mrb[255].mxu1 }
 0x469   :  { %4795 = vst.msk [vmem:[#allocation3 + $0x218] sm:$0xff] %vm4479_vm4, %v4739_v28  ;;  %4793 = vst.msk [vmem:[#allocation3 + $0x208] sm:$0xff] %vm4479_vm4, %v4737_v60  ;;  %v4445_v32 = vmax.f32 %v4333_v15, 0.0  ;;  %v4334_v44 = vadd.f32 %v17017_v59, %v12682_v52  ;;  %v3996_v18 = vpop.f32.mrb[143].mxu0 }
 0x46a   :  { %v4443_v5 = vmax.f32 %v4331_v29, 0.0  ;;  %v4332_v61 = vadd.f32 %v17017_v59, %v3996_v18  ;;  %v4630_v13 = vld [vmem:[#allocation3 + $0x250] sm:$0xff] }
 0x46b   :  { %4558 = vst.msk [vmem:[#allocation3 + $0x270] sm:$0xff] %vm4479_vm4, %v4445_v32  ;;  %v4446_v2 = vmax.f32 %v4334_v44, 0.0  ;;  %v4628_v3 = vld [vmem:[#allocation3 + $0x240] sm:$0xff] }
 0x46c   :  { %4556 = vst.msk [vmem:[#allocation3 + $0x260] sm:$0xff] %vm4479_vm4, %v4443_v5  ;;  %v4444_v16 = vmax.f32 %v4332_v61, 0.0 }
 0x46d   :  { %4559 = vst.msk [vmem:[#allocation3 + $0x278] sm:$0xff] %vm4479_vm4, %v4446_v2  ;;  %v17110_v19 = vpop.f32.mrb[0].mxu1  ;;  %v4631_v9 = vld [vmem:[#allocation3 + $0x258] sm:$0xff] }
 0x46e   :  { %4557 = vst.msk [vmem:[#allocation3 + $0x268] sm:$0xff] %vm4479_vm4, %v4444_v16  ;;  %v12685_v35 = vpop.f32.mrb[144].mxu0  ;;  %v17113_v56 = vpop.f32.mrb[1].mxu1 }
 0x46f   :  { %v4337_v8 = vadd.f32 %v17017_v59, %v12685_v35  ;;  %v4009_v45 = vpop.f32.mrb[145].mxu0  ;;  %v17116_v33 = vpop.f32.mrb[2].mxu1  ;;  %v4629_v28 = vld [vmem:[#allocation3 + $0x248] sm:$0xff] }
 0x470   :  { %v4850_v7 = vld [vmem:[#allocation3 + $0x210] ss:$2 sm:$0x3f]  ;;  %v4906_v55 = vld [vmem:[#allocation3 + $0x211] ss:$2 sm:$0x3f]  ;;  %v4335_v54 = vadd.f32 %v17017_v59, %v4009_v45 }
 0x471   :  { %v12686_v14 = vpop.f32.mrb[146].mxu0  ;;  %v4944_v27 = vmax.f32 %v4850_v7, %v4906_v55  ;;  %v4848_v48 = vld [vmem:[#allocation3 + $0x200] ss:$2 sm:$0xff]  ;;  %v4904_v4 = vld [vmem:[#allocation3 + $0x201] ss:$2 sm:$0xff]  ;;  %v4449_v51 = vmax.f32 %v4337_v8, 0.0 }
 0x472   :  { %v4338_v22 = vadd.f32 %v17017_v59, %v12686_v14  ;;  %v4012_v40 = vpop.f32.mrb[147].mxu0  ;;  %v4943_v34 = vmax.f32 %v4848_v48, %v4904_v4  ;;  %v4686_v10 = vld [vmem:[#allocation3 + $0x270] sm:$0xff]  ;;  %v4447_v36 = vmax.f32 %v4335_v54, 0.0  ;;  %v17119_v43 = vpop.f32.mrb[3].mxu1 }
 0x473   :  { %v4336_v25 = vadd.f32 %v17017_v59, %v4012_v40  ;;  %v11006_v39 = vpack.c.bf16 %v4944_v27, %v4944_v27  ;;  %v4684_v38 = vld [vmem:[#allocation3 + $0x260] sm:$0xff]  ;;  %4562 = vst.msk [vmem:[#allocation3 + $0x290] sm:$0xff] %vm4479_vm4, %v4449_v51  ;;  %v4742_v31 = vmax.f32 %v4630_v13, %v4686_v10 }
 0x474   :  { %v4450_v47 = vmax.f32 %v4338_v22, 0.0  ;;  %v11005_v17 = vpack.c.bf16 %v4943_v34, %v4943_v34  ;;  %v4687_v63 = vld [vmem:[#allocation3 + $0x278] sm:$0xff]  ;;  %4560 = vst.msk [vmem:[#allocation3 + $0x280] sm:$0xff] %vm4479_vm4, %v4447_v36  ;;  %v4740_v50 = vmax.f32 %v4628_v3, %v4684_v38 }
 0x475   :  { %v4448_v24 = vmax.f32 %v4336_v25, 0.0  ;;  %5086 = vst.msk [vmem:[%s17803_s6 + $0x44] sm:$0x7] %vm5069_vm5, %v11006_v39  ;;  %v4743_v37 = vmax.f32 %v4631_v9, %v4687_v63  ;;  %v4685_v60 = vld [vmem:[#allocation3 + $0x268] sm:$0xff]  ;;  %v17137_v29 = vpop.f32.mrb[4].mxu1 }
 0x476   :  { %4563 = vst.msk [vmem:[#allocation3 + $0x298] sm:$0xff] %vm4479_vm4, %v4450_v47  ;;  %4798 = vst.msk [vmem:[#allocation3 + $0x250] sm:$0xff] %vm4479_vm4, %v4742_v31  ;;  %v4741_v41 = vmax.f32 %v4629_v28, %v4685_v60  ;;  %v12689_v15 = vpop.f32.mrb[148].mxu0  ;;  %v17141_v44 = vpop.f32.mrb[5].mxu1 }
 0x477   :  { %5085 = vst.msk [vmem:[%s17803_s6 + $0x40] sm:$0xf] %vm5067_vm6, %v11005_v17  ;;  %v4341_v6 = vadd.f32 %v17017_v59, %v12689_v15  ;;  %v4025_v52 = vpop.f32.mrb[149].mxu0  ;;  %v17144_v2 = vpop.f32.mrb[6].mxu1 }
 0x478   :  { %4561 = vst.msk [vmem:[#allocation3 + $0x288] sm:$0xff] %vm4479_vm4, %v4448_v24  ;;  %4796 = vst.msk [vmem:[#allocation3 + $0x240] sm:$0xff] %vm4479_vm4, %v4740_v50  ;;  %v4339_v32 = vadd.f32 %v17017_v59, %v4025_v52  ;;  %v12690_v18 = vpop.f32.mrb[150].mxu0  ;;  %v17147_v8 = vpop.f32.mrb[7].mxu1 }
 0x479   :  { %4799 = vst.msk [vmem:[#allocation3 + $0x258] sm:$0xff] %vm4479_vm4, %v4743_v37  ;;  %4797 = vst.msk [vmem:[#allocation3 + $0x248] sm:$0xff] %vm4479_vm4, %v4741_v41  ;;  %v4453_v5 = vmax.f32 %v4341_v6, 0.0  ;;  %v4342_v61 = vadd.f32 %v17017_v59, %v12690_v18  ;;  %v4028_v16 = vpop.f32.mrb[151].mxu0 }
 0x47a   :  { %v4451_v35 = vmax.f32 %v4339_v32, 0.0  ;;  %v4340_v7 = vadd.f32 %v17017_v59, %v4028_v16  ;;  %v4634_v50 = vld [vmem:[#allocation3 + $0x290] sm:$0xff] }
 0x47b   :  { %4566 = vst.msk [vmem:[#allocation3 + $0x2b0] sm:$0xff] %vm4479_vm4, %v4453_v5  ;;  %v4454_v45 = vmax.f32 %v4342_v61, 0.0  ;;  %v4632_v15 = vld [vmem:[#allocation3 + $0x280] sm:$0xff] }
 0x47c   :  { %4564 = vst.msk [vmem:[#allocation3 + $0x2a0] sm:$0xff] %vm4479_vm4, %v4451_v35  ;;  %v4452_v55 = vmax.f32 %v4340_v7, 0.0 }
 0x47d   :  { %4567 = vst.msk [vmem:[#allocation3 + $0x2b8] sm:$0xff] %vm4479_vm4, %v4454_v45  ;;  %v17154_v48 = vpop.f32.mrb[8].mxu1  ;;  %v4635_v6 = vld [vmem:[#allocation3 + $0x298] sm:$0xff] }
 0x47e   :  { %4565 = vst.msk [vmem:[#allocation3 + $0x2a8] sm:$0xff] %vm4479_vm4, %v4452_v55  ;;  %v12693_v54 = vpop.f32.mrb[152].mxu0  ;;  %v17157_v40 = vpop.f32.mrb[9].mxu1 }
 0x47f   :  { %v4345_v27 = vadd.f32 %v17017_v59, %v12693_v54  ;;  %v4041_v4 = vpop.f32.mrb[153].mxu0  ;;  %v17160_v38 = vpop.f32.mrb[10].mxu1  ;;  %v4633_v5 = vld [vmem:[#allocation3 + $0x288] sm:$0xff] }
 0x480   :  { %v4854_v14 = vld [vmem:[#allocation3 + $0x250] ss:$2 sm:$0x3f]  ;;  %v4910_v51 = vld [vmem:[#allocation3 + $0x251] ss:$2 sm:$0x3f]  ;;  %v4343_v22 = vadd.f32 %v17017_v59, %v4041_v4 }
 0x481   :  { %v12694_v34 = vpop.f32.mrb[154].mxu0  ;;  %v4946_v10 = vmax.f32 %v4854_v14, %v4910_v51  ;;  %v4852_v36 = vld [vmem:[#allocation3 + $0x240] ss:$2 sm:$0xff]  ;;  %v4908_v25 = vld [vmem:[#allocation3 + $0x241] ss:$2 sm:$0xff]  ;;  %v4457_v39 = vmax.f32 %v4345_v27, 0.0 }
 0x482   :  { %v4346_v13 = vadd.f32 %v17017_v59, %v12694_v34  ;;  %v4044_v47 = vpop.f32.mrb[155].mxu0  ;;  %v4945_v17 = vmax.f32 %v4852_v36, %v4908_v25  ;;  %v4690_v31 = vld [vmem:[#allocation3 + $0x2b0] sm:$0xff]  ;;  %v4455_v3 = vmax.f32 %v4343_v22, 0.0  ;;  %v17163_v63 = vpop.f32.mrb[11].mxu1 }
 0x483   :  { %v4344_v9 = vadd.f32 %v17017_v59, %v4044_v47  ;;  %v11008_v24 = vpack.c.bf16 %v4946_v10, %v4946_v10  ;;  %v4688_v28 = vld [vmem:[#allocation3 + $0x2a0] sm:$0xff]  ;;  %4570 = vst.msk [vmem:[#allocation3 + $0x2d0] sm:$0xff] %vm4479_vm4, %v4457_v39  ;;  %v4746_v41 = vmax.f32 %v4634_v50, %v4690_v31 }
 0x484   :  { %v4458_v37 = vmax.f32 %v4346_v13, 0.0  ;;  %v11007_v60 = vpack.c.bf16 %v4945_v17, %v4945_v17  ;;  %v4691_v52 = vld [vmem:[#allocation3 + $0x2b8] sm:$0xff]  ;;  %4568 = vst.msk [vmem:[#allocation3 + $0x2c0] sm:$0xff] %vm4479_vm4, %v4455_v3  ;;  %v4744_v18 = vmax.f32 %v4632_v15, %v4688_v28 }
 0x485   :  { %v4456_v32 = vmax.f32 %v4344_v9, 0.0  ;;  %5088 = vst.msk [vmem:[%s17803_s6 + $0x4c] sm:$0x7] %vm5069_vm5, %v11008_v24  ;;  %v4747_v61 = vmax.f32 %v4635_v6, %v4691_v52  ;;  %v4689_v16 = vld [vmem:[#allocation3 + $0x2a8] sm:$0xff]  ;;  %v17181_v55 = vpop.f32.mrb[12].mxu1 }
 0x486   :  { %4571 = vst.msk [vmem:[#allocation3 + $0x2d8] sm:$0xff] %vm4479_vm4, %v4458_v37  ;;  %4802 = vst.msk [vmem:[#allocation3 + $0x290] sm:$0xff] %vm4479_vm4, %v4746_v41  ;;  %v4745_v35 = vmax.f32 %v4633_v5, %v4689_v16  ;;  %v12697_v7 = vpop.f32.mrb[156].mxu0  ;;  %v17185_v27 = vpop.f32.mrb[13].mxu1 }
 0x487   :  { %5087 = vst.msk [vmem:[%s17803_s6 + $0x48] sm:$0xf] %vm5067_vm6, %v11007_v60  ;;  %v4349_v45 = vadd.f32 %v17017_v59, %v12697_v7  ;;  %v4057_v54 = vpop.f32.mrb[157].mxu0  ;;  %v17188_v34 = vpop.f32.mrb[14].mxu1 }
 0x488   :  { %4569 = vst.msk [vmem:[#allocation3 + $0x2c8] sm:$0xff] %vm4479_vm4, %v4456_v32  ;;  %4800 = vst.msk [vmem:[#allocation3 + $0x280] sm:$0xff] %vm4479_vm4, %v4744_v18  ;;  %v4347_v14 = vadd.f32 %v17017_v59, %v4057_v54  ;;  %v12698_v4 = vpop.f32.mrb[158].mxu0  ;;  %v17191_v39 = vpop.f32.mrb[15].mxu1 }
 0x489   :  { %4803 = vst.msk [vmem:[#allocation3 + $0x298] sm:$0xff] %vm4479_vm4, %v4747_v61  ;;  %4801 = vst.msk [vmem:[#allocation3 + $0x288] sm:$0xff] %vm4479_vm4, %v4745_v35  ;;  %v4461_v51 = vmax.f32 %v4349_v45, 0.0  ;;  %v4350_v22 = vadd.f32 %v17017_v59, %v12698_v4  ;;  %v4060_v10 = vpop.f32.mrb[159].mxu0 }
 0x48a   :  { %v4459_v36 = vmax.f32 %v4347_v14, 0.0  ;;  %v4348_v25 = vadd.f32 %v17017_v59, %v4060_v10  ;;  %v4638_v14 = vld [vmem:[#allocation3 + $0x2d0] sm:$0xff] }
 0x48b   :  { %4574 = vst.msk [vmem:[#allocation3 + $0x2f0] sm:$0xff] %vm4479_vm4, %v4461_v51  ;;  %v4462_v13 = vmax.f32 %v4350_v22, 0.0 }
 0x48c   :  { %4572 = vst.msk [vmem:[#allocation3 + $0x2e0] sm:$0xff] %vm4479_vm4, %v4459_v36  ;;  %v4460_v47 = vmax.f32 %v4348_v25, 0.0  ;;  %v4636_v36 = vld [vmem:[#allocation3 + $0x2c0] sm:$0xff] }
 0x48d   :  { %4575 = vst.msk [vmem:[#allocation3 + $0x2f8] sm:$0xff] %vm4479_vm4, %v4462_v13  ;;  %v17198_v9 = vpop.f32.mrb[16].mxu1  ;;  %v4639_v25 = vld [vmem:[#allocation3 + $0x2d8] sm:$0xff] }
 0x48e   :  { %4573 = vst.msk [vmem:[#allocation3 + $0x2e8] sm:$0xff] %vm4479_vm4, %v4460_v47  ;;  %v12701_v17 = vpop.f32.mrb[160].mxu0  ;;  %v17201_v37 = vpop.f32.mrb[17].mxu1 }
 0x48f   :  { %v4353_v3 = vadd.f32 %v17017_v59, %v12701_v17  ;;  %v4073_v24 = vpop.f32.mrb[161].mxu0  ;;  %v17204_v18 = vpop.f32.mrb[18].mxu1 }
 0x490   :  { %v4858_v31 = vld [vmem:[#allocation3 + $0x290] ss:$2 sm:$0x3f]  ;;  %v4914_v50 = vld [vmem:[#allocation3 + $0x291] ss:$2 sm:$0x3f]  ;;  %v4351_v28 = vadd.f32 %v17017_v59, %v4073_v24 }
 0x491   :  { %v12702_v60 = vpop.f32.mrb[162].mxu0  ;;  %v4948_v41 = vmax.f32 %v4858_v31, %v4914_v50  ;;  %v4856_v15 = vld [vmem:[#allocation3 + $0x280] ss:$2 sm:$0xff]  ;;  %v4912_v6 = vld [vmem:[#allocation3 + $0x281] ss:$2 sm:$0xff]  ;;  %v4465_v52 = vmax.f32 %v4353_v3, 0.0 }
 0x492   :  { %v4354_v32 = vadd.f32 %v17017_v59, %v12702_v60  ;;  %v4076_v5 = vpop.f32.mrb[163].mxu0  ;;  %v4947_v61 = vmax.f32 %v4856_v15, %v4912_v6  ;;  %v4694_v16 = vld [vmem:[#allocation3 + $0x2f0] sm:$0xff]  ;;  %v4463_v35 = vmax.f32 %v4351_v28, 0.0  ;;  %v17207_v45 = vpop.f32.mrb[19].mxu1  ;;  %v4637_v31 = vld [vmem:[#allocation3 + $0x2c8] sm:$0xff] }
 0x493   :  { %v4352_v7 = vadd.f32 %v17017_v59, %v4076_v5  ;;  %v11010_v54 = vpack.c.bf16 %v4948_v41, %v4948_v41  ;;  %v4692_v4 = vld [vmem:[#allocation3 + $0x2e0] sm:$0xff]  ;;  %4578 = vst.msk [vmem:[#allocation3 + $0x310] sm:$0xff] %vm4479_vm4, %v4465_v52  ;;  %v4750_v10 = vmax.f32 %v4638_v14, %v4694_v16 }
 0x494   :  { %v4466_v51 = vmax.f32 %v4354_v32, 0.0  ;;  %v11009_v22 = vpack.c.bf16 %v4947_v61, %v4947_v61  ;;  %v4695_v13 = vld [vmem:[#allocation3 + $0x2f8] sm:$0xff]  ;;  %4576 = vst.msk [vmem:[#allocation3 + $0x300] sm:$0xff] %vm4479_vm4, %v4463_v35  ;;  %v4748_v17 = vmax.f32 %v4636_v36, %v4692_v4 }
 0x495   :  { %v4464_v47 = vmax.f32 %v4352_v7, 0.0  ;;  %5090 = vst.msk [vmem:[%s17803_s6 + $0x54] sm:$0x7] %vm5069_vm5, %v11010_v54  ;;  %v4751_v3 = vmax.f32 %v4639_v25, %v4695_v13  ;;  %v4693_v24 = vld [vmem:[#allocation3 + $0x2e8] sm:$0xff]  ;;  %v17225_v41 = vpop.f32.mrb[20].mxu1 }
 0x496   :  { %4579 = vst.msk [vmem:[#allocation3 + $0x318] sm:$0xff] %vm4479_vm4, %v4466_v51  ;;  %4806 = vst.msk [vmem:[#allocation3 + $0x2d0] sm:$0xff] %vm4479_vm4, %v4750_v10  ;;  %v4749_v50 = vmax.f32 %v4637_v31, %v4693_v24  ;;  %v12705_v28 = vpop.f32.mrb[164].mxu0  ;;  %v17229_v52 = vpop.f32.mrb[21].mxu1 }
 0x497   :  { %5089 = vst.msk [vmem:[%s17803_s6 + $0x50] sm:$0xf] %vm5067_vm6, %v11009_v22  ;;  %v4357_v60 = vadd.f32 %v17017_v59, %v12705_v28  ;;  %v4089_v15 = vpop.f32.mrb[165].mxu0  ;;  %v17232_v16 = vpop.f32.mrb[22].mxu1 }
 0x498   :  { %4577 = vst.msk [vmem:[#allocation3 + $0x308] sm:$0xff] %vm4479_vm4, %v4464_v47  ;;  %4804 = vst.msk [vmem:[#allocation3 + $0x2c0] sm:$0xff] %vm4479_vm4, %v4748_v17  ;;  %v4355_v6 = vadd.f32 %v17017_v59, %v4089_v15  ;;  %v12706_v32 = vpop.f32.mrb[166].mxu0  ;;  %v17235_v14 = vpop.f32.mrb[23].mxu1 }
 0x499   :  { %4807 = vst.msk [vmem:[#allocation3 + $0x2d8] sm:$0xff] %vm4479_vm4, %v4751_v3  ;;  %4805 = vst.msk [vmem:[#allocation3 + $0x2c8] sm:$0xff] %vm4479_vm4, %v4749_v50  ;;  %v4469_v5 = vmax.f32 %v4357_v60, 0.0  ;;  %v4358_v61 = vadd.f32 %v17017_v59, %v12706_v32  ;;  %v4092_v35 = vpop.f32.mrb[167].mxu0 }
 0x49a   :  { %v4467_v7 = vmax.f32 %v4355_v6, 0.0  ;;  %v4356_v54 = vadd.f32 %v17017_v59, %v4092_v35 }
 0x49b   :  { %4582 = vst.msk [vmem:[#allocation3 + $0x330] sm:$0xff] %vm4479_vm4, %v4469_v5  ;;  %v4470_v4 = vmax.f32 %v4358_v61, 0.0 }
 0x49c   :  { %4580 = vst.msk [vmem:[#allocation3 + $0x320] sm:$0xff] %vm4479_vm4, %v4467_v7  ;;  %v4468_v51 = vmax.f32 %v4356_v54, 0.0 }
 0x49d   :  { %4583 = vst.msk [vmem:[#allocation3 + $0x338] sm:$0xff] %vm4479_vm4, %v4470_v4  ;;  %v17242_v25 = vpop.f32.mrb[24].mxu1 }
 0x49e   :  { %4581 = vst.msk [vmem:[#allocation3 + $0x328] sm:$0xff] %vm4479_vm4, %v4468_v51  ;;  %v12709_v22 = vpop.f32.mrb[168].mxu0  ;;  %v17245_v31 = vpop.f32.mrb[25].mxu1  ;;  %v4642_v51 = vld [vmem:[#allocation3 + $0x310] sm:$0xff] }
 0x49f   :  { %v4361_v36 = vadd.f32 %v17017_v59, %v12709_v22  ;;  %v4105_v13 = vpop.f32.mrb[169].mxu0  ;;  %18035 = vst [vmem:[#allocation31_spill] sm:$0xff] %v17245_v31  ;;  %v17248_v6 = vpop.f32.mrb[26].mxu1 }
 0x4a0   :  { %v4862_v10 = vld [vmem:[#allocation3 + $0x2d0] ss:$2 sm:$0x3f]  ;;  %v4918_v47 = vld [vmem:[#allocation3 + $0x2d1] ss:$2 sm:$0x3f]  ;;  %v4359_v17 = vadd.f32 %v17017_v59, %v4105_v13 }
 0x4a1   :  { %v12710_v3 = vpop.f32.mrb[170].mxu0  ;;  %v4950_v24 = vmax.f32 %v4862_v10, %v4918_v47  ;;  %v4860_v50 = vld [vmem:[#allocation3 + $0x2c0] ss:$2 sm:$0xff]  ;;  %v4916_v28 = vld [vmem:[#allocation3 + $0x2c1] ss:$2 sm:$0xff]  ;;  %v4473_v60 = vmax.f32 %v4361_v36, 0.0 }
 0x4a2   :  { %v4362_v15 = vadd.f32 %v17017_v59, %v12710_v3  ;;  %v4108_v32 = vpop.f32.mrb[171].mxu0  ;;  %v4949_v5 = vmax.f32 %v4860_v50, %v4916_v28  ;;  %v4698_v61 = vld [vmem:[#allocation3 + $0x330] sm:$0xff]  ;;  %v4471_v35 = vmax.f32 %v4359_v17, 0.0  ;;  %v17251_v54 = vpop.f32.mrb[27].mxu1  ;;  %v4640_v47 = vld [vmem:[#allocation3 + $0x300] sm:$0xff]  ;;  %v4643_v3 = vld [vmem:[#allocation3 + $0x318] sm:$0xff] }
 0x4a3   :  { %v4360_v7 = vadd.f32 %v17017_v59, %v4108_v32  ;;  %v11012_v4 = vpack.c.bf16 %v4950_v24, %v4950_v24  ;;  %v4696_v22 = vld [vmem:[#allocation3 + $0x320] sm:$0xff]  ;;  %4586 = vst.msk [vmem:[#allocation3 + $0x350] sm:$0xff] %vm4479_vm4, %v4473_v60  ;;  %v4754_v36 = vmax.f32 %v4642_v51, %v4698_v61  ;;  %v4641_v24 = vld [vmem:[#allocation3 + $0x308] sm:$0xff] }
 0x4a4   :  { %v4474_v10 = vmax.f32 %v4362_v15, 0.0  ;;  %v11011_v13 = vpack.c.bf16 %v4949_v5, %v4949_v5  ;;  %v4699_v31 = vld [vmem:[#allocation3 + $0x338] sm:$0xff]  ;;  %4584 = vst.msk [vmem:[#allocation3 + $0x340] sm:$0xff] %vm4479_vm4, %v4471_v35  ;;  %v4752_v17 = vmax.f32 %v4640_v47, %v4696_v22 }
 0x4a5   :  { %v4472_v50 = vmax.f32 %v4360_v7, 0.0  ;;  %5092 = vst.msk [vmem:[%s17803_s6 + $0x5c] sm:$0x7] %vm5069_vm5, %v11012_v4  ;;  %v4755_v28 = vmax.f32 %v4643_v3, %v4699_v31  ;;  %v4697_v32 = vld [vmem:[#allocation3 + $0x328] sm:$0xff]  ;;  %v17269_v5 = vpop.f32.mrb[28].mxu1 }
 0x4a6   :  { %4587 = vst.msk [vmem:[#allocation3 + $0x358] sm:$0xff] %vm4479_vm4, %v4474_v10  ;;  %4810 = vst.msk [vmem:[#allocation3 + $0x310] sm:$0xff] %vm4479_vm4, %v4754_v36  ;;  %v4753_v60 = vmax.f32 %v4641_v24, %v4697_v32  ;;  %v12713_v15 = vpop.f32.mrb[172].mxu0  ;;  %v17273_v7 = vpop.f32.mrb[29].mxu1 }
 0x4a7   :  { %5091 = vst.msk [vmem:[%s17803_s6 + $0x58] sm:$0xf] %vm5067_vm6, %v11011_v13  ;;  %v4365_v31 = vadd.f32 %v17017_v59, %v12713_v15  ;;  %18036 = vst [vmem:[#allocation32_spill] sm:$0xff] %v17269_v5  ;;  %v4121_v61 = vpop.f32.mrb[173].mxu0  ;;  %v17276_v10 = vpop.f32.mrb[30].mxu1 }
 0x4a8   :  { %4585 = vst.msk [vmem:[#allocation3 + $0x348] sm:$0xff] %vm4479_vm4, %v4472_v50  ;;  %4808 = vst.msk [vmem:[#allocation3 + $0x300] sm:$0xff] %vm4479_vm4, %v4752_v17  ;;  %v4363_v35 = vadd.f32 %v17017_v59, %v4121_v61  ;;  %v12714_v4 = vpop.f32.mrb[174].mxu0  ;;  %v17279_v3 = vpop.f32.mrb[31].mxu1 }
 0x4a9   :  { %4811 = vst.msk [vmem:[#allocation3 + $0x318] sm:$0xff] %vm4479_vm4, %v4755_v28  ;;  %4809 = vst.msk [vmem:[#allocation3 + $0x308] sm:$0xff] %vm4479_vm4, %v4753_v60  ;;  %v4477_v51 = vmax.f32 %v4365_v31, 0.0  ;;  %v4366_v22 = vadd.f32 %v17017_v59, %v12714_v4  ;;  %v4124_v13 = vpop.f32.mrb[175].mxu0  ;;  %v17285_v28 = vld [vmem:[#allocation8] ss:$0 sm:$0xff] }
 0x4aa   :  { %18037 = vst [vmem:[#allocation35_spill] sm:$0xff] %v17273_v7  ;;  %18038 = vst [vmem:[#allocation36_spill] sm:$0xff] %v17276_v10  ;;  %v4475_v36 = vmax.f32 %v4363_v35, 0.0  ;;  %v4364_v47 = vadd.f32 %v17017_v59, %v4124_v13 }
 0x4ab   :  { %18039 = vst [vmem:[#allocation39_spill] sm:$0xff] %v17279_v3  ;;  %4590 = vst.msk [vmem:[#allocation3 + $0x370] sm:$0xff] %vm4479_vm4, %v4477_v51  ;;  %v4478_v50 = vmax.f32 %v4366_v22, 0.0 }
 0x4ac   :  { %4588 = vst.msk [vmem:[#allocation3 + $0x360] sm:$0xff] %vm4479_vm4, %v4475_v36  ;;  %v4476_v17 = vmax.f32 %v4364_v47, 0.0 }
 0x4ad   :  { %4591 = vst.msk [vmem:[#allocation3 + $0x378] sm:$0xff] %vm4479_vm4, %v4478_v50  ;;  %v17288_v15 = vpop.f32.mrb[32].mxu1 }
 0x4ae   :  { %4589 = vst.msk [vmem:[#allocation3 + $0x368] sm:$0xff] %vm4479_vm4, %v4476_v17  ;;  %v12873_v24 = vpop.f32.mrb[176].mxu0  ;;  %18040 = vst [vmem:[#allocation40_spill] sm:$0xff] %v17288_v15  ;;  %v17291_v35 = vpop.f32.mrb[33].mxu1 }
 0x4af   :  { %v13243_v60 = vadd.f32 %v17020_v46, %v12873_v24  ;;  %v7442_v59 = vpop.f32.mrb[177].mxu0  ;;  %18041 = vst [vmem:[#allocation43_spill] sm:$0xff] %v17291_v35  ;;  %v17295_v50 = vpop.f32.mrb[34].mxu1  ;;  %v4646_v35 = vld [vmem:[#allocation3 + $0x350] sm:$0xff] }
 0x4b0   :  { %v4866_v32 = vld [vmem:[#allocation3 + $0x310] ss:$2 sm:$0x3f]  ;;  %v4922_v31 = vld [vmem:[#allocation3 + $0x311] ss:$2 sm:$0x3f]  ;;  %v13244_v61 = vadd.f32 %v17023_v21, %v7442_v59 }
 0x4b1   :  { %v12874_v4 = vpop.f32.mrb[178].mxu0  ;;  %v4952_v51 = vmax.f32 %v4866_v32, %v4922_v31  ;;  %v4864_v22 = vld [vmem:[#allocation3 + $0x300] ss:$2 sm:$0xff]  ;;  %v4920_v13 = vld [vmem:[#allocation3 + $0x301] ss:$2 sm:$0xff]  ;;  %v9286_v36 = vadd.f32 %v13243_v60, %v17285_v28  ;;  %18042 = vst [vmem:[#allocation44_spill] sm:$0xff] %v17295_v50 }
 0x4b2   :  { %v13245_v47 = vadd.f32 %v17026_v0, %v12874_v4  ;;  %v7445_v17 = vpop.f32.mrb[179].mxu0  ;;  %v4951_v46 = vmax.f32 %v4864_v22, %v4920_v13  ;;  %v4702_v24 = vld [vmem:[#allocation3 + $0x370] sm:$0xff]  ;;  %v9284_v15 = vadd.f32 %v13244_v61, %v17285_v28  ;;  %v17299_v21 = vpop.f32.mrb[35].mxu1  ;;  %v4644_v0 = vld [vmem:[#allocation3 + $0x340] sm:$0xff]  ;;  %v4647_v4 = vld [vmem:[#allocation3 + $0x358] sm:$0xff] }
 0x4b3   :  { %v13246_v3 = vadd.f32 %v17029_v11, %v7445_v17  ;;  %v11014_v59 = vpack.c.bf16 %v4952_v51, %v4952_v51  ;;  %v4700_v32 = vld [vmem:[#allocation3 + $0x360] sm:$0xff]  ;;  %v9398_v31 = vmax.f32 %v9286_v36, 0.0  ;;  %v4758_v7 = vmax.f32 %v4646_v35, %v4702_v24  ;;  %v4645_v61 = vld [vmem:[#allocation3 + $0x348] sm:$0xff] }
 0x4b4   :  { %v9287_v10 = vadd.f32 %v13245_v47, %v17285_v28  ;;  %v11013_v60 = vpack.c.bf16 %v4951_v46, %v4951_v46  ;;  %v4703_v50 = vld [vmem:[#allocation3 + $0x378] sm:$0xff]  ;;  %v9396_v5 = vmax.f32 %v9284_v15, 0.0  ;;  %v4756_v11 = vmax.f32 %v4644_v0, %v4700_v32 }
 0x4b5   :  { %v9285_v22 = vadd.f32 %v13246_v3, %v17285_v28  ;;  %5094 = vst.msk [vmem:[%s17803_s6 + $0x64] sm:$0x7] %vm5069_vm5, %v11014_v59  ;;  %v4759_v51 = vmax.f32 %v4647_v4, %v4703_v50  ;;  %v4701_v13 = vld [vmem:[#allocation3 + $0x368] sm:$0xff]  ;;  %v17318_v47 = vpop.f32.mrb[36].mxu1 }
 0x4b6   :  { %9510 = vst.msk [vmem:[#allocation3 + $0x10] sm:$0xff] %vm4479_vm4, %v9398_v31  ;;  %v9399_v36 = vmax.f32 %v9287_v10, 0.0  ;;  %4814 = vst.msk [vmem:[#allocation3 + $0x350] sm:$0xff] %vm4479_vm4, %v4758_v7  ;;  %v4757_v3 = vmax.f32 %v4645_v61, %v4701_v13  ;;  %v12877_v35 = vpop.f32.mrb[180].mxu0 }
 0x4b7   :  { %5093 = vst.msk [vmem:[%s17803_s6 + $0x60] sm:$0xf] %vm5067_vm6, %v11013_v60  ;;  %v9397_v15 = vmax.f32 %v9285_v22, 0.0  ;;  %v13247_v10 = vadd.f32 %v17049_v53, %v12877_v35  ;;  %v7458_v50 = vpop.f32.mrb[181].mxu0 }
 0x4b8   :  { %9508 = vst.msk [vmem:[#allocation3] sm:$0xff] %vm4479_vm4, %v9396_v5  ;;  %4812 = vst.msk [vmem:[#allocation3 + $0x340] sm:$0xff] %vm4479_vm4, %v4756_v11  ;;  %v13248_v7 = vadd.f32 %v17053_v62, %v7458_v50  ;;  %v17323_v5 = vpop.f32.mrb[37].mxu1  ;;  %v12878_v17 = vpop.f32.mrb[182].mxu0 }
 0x4b9   :  { %4815 = vst.msk [vmem:[#allocation3 + $0x358] sm:$0xff] %vm4479_vm4, %v4759_v51  ;;  %9511 = vst.msk [vmem:[#allocation3 + $0x18] sm:$0xff] %vm4479_vm4, %v9399_v36  ;;  %v9290_v46 = vadd.f32 %v13247_v10, %v17285_v28  ;;  %v13249_v24 = vadd.f32 %v17056_v42, %v12878_v17  ;;  %v17327_v59 = vpop.f32.mrb[38].mxu1  ;;  %v7461_v32 = vpop.f32.mrb[183].mxu0 }
 0x4ba   :  { %4813 = vst.msk [vmem:[#allocation3 + $0x348] sm:$0xff] %vm4479_vm4, %v4757_v3  ;;  %9509 = vst.msk [vmem:[#allocation3 + $0x8] sm:$0xff] %vm4479_vm4, %v9397_v15  ;;  %v9288_v53 = vadd.f32 %v13248_v7, %v17285_v28  ;;  %v13250_v31 = vadd.f32 %v17059_v58, %v7461_v32  ;;  %v17331_v60 = vpop.f32.mrb[39].mxu1 }
 0x4bb   :  { %v9402_v0 = vmax.f32 %v9290_v46, 0.0  ;;  %v9291_v4 = vadd.f32 %v13249_v24, %v17285_v28 }
 0x4bc   :  { %v9400_v62 = vmax.f32 %v9288_v53, 0.0  ;;  %v9289_v22 = vadd.f32 %v13250_v31, %v17285_v28 }
 0x4bd   :  { %9514 = vst.msk [vmem:[#allocation3 + $0x30] sm:$0xff] %vm4479_vm4, %v9402_v0  ;;  %v9403_v11 = vmax.f32 %v9291_v4, 0.0  ;;  %v17339_v13 = vpop.f32.mrb[40].mxu1 }
 0x4be   :  { %9512 = vst.msk [vmem:[#allocation3 + $0x20] sm:$0xff] %vm4479_vm4, %v9400_v62  ;;  %v9401_v42 = vmax.f32 %v9289_v22, 0.0  ;;  %v12881_v61 = vpop.f32.mrb[184].mxu0  ;;  %v17343_v35 = vpop.f32.mrb[41].mxu1 }
 0x4bf   :  { %9515 = vst.msk [vmem:[#allocation3 + $0x38] sm:$0xff] %vm4479_vm4, %v9403_v11  ;;  %v13251_v58 = vadd.f32 %v17066_v30, %v12881_v61  ;;  %v7474_v36 = vpop.f32.mrb[185].mxu0  ;;  %v17347_v32 = vpop.f32.mrb[42].mxu1 }
 0x4c0   :  { %v4870_v51 = vld [vmem:[#allocation3 + $0x350] ss:$2 sm:$0x3f]  ;;  %v4926_v3 = vld [vmem:[#allocation3 + $0x351] ss:$2 sm:$0x3f]  ;;  %v13252_v15 = vadd.f32 %v17069_v49, %v7474_v36 }
 0x4c1   :  { %9513 = vst.msk [vmem:[#allocation3 + $0x28] sm:$0xff] %vm4479_vm4, %v9401_v42  ;;  %v12882_v10 = vpop.f32.mrb[186].mxu0  ;;  %v4954_v50 = vmax.f32 %v4870_v51, %v4926_v3  ;;  %v4868_v7 = vld [vmem:[#allocation3 + $0x340] ss:$2 sm:$0xff]  ;;  %v4924_v17 = vld [vmem:[#allocation3 + $0x341] ss:$2 sm:$0xff]  ;;  %v9294_v46 = vadd.f32 %v13251_v58, %v17285_v28 }
 0x4c2   :  { %v13253_v24 = vadd.f32 %v17072_v57, %v12882_v10  ;;  %v7477_v30 = vpop.f32.mrb[187].mxu0  ;;  %v4953_v53 = vmax.f32 %v4868_v7, %v4924_v17  ;;  %v9292_v31 = vadd.f32 %v13252_v15, %v17285_v28  ;;  %v17351_v4 = vpop.f32.mrb[43].mxu1  ;;  %v9622_v42 = vld [vmem:[#allocation3 + $0x10] sm:$0xff]  ;;  %v9620_v36 = vld [vmem:[#allocation3] sm:$0xff]  ;;  %v9623_v10 = vld [vmem:[#allocation3 + $0x18] sm:$0xff] }
 0x4c3   :  { %v13254_v0 = vadd.f32 %v17075_v26, %v7477_v30  ;;  %v11016_v49 = vpack.c.bf16 %v4954_v50, %v4954_v50  ;;  %v9406_v62 = vmax.f32 %v9294_v46, 0.0 }
 0x4c4   :  { %v9295_v22 = vadd.f32 %v13253_v24, %v17285_v28  ;;  %v11015_v11 = vpack.c.bf16 %v4953_v53, %v4953_v53  ;;  %v9678_v61 = vld [vmem:[#allocation3 + $0x30] sm:$0xff]  ;;  %v9404_v51 = vmax.f32 %v9292_v31, 0.0  ;;  %v9621_v24 = vld [vmem:[#allocation3 + $0x8] sm:$0xff] }
 0x4c5   :  { %v9293_v57 = vadd.f32 %v13254_v0, %v17285_v28  ;;  %5096 = vst.msk [vmem:[%s17803_s6 + $0x6c] sm:$0x7] %vm5069_vm5, %v11016_v49  ;;  %v9734_v58 = vmax.f32 %v9622_v42, %v9678_v61  ;;  %v9676_v26 = vld [vmem:[#allocation3 + $0x20] sm:$0xff]  ;;  %v17368_v31 = vpop.f32.mrb[44].mxu1 }
 0x4c6   :  { %9518 = vst.msk [vmem:[#allocation3 + $0x50] sm:$0xff] %vm4479_vm4, %v9406_v62  ;;  %v9407_v3 = vmax.f32 %v9295_v22, 0.0  ;;  %v9732_v15 = vmax.f32 %v9620_v36, %v9676_v26  ;;  %v9679_v50 = vld [vmem:[#allocation3 + $0x38] sm:$0xff]  ;;  %9516 = vst.msk [vmem:[#allocation3 + $0x40] sm:$0xff] %vm4479_vm4, %v9404_v51  ;;  %v12885_v17 = vpop.f32.mrb[188].mxu0  ;;  %v17373_v22 = vpop.f32.mrb[45].mxu1 }
 0x4c7   :  { %5095 = vst.msk [vmem:[%s17803_s6 + $0x68] sm:$0xf] %vm5067_vm6, %v11015_v11  ;;  %v9405_v7 = vmax.f32 %v9293_v57, 0.0  ;;  %v9735_v46 = vmax.f32 %v9623_v10, %v9679_v50  ;;  %v13255_v53 = vadd.f32 %v17093_v23, %v12885_v17  ;;  %v7490_v0 = vpop.f32.mrb[189].mxu0  ;;  %v17378_v23 = vpop.f32.mrb[46].mxu1 }
 0x4c8   :  { %9790 = vst.msk [vmem:[#allocation3 + $0x10] sm:$0xff] %vm4479_vm4, %v9734_v58  ;;  %v9677_v30 = vld [vmem:[#allocation3 + $0x28] sm:$0xff]  ;;  %9519 = vst.msk [vmem:[#allocation3 + $0x58] sm:$0xff] %vm4479_vm4, %v9407_v3  ;;  %v13256_v62 = vadd.f32 %v17097_v20, %v7490_v0  ;;  %v12886_v11 = vpop.f32.mrb[190].mxu0  ;;  %v17383_v36 = vpop.f32.mrb[47].mxu1 }
 0x4c9   :  { %9788 = vst.msk [vmem:[#allocation3] sm:$0xff] %vm4479_vm4, %v9732_v15  ;;  %v9733_v49 = vmax.f32 %v9621_v24, %v9677_v30  ;;  %9517 = vst.msk [vmem:[#allocation3 + $0x48] sm:$0xff] %vm4479_vm4, %v9405_v7  ;;  %v9298_v42 = vadd.f32 %v13255_v53, %v17285_v28  ;;  %v13257_v61 = vadd.f32 %v17100_v1, %v12886_v11  ;;  %v7493_v51 = vpop.f32.mrb[191].mxu0 }
 0x4ca   :  { %9791 = vst.msk [vmem:[#allocation3 + $0x18] sm:$0xff] %vm4479_vm4, %v9735_v46  ;;  %v9296_v57 = vadd.f32 %v13256_v62, %v17285_v28  ;;  %v13258_v58 = vadd.f32 %v17103_v12, %v7493_v51 }
 0x4cb   :  { %9789 = vst.msk [vmem:[#allocation3 + $0x8] sm:$0xff] %vm4479_vm4, %v9733_v49  ;;  %v9410_v20 = vmax.f32 %v9298_v42, 0.0  ;;  %v9299_v26 = vadd.f32 %v13257_v61, %v17285_v28 }
 0x4cc   :  { %v9408_v3 = vmax.f32 %v9296_v57, 0.0  ;;  %v9297_v15 = vadd.f32 %v13258_v58, %v17285_v28 }
 0x4cd   :  { %9522 = vst.msk [vmem:[#allocation3 + $0x70] sm:$0xff] %vm4479_vm4, %v9410_v20  ;;  %v9411_v1 = vmax.f32 %v9299_v26, 0.0  ;;  %v13185_v12 = vpop.f32.mrb[192].mxu1 }
 0x4ce   :  { %9520 = vst.msk [vmem:[#allocation3 + $0x60] sm:$0xff] %vm4479_vm4, %v9408_v3  ;;  %v9409_v10 = vmax.f32 %v9297_v15, 0.0  ;;  %v12889_v50 = vpop.f32.mrb[192].mxu0  ;;  %v9350_v30 = vadd.f32 %v13185_v12, %v17285_v28  ;;  %v8974_v42 = vpop.f32.mrb[193].mxu1  ;;  %v9626_v12 = vld [vmem:[#allocation3 + $0x50] sm:$0xff] }
 0x4cf   :  { %9523 = vst.msk [vmem:[#allocation3 + $0x78] sm:$0xff] %vm4479_vm4, %v9411_v1  ;;  %v13259_v7 = vadd.f32 %v17110_v19, %v12889_v50  ;;  %v7506_v17 = vpop.f32.mrb[193].mxu0  ;;  %v9348_v58 = vadd.f32 %v17285_v28, %v8974_v42  ;;  %v13186_v20 = vpop.f32.mrb[194].mxu1 }
 0x4d0   :  { %9521 = vst.msk [vmem:[#allocation3 + $0x68] sm:$0xff] %vm4479_vm4, %v9409_v10  ;;  %v13260_v53 = vadd.f32 %v17113_v56, %v7506_v17  ;;  %v12890_v61 = vpop.f32.mrb[194].mxu0  ;;  %v9462_v57 = vmax.f32 %v9350_v30, 0.0  ;;  %v9351_v56 = vadd.f32 %v13186_v20, %v17285_v28  ;;  %v8977_v10 = vpop.f32.mrb[195].mxu1 }
 0x4d1   :  { %v9845_v46 = vld [vmem:[#allocation3 + $0x10] ss:$2 sm:$0x3f]  ;;  %v9873_v24 = vld [vmem:[#allocation3 + $0x11] ss:$2 sm:$0x3f]  ;;  %v9302_v11 = vadd.f32 %v13259_v7, %v17285_v28  ;;  %v13261_v1 = vadd.f32 %v17116_v33, %v12890_v61 }
 0x4d2   :  { %v9901_v0 = vmax.f32 %v9845_v46, %v9873_v24  ;;  %v9844_v49 = vld [vmem:[#allocation3] ss:$2 sm:$0xff]  ;;  %v9872_v62 = vld [vmem:[#allocation3 + $0x1] ss:$2 sm:$0xff]  ;;  %v9300_v19 = vadd.f32 %v13260_v53, %v17285_v28  ;;  %v7509_v26 = vpop.f32.mrb[195].mxu0  ;;  %9574 = vst.msk [vmem:[#allocation3 + $0x210] sm:$0xff] %vm4479_vm4, %v9462_v57 }
 0x4d3   :  { %v9900_v51 = vmax.f32 %v9844_v49, %v9872_v62  ;;  %v9414_v15 = vmax.f32 %v9302_v11, 0.0  ;;  %v9460_v46 = vmax.f32 %v9348_v58, 0.0  ;;  %v13262_v24 = vadd.f32 %v17119_v43, %v7509_v26  ;;  %v9624_v53 = vld [vmem:[#allocation3 + $0x40] sm:$0xff]  ;;  %v9627_v11 = vld [vmem:[#allocation3 + $0x58] sm:$0xff] }
 0x4d4   :  { %v11018_v3 = vpack.c.bf16 %v9901_v0, %v9901_v0  ;;  %v9682_v7 = vld [vmem:[#allocation3 + $0x70] sm:$0xff]  ;;  %v9412_v17 = vmax.f32 %v9300_v19, 0.0  ;;  %v9303_v0 = vadd.f32 %v13261_v1, %v17285_v28  ;;  %v9463_v49 = vmax.f32 %v9351_v56, 0.0  ;;  %v9625_v19 = vld [vmem:[#allocation3 + $0x48] sm:$0xff] }
 0x4d5   :  { %v11017_v50 = vpack.c.bf16 %v9900_v51, %v9900_v51  ;;  %v9738_v30 = vmax.f32 %v9626_v12, %v9682_v7  ;;  %v9680_v33 = vld [vmem:[#allocation3 + $0x60] sm:$0xff]  ;;  %9526 = vst.msk [vmem:[#allocation3 + $0x90] sm:$0xff] %vm4479_vm4, %v9414_v15  ;;  %v9349_v62 = vadd.f32 %v17285_v28, %v8977_v10  ;;  %9572 = vst.msk [vmem:[#allocation3 + $0x200] sm:$0xff] %vm4479_vm4, %v9460_v46  ;;  %v13189_v15 = vpop.f32.mrb[196].mxu1 }
 0x4d6   :  { %10962 = vst.msk [vmem:[%s17803_s6 + $0x74] sm:$0x7] %vm5069_vm5, %v11018_v3  ;;  %v9736_v43 = vmax.f32 %v9624_v53, %v9680_v33  ;;  %v9683_v42 = vld [vmem:[#allocation3 + $0x78] sm:$0xff]  ;;  %v9301_v61 = vadd.f32 %v13262_v24, %v17285_v28  ;;  %v12893_v51 = vpop.f32.mrb[196].mxu0  ;;  %v9415_v20 = vmax.f32 %v9303_v0, 0.0  ;;  %v8990_v7 = vpop.f32.mrb[197].mxu1 }
 0x4d7   :  { %10961 = vst.msk [vmem:[%s17803_s6 + $0x70] sm:$0xf] %vm5067_vm6, %v11017_v50  ;;  %v9739_v57 = vmax.f32 %v9627_v11, %v9683_v42  ;;  %v9681_v58 = vld [vmem:[#allocation3 + $0x68] sm:$0xff]  ;;  %v9461_v26 = vmax.f32 %v9349_v62, 0.0  ;;  %v13263_v3 = vadd.f32 %v17137_v29, %v12893_v51  ;;  %v7522_v1 = vpop.f32.mrb[197].mxu0  ;;  %v9354_v50 = vadd.f32 %v13189_v15, %v17285_v28 }
 0x4d8   :  { %9524 = vst.msk [vmem:[#allocation3 + $0x80] sm:$0xff] %vm4479_vm4, %v9412_v17  ;;  %9794 = vst.msk [vmem:[#allocation3 + $0x50] sm:$0xff] %vm4479_vm4, %v9738_v30  ;;  %v9737_v56 = vmax.f32 %v9625_v19, %v9681_v58  ;;  %v9413_v10 = vmax.f32 %v9301_v61, 0.0  ;;  %v13264_v12 = vadd.f32 %v17141_v44, %v7522_v1  ;;  %v12894_v17 = vpop.f32.mrb[198].mxu0  ;;  %v9352_v46 = vadd.f32 %v17285_v28, %v8990_v7  ;;  %v13190_v30 = vpop.f32.mrb[198].mxu1 }
 0x4d9   :  { %9575 = vst.msk [vmem:[#allocation3 + $0x218] sm:$0xff] %vm4479_vm4, %v9463_v49  ;;  %9792 = vst.msk [vmem:[#allocation3 + $0x40] sm:$0xff] %vm4479_vm4, %v9736_v43  ;;  %v9306_v29 = vadd.f32 %v13263_v3, %v17285_v28  ;;  %v13265_v24 = vadd.f32 %v17144_v2, %v12894_v17  ;;  %v7525_v53 = vpop.f32.mrb[199].mxu0  ;;  %v9466_v44 = vmax.f32 %v9354_v50, 0.0  ;;  %v9355_v0 = vadd.f32 %v13190_v30, %v17285_v28  ;;  %v8993_v62 = vpop.f32.mrb[199].mxu1 }
 0x4da   :  { %9795 = vst.msk [vmem:[#allocation3 + $0x58] sm:$0xff] %vm4479_vm4, %v9739_v57  ;;  %9527 = vst.msk [vmem:[#allocation3 + $0x98] sm:$0xff] %vm4479_vm4, %v9415_v20  ;;  %v9304_v33 = vadd.f32 %v13264_v12, %v17285_v28  ;;  %v13266_v49 = vadd.f32 %v17147_v8, %v7525_v53  ;;  %v9464_v11 = vmax.f32 %v9352_v46, 0.0  ;;  %v9353_v2 = vadd.f32 %v17285_v28, %v8993_v62  ;;  %v9654_v53 = vld [vmem:[#allocation3 + $0x210] sm:$0xff] }
 0x4db   :  { %9573 = vst.msk [vmem:[#allocation3 + $0x208] sm:$0xff] %vm4479_vm4, %v9461_v26  ;;  %9793 = vst.msk [vmem:[#allocation3 + $0x48] sm:$0xff] %vm4479_vm4, %v9737_v56  ;;  %v9418_v43 = vmax.f32 %v9306_v29, 0.0  ;;  %v9307_v42 = vadd.f32 %v13265_v24, %v17285_v28  ;;  %v9467_v51 = vmax.f32 %v9355_v0, 0.0 }
 0x4dc   :  { %9525 = vst.msk [vmem:[#allocation3 + $0x88] sm:$0xff] %vm4479_vm4, %v9413_v10  ;;  %9578 = vst.msk [vmem:[#allocation3 + $0x230] sm:$0xff] %vm4479_vm4, %v9466_v44  ;;  %v9416_v61 = vmax.f32 %v9304_v33, 0.0  ;;  %v9305_v57 = vadd.f32 %v13266_v49, %v17285_v28  ;;  %v9465_v58 = vmax.f32 %v9353_v2, 0.0  ;;  %v9630_v30 = vld [vmem:[#allocation3 + $0x90] sm:$0xff] }
 0x4dd   :  { %9530 = vst.msk [vmem:[#allocation3 + $0xb0] sm:$0xff] %vm4479_vm4, %v9418_v43  ;;  %9576 = vst.msk [vmem:[#allocation3 + $0x220] sm:$0xff] %vm4479_vm4, %v9464_v11  ;;  %v9419_v19 = vmax.f32 %v9307_v42, 0.0  ;;  %v13193_v3 = vpop.f32.mrb[200].mxu1 }
 0x4de   :  { %9528 = vst.msk [vmem:[#allocation3 + $0xa0] sm:$0xff] %vm4479_vm4, %v9416_v61  ;;  %9579 = vst.msk [vmem:[#allocation3 + $0x238] sm:$0xff] %vm4479_vm4, %v9467_v51  ;;  %v9417_v8 = vmax.f32 %v9305_v57, 0.0  ;;  %v12897_v20 = vpop.f32.mrb[200].mxu0  ;;  %v9358_v10 = vadd.f32 %v13193_v3, %v17285_v28  ;;  %v9006_v46 = vpop.f32.mrb[201].mxu1 }
 0x4df   :  { %9531 = vst.msk [vmem:[#allocation3 + $0xb8] sm:$0xff] %vm4479_vm4, %v9419_v19  ;;  %9577 = vst.msk [vmem:[#allocation3 + $0x228] sm:$0xff] %vm4479_vm4, %v9465_v58  ;;  %v13267_v26 = vadd.f32 %v17154_v48, %v12897_v20  ;;  %v7538_v15 = vpop.f32.mrb[201].mxu0  ;;  %v9356_v33 = vadd.f32 %v17285_v28, %v9006_v46  ;;  %v13194_v49 = vpop.f32.mrb[202].mxu1  ;;  %v9628_v11 = vld [vmem:[#allocation3 + $0x80] sm:$0xff] }
 0x4e0   :  { %9529 = vst.msk [vmem:[#allocation3 + $0xa8] sm:$0xff] %vm4479_vm4, %v9417_v8  ;;  %v13268_v50 = vadd.f32 %v17157_v40, %v7538_v15  ;;  %v9470_v48 = vmax.f32 %v9358_v10, 0.0  ;;  %v12898_v0 = vpop.f32.mrb[202].mxu0  ;;  %v9652_v40 = vld [vmem:[#allocation3 + $0x200] sm:$0xff]  ;;  %v9359_v61 = vadd.f32 %v13194_v49, %v17285_v28  ;;  %v9009_v57 = vpop.f32.mrb[203].mxu1 }
 0x4e1   :  { %v9847_v1 = vld [vmem:[#allocation3 + $0x50] ss:$2 sm:$0x3f]  ;;  %v9875_v56 = vld [vmem:[#allocation3 + $0x51] ss:$2 sm:$0x3f]  ;;  %v9310_v29 = vadd.f32 %v13267_v26, %v17285_v28  ;;  %v13269_v2 = vadd.f32 %v17160_v38, %v12898_v0 }
 0x4e2   :  { %v9903_v12 = vmax.f32 %v9847_v1, %v9875_v56  ;;  %v9846_v7 = vld [vmem:[#allocation3 + $0x40] ss:$2 sm:$0xff]  ;;  %v9874_v17 = vld [vmem:[#allocation3 + $0x41] ss:$2 sm:$0xff]  ;;  %v9308_v44 = vadd.f32 %v13268_v50, %v17285_v28  ;;  %v7541_v51 = vpop.f32.mrb[203].mxu0  ;;  %v9655_v26 = vld [vmem:[#allocation3 + $0x218] sm:$0xff] }
 0x4e3   :  { %v9902_v24 = vmax.f32 %v9846_v7, %v9874_v17  ;;  %v9710_v43 = vld [vmem:[#allocation3 + $0x230] sm:$0xff]  ;;  %v9422_v42 = vmax.f32 %v9310_v29, 0.0  ;;  %9582 = vst.msk [vmem:[#allocation3 + $0x250] sm:$0xff] %vm4479_vm4, %v9470_v48  ;;  %v9468_v15 = vmax.f32 %v9356_v33, 0.0  ;;  %v9631_v10 = vld [vmem:[#allocation3 + $0x98] sm:$0xff]  ;;  %v9471_v7 = vmax.f32 %v9359_v61, 0.0 }
 0x4e4   :  { %v11020_v62 = vpack.c.bf16 %v9903_v12, %v9903_v12  ;;  %v9686_v58 = vld [vmem:[#allocation3 + $0xb0] sm:$0xff]  ;;  %v9766_v8 = vmax.f32 %v9654_v53, %v9710_v43  ;;  %v9708_v20 = vld [vmem:[#allocation3 + $0x220] sm:$0xff]  ;;  %v9420_v3 = vmax.f32 %v9308_v44, 0.0  ;;  %v9311_v12 = vadd.f32 %v13269_v2, %v17285_v28  ;;  %v9629_v0 = vld [vmem:[#allocation3 + $0x88] sm:$0xff] }
 0x4e5   :  { %v11019_v19 = vpack.c.bf16 %v9902_v24, %v9902_v24  ;;  %v9742_v1 = vmax.f32 %v9630_v30, %v9686_v58  ;;  %v9684_v38 = vld [vmem:[#allocation3 + $0xa0] sm:$0xff]  ;;  %v9764_v56 = vmax.f32 %v9652_v40, %v9708_v20  ;;  %v9711_v50 = vld [vmem:[#allocation3 + $0x238] sm:$0xff]  ;;  %9534 = vst.msk [vmem:[#allocation3 + $0xd0] sm:$0xff] %vm4479_vm4, %v9422_v42  ;;  %v9653_v24 = vld [vmem:[#allocation3 + $0x208] sm:$0xff]  ;;  %v13270_v53 = vadd.f32 %v17163_v63, %v7541_v51  ;;  %v13197_v40 = vpop.f32.mrb[204].mxu1 }
 0x4e6   :  { %10964 = vst.msk [vmem:[%s17803_s6 + $0x7c] sm:$0x7] %vm5069_vm5, %v11020_v62  ;;  %v9740_v17 = vmax.f32 %v9628_v11, %v9684_v38  ;;  %v9687_v29 = vld [vmem:[#allocation3 + $0xb8] sm:$0xff]  ;;  %v9767_v46 = vmax.f32 %v9655_v26, %v9711_v50  ;;  %v9709_v30 = vld [vmem:[#allocation3 + $0x228] sm:$0xff]  ;;  %v9357_v48 = vadd.f32 %v17285_v28, %v9009_v57  ;;  %v12901_v44 = vpop.f32.mrb[204].mxu0  ;;  %v9423_v43 = vmax.f32 %v9311_v12, 0.0 }
 0x4e7   :  { %10963 = vst.msk [vmem:[%s17803_s6 + $0x78] sm:$0xf] %vm5067_vm6, %v11019_v19  ;;  %v9743_v33 = vmax.f32 %v9631_v10, %v9687_v29  ;;  %v9685_v49 = vld [vmem:[#allocation3 + $0xa8] sm:$0xff]  ;;  %v9765_v62 = vmax.f32 %v9653_v24, %v9709_v30  ;;  %v13271_v11 = vadd.f32 %v17181_v55, %v12901_v44  ;;  %v7554_v42 = vpop.f32.mrb[205].mxu0  ;;  %v9309_v2 = vadd.f32 %v13270_v53, %v17285_v28  ;;  %v9022_v57 = vpop.f32.mrb[205].mxu1 }
 0x4e8   :  { %9822 = vst.msk [vmem:[#allocation3 + $0x210] sm:$0xff] %vm4479_vm4, %v9766_v8  ;;  %9532 = vst.msk [vmem:[#allocation3 + $0xc0] sm:$0xff] %vm4479_vm4, %v9420_v3  ;;  %v9741_v63 = vmax.f32 %v9629_v0, %v9685_v49  ;;  %v9469_v61 = vmax.f32 %v9357_v48, 0.0  ;;  %v9362_v51 = vadd.f32 %v13197_v40, %v17285_v28  ;;  %v12902_v19 = vpop.f32.mrb[206].mxu0  ;;  %v13272_v58 = vadd.f32 %v17185_v27, %v7554_v42  ;;  %v13198_v26 = vpop.f32.mrb[206].mxu1 }
 0x4e9   :  { %9580 = vst.msk [vmem:[#allocation3 + $0x240] sm:$0xff] %vm4479_vm4, %v9468_v15  ;;  %9798 = vst.msk [vmem:[#allocation3 + $0x90] sm:$0xff] %vm4479_vm4, %v9742_v1  ;;  %v9314_v55 = vadd.f32 %v13271_v11, %v17285_v28  ;;  %v9360_v8 = vadd.f32 %v17285_v28, %v9022_v57  ;;  %v13273_v20 = vadd.f32 %v17188_v34, %v12902_v19  ;;  %v7557_v3 = vpop.f32.mrb[207].mxu0  ;;  %v9421_v15 = vmax.f32 %v9309_v2, 0.0  ;;  %v9025_v10 = vpop.f32.mrb[207].mxu1 }
 0x4ea   :  { %9820 = vst.msk [vmem:[#allocation3 + $0x200] sm:$0xff] %vm4479_vm4, %v9764_v56  ;;  %9583 = vst.msk [vmem:[#allocation3 + $0x258] sm:$0xff] %vm4479_vm4, %v9471_v7  ;;  %v9474_v1 = vmax.f32 %v9362_v51, 0.0  ;;  %v9363_v38 = vadd.f32 %v13198_v26, %v17285_v28  ;;  %v13274_v56 = vadd.f32 %v17191_v39, %v7557_v3  ;;  %v9312_v27 = vadd.f32 %v13272_v58, %v17285_v28 }
 0x4eb   :  { %9796 = vst.msk [vmem:[#allocation3 + $0x80] sm:$0xff] %vm4479_vm4, %v9740_v17  ;;  %9823 = vst.msk [vmem:[#allocation3 + $0x218] sm:$0xff] %vm4479_vm4, %v9767_v46  ;;  %v9426_v50 = vmax.f32 %v9314_v55, 0.0  ;;  %v9472_v12 = vmax.f32 %v9360_v8, 0.0  ;;  %v9315_v7 = vadd.f32 %v13273_v20, %v17285_v28  ;;  %v9361_v29 = vadd.f32 %v17285_v28, %v9025_v10  ;;  %v9658_v8 = vld [vmem:[#allocation3 + $0x250] sm:$0xff] }
 0x4ec   :  { %9799 = vst.msk [vmem:[#allocation3 + $0x98] sm:$0xff] %vm4479_vm4, %v9743_v33  ;;  %9821 = vst.msk [vmem:[#allocation3 + $0x208] sm:$0xff] %vm4479_vm4, %v9765_v62  ;;  %v9475_v34 = vmax.f32 %v9363_v38, 0.0  ;;  %v9313_v17 = vadd.f32 %v13274_v56, %v17285_v28  ;;  %v9424_v46 = vmax.f32 %v9312_v27, 0.0  ;;  %v9634_v58 = vld [vmem:[#allocation3 + $0xd0] sm:$0xff] }
 0x4ed   :  { %9535 = vst.msk [vmem:[#allocation3 + $0xd8] sm:$0xff] %vm4479_vm4, %v9423_v43  ;;  %9797 = vst.msk [vmem:[#allocation3 + $0x88] sm:$0xff] %vm4479_vm4, %v9741_v63  ;;  %v9427_v39 = vmax.f32 %v9315_v7, 0.0  ;;  %v9473_v30 = vmax.f32 %v9361_v29, 0.0  ;;  %v13201_v57 = vpop.f32.mrb[208].mxu1 }
 0x4ee   :  { %9581 = vst.msk [vmem:[#allocation3 + $0x248] sm:$0xff] %vm4479_vm4, %v9469_v61  ;;  %9533 = vst.msk [vmem:[#allocation3 + $0xc8] sm:$0xff] %vm4479_vm4, %v9421_v15  ;;  %v9425_v24 = vmax.f32 %v9313_v17, 0.0  ;;  %v12905_v53 = vpop.f32.mrb[208].mxu0  ;;  %v9366_v3 = vadd.f32 %v13201_v57, %v17285_v28  ;;  %v9038_v15 = vpop.f32.mrb[209].mxu1 }
 0x4ef   :  { %9586 = vst.msk [vmem:[#allocation3 + $0x270] sm:$0xff] %vm4479_vm4, %v9474_v1  ;;  %9538 = vst.msk [vmem:[#allocation3 + $0xf0] sm:$0xff] %vm4479_vm4, %v9426_v50  ;;  %v13275_v33 = vadd.f32 %v17198_v9, %v12905_v53  ;;  %v7570_v19 = vpop.f32.mrb[209].mxu0  ;;  %v9632_v50 = vld [vmem:[#allocation3 + $0xc0] sm:$0xff]  ;;  %v13202_v17 = vpop.f32.mrb[210].mxu1 }
 0x4f0   :  { %9584 = vst.msk [vmem:[#allocation3 + $0x260] sm:$0xff] %vm4479_vm4, %v9472_v12  ;;  %9587 = vst.msk [vmem:[#allocation3 + $0x278] sm:$0xff] %vm4479_vm4, %v9475_v34  ;;  %v12906_v1 = vpop.f32.mrb[210].mxu0  ;;  %v9656_v27 = vld [vmem:[#allocation3 + $0x240] sm:$0xff]  ;;  %v13276_v7 = vadd.f32 %v17201_v37, %v7570_v19  ;;  %v9364_v34 = vadd.f32 %v17285_v28, %v9038_v15  ;;  %v9367_v19 = vadd.f32 %v13202_v17, %v17285_v28 }
 0x4f1   :  { %9536 = vst.msk [vmem:[#allocation3 + $0xe0] sm:$0xff] %vm4479_vm4, %v9424_v46  ;;  %9539 = vst.msk [vmem:[#allocation3 + $0xf8] sm:$0xff] %vm4479_vm4, %v9427_v39  ;;  %v9318_v63 = vadd.f32 %v13275_v33, %v17285_v28  ;;  %v7573_v29 = vpop.f32.mrb[211].mxu0  ;;  %v9659_v53 = vld [vmem:[#allocation3 + $0x258] sm:$0xff]  ;;  %v9041_v33 = vpop.f32.mrb[211].mxu1 }
 0x4f2   :  { %v9861_v48 = vld [vmem:[#allocation3 + $0x210] ss:$2 sm:$0x3f]  ;;  %v9889_v44 = vld [vmem:[#allocation3 + $0x211] ss:$2 sm:$0x3f] }
 0x4f3   :  { %v9849_v0 = vld [vmem:[#allocation3 + $0x90] ss:$2 sm:$0x3f]  ;;  %v9877_v49 = vld [vmem:[#allocation3 + $0x91] ss:$2 sm:$0x3f]  ;;  %v9917_v62 = vmax.f32 %v9861_v48, %v9889_v44 }
 0x4f4   :  { %9537 = vst.msk [vmem:[#allocation3 + $0xe8] sm:$0xff] %vm4479_vm4, %v9425_v24  ;;  %9585 = vst.msk [vmem:[#allocation3 + $0x268] sm:$0xff] %vm4479_vm4, %v9473_v30  ;;  %v9905_v43 = vmax.f32 %v9849_v0, %v9877_v49  ;;  %v9848_v11 = vld [vmem:[#allocation3 + $0x80] ss:$2 sm:$0xff]  ;;  %v9876_v40 = vld [vmem:[#allocation3 + $0x81] ss:$2 sm:$0xff] }
 0x4f5   :  { %v9860_v42 = vld [vmem:[#allocation3 + $0x200] ss:$2 sm:$0xff]  ;;  %v11034_v2 = vpack.c.bf16 %v9917_v62, %v9917_v62  ;;  %v9904_v61 = vmax.f32 %v9848_v11, %v9876_v40  ;;  %v9888_v51 = vld [vmem:[#allocation3 + $0x201] ss:$2 sm:$0xff]  ;;  %v9430_v26 = vmax.f32 %v9318_v63, 0.0  ;;  %v9635_v30 = vld [vmem:[#allocation3 + $0xd8] sm:$0xff]  ;;  %v13277_v40 = vadd.f32 %v17204_v18, %v12906_v1 }
 0x4f6   :  { %v11022_v55 = vpack.c.bf16 %v9905_v43, %v9905_v43  ;;  %v9916_v9 = vmax.f32 %v9860_v42, %v9888_v51  ;;  %v9714_v20 = vld [vmem:[#allocation3 + $0x270] sm:$0xff]  ;;  %v9478_v44 = vmax.f32 %v9366_v3, 0.0  ;;  %v9657_v62 = vld [vmem:[#allocation3 + $0x248] sm:$0xff]  ;;  %v9316_v43 = vadd.f32 %v13276_v7, %v17285_v28  ;;  %v12909_v42 = vpop.f32.mrb[212].mxu0 }
 0x4f7   :  { %10978 = vst.msk [vmem:[%s17803_s6 + $0xb4] sm:$0x7] %vm5069_vm5, %v11034_v2  ;;  %v11021_v38 = vpack.c.bf16 %v9904_v61, %v9904_v61  ;;  %v9690_v56 = vld [vmem:[#allocation3 + $0xf0] sm:$0xff]  ;;  %v9770_v10 = vmax.f32 %v9658_v8, %v9714_v20  ;;  %v9712_v12 = vld [vmem:[#allocation3 + $0x260] sm:$0xff]  ;;  %v9715_v48 = vld [vmem:[#allocation3 + $0x278] sm:$0xff]  ;;  %v9476_v11 = vmax.f32 %v9364_v34, 0.0  ;;  %v13278_v18 = vadd.f32 %v17207_v45, %v7573_v29 }
 0x4f8   :  { %10966 = vst.msk [vmem:[%s17803_s6 + $0x84] sm:$0x7] %vm5069_vm5, %v11022_v55  ;;  %v11033_v46 = vpack.c.bf16 %v9916_v9, %v9916_v9  ;;  %v9746_v39 = vmax.f32 %v9634_v58, %v9690_v56  ;;  %v9768_v24 = vmax.f32 %v9656_v27, %v9712_v12  ;;  %v9688_v37 = vld [vmem:[#allocation3 + $0xe0] sm:$0xff]  ;;  %v9691_v0 = vld [vmem:[#allocation3 + $0xf8] sm:$0xff]  ;;  %v9771_v49 = vmax.f32 %v9659_v53, %v9715_v48  ;;  %v9633_v61 = vld [vmem:[#allocation3 + $0xc8] sm:$0xff]  ;;  %v13205_v55 = vpop.f32.mrb[212].mxu1 }
 0x4f9   :  { %9542 = vst.msk [vmem:[#allocation3 + $0x110] sm:$0xff] %vm4479_vm4, %v9430_v26  ;;  %9826 = vst.msk [vmem:[#allocation3 + $0x250] sm:$0xff] %vm4479_vm4, %v9770_v10  ;;  %v9744_v63 = vmax.f32 %v9632_v50, %v9688_v37  ;;  %v9747_v2 = vmax.f32 %v9635_v30, %v9691_v0  ;;  %v7586_v9 = vpop.f32.mrb[213].mxu0  ;;  %v9428_v20 = vmax.f32 %v9316_v43, 0.0  ;;  %v9319_v26 = vadd.f32 %v13277_v40, %v17285_v28  ;;  %v9054_v3 = vpop.f32.mrb[213].mxu1 }
 0x4fa   :  { %10965 = vst.msk [vmem:[%s17803_s6 + $0x80] sm:$0xf] %vm5067_vm6, %v11021_v38  ;;  %10977 = vst.msk [vmem:[%s17803_s6 + $0xb0] sm:$0xf] %vm5067_vm6, %v11033_v46  ;;  %v12910_v15 = vpop.f32.mrb[214].mxu0  ;;  %v9479_v1 = vmax.f32 %v9367_v19, 0.0  ;;  %v9317_v45 = vadd.f32 %v13278_v18, %v17285_v28  ;;  %v9365_v38 = vadd.f32 %v17285_v28, %v9041_v33  ;;  %v13279_v56 = vadd.f32 %v17225_v41, %v12909_v42 }
 0x4fb   :  { %9802 = vst.msk [vmem:[#allocation3 + $0xd0] sm:$0xff] %vm4479_vm4, %v9746_v39  ;;  %9824 = vst.msk [vmem:[#allocation3 + $0x240] sm:$0xff] %vm4479_vm4, %v9768_v24  ;;  %v9689_v51 = vld [vmem:[#allocation3 + $0xe8] sm:$0xff]  ;;  %v13206_v10 = vpop.f32.mrb[214].mxu1  ;;  %v7589_v50 = vpop.f32.mrb[215].mxu0  ;;  %v9431_v27 = vmax.f32 %v9319_v26, 0.0  ;;  %v9370_v12 = vadd.f32 %v13205_v55, %v17285_v28  ;;  %v13280_v7 = vadd.f32 %v17229_v52, %v7586_v9  ;;  %v9368_v34 = vadd.f32 %v17285_v28, %v9054_v3 }
 0x4fc   :  { %v9713_v57 = vld [vmem:[#allocation3 + $0x268] sm:$0xff]  ;;  %9590 = vst.msk [vmem:[#allocation3 + $0x290] sm:$0xff] %vm4479_vm4, %v9478_v44  ;;  %9827 = vst.msk [vmem:[#allocation3 + $0x258] sm:$0xff] %vm4479_vm4, %v9771_v49  ;;  %v9745_v58 = vmax.f32 %v9633_v61, %v9689_v51  ;;  %v9057_v17 = vpop.f32.mrb[215].mxu1  ;;  %v9429_v29 = vmax.f32 %v9317_v45, 0.0  ;;  %v9477_v41 = vmax.f32 %v9365_v38, 0.0  ;;  %v9322_v46 = vadd.f32 %v13279_v56, %v17285_v28 }
 0x4fd   :  { %v9769_v8 = vmax.f32 %v9657_v62, %v9713_v57  ;;  %9588 = vst.msk [vmem:[#allocation3 + $0x280] sm:$0xff] %vm4479_vm4, %v9476_v11  ;;  %9800 = vst.msk [vmem:[#allocation3 + $0xc0] sm:$0xff] %vm4479_vm4, %v9744_v63  ;;  %v13281_v39 = vadd.f32 %v17232_v16, %v12910_v15  ;;  %v9482_v24 = vmax.f32 %v9370_v12, 0.0  ;;  %v9320_v30 = vadd.f32 %v13280_v7, %v17285_v28  ;;  %v13209_v15 = vpop.f32.mrb[216].mxu1 }
 0x4fe   :  { %9803 = vst.msk [vmem:[#allocation3 + $0xd8] sm:$0xff] %vm4479_vm4, %v9747_v2  ;;  %9801 = vst.msk [vmem:[#allocation3 + $0xc8] sm:$0xff] %vm4479_vm4, %v9745_v58  ;;  %v9480_v53 = vmax.f32 %v9368_v34, 0.0  ;;  %v9371_v48 = vadd.f32 %v13206_v10, %v17285_v28  ;;  %v9434_v52 = vmax.f32 %v9322_v46, 0.0  ;;  %v13282_v44 = vadd.f32 %v17235_v14, %v7589_v50  ;;  %v12913_v0 = vpop.f32.mrb[216].mxu0  ;;  %v18043_v10 = vld [vmem:[#allocation31_spill] sm:$0xff] }
 0x4ff   :  { %9825 = vst.msk [vmem:[#allocation3 + $0x248] sm:$0xff] %vm4479_vm4, %v9769_v8  ;;  %9540 = vst.msk [vmem:[#allocation3 + $0x100] sm:$0xff] %vm4479_vm4, %v9428_v20  ;;  %v9432_v33 = vmax.f32 %v9320_v30, 0.0  ;;  %v9323_v16 = vadd.f32 %v13281_v39, %v17285_v28  ;;  %v9369_v11 = vadd.f32 %v17285_v28, %v9057_v17  ;;  %v13283_v40 = vadd.f32 %v17242_v25, %v12913_v0 }
 0x500   :  { %9591 = vst.msk [vmem:[#allocation3 + $0x298] sm:$0xff] %vm4479_vm4, %v9479_v1  ;;  %9543 = vst.msk [vmem:[#allocation3 + $0x118] sm:$0xff] %vm4479_vm4, %v9431_v27  ;;  %v9483_v37 = vmax.f32 %v9371_v48, 0.0  ;;  %v9321_v43 = vadd.f32 %v13282_v44, %v17285_v28  ;;  %v7602_v1 = vpop.f32.mrb[217].mxu0  ;;  %v9374_v56 = vadd.f32 %v13209_v15, %v17285_v28  ;;  %v9070_v27 = vpop.f32.mrb[217].mxu1  ;;  %v9638_v30 = vld [vmem:[#allocation3 + $0x110] sm:$0xff] }
 0x501   :  { %9541 = vst.msk [vmem:[#allocation3 + $0x108] sm:$0xff] %vm4479_vm4, %v9429_v29  ;;  %9589 = vst.msk [vmem:[#allocation3 + $0x288] sm:$0xff] %vm4479_vm4, %v9477_v41  ;;  %v9326_v19 = vadd.f32 %v13283_v40, %v17285_v28  ;;  %v9435_v58 = vmax.f32 %v9323_v16, 0.0  ;;  %v9481_v26 = vmax.f32 %v9369_v11, 0.0  ;;  %v13284_v50 = vadd.f32 %v18043_v10, %v7602_v1  ;;  %v12914_v12 = vpop.f32.mrb[218].mxu0  ;;  %v13210_v39 = vpop.f32.mrb[218].mxu1 }
 0x502   :  { %9594 = vst.msk [vmem:[#allocation3 + $0x2b0] sm:$0xff] %vm4479_vm4, %v9482_v24  ;;  %9592 = vst.msk [vmem:[#allocation3 + $0x2a0] sm:$0xff] %vm4479_vm4, %v9480_v53  ;;  %v9433_v8 = vmax.f32 %v9321_v43, 0.0  ;;  %v17576_v41 = vld [vmem:[#allocation8] ss:$0 sm:$0xff]  ;;  %v13285_v46 = vadd.f32 %v17248_v6, %v12914_v12  ;;  %v7605_v24 = vpop.f32.mrb[219].mxu0 }
 0x503   :  { %v9863_v49 = vld [vmem:[#allocation3 + $0x250] ss:$2 sm:$0x3f]  ;;  %v9891_v62 = vld [vmem:[#allocation3 + $0x251] ss:$2 sm:$0x3f]  ;;  %v9372_v28 = vadd.f32 %v17576_v41, %v9070_v27  ;;  %v9324_v16 = vadd.f32 %v17576_v41, %v13284_v50 }
 0x504   :  { %9546 = vst.msk [vmem:[#allocation3 + $0x130] sm:$0xff] %vm4479_vm4, %v9434_v52  ;;  %v9919_v63 = vmax.f32 %v9863_v49, %v9891_v62  ;;  %9544 = vst.msk [vmem:[#allocation3 + $0x120] sm:$0xff] %vm4479_vm4, %v9432_v33  ;;  %v9438_v3 = vmax.f32 %v9326_v19, 0.0  ;;  %v9662_v38 = vld [vmem:[#allocation3 + $0x290] sm:$0xff]  ;;  %v9660_v17 = vld [vmem:[#allocation3 + $0x280] sm:$0xff]  ;;  %v9486_v33 = vmax.f32 %v9374_v56, 0.0  ;;  %v9327_v40 = vadd.f32 %v17576_v41, %v13285_v46 }
 0x505   :  { %v9851_v14 = vld [vmem:[#allocation3 + $0xd0] ss:$2 sm:$0x3f]  ;;  %v9879_v42 = vld [vmem:[#allocation3 + $0xd1] ss:$2 sm:$0x3f] }
 0x506   :  { %9595 = vst.msk [vmem:[#allocation3 + $0x2b8] sm:$0xff] %vm4479_vm4, %v9483_v37  ;;  %v9907_v2 = vmax.f32 %v9851_v14, %v9879_v42  ;;  %v9850_v61 = vld [vmem:[#allocation3 + $0xc0] ss:$2 sm:$0xff]  ;;  %v9878_v51 = vld [vmem:[#allocation3 + $0xc1] ss:$2 sm:$0xff]  ;;  %v11036_v18 = vpack.c.bf16 %v9919_v63, %v9919_v63  ;;  %9547 = vst.msk [vmem:[#allocation3 + $0x138] sm:$0xff] %vm4479_vm4, %v9435_v58  ;;  %v9375_v14 = vadd.f32 %v17576_v41, %v13210_v39 }
 0x507   :  { %v9862_v57 = vld [vmem:[#allocation3 + $0x240] ss:$2 sm:$0xff]  ;;  %v9906_v55 = vmax.f32 %v9850_v61, %v9878_v51  ;;  %v9890_v9 = vld [vmem:[#allocation3 + $0x241] ss:$2 sm:$0xff]  ;;  %9545 = vst.msk [vmem:[#allocation3 + $0x128] sm:$0xff] %vm4479_vm4, %v9433_v8  ;;  %9593 = vst.msk [vmem:[#allocation3 + $0x2a8] sm:$0xff] %vm4479_vm4, %v9481_v26 }
 0x508   :  { %v11024_v20 = vpack.c.bf16 %v9907_v2, %v9907_v2  ;;  %v9918_v25 = vmax.f32 %v9862_v57, %v9890_v9  ;;  %10980 = vst.msk [vmem:[%s17803_s6 + $0xbc] sm:$0x7] %vm5069_vm5, %v11036_v18  ;;  %v9636_v52 = vld [vmem:[#allocation3 + $0x100] sm:$0xff]  ;;  %v9073_v37 = vpop.f32.mrb[219].mxu1  ;;  %v12917_v0 = vpop.f32.mrb[220].mxu0  ;;  %v9663_v62 = vld [vmem:[#allocation3 + $0x298] sm:$0xff]  ;;  %v13286_v57 = vadd.f32 %v17251_v54, %v7605_v24 }
 0x509   :  { %v11023_v45 = vpack.c.bf16 %v9906_v55, %v9906_v55  ;;  %v9718_v34 = vld [vmem:[#allocation3 + $0x2b0] sm:$0xff]  ;;  %v9716_v29 = vld [vmem:[#allocation3 + $0x2a0] sm:$0xff]  ;;  %9550 = vst.msk [vmem:[#allocation3 + $0x150] sm:$0xff] %vm4479_vm4, %v9438_v3  ;;  %v9484_v11 = vmax.f32 %v9372_v28, 0.0  ;;  %v13213_v42 = vpop.f32.mrb[220].mxu1  ;;  %v7618_v63 = vpop.f32.mrb[221].mxu0  ;;  %v9373_v58 = vadd.f32 %v17576_v41, %v9073_v37 }
 0x50a   :  { %10968 = vst.msk [vmem:[%s17803_s6 + $0x8c] sm:$0x7] %vm5069_vm5, %v11024_v20  ;;  %v11035_v7 = vpack.c.bf16 %v9918_v25, %v9918_v25  ;;  %v9774_v48 = vmax.f32 %v9662_v38, %v9718_v34  ;;  %v9772_v44 = vmax.f32 %v9660_v17, %v9716_v29  ;;  %v9436_v51 = vmax.f32 %v9324_v16, 0.0  ;;  %v9086_v19 = vpop.f32.mrb[221].mxu1  ;;  %v12918_v18 = vpop.f32.mrb[222].mxu0  ;;  %v18044_v8 = vld [vmem:[#allocation32_spill] sm:$0xff] }
 0x50b   :  { %10967 = vst.msk [vmem:[%s17803_s6 + $0x88] sm:$0xf] %vm5067_vm6, %v11023_v45  ;;  %v9694_v53 = vld [vmem:[#allocation3 + $0x130] sm:$0xff]  ;;  %v9692_v49 = vld [vmem:[#allocation3 + $0x120] sm:$0xff]  ;;  %v9439_v55 = vmax.f32 %v9327_v40, 0.0  ;;  %v9487_v9 = vmax.f32 %v9375_v14, 0.0  ;;  %v13287_v20 = vadd.f32 %v18044_v8, %v12917_v0  ;;  %v9325_v54 = vadd.f32 %v17576_v41, %v13286_v57 }
 0x50c   :  { %10979 = vst.msk [vmem:[%s17803_s6 + $0xb8] sm:$0xf] %vm5067_vm6, %v11035_v7  ;;  %v9750_v6 = vmax.f32 %v9638_v30, %v9694_v53  ;;  %v9748_v2 = vmax.f32 %v9636_v52, %v9692_v49  ;;  %v13214_v25 = vpop.f32.mrb[222].mxu1  ;;  %v7621_v26 = vpop.f32.mrb[223].mxu0  ;;  %v9639_v3 = vld [vmem:[#allocation3 + $0x118] sm:$0xff]  ;;  %v9378_v15 = vadd.f32 %v17576_v41, %v13213_v42  ;;  %v9376_v38 = vadd.f32 %v17576_v41, %v9086_v19  ;;  %v9637_v50 = vld [vmem:[#allocation3 + $0x108] sm:$0xff] }
 0x50d   :  { %v9719_v43 = vld [vmem:[#allocation3 + $0x2b8] sm:$0xff]  ;;  %9830 = vst.msk [vmem:[#allocation3 + $0x290] sm:$0xff] %vm4479_vm4, %v9774_v48  ;;  %9828 = vst.msk [vmem:[#allocation3 + $0x280] sm:$0xff] %vm4479_vm4, %v9772_v44  ;;  %v9089_v56 = vpop.f32.mrb[223].mxu1  ;;  %v9485_v12 = vmax.f32 %v9373_v58, 0.0  ;;  %v9330_v7 = vadd.f32 %v17576_v41, %v13287_v20  ;;  %v9379_v29 = vadd.f32 %v17576_v41, %v13214_v25  ;;  %v9661_v39 = vld [vmem:[#allocation3 + $0x288] sm:$0xff] }
 0x50e   :  { %v9775_v61 = vmax.f32 %v9663_v62, %v9719_v43  ;;  %9598 = vst.msk [vmem:[#allocation3 + $0x2d0] sm:$0xff] %vm4479_vm4, %v9486_v33  ;;  %9806 = vst.msk [vmem:[#allocation3 + $0x110] sm:$0xff] %vm4479_vm4, %v9750_v6  ;;  %v18045_v1 = vld [vmem:[#allocation35_spill] sm:$0xff]  ;;  %v9693_v27 = vld [vmem:[#allocation3 + $0x128] sm:$0xff]  ;;  %v9437_v30 = vmax.f32 %v9325_v54, 0.0  ;;  %v9490_v53 = vmax.f32 %v9378_v15, 0.0  ;;  %v9377_v49 = vadd.f32 %v17576_v41, %v9089_v56 }
 0x50f   :  { %9596 = vst.msk [vmem:[#allocation3 + $0x2c0] sm:$0xff] %vm4479_vm4, %v9484_v11  ;;  %9804 = vst.msk [vmem:[#allocation3 + $0x100] sm:$0xff] %vm4479_vm4, %v9748_v2  ;;  %v13288_v45 = vadd.f32 %v18045_v1, %v7618_v63  ;;  %v9695_v10 = vld [vmem:[#allocation3 + $0x138] sm:$0xff]  ;;  %v9749_v46 = vmax.f32 %v9637_v50, %v9693_v27  ;;  %v9717_v24 = vld [vmem:[#allocation3 + $0x2a8] sm:$0xff]  ;;  %v9442_v52 = vmax.f32 %v9330_v7, 0.0  ;;  %v9488_v33 = vmax.f32 %v9376_v38, 0.0 }
 0x510   :  { %9831 = vst.msk [vmem:[#allocation3 + $0x298] sm:$0xff] %vm4479_vm4, %v9775_v61  ;;  %9548 = vst.msk [vmem:[#allocation3 + $0x140] sm:$0xff] %vm4479_vm4, %v9436_v51  ;;  %v18046_v34 = vld [vmem:[#allocation36_spill] sm:$0xff]  ;;  %v9751_v28 = vmax.f32 %v9639_v3, %v9695_v10  ;;  %v9773_v48 = vmax.f32 %v9661_v39, %v9717_v24  ;;  %v9491_v37 = vmax.f32 %v9379_v29, 0.0  ;;  %v18047_v0 = vld [vmem:[#allocation39_spill] sm:$0xff]  ;;  %v12921_v62 = vpop.f32.mrb[224].mxu0 }
 0x511   :  { %9551 = vst.msk [vmem:[#allocation3 + $0x158] sm:$0xff] %vm4479_vm4, %v9439_v55  ;;  %9599 = vst.msk [vmem:[#allocation3 + $0x2d8] sm:$0xff] %vm4479_vm4, %v9487_v9  ;;  %v13289_v17 = vadd.f32 %v18046_v34, %v12918_v18  ;;  %v9328_v44 = vadd.f32 %v17576_v41, %v13288_v45  ;;  %v13290_v6 = vadd.f32 %v18047_v0, %v7621_v26  ;;  %v18048_v11 = vld [vmem:[#allocation40_spill] sm:$0xff]  ;;  %v13217_v14 = vpop.f32.mrb[224].mxu1  ;;  %v7634_v42 = vpop.f32.mrb[225].mxu0  ;;  %v9489_v61 = vmax.f32 %v9377_v49, 0.0 }
 0x512   :  { %9597 = vst.msk [vmem:[#allocation3 + $0x2c8] sm:$0xff] %vm4479_vm4, %v9485_v12  ;;  %9807 = vst.msk [vmem:[#allocation3 + $0x118] sm:$0xff] %vm4479_vm4, %v9751_v28  ;;  %v13291_v40 = vadd.f32 %v18048_v11, %v12921_v62  ;;  %v9382_v51 = vadd.f32 %v17576_v41, %v13217_v14  ;;  %v9102_v57 = vpop.f32.mrb[225].mxu1  ;;  %v12922_v19 = vpop.f32.mrb[226].mxu0  ;;  %v18049_v58 = vld [vmem:[#allocation43_spill] sm:$0xff]  ;;  %v18050_v25 = vld [vmem:[#allocation44_spill] sm:$0xff] }
 0x513   :  { %9805 = vst.msk [vmem:[#allocation3 + $0x108] sm:$0xff] %vm4479_vm4, %v9749_v46  ;;  %9549 = vst.msk [vmem:[#allocation3 + $0x148] sm:$0xff] %vm4479_vm4, %v9437_v30  ;;  %v9331_v16 = vadd.f32 %v17576_v41, %v13289_v17  ;;  %v9440_v43 = vmax.f32 %v9328_v44, 0.0  ;;  %v9329_v2 = vadd.f32 %v17576_v41, %v13290_v6  ;;  %v13292_v8 = vadd.f32 %v18049_v58, %v7634_v42  ;;  %v13218_v1 = vpop.f32.mrb[226].mxu1  ;;  %v7637_v50 = vpop.f32.mrb[227].mxu0  ;;  %v9642_v29 = vld [vmem:[#allocation3 + $0x150] sm:$0xff] }
 0x514   :  { %9602 = vst.msk [vmem:[#allocation3 + $0x2f0] sm:$0xff] %vm4479_vm4, %v9490_v53  ;;  %9829 = vst.msk [vmem:[#allocation3 + $0x288] sm:$0xff] %vm4479_vm4, %v9773_v48  ;;  %v9334_v9 = vadd.f32 %v17576_v41, %v13291_v40  ;;  %v9380_v20 = vadd.f32 %v17576_v41, %v9102_v57  ;;  %v13293_v26 = vadd.f32 %v18050_v25, %v12922_v19  ;;  %v9494_v15 = vmax.f32 %v9382_v51, 0.0  ;;  %v9105_v27 = vpop.f32.mrb[227].mxu1 }
 0x515   :  { %9554 = vst.msk [vmem:[#allocation3 + $0x170] sm:$0xff] %vm4479_vm4, %v9442_v52  ;;  %9600 = vst.msk [vmem:[#allocation3 + $0x2e0] sm:$0xff] %vm4479_vm4, %v9488_v33  ;;  %v9443_v63 = vmax.f32 %v9331_v16, 0.0  ;;  %v9441_v54 = vmax.f32 %v9329_v2, 0.0  ;;  %v9332_v38 = vadd.f32 %v17576_v41, %v13292_v8  ;;  %v13294_v7 = vadd.f32 %v17299_v21, %v7637_v50  ;;  %v9666_v28 = vld [vmem:[#allocation3 + $0x2d0] sm:$0xff]  ;;  %v13221_v57 = vpop.f32.mrb[228].mxu1 }
 0x516   :  { %9603 = vst.msk [vmem:[#allocation3 + $0x2f8] sm:$0xff] %vm4479_vm4, %v9491_v37  ;;  %9552 = vst.msk [vmem:[#allocation3 + $0x160] sm:$0xff] %vm4479_vm4, %v9440_v43  ;;  %v9446_v45 = vmax.f32 %v9334_v9, 0.0  ;;  %v9492_v56 = vmax.f32 %v9380_v20, 0.0  ;;  %v9335_v10 = vadd.f32 %v17576_v41, %v13293_v26  ;;  %v9664_v48 = vld [vmem:[#allocation3 + $0x2c0] sm:$0xff]  ;;  %v9383_v52 = vadd.f32 %v17576_v41, %v13218_v1  ;;  %v12925_v51 = vpop.f32.mrb[228].mxu0 }
 0x517   :  { %v9865_v18 = vld [vmem:[#allocation3 + $0x290] ss:$2 sm:$0x3f]  ;;  %v9893_v55 = vld [vmem:[#allocation3 + $0x291] ss:$2 sm:$0x3f]  ;;  %v9381_v44 = vadd.f32 %v17576_v41, %v9105_v27  ;;  %v9333_v43 = vadd.f32 %v17576_v41, %v13294_v7  ;;  %v9386_v7 = vadd.f32 %v17576_v41, %v13221_v57 }
 0x518   :  { %v9921_v3 = vmax.f32 %v9865_v18, %v9893_v55  ;;  %9555 = vst.msk [vmem:[#allocation3 + $0x178] sm:$0xff] %vm4479_vm4, %v9443_v63  ;;  %9601 = vst.msk [vmem:[#allocation3 + $0x2e8] sm:$0xff] %vm4479_vm4, %v9489_v61  ;;  %v9640_v53 = vld [vmem:[#allocation3 + $0x140] sm:$0xff]  ;;  %v9667_v21 = vld [vmem:[#allocation3 + $0x2d8] sm:$0xff]  ;;  %v9444_v49 = vmax.f32 %v9332_v38, 0.0  ;;  %v9447_v62 = vmax.f32 %v9335_v10, 0.0 }
 0x519   :  { %9553 = vst.msk [vmem:[#allocation3 + $0x168] sm:$0xff] %vm4479_vm4, %v9441_v54  ;;  %9606 = vst.msk [vmem:[#allocation3 + $0x310] sm:$0xff] %vm4479_vm4, %v9494_v15  ;;  %v9853_v34 = vld [vmem:[#allocation3 + $0x110] ss:$2 sm:$0x3f]  ;;  %v9665_v8 = vld [vmem:[#allocation3 + $0x2c8] sm:$0xff] }
 0x51a   :  { %v11038_v12 = vpack.c.bf16 %v9921_v3, %v9921_v3  ;;  %v9881_v17 = vld [vmem:[#allocation3 + $0x111] ss:$2 sm:$0x3f]  ;;  %9558 = vst.msk [vmem:[#allocation3 + $0x190] sm:$0xff] %vm4479_vm4, %v9446_v45  ;;  %9604 = vst.msk [vmem:[#allocation3 + $0x300] sm:$0xff] %vm4479_vm4, %v9492_v56  ;;  %v7650_v25 = vpop.f32.mrb[229].mxu0 }
 0x51b   :  { %v9909_v46 = vmax.f32 %v9853_v34, %v9881_v17  ;;  %v9852_v39 = vld [vmem:[#allocation3 + $0x100] ss:$2 sm:$0xff]  ;;  %v9880_v24 = vld [vmem:[#allocation3 + $0x101] ss:$2 sm:$0xff]  ;;  %v9722_v0 = vld [vmem:[#allocation3 + $0x2f0] sm:$0xff]  ;;  %9556 = vst.msk [vmem:[#allocation3 + $0x180] sm:$0xff] %vm4479_vm4, %v9444_v49 }
 0x51c   :  { %10982 = vst.msk [vmem:[%s17803_s6 + $0xc4] sm:$0x7] %vm5069_vm5, %v11038_v12  ;;  %v9864_v30 = vld [vmem:[#allocation3 + $0x280] ss:$2 sm:$0xff]  ;;  %v9908_v33 = vmax.f32 %v9852_v39, %v9880_v24  ;;  %v9892_v16 = vld [vmem:[#allocation3 + $0x281] ss:$2 sm:$0xff]  ;;  %v9778_v42 = vmax.f32 %v9666_v28, %v9722_v0  ;;  %v13295_v12 = vadd.f32 %v17318_v47, %v12925_v51  ;;  %v13296_v28 = vadd.f32 %v17323_v5, %v7650_v25 }
 0x51d   :  { %v9698_v37 = vld [vmem:[#allocation3 + $0x170] sm:$0xff]  ;;  %v9643_v6 = vld [vmem:[#allocation3 + $0x158] sm:$0xff]  ;;  %v11026_v11 = vpack.c.bf16 %v9909_v46, %v9909_v46  ;;  %v9920_v40 = vmax.f32 %v9864_v30, %v9892_v16  ;;  %v9696_v63 = vld [vmem:[#allocation3 + $0x160] sm:$0xff]  ;;  %9559 = vst.msk [vmem:[#allocation3 + $0x198] sm:$0xff] %vm4479_vm4, %v9447_v62  ;;  %v9118_v26 = vpop.f32.mrb[229].mxu1  ;;  %v9495_v1 = vmax.f32 %v9383_v52, 0.0 }
 0x51e   :  { %v9754_v14 = vmax.f32 %v9642_v29, %v9698_v37  ;;  %v9720_v2 = vld [vmem:[#allocation3 + $0x2e0] sm:$0xff]  ;;  %v9723_v61 = vld [vmem:[#allocation3 + $0x2f8] sm:$0xff]  ;;  %v11025_v19 = vpack.c.bf16 %v9908_v33, %v9908_v33  ;;  %v9752_v18 = vmax.f32 %v9640_v53, %v9696_v63  ;;  %9834 = vst.msk [vmem:[#allocation3 + $0x2d0] sm:$0xff] %vm4479_vm4, %v9778_v42  ;;  %v12926_v45 = vpop.f32.mrb[230].mxu0  ;;  %v13222_v38 = vpop.f32.mrb[230].mxu1  ;;  %v9641_v56 = vld [vmem:[#allocation3 + $0x148] sm:$0xff]  ;;  %v9384_v47 = vadd.f32 %v17576_v41, %v9118_v26 }
 0x51f   :  { %v9776_v55 = vmax.f32 %v9664_v48, %v9720_v2  ;;  %v9699_v9 = vld [vmem:[#allocation3 + $0x178] sm:$0xff]  ;;  %v9779_v58 = vmax.f32 %v9667_v21, %v9723_v61  ;;  %v9721_v20 = vld [vmem:[#allocation3 + $0x2e8] sm:$0xff]  ;;  %10970 = vst.msk [vmem:[%s17803_s6 + $0x94] sm:$0x7] %vm5069_vm5, %v11026_v11  ;;  %v11037_v3 = vpack.c.bf16 %v9920_v40, %v9920_v40  ;;  %v9445_v50 = vmax.f32 %v9333_v43, 0.0  ;;  %v7653_v34 = vpop.f32.mrb[231].mxu0 }
 0x520   :  { %9810 = vst.msk [vmem:[#allocation3 + $0x150] sm:$0xff] %vm4479_vm4, %v9754_v14  ;;  %v9755_v54 = vmax.f32 %v9643_v6, %v9699_v9  ;;  %v9777_v15 = vmax.f32 %v9665_v8, %v9721_v20  ;;  %9808 = vst.msk [vmem:[#allocation3 + $0x140] sm:$0xff] %vm4479_vm4, %v9752_v18  ;;  %v9697_v10 = vld [vmem:[#allocation3 + $0x168] sm:$0xff]  ;;  %v9493_v27 = vmax.f32 %v9381_v44, 0.0  ;;  %v9121_v17 = vpop.f32.mrb[231].mxu1  ;;  %v13297_v46 = vadd.f32 %v17327_v59, %v12926_v45  ;;  %v12929_v52 = vpop.f32.mrb[232].mxu0 }
 0x521   :  { %10969 = vst.msk [vmem:[%s17803_s6 + $0x90] sm:$0xf] %vm5067_vm6, %v11025_v19  ;;  %10981 = vst.msk [vmem:[%s17803_s6 + $0xc0] sm:$0xf] %vm5067_vm6, %v11037_v3  ;;  %v9753_v29 = vmax.f32 %v9641_v56, %v9697_v10  ;;  %v9338_v39 = vadd.f32 %v17576_v41, %v13295_v12  ;;  %v9498_v24 = vmax.f32 %v9386_v7, 0.0  ;;  %v9387_v30 = vadd.f32 %v17576_v41, %v13222_v38  ;;  %v13225_v0 = vpop.f32.mrb[232].mxu1 }
 0x522   :  { %9832 = vst.msk [vmem:[#allocation3 + $0x2c0] sm:$0xff] %vm4479_vm4, %v9776_v55  ;;  %9835 = vst.msk [vmem:[#allocation3 + $0x2d8] sm:$0xff] %vm4479_vm4, %v9779_v58  ;;  %v13298_v53 = vadd.f32 %v17331_v60, %v7653_v34  ;;  %v9336_v48 = vadd.f32 %v17576_v41, %v13296_v28  ;;  %v9496_v5 = vmax.f32 %v9384_v47, 0.0  ;;  %v9339_v21 = vadd.f32 %v17576_v41, %v13297_v46  ;;  %v7666_v60 = vpop.f32.mrb[233].mxu0  ;;  %v9134_v43 = vpop.f32.mrb[233].mxu1  ;;  %v9646_v10 = vld [vmem:[#allocation3 + $0x190] sm:$0xff] }
 0x523   :  { %9811 = vst.msk [vmem:[#allocation3 + $0x158] sm:$0xff] %vm4479_vm4, %v9755_v54  ;;  %9833 = vst.msk [vmem:[#allocation3 + $0x2c8] sm:$0xff] %vm4479_vm4, %v9777_v15  ;;  %v9385_v59 = vadd.f32 %v17576_v41, %v9121_v17  ;;  %v9450_v44 = vmax.f32 %v9338_v39, 0.0  ;;  %v9499_v33 = vmax.f32 %v9387_v30, 0.0  ;;  %v13299_v37 = vadd.f32 %v17339_v13, %v12929_v52  ;;  %v12930_v13 = vpop.f32.mrb[234].mxu0  ;;  %v13226_v63 = vpop.f32.mrb[234].mxu1 }
 0x524   :  { %9607 = vst.msk [vmem:[#allocation3 + $0x318] sm:$0xff] %vm4479_vm4, %v9495_v1  ;;  %9557 = vst.msk [vmem:[#allocation3 + $0x188] sm:$0xff] %vm4479_vm4, %v9445_v50  ;;  %v9337_v16 = vadd.f32 %v17576_v41, %v13298_v53  ;;  %v9448_v6 = vmax.f32 %v9336_v48, 0.0  ;;  %v9451_v49 = vmax.f32 %v9339_v21, 0.0  ;;  %v9390_v14 = vadd.f32 %v17576_v41, %v13225_v0  ;;  %v7669_v34 = vpop.f32.mrb[235].mxu0  ;;  %v9137_v17 = vpop.f32.mrb[235].mxu1 }
 0x525   :  { %9605 = vst.msk [vmem:[#allocation3 + $0x308] sm:$0xff] %vm4479_vm4, %v9493_v27  ;;  %9809 = vst.msk [vmem:[#allocation3 + $0x148] sm:$0xff] %vm4479_vm4, %v9753_v29  ;;  %v9497_v62 = vmax.f32 %v9385_v59, 0.0  ;;  %v9342_v40 = vadd.f32 %v17576_v41, %v13299_v37  ;;  %v13300_v42 = vadd.f32 %v17343_v35, %v7666_v60  ;;  %v9388_v51 = vadd.f32 %v17576_v41, %v9134_v43  ;;  %v9668_v27 = vld [vmem:[#allocation3 + $0x300] sm:$0xff]  ;;  %v9647_v39 = vld [vmem:[#allocation3 + $0x198] sm:$0xff] }
 0x526   :  { %9610 = vst.msk [vmem:[#allocation3 + $0x330] sm:$0xff] %vm4479_vm4, %v9498_v24  ;;  %9608 = vst.msk [vmem:[#allocation3 + $0x320] sm:$0xff] %vm4479_vm4, %v9496_v5  ;;  %v9449_v11 = vmax.f32 %v9337_v16, 0.0  ;;  %v13301_v57 = vadd.f32 %v17347_v32, %v12930_v13  ;;  %v9391_v9 = vadd.f32 %v17576_v41, %v13226_v63  ;;  %v9670_v32 = vld [vmem:[#allocation3 + $0x310] sm:$0xff]  ;;  %v9502_v45 = vmax.f32 %v9390_v14, 0.0  ;;  %v9644_v47 = vld [vmem:[#allocation3 + $0x180] sm:$0xff] }
 0x527   :  { %9562 = vst.msk [vmem:[#allocation3 + $0x1b0] sm:$0xff] %vm4479_vm4, %v9450_v44  ;;  %9611 = vst.msk [vmem:[#allocation3 + $0x338] sm:$0xff] %vm4479_vm4, %v9499_v33  ;;  %v9340_v35 = vadd.f32 %v17576_v41, %v13300_v42  ;;  %v9454_v25 = vmax.f32 %v9342_v40, 0.0  ;;  %v9500_v7 = vmax.f32 %v9388_v51, 0.0  ;;  %v12933_v48 = vpop.f32.mrb[236].mxu0  ;;  %v13229_v5 = vpop.f32.mrb[236].mxu1  ;;  %v13302_v16 = vadd.f32 %v17351_v4, %v7669_v34 }
 0x528   :  { %9560 = vst.msk [vmem:[#allocation3 + $0x1a0] sm:$0xff] %vm4479_vm4, %v9448_v6  ;;  %9563 = vst.msk [vmem:[#allocation3 + $0x1b8] sm:$0xff] %vm4479_vm4, %v9451_v49  ;;  %v9343_v26 = vadd.f32 %v17576_v41, %v13301_v57  ;;  %v9503_v53 = vmax.f32 %v9391_v9, 0.0  ;;  %v9389_v37 = vadd.f32 %v17576_v41, %v9137_v17  ;;  %v7682_v0 = vpop.f32.mrb[237].mxu0  ;;  %v9150_v60 = vpop.f32.mrb[237].mxu1  ;;  %v13303_v4 = vadd.f32 %v17368_v31, %v12933_v48 }
 0x529   :  { %v9867_v2 = vld [vmem:[#allocation3 + $0x2d0] ss:$2 sm:$0x3f]  ;;  %v9895_v61 = vld [vmem:[#allocation3 + $0x2d1] ss:$2 sm:$0x3f]  ;;  %v9394_v40 = vadd.f32 %v17576_v41, %v13229_v5  ;;  %v9341_v57 = vadd.f32 %v17576_v41, %v13302_v16 }
 0x52a   :  { %9609 = vst.msk [vmem:[#allocation3 + $0x328] sm:$0xff] %vm4479_vm4, %v9497_v62  ;;  %v9855_v19 = vld [vmem:[#allocation3 + $0x150] ss:$2 sm:$0x3f]  ;;  %v9923_v55 = vmax.f32 %v9867_v2, %v9895_v61  ;;  %9561 = vst.msk [vmem:[#allocation3 + $0x1a8] sm:$0xff] %vm4479_vm4, %v9449_v11  ;;  %v9452_v12 = vmax.f32 %v9340_v35, 0.0  ;;  %v9346_v35 = vadd.f32 %v17576_v41, %v13303_v4 }
 0x52b   :  { %v9883_v18 = vld [vmem:[#allocation3 + $0x151] ss:$2 sm:$0x3f]  ;;  %v9866_v8 = vld [vmem:[#allocation3 + $0x2c0] ss:$2 sm:$0xff]  ;;  %9566 = vst.msk [vmem:[#allocation3 + $0x1d0] sm:$0xff] %vm4479_vm4, %v9454_v25 }
 0x52c   :  { %v9911_v58 = vmax.f32 %v9855_v19, %v9883_v18  ;;  %v9894_v20 = vld [vmem:[#allocation3 + $0x2c1] ss:$2 sm:$0xff]  ;;  %v11040_v3 = vpack.c.bf16 %v9923_v55, %v9923_v55  ;;  %v9854_v54 = vld [vmem:[#allocation3 + $0x140] ss:$2 sm:$0xff]  ;;  %v9671_v24 = vld [vmem:[#allocation3 + $0x318] sm:$0xff]  ;;  %9614 = vst.msk [vmem:[#allocation3 + $0x350] sm:$0xff] %vm4479_vm4, %v9502_v45 }
 0x52d   :  { %v9882_v15 = vld [vmem:[#allocation3 + $0x141] ss:$2 sm:$0xff]  ;;  %v9922_v1 = vmax.f32 %v9866_v8, %v9894_v20  ;;  %v9726_v50 = vld [vmem:[#allocation3 + $0x330] sm:$0xff]  ;;  %v9455_v30 = vmax.f32 %v9343_v26, 0.0  ;;  %9564 = vst.msk [vmem:[#allocation3 + $0x1c0] sm:$0xff] %vm4479_vm4, %v9452_v12  ;;  %9612 = vst.msk [vmem:[#allocation3 + $0x340] sm:$0xff] %vm4479_vm4, %v9500_v7  ;;  %v13304_v8 = vadd.f32 %v17373_v22, %v7682_v0  ;;  %v9392_v20 = vadd.f32 %v17576_v41, %v9150_v60 }
 0x52e   :  { %v11028_v38 = vpack.c.bf16 %v9911_v58, %v9911_v58  ;;  %v9910_v56 = vmax.f32 %v9854_v54, %v9882_v15  ;;  %10984 = vst.msk [vmem:[%s17803_s6 + $0xcc] sm:$0x7] %vm5069_vm5, %v11040_v3  ;;  %v9782_v28 = vmax.f32 %v9670_v32, %v9726_v50  ;;  %v9724_v46 = vld [vmem:[#allocation3 + $0x320] sm:$0xff]  ;;  %v9702_v59 = vld [vmem:[#allocation3 + $0x1b0] sm:$0xff]  ;;  %v9727_v44 = vld [vmem:[#allocation3 + $0x338] sm:$0xff]  ;;  %v12934_v14 = vpop.f32.mrb[238].mxu0 }
 0x52f   :  { %v11039_v29 = vpack.c.bf16 %v9922_v1, %v9922_v1  ;;  %v9780_v52 = vmax.f32 %v9668_v27, %v9724_v46  ;;  %v9669_v33 = vld [vmem:[#allocation3 + $0x308] sm:$0xff]  ;;  %v9758_v6 = vmax.f32 %v9646_v10, %v9702_v59  ;;  %v9700_v49 = vld [vmem:[#allocation3 + $0x1a0] sm:$0xff]  ;;  %v9703_v62 = vld [vmem:[#allocation3 + $0x1b8] sm:$0xff]  ;;  %v9783_v43 = vmax.f32 %v9671_v24, %v9727_v44  ;;  %9567 = vst.msk [vmem:[#allocation3 + $0x1d8] sm:$0xff] %vm4479_vm4, %v9455_v30  ;;  %v13230_v42 = vpop.f32.mrb[238].mxu1  ;;  %v7685_v19 = vpop.f32.mrb[239].mxu0 }
 0x530   :  { %10972 = vst.msk [vmem:[%s17803_s6 + $0x9c] sm:$0x7] %vm5069_vm5, %v11028_v38  ;;  %v11027_v21 = vpack.c.bf16 %v9910_v56, %v9910_v56  ;;  %v9756_v13 = vmax.f32 %v9644_v47, %v9700_v49  ;;  %v9759_v63 = vmax.f32 %v9647_v39, %v9703_v62  ;;  %v9645_v2 = vld [vmem:[#allocation3 + $0x188] sm:$0xff]  ;;  %v9153_v31 = vpop.f32.mrb[239].mxu1  ;;  %v9501_v55 = vmax.f32 %v9389_v37, 0.0 }
 0x531   :  { %10983 = vst.msk [vmem:[%s17803_s6 + $0xc8] sm:$0xf] %vm5067_vm6, %v11039_v29  ;;  %v9725_v11 = vld [vmem:[#allocation3 + $0x328] sm:$0xff]  ;;  %v9506_v9 = vmax.f32 %v9394_v40, 0.0  ;;  %v9453_v58 = vmax.f32 %v9341_v57, 0.0  ;;  %v13305_v25 = vadd.f32 %v17378_v23, %v12934_v14  ;;  %v9458_v26 = vmax.f32 %v9346_v35, 0.0 }
 0x532   :  { %9838 = vst.msk [vmem:[#allocation3 + $0x310] sm:$0xff] %vm4479_vm4, %v9782_v28  ;;  %9615 = vst.msk [vmem:[#allocation3 + $0x358] sm:$0xff] %vm4479_vm4, %v9503_v53  ;;  %v9701_v61 = vld [vmem:[#allocation3 + $0x1a8] sm:$0xff]  ;;  %v9781_v51 = vmax.f32 %v9669_v33, %v9725_v11  ;;  %v9395_v3 = vadd.f32 %v17576_v41, %v13230_v42  ;;  %v13306_v54 = vadd.f32 %v17383_v36, %v7685_v19  ;;  %v9504_v1 = vmax.f32 %v9392_v20, 0.0  ;;  %v9650_v5 = vld [vmem:[#allocation3 + $0x1d0] sm:$0xff] }
 0x533   :  { %10971 = vst.msk [vmem:[%s17803_s6 + $0x98] sm:$0xf] %vm5067_vm6, %v11027_v21  ;;  %v9757_v18 = vmax.f32 %v9645_v2, %v9701_v61  ;;  %v9393_v15 = vadd.f32 %v17576_v41, %v9153_v31  ;;  %v9344_v22 = vadd.f32 %v17576_v41, %v13304_v8  ;;  %v9347_v23 = vadd.f32 %v17576_v41, %v13305_v25  ;;  %v9674_v24 = vld [vmem:[#allocation3 + $0x350] sm:$0xff] }
 0x534   :  { %9836 = vst.msk [vmem:[#allocation3 + $0x300] sm:$0xff] %vm4479_vm4, %v9780_v52  ;;  %9814 = vst.msk [vmem:[#allocation3 + $0x190] sm:$0xff] %vm4479_vm4, %v9758_v6  ;;  %v9507_v32 = vmax.f32 %v9395_v3, 0.0  ;;  %v9345_v45 = vadd.f32 %v17576_v41, %v13306_v54  ;;  %v9648_v33 = vld [vmem:[#allocation3 + $0x1c0] sm:$0xff] }
 0x535   :  { %9839 = vst.msk [vmem:[#allocation3 + $0x318] sm:$0xff] %vm4479_vm4, %v9783_v43  ;;  %9812 = vst.msk [vmem:[#allocation3 + $0x180] sm:$0xff] %vm4479_vm4, %v9756_v13  ;;  %v9505_v38 = vmax.f32 %v9393_v15, 0.0  ;;  %v9456_v56 = vmax.f32 %v9344_v22, 0.0  ;;  %v9459_v10 = vmax.f32 %v9347_v23, 0.0  ;;  %v9672_v16 = vld [vmem:[#allocation3 + $0x340] sm:$0xff] }
 0x536   :  { %9815 = vst.msk [vmem:[#allocation3 + $0x198] sm:$0xff] %vm4479_vm4, %v9759_v63  ;;  %9837 = vst.msk [vmem:[#allocation3 + $0x308] sm:$0xff] %vm4479_vm4, %v9781_v51  ;;  %v9457_v36 = vmax.f32 %v9345_v45, 0.0  ;;  %v9651_v4 = vld [vmem:[#allocation3 + $0x1d8] sm:$0xff] }
 0x537   :  { %9813 = vst.msk [vmem:[#allocation3 + $0x188] sm:$0xff] %vm4479_vm4, %v9757_v18  ;;  %9613 = vst.msk [vmem:[#allocation3 + $0x348] sm:$0xff] %vm4479_vm4, %v9501_v55 }
 0x538   :  { %9618 = vst.msk [vmem:[#allocation3 + $0x370] sm:$0xff] %vm4479_vm4, %v9506_v9  ;;  %9565 = vst.msk [vmem:[#allocation3 + $0x1c8] sm:$0xff] %vm4479_vm4, %v9453_v58 }
 0x539   :  { %9570 = vst.msk [vmem:[#allocation3 + $0x1f0] sm:$0xff] %vm4479_vm4, %v9458_v26  ;;  %9616 = vst.msk [vmem:[#allocation3 + $0x360] sm:$0xff] %vm4479_vm4, %v9504_v1  ;;  %v9675_v0 = vld [vmem:[#allocation3 + $0x358] sm:$0xff] }
 0x53a   :  { %9619 = vst.msk [vmem:[#allocation3 + $0x378] sm:$0xff] %vm4479_vm4, %v9507_v32  ;;  %9617 = vst.msk [vmem:[#allocation3 + $0x368] sm:$0xff] %vm4479_vm4, %v9505_v38 }
 0x53b   :  { %9568 = vst.msk [vmem:[#allocation3 + $0x1e0] sm:$0xff] %vm4479_vm4, %v9456_v56  ;;  %9571 = vst.msk [vmem:[#allocation3 + $0x1f8] sm:$0xff] %vm4479_vm4, %v9459_v10 }
 0x53c   :  { %v9869_v50 = vld [vmem:[#allocation3 + $0x310] ss:$2 sm:$0x3f]  ;;  %v9897_v27 = vld [vmem:[#allocation3 + $0x311] ss:$2 sm:$0x3f] }
 0x53d   :  { %v9857_v12 = vld [vmem:[#allocation3 + $0x190] ss:$2 sm:$0x3f]  ;;  %v9885_v7 = vld [vmem:[#allocation3 + $0x191] ss:$2 sm:$0x3f]  ;;  %v9925_v34 = vmax.f32 %v9869_v50, %v9897_v27 }
 0x53e   :  { %9569 = vst.msk [vmem:[#allocation3 + $0x1e8] sm:$0xff] %vm4479_vm4, %v9457_v36  ;;  %v9913_v41 = vmax.f32 %v9857_v12, %v9885_v7  ;;  %v9856_v17 = vld [vmem:[#allocation3 + $0x180] ss:$2 sm:$0xff]  ;;  %v9884_v29 = vld [vmem:[#allocation3 + $0x181] ss:$2 sm:$0xff] }
 0x53f   :  { %v9868_v28 = vld [vmem:[#allocation3 + $0x300] ss:$2 sm:$0xff]  ;;  %v11042_v47 = vpack.c.bf16 %v9925_v34, %v9925_v34  ;;  %v9912_v46 = vmax.f32 %v9856_v17, %v9884_v29  ;;  %v9896_v39 = vld [vmem:[#allocation3 + $0x301] ss:$2 sm:$0xff]  ;;  %v9730_v30 = vld [vmem:[#allocation3 + $0x370] sm:$0xff] }
 0x540   :  { %v11030_v53 = vpack.c.bf16 %v9913_v41, %v9913_v41  ;;  %v9924_v48 = vmax.f32 %v9868_v28, %v9896_v39  ;;  %v9706_v21 = vld [vmem:[#allocation3 + $0x1f0] sm:$0xff]  ;;  %v9786_v59 = vmax.f32 %v9674_v24, %v9730_v30  ;;  %v9728_v37 = vld [vmem:[#allocation3 + $0x360] sm:$0xff]  ;;  %v9673_v62 = vld [vmem:[#allocation3 + $0x348] sm:$0xff] }
 0x541   :  { %10986 = vst.msk [vmem:[%s17803_s6 + $0xd4] sm:$0x7] %vm5069_vm5, %v11042_v47  ;;  %v11029_v52 = vpack.c.bf16 %v9912_v46, %v9912_v46  ;;  %v9762_v44 = vmax.f32 %v9650_v5, %v9706_v21  ;;  %v9784_v6 = vmax.f32 %v9672_v16, %v9728_v37  ;;  %v9731_v49 = vld [vmem:[#allocation3 + $0x378] sm:$0xff]  ;;  %v9729_v43 = vld [vmem:[#allocation3 + $0x368] sm:$0xff] }
 0x542   :  { %10974 = vst.msk [vmem:[%s17803_s6 + $0xa4] sm:$0x7] %vm5069_vm5, %v11030_v53  ;;  %v11041_v60 = vpack.c.bf16 %v9924_v48, %v9924_v48  ;;  %v9704_v11 = vld [vmem:[#allocation3 + $0x1e0] sm:$0xff]  ;;  %v9707_v40 = vld [vmem:[#allocation3 + $0x1f8] sm:$0xff]  ;;  %v9787_v14 = vmax.f32 %v9675_v0, %v9731_v49  ;;  %v9785_v42 = vmax.f32 %v9673_v62, %v9729_v43  ;;  %v9649_v2 = vld [vmem:[#allocation3 + $0x1c8] sm:$0xff] }
 0x543   :  { %9842 = vst.msk [vmem:[#allocation3 + $0x350] sm:$0xff] %vm4479_vm4, %v9786_v59  ;;  %9818 = vst.msk [vmem:[#allocation3 + $0x1d0] sm:$0xff] %vm4479_vm4, %v9762_v44  ;;  %v9760_v13 = vmax.f32 %v9648_v33, %v9704_v11  ;;  %v9763_v63 = vmax.f32 %v9651_v4, %v9707_v40 }
 0x544   :  { %10973 = vst.msk [vmem:[%s17803_s6 + $0xa0] sm:$0xf] %vm5067_vm6, %v11029_v52  ;;  %10985 = vst.msk [vmem:[%s17803_s6 + $0xd0] sm:$0xf] %vm5067_vm6, %v11041_v60 }
 0x545   :  { %9840 = vst.msk [vmem:[#allocation3 + $0x340] sm:$0xff] %vm4479_vm4, %v9784_v6  ;;  %v9705_v61 = vld [vmem:[#allocation3 + $0x1e8] sm:$0xff]  ;;  %9843 = vst.msk [vmem:[#allocation3 + $0x358] sm:$0xff] %vm4479_vm4, %v9787_v14 }
 0x546   :  { %v9761_v51 = vmax.f32 %v9649_v2, %v9705_v61  ;;  %9841 = vst.msk [vmem:[#allocation3 + $0x348] sm:$0xff] %vm4479_vm4, %v9785_v42  ;;  %9816 = vst.msk [vmem:[#allocation3 + $0x1c0] sm:$0xff] %vm4479_vm4, %v9760_v13 }
 0x547   :  { %9819 = vst.msk [vmem:[#allocation3 + $0x1d8] sm:$0xff] %vm4479_vm4, %v9763_v63 }
 0x548   :  { %9817 = vst.msk [vmem:[#allocation3 + $0x1c8] sm:$0xff] %vm4479_vm4, %v9761_v51 }
 0x54c   :  { %v9871_v57 = vld [vmem:[#allocation3 + $0x350] ss:$2 sm:$0x3f]  ;;  %v9899_v19 = vld [vmem:[#allocation3 + $0x351] ss:$2 sm:$0x3f] }
 0x54d   :  { %v9927_v55 = vmax.f32 %v9871_v57, %v9899_v19  ;;  %v9870_v8 = vld [vmem:[#allocation3 + $0x340] ss:$2 sm:$0xff]  ;;  %v9898_v26 = vld [vmem:[#allocation3 + $0x341] ss:$2 sm:$0xff] }
 0x54e   :  { %v9859_v31 = vld [vmem:[#allocation3 + $0x1d0] ss:$2 sm:$0x3f]  ;;  %v9887_v18 = vld [vmem:[#allocation3 + $0x1d1] ss:$2 sm:$0x3f]  ;;  %v9926_v54 = vmax.f32 %v9870_v8, %v9898_v26 }
 0x54f   :  { %v9915_v35 = vmax.f32 %v9859_v31, %v9887_v18  ;;  %v9858_v9 = vld [vmem:[#allocation3 + $0x1c0] ss:$2 sm:$0xff]  ;;  %v9886_v58 = vld [vmem:[#allocation3 + $0x1c1] ss:$2 sm:$0xff]  ;;  %v11044_v20 = vpack.c.bf16 %v9927_v55, %v9927_v55 }
 0x550   :  { %v9914_v25 = vmax.f32 %v9858_v9, %v9886_v58  ;;  %v11043_v22 = vpack.c.bf16 %v9926_v54, %v9926_v54 }
 0x551   :  { %v11032_v3 = vpack.c.bf16 %v9915_v35, %v9915_v35  ;;  %10988 = vst.msk [vmem:[%s17803_s6 + $0xdc] sm:$0x7] %vm5069_vm5, %v11044_v20 }
 0x552   :  { %v11031_v15 = vpack.c.bf16 %v9914_v25, %v9914_v25  ;;  %10987 = vst.msk [vmem:[%s17803_s6 + $0xd8] sm:$0xf] %vm5067_vm6, %v11043_v22 }
 0x553   :  { %10976 = vst.msk [vmem:[%s17803_s6 + $0xac] sm:$0x7] %vm5069_vm5, %v11032_v3 }
 0x554   :  { %10975 = vst.msk [vmem:[%s17803_s6 + $0xa8] sm:$0xf] %vm5067_vm6, %v11031_v15 }
 0x555   :  { %10073 = vsyncpa [#allocation5], 1 }
 0x556   :  { %10074 = vsyncpa [#allocation7], 1 }

</bundles_post_ra>
